<compile_context>
chip_gen: v6e
topology: v6e:2x2x1
jax: 0.10.0
libtpu: 0.0.40
codegen_flags: <defaults>
</compile_context>

<pallas_src>
import functools

import numpy as np
import jax
import jax.numpy as jnp
from jax import lax
from jax.experimental import pallas as pl
from jax.experimental.pallas import tpu as pltpu


def _round_up(x, m):
    return (x + m - 1) // m * m


def _apply_gates(gates, c, H):
    """PyTorch LSTM gate math (gate order i, f, g, o). gates/c are float32."""
    i = jax.nn.sigmoid(gates[:, 0 * H:1 * H])
    f = jax.nn.sigmoid(gates[:, 1 * H:2 * H])
    g = jnp.tanh(gates[:, 2 * H:3 * H])
    o = jax.nn.sigmoid(gates[:, 3 * H:4 * H])
    c_new = f * c + i * g
    h_new = o * jnp.tanh(c_new)
    return h_new, c_new


def _lstm_cell(x, h, c, w_ih_t, w_hh_t, b, H):
    """Reference-only full LSTM cell (float32)."""
    gates = x @ w_ih_t + h @ w_hh_t + b
    return _apply_gates(gates, c, H)


# ------------------------------- Pallas kernel --------------------------------
def _encdec_kernel(T, B,
                   x_ref, w_l0_ref, b_l0_ref,
                   ew_hh0_ref, ew_ih1_ref, ew_hh1_ref, eb1_ref,
                   dw_hh0_hbm, dw_ih1_hbm, dw_hh1_hbm, db1_ref,
                   w_out_hbm, b_out_ref,
                   out_ref,
                   xp_ref, h1_ref,
                   dw_hh0_v, dw_ih1_v, dw_hh1_v, w_out_v, dma_sem):
    Hp = ew_hh0_ref.shape[0]          # padded hidden size (multiple of 128)
    cdt = ew_hh0_ref.dtype            # matmul operand dtype (bfloat16)

    # ---- Decoder-weight DMA: start now, hide behind the encoder phase. ----
    dcopies = (
        pltpu.make_async_copy(dw_hh0_hbm, dw_hh0_v, dma_sem.at[0]),
        pltpu.make_async_copy(dw_ih1_hbm, dw_ih1_v, dma_sem.at[1]),
        pltpu.make_async_copy(dw_hh1_hbm, dw_hh1_v, dma_sem.at[2]),
        pltpu.make_async_copy(w_out_hbm, w_out_v, dma_sem.at[3]),
    )
    for cp in dcopies:
        cp.start()

    # ---- Fused hoisted layer-0 input projections (encoder cols [0,4Hp), ----
    # ---- decoder cols [4Hp,8Hp)): one big MXU matmul, f32 accumulation,  ----
    # ---- + combined bias, stored in a bf16 VMEM scratch.                 ----
    xp_ref[...] = (jnp.dot(x_ref[...], w_l0_ref[...],
                           preferred_element_type=jnp.float32)
                   + b_l0_ref[...]).astype(cdt)

    # Hoist only the small biases; weights are read at their dot call sites.
    eb1 = eb1_ref[...]
    db1 = db1_ref[...]

    zeros = jnp.zeros((B, Hp), jnp.float32)
    # Retuned for vreg pressure: full unroll only for tiny T/Hp; 2 at Hp>=512.
    if T <= 32 and Hp <= 128:
        unroll = True
    elif Hp <= 256:
        unroll = 4
    else:
        unroll = 2

    def cell_l0(gates_x, h, c, w_hh_ref):
        # Layer 0: x-projection precomputed; only h @ W_hh^T remains.
        gates = gates_x.astype(jnp.float32) + jnp.dot(
            h.astype(cdt), w_hh_ref[...], preferred_element_type=jnp.float32)
        return _apply_gates(gates, c, Hp)

    def cell_l1(h_in, h, c, w_ih_ref, w_hh_ref, b):
        # Layer 1: two MXU dots accumulated in f32 (no per-step concat buffer).
        gates = (jnp.dot(h_in.astype(cdt), w_ih_ref[...],
                         preferred_element_type=jnp.float32)
                 + jnp.dot(h.astype(cdt), w_hh_ref[...],
                           preferred_element_type=jnp.float32)
                 + b)
        return _apply_gates(gates, c, Hp)

    # --------------- Encoder: 2-layer LSTM over the full sequence -------------
    def enc_body(t, carry):
        h0, c0, h1, c1 = carry
        row = pl.multiple_of(t * B, B)
        gx = xp_ref[pl.ds(row, B), pl.ds(0, 4 * Hp)]
        h0, c0 = cell_l0(gx, h0, c0, ew_hh0_ref)
        h1, c1 = cell_l1(h0, h1, c1, ew_ih1_ref, ew_hh1_ref, eb1)
        return (h0, c0, h1, c1)

    carry = lax.fori_loop(0, T, enc_body, (zeros, zeros, zeros, zeros),
                          unroll=unroll)

    # Decoder weights must be resident before the decoder loop starts.
    for cp in dcopies:
        cp.wait()

    # -------- Decoder: step-wise, state handed over from the encoder ----------
    def dec_body(t, carry):
        h0, c0, h1, c1 = carry
        # Teacher forcing schedule: step t consumes x[(t - 1) mod T].
        src = jnp.where(t == 0, T - 1, t - 1)
        row = pl.multiple_of(src * B, B)
        gx = xp_ref[pl.ds(row, B), pl.ds(4 * Hp, 4 * Hp)]
        h0, c0 = cell_l0(gx, h0, c0, dw_hh0_v)
        h1, c1 = cell_l1(h0, h1, c1, dw_ih1_v, dw_hh1_v, db1)
        # Only store h1; the output projection is deferred to one big matmul.
        orow = pl.multiple_of(t * B, B)
        h1_ref[pl.ds(orow, B), :] = h1.astype(cdt)
        return (h0, c0, h1, c1)

    lax.fori_loop(0, T, dec_body, carry, unroll=unroll)

    # ---- Deferred output projection: one (T*B,Hp)x(Hp,Fp) MXU matmul and ----
    # ---- one lane/sublane-dense store (replaces T tiny dots + T stores). ----
    out_ref[...] = (jnp.dot(h1_ref[...], w_out_v[...],
                            preferred_element_type=jnp.float32)
                    + b_out_ref[...]).astype(out_ref.dtype)


# ------------------------- parameter prep for the kernel ----------------------
def _prepare_kernel_params(params, compute_dtype):
    (ew_ih0, ew_hh0, eb0, ew_ih1, ew_hh1, eb1,
     dw_ih0, dw_hh0, db0, dw_ih1, dw_hh1, db1, w_out, b_out) = params
    H = ew_hh0.shape[0]
    F = w_out.shape[1]
    Hp = _round_up(H, 128)
    Fp = _round_up(F, 128)
    Fk = _round_up(F, 128)   # lane-padded contraction dim for the hoisted matmul

    def pad_gates(w):
        # (lead, 4H) -> (lead, 4Hp): zero-pad each gate block so gate slices are
        # lane-aligned.  Padded gate units stay exactly zero through the cell.
        lead = w.shape[0]
        w4 = w.reshape(lead, 4, H)
        w4 = jnp.pad(w4, ((0, 0), (0, 0), (0, Hp - H)))
        return w4.reshape(lead, 4 * Hp)

    def pad_rows(w, rows):
        return jnp.pad(w, ((0, rows - w.shape[0]), (0, 0)))

    cdt = compute_dtype
    # Fused layer-0 input projection weights/bias: [encoder | decoder] along N.
    w_l0 = jnp.concatenate([pad_gates(ew_ih0), pad_gates(dw_ih0)], axis=1)
    w_l0 = pad_rows(w_l0, Fk).astype(cdt)                         # (Fk, 8Hp)
    b_l0 = jnp.concatenate([pad_gates(eb0), pad_gates(db0)],
                           axis=1).astype(jnp.float32)            # (1, 8Hp)

    k_ew_hh0 = pad_rows(pad_gates(ew_hh0), Hp).astype(cdt)        # (Hp, 4Hp)
    k_ew_ih1 = pad_rows(pad_gates(ew_ih1), Hp).astype(cdt)
    k_ew_hh1 = pad_rows(pad_gates(ew_hh1), Hp).astype(cdt)
    k_eb1 = pad_gates(eb1).astype(jnp.float32)

    k_dw_hh0 = pad_rows(pad_gates(dw_hh0), Hp).astype(cdt)
    k_dw_ih1 = pad_rows(pad_gates(dw_ih1), Hp).astype(cdt)
    k_dw_hh1 = pad_rows(pad_gates(dw_hh1), Hp).astype(cdt)
    k_db1 = pad_gates(db1).astype(jnp.float32)

    k_w_out = jnp.pad(w_out, ((0, Hp - H), (0, Fp - F))).astype(cdt)  # (Hp, Fp)
    k_b_out = jnp.pad(b_out, ((0, 0), (0, Fp - F))).astype(jnp.float32)

    kparams = (w_l0, b_l0,
               k_ew_hh0, k_ew_ih1, k_ew_hh1, k_eb1,
               k_dw_hh0, k_dw_ih1, k_dw_hh1, k_db1,
               k_w_out, k_b_out)
    return kparams, Hp, Fp, Fk


# ----------------------------------- wrapper ----------------------------------
def hidden_lstm_encoder_decoder(x, params, *, compute_dtype=jnp.bfloat16):
    """x: (B, T, F) batch-first (PyTorch convention). Returns (B, T, F) f32."""
    B, T, F = x.shape
    kparams, Hp, Fp, Fk = _prepare_kernel_params(params, compute_dtype)
    Bp = _round_up(B, 8)   # full f32 sublane tile; padded rows sliced off below

    # Time-major, batch- and lane-padded, flattened to (T*Bp, Fk).  A single
    # input feeds both encoder and decoder; the decoder's teacher-forcing
    # schedule is realized in-kernel via row index (t - 1) mod T.
    x_tm = jnp.transpose(x, (1, 0, 2))
    x_tm = jnp.pad(x_tm, ((0, 0), (0, Bp - B), (0, Fk - F)))
    x2d = x_tm.reshape(T * Bp, Fk).astype(compute_dtype)

    cbytes = jnp.dtype(compute_dtype).itemsize
    vmem_bytes = (
        T * Bp * Fk * cbytes                                     # input
        + T * Bp * Fp * 4                                        # output
        + (Fk * 8 * Hp + 6 * Hp * 4 * Hp + Hp * Fp) * cbytes     # weights in VMEM
        + (8 * Hp + 8 * Hp + Fp) * 4                             # biases
        + T * Bp * (8 * Hp + Hp) * cbytes                        # x-proj + h1 slabs
    )
    # TODO(synk): per-generation cap (<= ~56 MiB on v7x) and a 2-TensorCore
    # batch-split grid for v7x once chip generation is queried at trace time.
    vmem_limit = min(max(int(vmem_bytes) + (8 << 20), 32 << 20), 96 << 20)

    vmem = pl.BlockSpec(memory_space=pltpu.MemorySpace.VMEM)
    hbm = pl.BlockSpec(memory_space=pl.ANY)
    in_specs = [vmem,                       # x2d
                vmem, vmem,                 # w_l0, b_l0
                vmem, vmem, vmem, vmem,     # encoder weights + bias
                hbm, hbm, hbm,              # decoder recurrent weights (manual DMA)
                vmem,                       # db1
                hbm,                        # w_out (manual DMA)
                vmem]                       # b_out

    out2d = pl.pallas_call(
        functools.partial(_encdec_kernel, T, Bp),
        out_shape=jax.ShapeDtypeStruct((T * Bp, Fp), jnp.float32),
        in_specs=in_specs,
        out_specs=vmem,
        scratch_shapes=[
            pltpu.VMEM((T * Bp, 8 * Hp), compute_dtype),   # fused layer-0 x-proj
            pltpu.VMEM((T * Bp, Hp), compute_dtype),       # decoder h1 slab
            pltpu.VMEM((Hp, 4 * Hp), compute_dtype),       # dw_hh0 (DMA target)
            pltpu.VMEM((Hp, 4 * Hp), compute_dtype),       # dw_ih1 (DMA target)
            pltpu.VMEM((Hp, 4 * Hp), compute_dtype),       # dw_hh1 (DMA target)
            pltpu.VMEM((Hp, Fp), compute_dtype),           # w_out  (DMA target)
            pltpu.SemaphoreType.DMA((4,)),
        ],
        compiler_params=pltpu.CompilerParams(vmem_limit_bytes=vmem_limit),
    )(x2d, *kparams)

    out = out2d.reshape(T, Bp, Fp)
    return jnp.transpose(out, (1, 0, 2))[:B, :, :F]     # (B, T, F)


# --------------------------- parameter construction ---------------------------
def init_params(key, input_dim, latent_dim):
    """Deterministic init mimicking PyTorch's uniform(-1/sqrt(H), 1/sqrt(H))."""
    H, F = latent_dim, input_dim
    bound = 1.0 / np.sqrt(H)
    keys = iter(jax.random.split(key, 32))

    def u(shape):
        return jax.random.uniform(next(keys), shape, jnp.float32, -bound, bound)

    def lstm_layer(in_dim):
        w_ih_t = u((in_dim, 4 * H))           # W_ih^T
        w_hh_t = u((H, 4 * H))                # W_hh^T
        b = u((1, 4 * H)) + u((1, 4 * H))     # b_ih + b_hh
        return w_ih_t, w_hh_t, b

    enc_l0 = lstm_layer(F)
    enc_l1 = lstm_layer(H)
    dec_l0 = lstm_layer(F)
    dec_l1 = lstm_layer(H)
    w_out_t = u((H, F))                       # hidden_to_embed weight^T
    b_out = u((1, F))
    return (*enc_l0, *enc_l1, *dec_l0, *dec_l1, w_out_t, b_out)


# ------------------------------ pure-JAX reference ----------------------------
def reference(x, params):
    (ew_ih0, ew_hh0, eb0, ew_ih1, ew_hh1, eb1,
     dw_ih0, dw_hh0, db0, dw_ih1, dw_hh1, db1, w_out, b_out) = params
    B, T, F = x.shape
    H = ew_hh0.shape[0]
    zeros = jnp.zeros((B, H), jnp.float32)

    def enc_step(carry, xt):
        h0, c0, h1, c1 = carry
        h0, c0 = _lstm_cell(xt, h0, c0, ew_ih0, ew_hh0, eb0, H)
        h1, c1 = _lstm_cell(h0, h1, c1, ew_ih1, ew_hh1, eb1, H)
        return (h0, c0, h1, c1), None

    carry, _ = lax.scan(enc_step, (zeros, zeros, zeros, zeros),
                        jnp.transpose(x, (1, 0, 2)))

    dec_in = jnp.concatenate([x[:, -1:, :], x[:, :-1, :]], axis=1)

    def dec_step(carry, xt):
        h0, c0, h1, c1 = carry
        h0, c0 = _lstm_cell(xt, h0, c0, dw_ih0, dw_hh0, db0, H)
        h1, c1 = _lstm_cell(h0, h1, c1, dw_ih1, dw_hh1, db1, H)
        out = h1 @ w_out + b_out
        return (h0, c0, h1, c1), out

    _, outs = lax.scan(dec_step, carry, jnp.transpose(dec_in, (1, 0, 2)))
    return jnp.transpose(outs, (1, 0, 2))


if __name__ == "__main__":
    # Small shapes consistent with the module's forward (B, seq_len, input_dim).
    B, T = 2, 8
    input_dim = 51      # module default
    latent_dim = 32     # small stand-in for 512 (padded to 128 lanes in-kernel)

    key = jax.random.PRNGKey(0)
    kx, kp = jax.random.split(key)
    x = jax.random.normal(kx, (B, T, input_dim), dtype=jnp.float32)
    params = init_params(kp, input_dim, latent_dim)

    fwd = jax.jit(lambda xx: hidden_lstm_encoder_decoder(xx, params))
    out = jax.block_until_ready(fwd(x))
    assert out.shape == (B, T, input_dim), out.shape

    ref = jax.block_until_ready(reference(x, params))
    # bf16 matmul operands / bf16 x-proj & h1 slabs (f32 accumulation and f32
    # cell math) vs. the f32 reference.
    np.testing.assert_allclose(np.asarray(out), np.asarray(ref),
                               rtol=2e-2, atol=2e-2)
    print("KERNEL_OK")
</pallas_src>

<mosaic_0001>
module attributes {stable_mosaic.version = 11 : i64} {
  func.func @_encdec_kernel(%arg0: memref<64x128xbf16, #tpu.memory_space<vmem>>, %arg1: memref<128x1024xbf16, #tpu.memory_space<vmem>>, %arg2: memref<1x1024xf32, #tpu.memory_space<vmem>>, %arg3: memref<128x512xbf16, #tpu.memory_space<vmem>>, %arg4: memref<128x512xbf16, #tpu.memory_space<vmem>>, %arg5: memref<128x512xbf16, #tpu.memory_space<vmem>>, %arg6: memref<1x512xf32, #tpu.memory_space<vmem>>, %arg7: memref<128x512xbf16, #tpu.memory_space<any>>, %arg8: memref<128x512xbf16, #tpu.memory_space<any>>, %arg9: memref<128x512xbf16, #tpu.memory_space<any>>, %arg10: memref<1x512xf32, #tpu.memory_space<vmem>>, %arg11: memref<128x128xbf16, #tpu.memory_space<any>>, %arg12: memref<1x128xf32, #tpu.memory_space<vmem>>, %arg13: memref<64x128xf32, #tpu.memory_space<vmem>>, %arg14: memref<64x1024xbf16, #tpu.memory_space<vmem>>, %arg15: memref<64x128xbf16, #tpu.memory_space<vmem>>, %arg16: memref<128x512xbf16, #tpu.memory_space<vmem>>, %arg17: memref<128x512xbf16, #tpu.memory_space<vmem>>, %arg18: memref<128x512xbf16, #tpu.memory_space<vmem>>, %arg19: memref<128x128xbf16, #tpu.memory_space<vmem>>, %arg20: memref<4x!tpu.dma_semaphore, #tpu.memory_space<semaphore_mem>>) attributes {dimension_semantics = [], scalar_prefetch = 0 : i64, scratch_operands = 7 : i64, tpu.core_type = #tpu.core_type<tc>} {
    %c0_i32 = arith.constant 0 : i32
    %0 = tpu.memref_slice %arg20[%c0_i32] : memref<4x!tpu.dma_semaphore, #tpu.memory_space<semaphore_mem>> -> memref<1x!tpu.dma_semaphore, #tpu.memory_space<semaphore_mem>>
    %1 = tpu.memref_squeeze %0 : memref<1x!tpu.dma_semaphore, #tpu.memory_space<semaphore_mem>> -> memref<!tpu.dma_semaphore, #tpu.memory_space<semaphore_mem>>
    tpu.enqueue_dma source(%arg7 : memref<128x512xbf16, #tpu.memory_space<any>>) target(%arg16 : memref<128x512xbf16, #tpu.memory_space<vmem>>) target_semaphore(%1 : memref<!tpu.dma_semaphore, #tpu.memory_space<semaphore_mem>>)
    %c1_i32 = arith.constant 1 : i32
    %2 = tpu.memref_slice %arg20[%c1_i32] : memref<4x!tpu.dma_semaphore, #tpu.memory_space<semaphore_mem>> -> memref<1x!tpu.dma_semaphore, #tpu.memory_space<semaphore_mem>>
    %3 = tpu.memref_squeeze %2 : memref<1x!tpu.dma_semaphore, #tpu.memory_space<semaphore_mem>> -> memref<!tpu.dma_semaphore, #tpu.memory_space<semaphore_mem>>
    tpu.enqueue_dma source(%arg8 : memref<128x512xbf16, #tpu.memory_space<any>>) target(%arg17 : memref<128x512xbf16, #tpu.memory_space<vmem>>) target_semaphore(%3 : memref<!tpu.dma_semaphore, #tpu.memory_space<semaphore_mem>>)
    %c2_i32 = arith.constant 2 : i32
    %4 = tpu.memref_slice %arg20[%c2_i32] : memref<4x!tpu.dma_semaphore, #tpu.memory_space<semaphore_mem>> -> memref<1x!tpu.dma_semaphore, #tpu.memory_space<semaphore_mem>>
    %5 = tpu.memref_squeeze %4 : memref<1x!tpu.dma_semaphore, #tpu.memory_space<semaphore_mem>> -> memref<!tpu.dma_semaphore, #tpu.memory_space<semaphore_mem>>
    tpu.enqueue_dma source(%arg9 : memref<128x512xbf16, #tpu.memory_space<any>>) target(%arg18 : memref<128x512xbf16, #tpu.memory_space<vmem>>) target_semaphore(%5 : memref<!tpu.dma_semaphore, #tpu.memory_space<semaphore_mem>>)
    %c3_i32 = arith.constant 3 : i32
    %6 = tpu.memref_slice %arg20[%c3_i32] : memref<4x!tpu.dma_semaphore, #tpu.memory_space<semaphore_mem>> -> memref<1x!tpu.dma_semaphore, #tpu.memory_space<semaphore_mem>>
    %7 = tpu.memref_squeeze %6 : memref<1x!tpu.dma_semaphore, #tpu.memory_space<semaphore_mem>> -> memref<!tpu.dma_semaphore, #tpu.memory_space<semaphore_mem>>
    tpu.enqueue_dma source(%arg11 : memref<128x128xbf16, #tpu.memory_space<any>>) target(%arg19 : memref<128x128xbf16, #tpu.memory_space<vmem>>) target_semaphore(%7 : memref<!tpu.dma_semaphore, #tpu.memory_space<semaphore_mem>>)
    %c0 = arith.constant 0 : index
    %c0_0 = arith.constant 0 : index
    %8 = vector.load %arg0[%c0, %c0_0] : memref<64x128xbf16, #tpu.memory_space<vmem>>, vector<64x128xbf16>
    %c0_1 = arith.constant 0 : index
    %c0_2 = arith.constant 0 : index
    %9 = vector.load %arg1[%c0_1, %c0_2] : memref<128x1024xbf16, #tpu.memory_space<vmem>>, vector<128x1024xbf16>
    %cst = arith.constant dense<0.000000e+00> : vector<64x1024xf32>
    %10 = tpu.matmul %8, %9, %cst {dimension_numbers = #tpu.dot_dimension_numbers<[1], [0], [0], [1], [0, 0, 1, 1], [], []>} : vector<64x128xbf16>, vector<128x1024xbf16>, vector<64x1024xf32> -> vector<64x1024xf32>
    %c0_3 = arith.constant 0 : index
    %c0_4 = arith.constant 0 : index
    %11 = vector.load %arg2[%c0_3, %c0_4] : memref<1x1024xf32, #tpu.memory_space<vmem>>, vector<1x1024xf32>
    %12 = vector.broadcast %11 : vector<1x1024xf32> to vector<64x1024xf32>
    %13 = arith.addf %10, %12 : vector<64x1024xf32>
    %14 = arith.truncf %13 : vector<64x1024xf32> to vector<64x1024xbf16>
    %c0_5 = arith.constant 0 : index
    %c0_6 = arith.constant 0 : index
    %15 = vector.load %arg14[%c0_5, %c0_6] : memref<64x1024xbf16, #tpu.memory_space<vmem>>, vector<64x1024xbf16>
    tpu.vector_store %arg14[%c0_5, %c0_6], %14 {strides = array<i32>} : memref<64x1024xbf16, #tpu.memory_space<vmem>>, vector<64x1024xbf16>,
    %c0_7 = arith.constant 0 : index
    %c0_8 = arith.constant 0 : index
    %16 = vector.load %arg6[%c0_7, %c0_8] : memref<1x512xf32, #tpu.memory_space<vmem>>, vector<1x512xf32>
    %c0_9 = arith.constant 0 : index
    %c0_10 = arith.constant 0 : index
    %17 = vector.load %arg10[%c0_9, %c0_10] : memref<1x512xf32, #tpu.memory_space<vmem>>, vector<1x512xf32>
    %cst_11 = arith.constant 0.000000e+00 : f32
    %18 = vector.broadcast %cst_11 : f32 to vector<8x128xf32>
    %c0_i32_12 = arith.constant 0 : i32
    %c8_i32 = arith.constant 8 : i32
    %19 = arith.muli %c0_i32_12, %c8_i32 : i32
    %20 = tpu.assume_multiple %19, 8 : i32
    %21 = arith.index_cast %20 : i32 to index
    %c0_13 = arith.constant 0 : index
    %22 = vector.load %arg14[%21, %c0_13] : memref<64x1024xbf16, #tpu.memory_space<vmem>>, vector<8x512xbf16>
    %23 = arith.extf %22 : vector<8x512xbf16> to vector<8x512xf32>
    %24 = arith.truncf %18 : vector<8x128xf32> to vector<8x128xbf16>
    %c0_14 = arith.constant 0 : index
    %c0_15 = arith.constant 0 : index
    %25 = vector.load %arg3[%c0_14, %c0_15] : memref<128x512xbf16, #tpu.memory_space<vmem>>, vector<128x512xbf16>
    %cst_16 = arith.constant dense<0.000000e+00> : vector<8x512xf32>
    %26 = tpu.matmul %24, %25, %cst_16 {dimension_numbers = #tpu.dot_dimension_numbers<[1], [0], [0], [1], [0, 0, 1, 1], [], []>} : vector<8x128xbf16>, vector<128x512xbf16>, vector<8x512xf32> -> vector<8x512xf32>
    %27 = arith.addf %23, %26 : vector<8x512xf32>
    %28 = vector.extract_strided_slice %27 {offsets = [0, 0], sizes = [8, 128], strides = [1, 1]} : vector<8x512xf32> to vector<8x128xf32>
    %29 = arith.negf %28 : vector<8x128xf32>
    %30 = math.exp %29 : vector<8x128xf32>
    %cst_17 = arith.constant 1.000000e+00 : f32
    %31 = vector.broadcast %cst_17 : f32 to vector<8x128xf32>
    %32 = arith.addf %31, %30 : vector<8x128xf32>
    %33 = arith.divf %31, %32 : vector<8x128xf32>
    %34 = vector.extract_strided_slice %27 {offsets = [0, 128], sizes = [8, 128], strides = [1, 1]} : vector<8x512xf32> to vector<8x128xf32>
    %35 = arith.negf %34 : vector<8x128xf32>
    %36 = math.exp %35 : vector<8x128xf32>
    %cst_18 = arith.constant 1.000000e+00 : f32
    %37 = vector.broadcast %cst_18 : f32 to vector<8x128xf32>
    %38 = arith.addf %37, %36 : vector<8x128xf32>
    %39 = arith.divf %37, %38 : vector<8x128xf32>
    %40 = vector.extract_strided_slice %27 {offsets = [0, 256], sizes = [8, 128], strides = [1, 1]} : vector<8x512xf32> to vector<8x128xf32>
    %41 = math.tanh %40 : vector<8x128xf32>
    %42 = vector.extract_strided_slice %27 {offsets = [0, 384], sizes = [8, 128], strides = [1, 1]} : vector<8x512xf32> to vector<8x128xf32>
    %43 = arith.negf %42 : vector<8x128xf32>
    %44 = math.exp %43 : vector<8x128xf32>
    %cst_19 = arith.constant 1.000000e+00 : f32
    %45 = vector.broadcast %cst_19 : f32 to vector<8x128xf32>
    %46 = arith.addf %45, %44 : vector<8x128xf32>
    %47 = arith.divf %45, %46 : vector<8x128xf32>
    %48 = arith.mulf %39, %18 : vector<8x128xf32>
    %49 = arith.mulf %33, %41 : vector<8x128xf32>
    %50 = arith.addf %48, %49 : vector<8x128xf32>
    %51 = math.tanh %50 : vector<8x128xf32>
    %52 = arith.mulf %47, %51 : vector<8x128xf32>
    %53 = arith.truncf %52 : vector<8x128xf32> to vector<8x128xbf16>
    %c0_20 = arith.constant 0 : index
    %c0_21 = arith.constant 0 : index
    %54 = vector.load %arg4[%c0_20, %c0_21] : memref<128x512xbf16, #tpu.memory_space<vmem>>, vector<128x512xbf16>
    %cst_22 = arith.constant dense<0.000000e+00> : vector<8x512xf32>
    %55 = tpu.matmul %53, %54, %cst_22 {dimension_numbers = #tpu.dot_dimension_numbers<[1], [0], [0], [1], [0, 0, 1, 1], [], []>} : vector<8x128xbf16>, vector<128x512xbf16>, vector<8x512xf32> -> vector<8x512xf32>
    %56 = arith.truncf %18 : vector<8x128xf32> to vector<8x128xbf16>
    %c0_23 = arith.constant 0 : index
    %c0_24 = arith.constant 0 : index
    %57 = vector.load %arg5[%c0_23, %c0_24] : memref<128x512xbf16, #tpu.memory_space<vmem>>, vector<128x512xbf16>
    %cst_25 = arith.constant dense<0.000000e+00> : vector<8x512xf32>
    %58 = tpu.matmul %56, %57, %cst_25 {dimension_numbers = #tpu.dot_dimension_numbers<[1], [0], [0], [1], [0, 0, 1, 1], [], []>} : vector<8x128xbf16>, vector<128x512xbf16>, vector<8x512xf32> -> vector<8x512xf32>
    %59 = arith.addf %55, %58 : vector<8x512xf32>
    %60 = vector.broadcast %16 : vector<1x512xf32> to vector<8x512xf32>
    %61 = arith.addf %59, %60 : vector<8x512xf32>
    %62 = vector.extract_strided_slice %61 {offsets = [0, 0], sizes = [8, 128], strides = [1, 1]} : vector<8x512xf32> to vector<8x128xf32>
    %63 = arith.negf %62 : vector<8x128xf32>
    %64 = math.exp %63 : vector<8x128xf32>
    %cst_26 = arith.constant 1.000000e+00 : f32
    %65 = vector.broadcast %cst_26 : f32 to vector<8x128xf32>
    %66 = arith.addf %65, %64 : vector<8x128xf32>
    %67 = arith.divf %65, %66 : vector<8x128xf32>
    %68 = vector.extract_strided_slice %61 {offsets = [0, 128], sizes = [8, 128], strides = [1, 1]} : vector<8x512xf32> to vector<8x128xf32>
    %69 = arith.negf %68 : vector<8x128xf32>
    %70 = math.exp %69 : vector<8x128xf32>
    %cst_27 = arith.constant 1.000000e+00 : f32
    %71 = vector.broadcast %cst_27 : f32 to vector<8x128xf32>
    %72 = arith.addf %71, %70 : vector<8x128xf32>
    %73 = arith.divf %71, %72 : vector<8x128xf32>
    %74 = vector.extract_strided_slice %61 {offsets = [0, 256], sizes = [8, 128], strides = [1, 1]} : vector<8x512xf32> to vector<8x128xf32>
    %75 = math.tanh %74 : vector<8x128xf32>
    %76 = vector.extract_strided_slice %61 {offsets = [0, 384], sizes = [8, 128], strides = [1, 1]} : vector<8x512xf32> to vector<8x128xf32>
    %77 = arith.negf %76 : vector<8x128xf32>
    %78 = math.exp %77 : vector<8x128xf32>
    %cst_28 = arith.constant 1.000000e+00 : f32
    %79 = vector.broadcast %cst_28 : f32 to vector<8x128xf32>
    %80 = arith.addf %79, %78 : vector<8x128xf32>
    %81 = arith.divf %79, %80 : vector<8x128xf32>
    %82 = arith.mulf %73, %18 : vector<8x128xf32>
    %83 = arith.mulf %67, %75 : vector<8x128xf32>
    %84 = arith.addf %82, %83 : vector<8x128xf32>
    %85 = math.tanh %84 : vector<8x128xf32>
    %86 = arith.mulf %81, %85 : vector<8x128xf32>
    %c1_i32_29 = arith.constant 1 : i32
    %c8_i32_30 = arith.constant 8 : i32
    %87 = arith.muli %c1_i32_29, %c8_i32_30 : i32
    %88 = tpu.assume_multiple %87, 8 : i32
    %89 = arith.index_cast %88 : i32 to index
    %c0_31 = arith.constant 0 : index
    %90 = vector.load %arg14[%89, %c0_31] : memref<64x1024xbf16, #tpu.memory_space<vmem>>, vector<8x512xbf16>
    %91 = arith.extf %90 : vector<8x512xbf16> to vector<8x512xf32>
    %92 = arith.truncf %52 : vector<8x128xf32> to vector<8x128xbf16>
    %c0_32 = arith.constant 0 : index
    %c0_33 = arith.constant 0 : index
    %93 = vector.load %arg3[%c0_32, %c0_33] : memref<128x512xbf16, #tpu.memory_space<vmem>>, vector<128x512xbf16>
    %cst_34 = arith.constant dense<0.000000e+00> : vector<8x512xf32>
    %94 = tpu.matmul %92, %93, %cst_34 {dimension_numbers = #tpu.dot_dimension_numbers<[1], [0], [0], [1], [0, 0, 1, 1], [], []>} : vector<8x128xbf16>, vector<128x512xbf16>, vector<8x512xf32> -> vector<8x512xf32>
    %95 = arith.addf %91, %94 : vector<8x512xf32>
    %96 = vector.extract_strided_slice %95 {offsets = [0, 0], sizes = [8, 128], strides = [1, 1]} : vector<8x512xf32> to vector<8x128xf32>
    %97 = arith.negf %96 : vector<8x128xf32>
    %98 = math.exp %97 : vector<8x128xf32>
    %cst_35 = arith.constant 1.000000e+00 : f32
    %99 = vector.broadcast %cst_35 : f32 to vector<8x128xf32>
    %100 = arith.addf %99, %98 : vector<8x128xf32>
    %101 = arith.divf %99, %100 : vector<8x128xf32>
    %102 = vector.extract_strided_slice %95 {offsets = [0, 128], sizes = [8, 128], strides = [1, 1]} : vector<8x512xf32> to vector<8x128xf32>
    %103 = arith.negf %102 : vector<8x128xf32>
    %104 = math.exp %103 : vector<8x128xf32>
    %cst_36 = arith.constant 1.000000e+00 : f32
    %105 = vector.broadcast %cst_36 : f32 to vector<8x128xf32>
    %106 = arith.addf %105, %104 : vector<8x128xf32>
    %107 = arith.divf %105, %106 : vector<8x128xf32>
    %108 = vector.extract_strided_slice %95 {offsets = [0, 256], sizes = [8, 128], strides = [1, 1]} : vector<8x512xf32> to vector<8x128xf32>
    %109 = math.tanh %108 : vector<8x128xf32>
    %110 = vector.extract_strided_slice %95 {offsets = [0, 384], sizes = [8, 128], strides = [1, 1]} : vector<8x512xf32> to vector<8x128xf32>
    %111 = arith.negf %110 : vector<8x128xf32>
    %112 = math.exp %111 : vector<8x128xf32>
    %cst_37 = arith.constant 1.000000e+00 : f32
    %113 = vector.broadcast %cst_37 : f32 to vector<8x128xf32>
    %114 = arith.addf %113, %112 : vector<8x128xf32>
    %115 = arith.divf %113, %114 : vector<8x128xf32>
    %116 = arith.mulf %107, %50 : vector<8x128xf32>
    %117 = arith.mulf %101, %109 : vector<8x128xf32>
    %118 = arith.addf %116, %117 : vector<8x128xf32>
    %119 = math.tanh %118 : vector<8x128xf32>
    %120 = arith.mulf %115, %119 : vector<8x128xf32>
    %121 = arith.truncf %120 : vector<8x128xf32> to vector<8x128xbf16>
    %c0_38 = arith.constant 0 : index
    %c0_39 = arith.constant 0 : index
    %122 = vector.load %arg4[%c0_38, %c0_39] : memref<128x512xbf16, #tpu.memory_space<vmem>>, vector<128x512xbf16>
    %cst_40 = arith.constant dense<0.000000e+00> : vector<8x512xf32>
    %123 = tpu.matmul %121, %122, %cst_40 {dimension_numbers = #tpu.dot_dimension_numbers<[1], [0], [0], [1], [0, 0, 1, 1], [], []>} : vector<8x128xbf16>, vector<128x512xbf16>, vector<8x512xf32> -> vector<8x512xf32>
    %124 = arith.truncf %86 : vector<8x128xf32> to vector<8x128xbf16>
    %c0_41 = arith.constant 0 : index
    %c0_42 = arith.constant 0 : index
    %125 = vector.load %arg5[%c0_41, %c0_42] : memref<128x512xbf16, #tpu.memory_space<vmem>>, vector<128x512xbf16>
    %cst_43 = arith.constant dense<0.000000e+00> : vector<8x512xf32>
    %126 = tpu.matmul %124, %125, %cst_43 {dimension_numbers = #tpu.dot_dimension_numbers<[1], [0], [0], [1], [0, 0, 1, 1], [], []>} : vector<8x128xbf16>, vector<128x512xbf16>, vector<8x512xf32> -> vector<8x512xf32>
    %127 = arith.addf %123, %126 : vector<8x512xf32>
    %128 = vector.broadcast %16 : vector<1x512xf32> to vector<8x512xf32>
    %129 = arith.addf %127, %128 : vector<8x512xf32>
    %130 = vector.extract_strided_slice %129 {offsets = [0, 0], sizes = [8, 128], strides = [1, 1]} : vector<8x512xf32> to vector<8x128xf32>
    %131 = arith.negf %130 : vector<8x128xf32>
    %132 = math.exp %131 : vector<8x128xf32>
    %cst_44 = arith.constant 1.000000e+00 : f32
    %133 = vector.broadcast %cst_44 : f32 to vector<8x128xf32>
    %134 = arith.addf %133, %132 : vector<8x128xf32>
    %135 = arith.divf %133, %134 : vector<8x128xf32>
    %136 = vector.extract_strided_slice %129 {offsets = [0, 128], sizes = [8, 128], strides = [1, 1]} : vector<8x512xf32> to vector<8x128xf32>
    %137 = arith.negf %136 : vector<8x128xf32>
    %138 = math.exp %137 : vector<8x128xf32>
    %cst_45 = arith.constant 1.000000e+00 : f32
    %139 = vector.broadcast %cst_45 : f32 to vector<8x128xf32>
    %140 = arith.addf %139, %138 : vector<8x128xf32>
    %141 = arith.divf %139, %140 : vector<8x128xf32>
    %142 = vector.extract_strided_slice %129 {offsets = [0, 256], sizes = [8, 128], strides = [1, 1]} : vector<8x512xf32> to vector<8x128xf32>
    %143 = math.tanh %142 : vector<8x128xf32>
    %144 = vector.extract_strided_slice %129 {offsets = [0, 384], sizes = [8, 128], strides = [1, 1]} : vector<8x512xf32> to vector<8x128xf32>
    %145 = arith.negf %144 : vector<8x128xf32>
    %146 = math.exp %145 : vector<8x128xf32>
    %cst_46 = arith.constant 1.000000e+00 : f32
    %147 = vector.broadcast %cst_46 : f32 to vector<8x128xf32>
    %148 = arith.addf %147, %146 : vector<8x128xf32>
    %149 = arith.divf %147, %148 : vector<8x128xf32>
    %150 = arith.mulf %141, %84 : vector<8x128xf32>
    %151 = arith.mulf %135, %143 : vector<8x128xf32>
    %152 = arith.addf %150, %151 : vector<8x128xf32>
    %153 = math.tanh %152 : vector<8x128xf32>
    %154 = arith.mulf %149, %153 : vector<8x128xf32>
    %c2_i32_47 = arith.constant 2 : i32
    %c8_i32_48 = arith.constant 8 : i32
    %155 = arith.muli %c2_i32_47, %c8_i32_48 : i32
    %156 = tpu.assume_multiple %155, 8 : i32
    %157 = arith.index_cast %156 : i32 to index
    %c0_49 = arith.constant 0 : index
    %158 = vector.load %arg14[%157, %c0_49] : memref<64x1024xbf16, #tpu.memory_space<vmem>>, vector<8x512xbf16>
    %159 = arith.extf %158 : vector<8x512xbf16> to vector<8x512xf32>
    %160 = arith.truncf %120 : vector<8x128xf32> to vector<8x128xbf16>
    %c0_50 = arith.constant 0 : index
    %c0_51 = arith.constant 0 : index
    %161 = vector.load %arg3[%c0_50, %c0_51] : memref<128x512xbf16, #tpu.memory_space<vmem>>, vector<128x512xbf16>
    %cst_52 = arith.constant dense<0.000000e+00> : vector<8x512xf32>
    %162 = tpu.matmul %160, %161, %cst_52 {dimension_numbers = #tpu.dot_dimension_numbers<[1], [0], [0], [1], [0, 0, 1, 1], [], []>} : vector<8x128xbf16>, vector<128x512xbf16>, vector<8x512xf32> -> vector<8x512xf32>
    %163 = arith.addf %159, %162 : vector<8x512xf32>
    %164 = vector.extract_strided_slice %163 {offsets = [0, 0], sizes = [8, 128], strides = [1, 1]} : vector<8x512xf32> to vector<8x128xf32>
    %165 = arith.negf %164 : vector<8x128xf32>
    %166 = math.exp %165 : vector<8x128xf32>
    %cst_53 = arith.constant 1.000000e+00 : f32
    %167 = vector.broadcast %cst_53 : f32 to vector<8x128xf32>
    %168 = arith.addf %167, %166 : vector<8x128xf32>
    %169 = arith.divf %167, %168 : vector<8x128xf32>
    %170 = vector.extract_strided_slice %163 {offsets = [0, 128], sizes = [8, 128], strides = [1, 1]} : vector<8x512xf32> to vector<8x128xf32>
    %171 = arith.negf %170 : vector<8x128xf32>
    %172 = math.exp %171 : vector<8x128xf32>
    %cst_54 = arith.constant 1.000000e+00 : f32
    %173 = vector.broadcast %cst_54 : f32 to vector<8x128xf32>
    %174 = arith.addf %173, %172 : vector<8x128xf32>
    %175 = arith.divf %173, %174 : vector<8x128xf32>
    %176 = vector.extract_strided_slice %163 {offsets = [0, 256], sizes = [8, 128], strides = [1, 1]} : vector<8x512xf32> to vector<8x128xf32>
    %177 = math.tanh %176 : vector<8x128xf32>
    %178 = vector.extract_strided_slice %163 {offsets = [0, 384], sizes = [8, 128], strides = [1, 1]} : vector<8x512xf32> to vector<8x128xf32>
    %179 = arith.negf %178 : vector<8x128xf32>
    %180 = math.exp %179 : vector<8x128xf32>
    %cst_55 = arith.constant 1.000000e+00 : f32
    %181 = vector.broadcast %cst_55 : f32 to vector<8x128xf32>
    %182 = arith.addf %181, %180 : vector<8x128xf32>
    %183 = arith.divf %181, %182 : vector<8x128xf32>
    %184 = arith.mulf %175, %118 : vector<8x128xf32>
    %185 = arith.mulf %169, %177 : vector<8x128xf32>
    %186 = arith.addf %184, %185 : vector<8x128xf32>
    %187 = math.tanh %186 : vector<8x128xf32>
    %188 = arith.mulf %183, %187 : vector<8x128xf32>
    %189 = arith.truncf %188 : vector<8x128xf32> to vector<8x128xbf16>
    %c0_56 = arith.constant 0 : index
    %c0_57 = arith.constant 0 : index
    %190 = vector.load %arg4[%c0_56, %c0_57] : memref<128x512xbf16, #tpu.memory_space<vmem>>, vector<128x512xbf16>
    %cst_58 = arith.constant dense<0.000000e+00> : vector<8x512xf32>
    %191 = tpu.matmul %189, %190, %cst_58 {dimension_numbers = #tpu.dot_dimension_numbers<[1], [0], [0], [1], [0, 0, 1, 1], [], []>} : vector<8x128xbf16>, vector<128x512xbf16>, vector<8x512xf32> -> vector<8x512xf32>
    %192 = arith.truncf %154 : vector<8x128xf32> to vector<8x128xbf16>
    %c0_59 = arith.constant 0 : index
    %c0_60 = arith.constant 0 : index
    %193 = vector.load %arg5[%c0_59, %c0_60] : memref<128x512xbf16, #tpu.memory_space<vmem>>, vector<128x512xbf16>
    %cst_61 = arith.constant dense<0.000000e+00> : vector<8x512xf32>
    %194 = tpu.matmul %192, %193, %cst_61 {dimension_numbers = #tpu.dot_dimension_numbers<[1], [0], [0], [1], [0, 0, 1, 1], [], []>} : vector<8x128xbf16>, vector<128x512xbf16>, vector<8x512xf32> -> vector<8x512xf32>
    %195 = arith.addf %191, %194 : vector<8x512xf32>
    %196 = vector.broadcast %16 : vector<1x512xf32> to vector<8x512xf32>
    %197 = arith.addf %195, %196 : vector<8x512xf32>
    %198 = vector.extract_strided_slice %197 {offsets = [0, 0], sizes = [8, 128], strides = [1, 1]} : vector<8x512xf32> to vector<8x128xf32>
    %199 = arith.negf %198 : vector<8x128xf32>
    %200 = math.exp %199 : vector<8x128xf32>
    %cst_62 = arith.constant 1.000000e+00 : f32
    %201 = vector.broadcast %cst_62 : f32 to vector<8x128xf32>
    %202 = arith.addf %201, %200 : vector<8x128xf32>
    %203 = arith.divf %201, %202 : vector<8x128xf32>
    %204 = vector.extract_strided_slice %197 {offsets = [0, 128], sizes = [8, 128], strides = [1, 1]} : vector<8x512xf32> to vector<8x128xf32>
    %205 = arith.negf %204 : vector<8x128xf32>
    %206 = math.exp %205 : vector<8x128xf32>
    %cst_63 = arith.constant 1.000000e+00 : f32
    %207 = vector.broadcast %cst_63 : f32 to vector<8x128xf32>
    %208 = arith.addf %207, %206 : vector<8x128xf32>
    %209 = arith.divf %207, %208 : vector<8x128xf32>
    %210 = vector.extract_strided_slice %197 {offsets = [0, 256], sizes = [8, 128], strides = [1, 1]} : vector<8x512xf32> to vector<8x128xf32>
    %211 = math.tanh %210 : vector<8x128xf32>
    %212 = vector.extract_strided_slice %197 {offsets = [0, 384], sizes = [8, 128], strides = [1, 1]} : vector<8x512xf32> to vector<8x128xf32>
    %213 = arith.negf %212 : vector<8x128xf32>
    %214 = math.exp %213 : vector<8x128xf32>
    %cst_64 = arith.constant 1.000000e+00 : f32
    %215 = vector.broadcast %cst_64 : f32 to vector<8x128xf32>
    %216 = arith.addf %215, %214 : vector<8x128xf32>
    %217 = arith.divf %215, %216 : vector<8x128xf32>
    %218 = arith.mulf %209, %152 : vector<8x128xf32>
    %219 = arith.mulf %203, %211 : vector<8x128xf32>
    %220 = arith.addf %218, %219 : vector<8x128xf32>
    %221 = math.tanh %220 : vector<8x128xf32>
    %222 = arith.mulf %217, %221 : vector<8x128xf32>
    %c3_i32_65 = arith.constant 3 : i32
    %c8_i32_66 = arith.constant 8 : i32
    %223 = arith.muli %c3_i32_65, %c8_i32_66 : i32
    %224 = tpu.assume_multiple %223, 8 : i32
    %225 = arith.index_cast %224 : i32 to index
    %c0_67 = arith.constant 0 : index
    %226 = vector.load %arg14[%225, %c0_67] : memref<64x1024xbf16, #tpu.memory_space<vmem>>, vector<8x512xbf16>
    %227 = arith.extf %226 : vector<8x512xbf16> to vector<8x512xf32>
    %228 = arith.truncf %188 : vector<8x128xf32> to vector<8x128xbf16>
    %c0_68 = arith.constant 0 : index
    %c0_69 = arith.constant 0 : index
    %229 = vector.load %arg3[%c0_68, %c0_69] : memref<128x512xbf16, #tpu.memory_space<vmem>>, vector<128x512xbf16>
    %cst_70 = arith.constant dense<0.000000e+00> : vector<8x512xf32>
    %230 = tpu.matmul %228, %229, %cst_70 {dimension_numbers = #tpu.dot_dimension_numbers<[1], [0], [0], [1], [0, 0, 1, 1], [], []>} : vector<8x128xbf16>, vector<128x512xbf16>, vector<8x512xf32> -> vector<8x512xf32>
    %231 = arith.addf %227, %230 : vector<8x512xf32>
    %232 = vector.extract_strided_slice %231 {offsets = [0, 0], sizes = [8, 128], strides = [1, 1]} : vector<8x512xf32> to vector<8x128xf32>
    %233 = arith.negf %232 : vector<8x128xf32>
    %234 = math.exp %233 : vector<8x128xf32>
    %cst_71 = arith.constant 1.000000e+00 : f32
    %235 = vector.broadcast %cst_71 : f32 to vector<8x128xf32>
    %236 = arith.addf %235, %234 : vector<8x128xf32>
    %237 = arith.divf %235, %236 : vector<8x128xf32>
    %238 = vector.extract_strided_slice %231 {offsets = [0, 128], sizes = [8, 128], strides = [1, 1]} : vector<8x512xf32> to vector<8x128xf32>
    %239 = arith.negf %238 : vector<8x128xf32>
    %240 = math.exp %239 : vector<8x128xf32>
    %cst_72 = arith.constant 1.000000e+00 : f32
    %241 = vector.broadcast %cst_72 : f32 to vector<8x128xf32>
    %242 = arith.addf %241, %240 : vector<8x128xf32>
    %243 = arith.divf %241, %242 : vector<8x128xf32>
    %244 = vector.extract_strided_slice %231 {offsets = [0, 256], sizes = [8, 128], strides = [1, 1]} : vector<8x512xf32> to vector<8x128xf32>
    %245 = math.tanh %244 : vector<8x128xf32>
    %246 = vector.extract_strided_slice %231 {offsets = [0, 384], sizes = [8, 128], strides = [1, 1]} : vector<8x512xf32> to vector<8x128xf32>
    %247 = arith.negf %246 : vector<8x128xf32>
    %248 = math.exp %247 : vector<8x128xf32>
    %cst_73 = arith.constant 1.000000e+00 : f32
    %249 = vector.broadcast %cst_73 : f32 to vector<8x128xf32>
    %250 = arith.addf %249, %248 : vector<8x128xf32>
    %251 = arith.divf %249, %250 : vector<8x128xf32>
    %252 = arith.mulf %243, %186 : vector<8x128xf32>
    %253 = arith.mulf %237, %245 : vector<8x128xf32>
    %254 = arith.addf %252, %253 : vector<8x128xf32>
    %255 = math.tanh %254 : vector<8x128xf32>
    %256 = arith.mulf %251, %255 : vector<8x128xf32>
    %257 = arith.truncf %256 : vector<8x128xf32> to vector<8x128xbf16>
    %c0_74 = arith.constant 0 : index
    %c0_75 = arith.constant 0 : index
    %258 = vector.load %arg4[%c0_74, %c0_75] : memref<128x512xbf16, #tpu.memory_space<vmem>>, vector<128x512xbf16>
    %cst_76 = arith.constant dense<0.000000e+00> : vector<8x512xf32>
    %259 = tpu.matmul %257, %258, %cst_76 {dimension_numbers = #tpu.dot_dimension_numbers<[1], [0], [0], [1], [0, 0, 1, 1], [], []>} : vector<8x128xbf16>, vector<128x512xbf16>, vector<8x512xf32> -> vector<8x512xf32>
    %260 = arith.truncf %222 : vector<8x128xf32> to vector<8x128xbf16>
    %c0_77 = arith.constant 0 : index
    %c0_78 = arith.constant 0 : index
    %261 = vector.load %arg5[%c0_77, %c0_78] : memref<128x512xbf16, #tpu.memory_space<vmem>>, vector<128x512xbf16>
    %cst_79 = arith.constant dense<0.000000e+00> : vector<8x512xf32>
    %262 = tpu.matmul %260, %261, %cst_79 {dimension_numbers = #tpu.dot_dimension_numbers<[1], [0], [0], [1], [0, 0, 1, 1], [], []>} : vector<8x128xbf16>, vector<128x512xbf16>, vector<8x512xf32> -> vector<8x512xf32>
    %263 = arith.addf %259, %262 : vector<8x512xf32>
    %264 = vector.broadcast %16 : vector<1x512xf32> to vector<8x512xf32>
    %265 = arith.addf %263, %264 : vector<8x512xf32>
    %266 = vector.extract_strided_slice %265 {offsets = [0, 0], sizes = [8, 128], strides = [1, 1]} : vector<8x512xf32> to vector<8x128xf32>
    %267 = arith.negf %266 : vector<8x128xf32>
    %268 = math.exp %267 : vector<8x128xf32>
    %cst_80 = arith.constant 1.000000e+00 : f32
    %269 = vector.broadcast %cst_80 : f32 to vector<8x128xf32>
    %270 = arith.addf %269, %268 : vector<8x128xf32>
    %271 = arith.divf %269, %270 : vector<8x128xf32>
    %272 = vector.extract_strided_slice %265 {offsets = [0, 128], sizes = [8, 128], strides = [1, 1]} : vector<8x512xf32> to vector<8x128xf32>
    %273 = arith.negf %272 : vector<8x128xf32>
    %274 = math.exp %273 : vector<8x128xf32>
    %cst_81 = arith.constant 1.000000e+00 : f32
    %275 = vector.broadcast %cst_81 : f32 to vector<8x128xf32>
    %276 = arith.addf %275, %274 : vector<8x128xf32>
    %277 = arith.divf %275, %276 : vector<8x128xf32>
    %278 = vector.extract_strided_slice %265 {offsets = [0, 256], sizes = [8, 128], strides = [1, 1]} : vector<8x512xf32> to vector<8x128xf32>
    %279 = math.tanh %278 : vector<8x128xf32>
    %280 = vector.extract_strided_slice %265 {offsets = [0, 384], sizes = [8, 128], strides = [1, 1]} : vector<8x512xf32> to vector<8x128xf32>
    %281 = arith.negf %280 : vector<8x128xf32>
    %282 = math.exp %281 : vector<8x128xf32>
    %cst_82 = arith.constant 1.000000e+00 : f32
    %283 = vector.broadcast %cst_82 : f32 to vector<8x128xf32>
    %284 = arith.addf %283, %282 : vector<8x128xf32>
    %285 = arith.divf %283, %284 : vector<8x128xf32>
    %286 = arith.mulf %277, %220 : vector<8x128xf32>
    %287 = arith.mulf %271, %279 : vector<8x128xf32>
    %288 = arith.addf %286, %287 : vector<8x128xf32>
    %289 = math.tanh %288 : vector<8x128xf32>
    %290 = arith.mulf %285, %289 : vector<8x128xf32>
    %c4_i32 = arith.constant 4 : i32
    %c8_i32_83 = arith.constant 8 : i32
    %291 = arith.muli %c4_i32, %c8_i32_83 : i32
    %292 = tpu.assume_multiple %291, 8 : i32
    %293 = arith.index_cast %292 : i32 to index
    %c0_84 = arith.constant 0 : index
    %294 = vector.load %arg14[%293, %c0_84] : memref<64x1024xbf16, #tpu.memory_space<vmem>>, vector<8x512xbf16>
    %295 = arith.extf %294 : vector<8x512xbf16> to vector<8x512xf32>
    %296 = arith.truncf %256 : vector<8x128xf32> to vector<8x128xbf16>
    %c0_85 = arith.constant 0 : index
    %c0_86 = arith.constant 0 : index
    %297 = vector.load %arg3[%c0_85, %c0_86] : memref<128x512xbf16, #tpu.memory_space<vmem>>, vector<128x512xbf16>
    %cst_87 = arith.constant dense<0.000000e+00> : vector<8x512xf32>
    %298 = tpu.matmul %296, %297, %cst_87 {dimension_numbers = #tpu.dot_dimension_numbers<[1], [0], [0], [1], [0, 0, 1, 1], [], []>} : vector<8x128xbf16>, vector<128x512xbf16>, vector<8x512xf32> -> vector<8x512xf32>
    %299 = arith.addf %295, %298 : vector<8x512xf32>
    %300 = vector.extract_strided_slice %299 {offsets = [0, 0], sizes = [8, 128], strides = [1, 1]} : vector<8x512xf32> to vector<8x128xf32>
    %301 = arith.negf %300 : vector<8x128xf32>
    %302 = math.exp %301 : vector<8x128xf32>
    %cst_88 = arith.constant 1.000000e+00 : f32
    %303 = vector.broadcast %cst_88 : f32 to vector<8x128xf32>
    %304 = arith.addf %303, %302 : vector<8x128xf32>
    %305 = arith.divf %303, %304 : vector<8x128xf32>
    %306 = vector.extract_strided_slice %299 {offsets = [0, 128], sizes = [8, 128], strides = [1, 1]} : vector<8x512xf32> to vector<8x128xf32>
    %307 = arith.negf %306 : vector<8x128xf32>
    %308 = math.exp %307 : vector<8x128xf32>
    %cst_89 = arith.constant 1.000000e+00 : f32
    %309 = vector.broadcast %cst_89 : f32 to vector<8x128xf32>
    %310 = arith.addf %309, %308 : vector<8x128xf32>
    %311 = arith.divf %309, %310 : vector<8x128xf32>
    %312 = vector.extract_strided_slice %299 {offsets = [0, 256], sizes = [8, 128], strides = [1, 1]} : vector<8x512xf32> to vector<8x128xf32>
    %313 = math.tanh %312 : vector<8x128xf32>
    %314 = vector.extract_strided_slice %299 {offsets = [0, 384], sizes = [8, 128], strides = [1, 1]} : vector<8x512xf32> to vector<8x128xf32>
    %315 = arith.negf %314 : vector<8x128xf32>
    %316 = math.exp %315 : vector<8x128xf32>
    %cst_90 = arith.constant 1.000000e+00 : f32
    %317 = vector.broadcast %cst_90 : f32 to vector<8x128xf32>
    %318 = arith.addf %317, %316 : vector<8x128xf32>
    %319 = arith.divf %317, %318 : vector<8x128xf32>
    %320 = arith.mulf %311, %254 : vector<8x128xf32>
    %321 = arith.mulf %305, %313 : vector<8x128xf32>
    %322 = arith.addf %320, %321 : vector<8x128xf32>
    %323 = math.tanh %322 : vector<8x128xf32>
    %324 = arith.mulf %319, %323 : vector<8x128xf32>
    %325 = arith.truncf %324 : vector<8x128xf32> to vector<8x128xbf16>
    %c0_91 = arith.constant 0 : index
    %c0_92 = arith.constant 0 : index
    %326 = vector.load %arg4[%c0_91, %c0_92] : memref<128x512xbf16, #tpu.memory_space<vmem>>, vector<128x512xbf16>
    %cst_93 = arith.constant dense<0.000000e+00> : vector<8x512xf32>
    %327 = tpu.matmul %325, %326, %cst_93 {dimension_numbers = #tpu.dot_dimension_numbers<[1], [0], [0], [1], [0, 0, 1, 1], [], []>} : vector<8x128xbf16>, vector<128x512xbf16>, vector<8x512xf32> -> vector<8x512xf32>
    %328 = arith.truncf %290 : vector<8x128xf32> to vector<8x128xbf16>
    %c0_94 = arith.constant 0 : index
    %c0_95 = arith.constant 0 : index
    %329 = vector.load %arg5[%c0_94, %c0_95] : memref<128x512xbf16, #tpu.memory_space<vmem>>, vector<128x512xbf16>
    %cst_96 = arith.constant dense<0.000000e+00> : vector<8x512xf32>
    %330 = tpu.matmul %328, %329, %cst_96 {dimension_numbers = #tpu.dot_dimension_numbers<[1], [0], [0], [1], [0, 0, 1, 1], [], []>} : vector<8x128xbf16>, vector<128x512xbf16>, vector<8x512xf32> -> vector<8x512xf32>
    %331 = arith.addf %327, %330 : vector<8x512xf32>
    %332 = vector.broadcast %16 : vector<1x512xf32> to vector<8x512xf32>
    %333 = arith.addf %331, %332 : vector<8x512xf32>
    %334 = vector.extract_strided_slice %333 {offsets = [0, 0], sizes = [8, 128], strides = [1, 1]} : vector<8x512xf32> to vector<8x128xf32>
    %335 = arith.negf %334 : vector<8x128xf32>
    %336 = math.exp %335 : vector<8x128xf32>
    %cst_97 = arith.constant 1.000000e+00 : f32
    %337 = vector.broadcast %cst_97 : f32 to vector<8x128xf32>
    %338 = arith.addf %337, %336 : vector<8x128xf32>
    %339 = arith.divf %337, %338 : vector<8x128xf32>
    %340 = vector.extract_strided_slice %333 {offsets = [0, 128], sizes = [8, 128], strides = [1, 1]} : vector<8x512xf32> to vector<8x128xf32>
    %341 = arith.negf %340 : vector<8x128xf32>
    %342 = math.exp %341 : vector<8x128xf32>
    %cst_98 = arith.constant 1.000000e+00 : f32
    %343 = vector.broadcast %cst_98 : f32 to vector<8x128xf32>
    %344 = arith.addf %343, %342 : vector<8x128xf32>
    %345 = arith.divf %343, %344 : vector<8x128xf32>
    %346 = vector.extract_strided_slice %333 {offsets = [0, 256], sizes = [8, 128], strides = [1, 1]} : vector<8x512xf32> to vector<8x128xf32>
    %347 = math.tanh %346 : vector<8x128xf32>
    %348 = vector.extract_strided_slice %333 {offsets = [0, 384], sizes = [8, 128], strides = [1, 1]} : vector<8x512xf32> to vector<8x128xf32>
    %349 = arith.negf %348 : vector<8x128xf32>
    %350 = math.exp %349 : vector<8x128xf32>
    %cst_99 = arith.constant 1.000000e+00 : f32
    %351 = vector.broadcast %cst_99 : f32 to vector<8x128xf32>
    %352 = arith.addf %351, %350 : vector<8x128xf32>
    %353 = arith.divf %351, %352 : vector<8x128xf32>
    %354 = arith.mulf %345, %288 : vector<8x128xf32>
    %355 = arith.mulf %339, %347 : vector<8x128xf32>
    %356 = arith.addf %354, %355 : vector<8x128xf32>
    %357 = math.tanh %356 : vector<8x128xf32>
    %358 = arith.mulf %353, %357 : vector<8x128xf32>
    %c5_i32 = arith.constant 5 : i32
    %c8_i32_100 = arith.constant 8 : i32
    %359 = arith.muli %c5_i32, %c8_i32_100 : i32
    %360 = tpu.assume_multiple %359, 8 : i32
    %361 = arith.index_cast %360 : i32 to index
    %c0_101 = arith.constant 0 : index
    %362 = vector.load %arg14[%361, %c0_101] : memref<64x1024xbf16, #tpu.memory_space<vmem>>, vector<8x512xbf16>
    %363 = arith.extf %362 : vector<8x512xbf16> to vector<8x512xf32>
    %364 = arith.truncf %324 : vector<8x128xf32> to vector<8x128xbf16>
    %c0_102 = arith.constant 0 : index
    %c0_103 = arith.constant 0 : index
    %365 = vector.load %arg3[%c0_102, %c0_103] : memref<128x512xbf16, #tpu.memory_space<vmem>>, vector<128x512xbf16>
    %cst_104 = arith.constant dense<0.000000e+00> : vector<8x512xf32>
    %366 = tpu.matmul %364, %365, %cst_104 {dimension_numbers = #tpu.dot_dimension_numbers<[1], [0], [0], [1], [0, 0, 1, 1], [], []>} : vector<8x128xbf16>, vector<128x512xbf16>, vector<8x512xf32> -> vector<8x512xf32>
    %367 = arith.addf %363, %366 : vector<8x512xf32>
    %368 = vector.extract_strided_slice %367 {offsets = [0, 0], sizes = [8, 128], strides = [1, 1]} : vector<8x512xf32> to vector<8x128xf32>
    %369 = arith.negf %368 : vector<8x128xf32>
    %370 = math.exp %369 : vector<8x128xf32>
    %cst_105 = arith.constant 1.000000e+00 : f32
    %371 = vector.broadcast %cst_105 : f32 to vector<8x128xf32>
    %372 = arith.addf %371, %370 : vector<8x128xf32>
    %373 = arith.divf %371, %372 : vector<8x128xf32>
    %374 = vector.extract_strided_slice %367 {offsets = [0, 128], sizes = [8, 128], strides = [1, 1]} : vector<8x512xf32> to vector<8x128xf32>
    %375 = arith.negf %374 : vector<8x128xf32>
    %376 = math.exp %375 : vector<8x128xf32>
    %cst_106 = arith.constant 1.000000e+00 : f32
    %377 = vector.broadcast %cst_106 : f32 to vector<8x128xf32>
    %378 = arith.addf %377, %376 : vector<8x128xf32>
    %379 = arith.divf %377, %378 : vector<8x128xf32>
    %380 = vector.extract_strided_slice %367 {offsets = [0, 256], sizes = [8, 128], strides = [1, 1]} : vector<8x512xf32> to vector<8x128xf32>
    %381 = math.tanh %380 : vector<8x128xf32>
    %382 = vector.extract_strided_slice %367 {offsets = [0, 384], sizes = [8, 128], strides = [1, 1]} : vector<8x512xf32> to vector<8x128xf32>
    %383 = arith.negf %382 : vector<8x128xf32>
    %384 = math.exp %383 : vector<8x128xf32>
    %cst_107 = arith.constant 1.000000e+00 : f32
    %385 = vector.broadcast %cst_107 : f32 to vector<8x128xf32>
    %386 = arith.addf %385, %384 : vector<8x128xf32>
    %387 = arith.divf %385, %386 : vector<8x128xf32>
    %388 = arith.mulf %379, %322 : vector<8x128xf32>
    %389 = arith.mulf %373, %381 : vector<8x128xf32>
    %390 = arith.addf %388, %389 : vector<8x128xf32>
    %391 = math.tanh %390 : vector<8x128xf32>
    %392 = arith.mulf %387, %391 : vector<8x128xf32>
    %393 = arith.truncf %392 : vector<8x128xf32> to vector<8x128xbf16>
    %c0_108 = arith.constant 0 : index
    %c0_109 = arith.constant 0 : index
    %394 = vector.load %arg4[%c0_108, %c0_109] : memref<128x512xbf16, #tpu.memory_space<vmem>>, vector<128x512xbf16>
    %cst_110 = arith.constant dense<0.000000e+00> : vector<8x512xf32>
    %395 = tpu.matmul %393, %394, %cst_110 {dimension_numbers = #tpu.dot_dimension_numbers<[1], [0], [0], [1], [0, 0, 1, 1], [], []>} : vector<8x128xbf16>, vector<128x512xbf16>, vector<8x512xf32> -> vector<8x512xf32>
    %396 = arith.truncf %358 : vector<8x128xf32> to vector<8x128xbf16>
    %c0_111 = arith.constant 0 : index
    %c0_112 = arith.constant 0 : index
    %397 = vector.load %arg5[%c0_111, %c0_112] : memref<128x512xbf16, #tpu.memory_space<vmem>>, vector<128x512xbf16>
    %cst_113 = arith.constant dense<0.000000e+00> : vector<8x512xf32>
    %398 = tpu.matmul %396, %397, %cst_113 {dimension_numbers = #tpu.dot_dimension_numbers<[1], [0], [0], [1], [0, 0, 1, 1], [], []>} : vector<8x128xbf16>, vector<128x512xbf16>, vector<8x512xf32> -> vector<8x512xf32>
    %399 = arith.addf %395, %398 : vector<8x512xf32>
    %400 = vector.broadcast %16 : vector<1x512xf32> to vector<8x512xf32>
    %401 = arith.addf %399, %400 : vector<8x512xf32>
    %402 = vector.extract_strided_slice %401 {offsets = [0, 0], sizes = [8, 128], strides = [1, 1]} : vector<8x512xf32> to vector<8x128xf32>
    %403 = arith.negf %402 : vector<8x128xf32>
    %404 = math.exp %403 : vector<8x128xf32>
    %cst_114 = arith.constant 1.000000e+00 : f32
    %405 = vector.broadcast %cst_114 : f32 to vector<8x128xf32>
    %406 = arith.addf %405, %404 : vector<8x128xf32>
    %407 = arith.divf %405, %406 : vector<8x128xf32>
    %408 = vector.extract_strided_slice %401 {offsets = [0, 128], sizes = [8, 128], strides = [1, 1]} : vector<8x512xf32> to vector<8x128xf32>
    %409 = arith.negf %408 : vector<8x128xf32>
    %410 = math.exp %409 : vector<8x128xf32>
    %cst_115 = arith.constant 1.000000e+00 : f32
    %411 = vector.broadcast %cst_115 : f32 to vector<8x128xf32>
    %412 = arith.addf %411, %410 : vector<8x128xf32>
    %413 = arith.divf %411, %412 : vector<8x128xf32>
    %414 = vector.extract_strided_slice %401 {offsets = [0, 256], sizes = [8, 128], strides = [1, 1]} : vector<8x512xf32> to vector<8x128xf32>
    %415 = math.tanh %414 : vector<8x128xf32>
    %416 = vector.extract_strided_slice %401 {offsets = [0, 384], sizes = [8, 128], strides = [1, 1]} : vector<8x512xf32> to vector<8x128xf32>
    %417 = arith.negf %416 : vector<8x128xf32>
    %418 = math.exp %417 : vector<8x128xf32>
    %cst_116 = arith.constant 1.000000e+00 : f32
    %419 = vector.broadcast %cst_116 : f32 to vector<8x128xf32>
    %420 = arith.addf %419, %418 : vector<8x128xf32>
    %421 = arith.divf %419, %420 : vector<8x128xf32>
    %422 = arith.mulf %413, %356 : vector<8x128xf32>
    %423 = arith.mulf %407, %415 : vector<8x128xf32>
    %424 = arith.addf %422, %423 : vector<8x128xf32>
    %425 = math.tanh %424 : vector<8x128xf32>
    %426 = arith.mulf %421, %425 : vector<8x128xf32>
    %c6_i32 = arith.constant 6 : i32
    %c8_i32_117 = arith.constant 8 : i32
    %427 = arith.muli %c6_i32, %c8_i32_117 : i32
    %428 = tpu.assume_multiple %427, 8 : i32
    %429 = arith.index_cast %428 : i32 to index
    %c0_118 = arith.constant 0 : index
    %430 = vector.load %arg14[%429, %c0_118] : memref<64x1024xbf16, #tpu.memory_space<vmem>>, vector<8x512xbf16>
    %431 = arith.extf %430 : vector<8x512xbf16> to vector<8x512xf32>
    %432 = arith.truncf %392 : vector<8x128xf32> to vector<8x128xbf16>
    %c0_119 = arith.constant 0 : index
    %c0_120 = arith.constant 0 : index
    %433 = vector.load %arg3[%c0_119, %c0_120] : memref<128x512xbf16, #tpu.memory_space<vmem>>, vector<128x512xbf16>
    %cst_121 = arith.constant dense<0.000000e+00> : vector<8x512xf32>
    %434 = tpu.matmul %432, %433, %cst_121 {dimension_numbers = #tpu.dot_dimension_numbers<[1], [0], [0], [1], [0, 0, 1, 1], [], []>} : vector<8x128xbf16>, vector<128x512xbf16>, vector<8x512xf32> -> vector<8x512xf32>
    %435 = arith.addf %431, %434 : vector<8x512xf32>
    %436 = vector.extract_strided_slice %435 {offsets = [0, 0], sizes = [8, 128], strides = [1, 1]} : vector<8x512xf32> to vector<8x128xf32>
    %437 = arith.negf %436 : vector<8x128xf32>
    %438 = math.exp %437 : vector<8x128xf32>
    %cst_122 = arith.constant 1.000000e+00 : f32
    %439 = vector.broadcast %cst_122 : f32 to vector<8x128xf32>
    %440 = arith.addf %439, %438 : vector<8x128xf32>
    %441 = arith.divf %439, %440 : vector<8x128xf32>
    %442 = vector.extract_strided_slice %435 {offsets = [0, 128], sizes = [8, 128], strides = [1, 1]} : vector<8x512xf32> to vector<8x128xf32>
    %443 = arith.negf %442 : vector<8x128xf32>
    %444 = math.exp %443 : vector<8x128xf32>
    %cst_123 = arith.constant 1.000000e+00 : f32
    %445 = vector.broadcast %cst_123 : f32 to vector<8x128xf32>
    %446 = arith.addf %445, %444 : vector<8x128xf32>
    %447 = arith.divf %445, %446 : vector<8x128xf32>
    %448 = vector.extract_strided_slice %435 {offsets = [0, 256], sizes = [8, 128], strides = [1, 1]} : vector<8x512xf32> to vector<8x128xf32>
    %449 = math.tanh %448 : vector<8x128xf32>
    %450 = vector.extract_strided_slice %435 {offsets = [0, 384], sizes = [8, 128], strides = [1, 1]} : vector<8x512xf32> to vector<8x128xf32>
    %451 = arith.negf %450 : vector<8x128xf32>
    %452 = math.exp %451 : vector<8x128xf32>
    %cst_124 = arith.constant 1.000000e+00 : f32
    %453 = vector.broadcast %cst_124 : f32 to vector<8x128xf32>
    %454 = arith.addf %453, %452 : vector<8x128xf32>
    %455 = arith.divf %453, %454 : vector<8x128xf32>
    %456 = arith.mulf %447, %390 : vector<8x128xf32>
    %457 = arith.mulf %441, %449 : vector<8x128xf32>
    %458 = arith.addf %456, %457 : vector<8x128xf32>
    %459 = math.tanh %458 : vector<8x128xf32>
    %460 = arith.mulf %455, %459 : vector<8x128xf32>
    %461 = arith.truncf %460 : vector<8x128xf32> to vector<8x128xbf16>
    %c0_125 = arith.constant 0 : index
    %c0_126 = arith.constant 0 : index
    %462 = vector.load %arg4[%c0_125, %c0_126] : memref<128x512xbf16, #tpu.memory_space<vmem>>, vector<128x512xbf16>
    %cst_127 = arith.constant dense<0.000000e+00> : vector<8x512xf32>
    %463 = tpu.matmul %461, %462, %cst_127 {dimension_numbers = #tpu.dot_dimension_numbers<[1], [0], [0], [1], [0, 0, 1, 1], [], []>} : vector<8x128xbf16>, vector<128x512xbf16>, vector<8x512xf32> -> vector<8x512xf32>
    %464 = arith.truncf %426 : vector<8x128xf32> to vector<8x128xbf16>
    %c0_128 = arith.constant 0 : index
    %c0_129 = arith.constant 0 : index
    %465 = vector.load %arg5[%c0_128, %c0_129] : memref<128x512xbf16, #tpu.memory_space<vmem>>, vector<128x512xbf16>
    %cst_130 = arith.constant dense<0.000000e+00> : vector<8x512xf32>
    %466 = tpu.matmul %464, %465, %cst_130 {dimension_numbers = #tpu.dot_dimension_numbers<[1], [0], [0], [1], [0, 0, 1, 1], [], []>} : vector<8x128xbf16>, vector<128x512xbf16>, vector<8x512xf32> -> vector<8x512xf32>
    %467 = arith.addf %463, %466 : vector<8x512xf32>
    %468 = vector.broadcast %16 : vector<1x512xf32> to vector<8x512xf32>
    %469 = arith.addf %467, %468 : vector<8x512xf32>
    %470 = vector.extract_strided_slice %469 {offsets = [0, 0], sizes = [8, 128], strides = [1, 1]} : vector<8x512xf32> to vector<8x128xf32>
    %471 = arith.negf %470 : vector<8x128xf32>
    %472 = math.exp %471 : vector<8x128xf32>
    %cst_131 = arith.constant 1.000000e+00 : f32
    %473 = vector.broadcast %cst_131 : f32 to vector<8x128xf32>
    %474 = arith.addf %473, %472 : vector<8x128xf32>
    %475 = arith.divf %473, %474 : vector<8x128xf32>
    %476 = vector.extract_strided_slice %469 {offsets = [0, 128], sizes = [8, 128], strides = [1, 1]} : vector<8x512xf32> to vector<8x128xf32>
    %477 = arith.negf %476 : vector<8x128xf32>
    %478 = math.exp %477 : vector<8x128xf32>
    %cst_132 = arith.constant 1.000000e+00 : f32
    %479 = vector.broadcast %cst_132 : f32 to vector<8x128xf32>
    %480 = arith.addf %479, %478 : vector<8x128xf32>
    %481 = arith.divf %479, %480 : vector<8x128xf32>
    %482 = vector.extract_strided_slice %469 {offsets = [0, 256], sizes = [8, 128], strides = [1, 1]} : vector<8x512xf32> to vector<8x128xf32>
    %483 = math.tanh %482 : vector<8x128xf32>
    %484 = vector.extract_strided_slice %469 {offsets = [0, 384], sizes = [8, 128], strides = [1, 1]} : vector<8x512xf32> to vector<8x128xf32>
    %485 = arith.negf %484 : vector<8x128xf32>
    %486 = math.exp %485 : vector<8x128xf32>
    %cst_133 = arith.constant 1.000000e+00 : f32
    %487 = vector.broadcast %cst_133 : f32 to vector<8x128xf32>
    %488 = arith.addf %487, %486 : vector<8x128xf32>
    %489 = arith.divf %487, %488 : vector<8x128xf32>
    %490 = arith.mulf %481, %424 : vector<8x128xf32>
    %491 = arith.mulf %475, %483 : vector<8x128xf32>
    %492 = arith.addf %490, %491 : vector<8x128xf32>
    %493 = math.tanh %492 : vector<8x128xf32>
    %494 = arith.mulf %489, %493 : vector<8x128xf32>
    %c7_i32 = arith.constant 7 : i32
    %c8_i32_134 = arith.constant 8 : i32
    %495 = arith.muli %c7_i32, %c8_i32_134 : i32
    %496 = tpu.assume_multiple %495, 8 : i32
    %497 = arith.index_cast %496 : i32 to index
    %c0_135 = arith.constant 0 : index
    %498 = vector.load %arg14[%497, %c0_135] : memref<64x1024xbf16, #tpu.memory_space<vmem>>, vector<8x512xbf16>
    %499 = arith.extf %498 : vector<8x512xbf16> to vector<8x512xf32>
    %500 = arith.truncf %460 : vector<8x128xf32> to vector<8x128xbf16>
    %c0_136 = arith.constant 0 : index
    %c0_137 = arith.constant 0 : index
    %501 = vector.load %arg3[%c0_136, %c0_137] : memref<128x512xbf16, #tpu.memory_space<vmem>>, vector<128x512xbf16>
    %cst_138 = arith.constant dense<0.000000e+00> : vector<8x512xf32>
    %502 = tpu.matmul %500, %501, %cst_138 {dimension_numbers = #tpu.dot_dimension_numbers<[1], [0], [0], [1], [0, 0, 1, 1], [], []>} : vector<8x128xbf16>, vector<128x512xbf16>, vector<8x512xf32> -> vector<8x512xf32>
    %503 = arith.addf %499, %502 : vector<8x512xf32>
    %504 = vector.extract_strided_slice %503 {offsets = [0, 0], sizes = [8, 128], strides = [1, 1]} : vector<8x512xf32> to vector<8x128xf32>
    %505 = arith.negf %504 : vector<8x128xf32>
    %506 = math.exp %505 : vector<8x128xf32>
    %cst_139 = arith.constant 1.000000e+00 : f32
    %507 = vector.broadcast %cst_139 : f32 to vector<8x128xf32>
    %508 = arith.addf %507, %506 : vector<8x128xf32>
    %509 = arith.divf %507, %508 : vector<8x128xf32>
    %510 = vector.extract_strided_slice %503 {offsets = [0, 128], sizes = [8, 128], strides = [1, 1]} : vector<8x512xf32> to vector<8x128xf32>
    %511 = arith.negf %510 : vector<8x128xf32>
    %512 = math.exp %511 : vector<8x128xf32>
    %cst_140 = arith.constant 1.000000e+00 : f32
    %513 = vector.broadcast %cst_140 : f32 to vector<8x128xf32>
    %514 = arith.addf %513, %512 : vector<8x128xf32>
    %515 = arith.divf %513, %514 : vector<8x128xf32>
    %516 = vector.extract_strided_slice %503 {offsets = [0, 256], sizes = [8, 128], strides = [1, 1]} : vector<8x512xf32> to vector<8x128xf32>
    %517 = math.tanh %516 : vector<8x128xf32>
    %518 = vector.extract_strided_slice %503 {offsets = [0, 384], sizes = [8, 128], strides = [1, 1]} : vector<8x512xf32> to vector<8x128xf32>
    %519 = arith.negf %518 : vector<8x128xf32>
    %520 = math.exp %519 : vector<8x128xf32>
    %cst_141 = arith.constant 1.000000e+00 : f32
    %521 = vector.broadcast %cst_141 : f32 to vector<8x128xf32>
    %522 = arith.addf %521, %520 : vector<8x128xf32>
    %523 = arith.divf %521, %522 : vector<8x128xf32>
    %524 = arith.mulf %515, %458 : vector<8x128xf32>
    %525 = arith.mulf %509, %517 : vector<8x128xf32>
    %526 = arith.addf %524, %525 : vector<8x128xf32>
    %527 = math.tanh %526 : vector<8x128xf32>
    %528 = arith.mulf %523, %527 : vector<8x128xf32>
    %529 = arith.truncf %528 : vector<8x128xf32> to vector<8x128xbf16>
    %c0_142 = arith.constant 0 : index
    %c0_143 = arith.constant 0 : index
    %530 = vector.load %arg4[%c0_142, %c0_143] : memref<128x512xbf16, #tpu.memory_space<vmem>>, vector<128x512xbf16>
    %cst_144 = arith.constant dense<0.000000e+00> : vector<8x512xf32>
    %531 = tpu.matmul %529, %530, %cst_144 {dimension_numbers = #tpu.dot_dimension_numbers<[1], [0], [0], [1], [0, 0, 1, 1], [], []>} : vector<8x128xbf16>, vector<128x512xbf16>, vector<8x512xf32> -> vector<8x512xf32>
    %532 = arith.truncf %494 : vector<8x128xf32> to vector<8x128xbf16>
    %c0_145 = arith.constant 0 : index
    %c0_146 = arith.constant 0 : index
    %533 = vector.load %arg5[%c0_145, %c0_146] : memref<128x512xbf16, #tpu.memory_space<vmem>>, vector<128x512xbf16>
    %cst_147 = arith.constant dense<0.000000e+00> : vector<8x512xf32>
    %534 = tpu.matmul %532, %533, %cst_147 {dimension_numbers = #tpu.dot_dimension_numbers<[1], [0], [0], [1], [0, 0, 1, 1], [], []>} : vector<8x128xbf16>, vector<128x512xbf16>, vector<8x512xf32> -> vector<8x512xf32>
    %535 = arith.addf %531, %534 : vector<8x512xf32>
    %536 = vector.broadcast %16 : vector<1x512xf32> to vector<8x512xf32>
    %537 = arith.addf %535, %536 : vector<8x512xf32>
    %538 = vector.extract_strided_slice %537 {offsets = [0, 0], sizes = [8, 128], strides = [1, 1]} : vector<8x512xf32> to vector<8x128xf32>
    %539 = arith.negf %538 : vector<8x128xf32>
    %540 = math.exp %539 : vector<8x128xf32>
    %cst_148 = arith.constant 1.000000e+00 : f32
    %541 = vector.broadcast %cst_148 : f32 to vector<8x128xf32>
    %542 = arith.addf %541, %540 : vector<8x128xf32>
    %543 = arith.divf %541, %542 : vector<8x128xf32>
    %544 = vector.extract_strided_slice %537 {offsets = [0, 128], sizes = [8, 128], strides = [1, 1]} : vector<8x512xf32> to vector<8x128xf32>
    %545 = arith.negf %544 : vector<8x128xf32>
    %546 = math.exp %545 : vector<8x128xf32>
    %cst_149 = arith.constant 1.000000e+00 : f32
    %547 = vector.broadcast %cst_149 : f32 to vector<8x128xf32>
    %548 = arith.addf %547, %546 : vector<8x128xf32>
    %549 = arith.divf %547, %548 : vector<8x128xf32>
    %550 = vector.extract_strided_slice %537 {offsets = [0, 256], sizes = [8, 128], strides = [1, 1]} : vector<8x512xf32> to vector<8x128xf32>
    %551 = math.tanh %550 : vector<8x128xf32>
    %552 = vector.extract_strided_slice %537 {offsets = [0, 384], sizes = [8, 128], strides = [1, 1]} : vector<8x512xf32> to vector<8x128xf32>
    %553 = arith.negf %552 : vector<8x128xf32>
    %554 = math.exp %553 : vector<8x128xf32>
    %cst_150 = arith.constant 1.000000e+00 : f32
    %555 = vector.broadcast %cst_150 : f32 to vector<8x128xf32>
    %556 = arith.addf %555, %554 : vector<8x128xf32>
    %557 = arith.divf %555, %556 : vector<8x128xf32>
    %558 = arith.mulf %549, %492 : vector<8x128xf32>
    %559 = arith.mulf %543, %551 : vector<8x128xf32>
    %560 = arith.addf %558, %559 : vector<8x128xf32>
    %561 = math.tanh %560 : vector<8x128xf32>
    %562 = arith.mulf %557, %561 : vector<8x128xf32>
    %c8_i32_151 = arith.constant 8 : i32
    %c0_i32_152 = arith.constant 0 : i32
    %563 = tpu.memref_slice %arg20[%c0_i32_152] : memref<4x!tpu.dma_semaphore, #tpu.memory_space<semaphore_mem>> -> memref<1x!tpu.dma_semaphore, #tpu.memory_space<semaphore_mem>>
    %564 = tpu.memref_squeeze %563 : memref<1x!tpu.dma_semaphore, #tpu.memory_space<semaphore_mem>> -> memref<!tpu.dma_semaphore, #tpu.memory_space<semaphore_mem>>
    tpu.wait_dma2 semaphore(%564 : memref<!tpu.dma_semaphore, #tpu.memory_space<semaphore_mem>>) src(%arg7 : memref<128x512xbf16, #tpu.memory_space<any>>) dst(%arg16 : memref<128x512xbf16, #tpu.memory_space<vmem>>)
    %c1_i32_153 = arith.constant 1 : i32
    %565 = tpu.memref_slice %arg20[%c1_i32_153] : memref<4x!tpu.dma_semaphore, #tpu.memory_space<semaphore_mem>> -> memref<1x!tpu.dma_semaphore, #tpu.memory_space<semaphore_mem>>
    %566 = tpu.memref_squeeze %565 : memref<1x!tpu.dma_semaphore, #tpu.memory_space<semaphore_mem>> -> memref<!tpu.dma_semaphore, #tpu.memory_space<semaphore_mem>>
    tpu.wait_dma2 semaphore(%566 : memref<!tpu.dma_semaphore, #tpu.memory_space<semaphore_mem>>) src(%arg8 : memref<128x512xbf16, #tpu.memory_space<any>>) dst(%arg17 : memref<128x512xbf16, #tpu.memory_space<vmem>>)
    %c2_i32_154 = arith.constant 2 : i32
    %567 = tpu.memref_slice %arg20[%c2_i32_154] : memref<4x!tpu.dma_semaphore, #tpu.memory_space<semaphore_mem>> -> memref<1x!tpu.dma_semaphore, #tpu.memory_space<semaphore_mem>>
    %568 = tpu.memref_squeeze %567 : memref<1x!tpu.dma_semaphore, #tpu.memory_space<semaphore_mem>> -> memref<!tpu.dma_semaphore, #tpu.memory_space<semaphore_mem>>
    tpu.wait_dma2 semaphore(%568 : memref<!tpu.dma_semaphore, #tpu.memory_space<semaphore_mem>>) src(%arg9 : memref<128x512xbf16, #tpu.memory_space<any>>) dst(%arg18 : memref<128x512xbf16, #tpu.memory_space<vmem>>)
    %c3_i32_155 = arith.constant 3 : i32
    %569 = tpu.memref_slice %arg20[%c3_i32_155] : memref<4x!tpu.dma_semaphore, #tpu.memory_space<semaphore_mem>> -> memref<1x!tpu.dma_semaphore, #tpu.memory_space<semaphore_mem>>
    %570 = tpu.memref_squeeze %569 : memref<1x!tpu.dma_semaphore, #tpu.memory_space<semaphore_mem>> -> memref<!tpu.dma_semaphore, #tpu.memory_space<semaphore_mem>>
    tpu.wait_dma2 semaphore(%570 : memref<!tpu.dma_semaphore, #tpu.memory_space<semaphore_mem>>) src(%arg11 : memref<128x128xbf16, #tpu.memory_space<any>>) dst(%arg19 : memref<128x128xbf16, #tpu.memory_space<vmem>>)
    %c0_i32_156 = arith.constant 0 : i32
    %c0_i32_157 = arith.constant 0 : i32
    %571 = arith.cmpi eq, %c0_i32_156, %c0_i32_157 : i32
    %c1_i32_158 = arith.constant 1 : i32
    %572 = arith.subi %c0_i32_156, %c1_i32_158 : i32
    %c7_i32_159 = arith.constant 7 : i32
    %573 = arith.select %571, %c7_i32_159, %572 : i32
    %c8_i32_160 = arith.constant 8 : i32
    %574 = arith.muli %573, %c8_i32_160 : i32
    %575 = tpu.assume_multiple %574, 8 : i32
    %576 = arith.index_cast %575 : i32 to index
    %c512 = arith.constant 512 : index
    %577 = vector.load %arg14[%576, %c512] : memref<64x1024xbf16, #tpu.memory_space<vmem>>, vector<8x512xbf16>
    %578 = arith.extf %577 : vector<8x512xbf16> to vector<8x512xf32>
    %579 = arith.truncf %528 : vector<8x128xf32> to vector<8x128xbf16>
    %c0_161 = arith.constant 0 : index
    %c0_162 = arith.constant 0 : index
    %580 = vector.load %arg16[%c0_161, %c0_162] : memref<128x512xbf16, #tpu.memory_space<vmem>>, vector<128x512xbf16>
    %cst_163 = arith.constant dense<0.000000e+00> : vector<8x512xf32>
    %581 = tpu.matmul %579, %580, %cst_163 {dimension_numbers = #tpu.dot_dimension_numbers<[1], [0], [0], [1], [0, 0, 1, 1], [], []>} : vector<8x128xbf16>, vector<128x512xbf16>, vector<8x512xf32> -> vector<8x512xf32>
    %582 = arith.addf %578, %581 : vector<8x512xf32>
    %583 = vector.extract_strided_slice %582 {offsets = [0, 0], sizes = [8, 128], strides = [1, 1]} : vector<8x512xf32> to vector<8x128xf32>
    %584 = arith.negf %583 : vector<8x128xf32>
    %585 = math.exp %584 : vector<8x128xf32>
    %cst_164 = arith.constant 1.000000e+00 : f32
    %586 = vector.broadcast %cst_164 : f32 to vector<8x128xf32>
    %587 = arith.addf %586, %585 : vector<8x128xf32>
    %588 = arith.divf %586, %587 : vector<8x128xf32>
    %589 = vector.extract_strided_slice %582 {offsets = [0, 128], sizes = [8, 128], strides = [1, 1]} : vector<8x512xf32> to vector<8x128xf32>
    %590 = arith.negf %589 : vector<8x128xf32>
    %591 = math.exp %590 : vector<8x128xf32>
    %cst_165 = arith.constant 1.000000e+00 : f32
    %592 = vector.broadcast %cst_165 : f32 to vector<8x128xf32>
    %593 = arith.addf %592, %591 : vector<8x128xf32>
    %594 = arith.divf %592, %593 : vector<8x128xf32>
    %595 = vector.extract_strided_slice %582 {offsets = [0, 256], sizes = [8, 128], strides = [1, 1]} : vector<8x512xf32> to vector<8x128xf32>
    %596 = math.tanh %595 : vector<8x128xf32>
    %597 = vector.extract_strided_slice %582 {offsets = [0, 384], sizes = [8, 128], strides = [1, 1]} : vector<8x512xf32> to vector<8x128xf32>
    %598 = arith.negf %597 : vector<8x128xf32>
    %599 = math.exp %598 : vector<8x128xf32>
    %cst_166 = arith.constant 1.000000e+00 : f32
    %600 = vector.broadcast %cst_166 : f32 to vector<8x128xf32>
    %601 = arith.addf %600, %599 : vector<8x128xf32>
    %602 = arith.divf %600, %601 : vector<8x128xf32>
    %603 = arith.mulf %594, %526 : vector<8x128xf32>
    %604 = arith.mulf %588, %596 : vector<8x128xf32>
    %605 = arith.addf %603, %604 : vector<8x128xf32>
    %606 = math.tanh %605 : vector<8x128xf32>
    %607 = arith.mulf %602, %606 : vector<8x128xf32>
    %608 = arith.truncf %607 : vector<8x128xf32> to vector<8x128xbf16>
    %c0_167 = arith.constant 0 : index
    %c0_168 = arith.constant 0 : index
    %609 = vector.load %arg17[%c0_167, %c0_168] : memref<128x512xbf16, #tpu.memory_space<vmem>>, vector<128x512xbf16>
    %cst_169 = arith.constant dense<0.000000e+00> : vector<8x512xf32>
    %610 = tpu.matmul %608, %609, %cst_169 {dimension_numbers = #tpu.dot_dimension_numbers<[1], [0], [0], [1], [0, 0, 1, 1], [], []>} : vector<8x128xbf16>, vector<128x512xbf16>, vector<8x512xf32> -> vector<8x512xf32>
    %611 = arith.truncf %562 : vector<8x128xf32> to vector<8x128xbf16>
    %c0_170 = arith.constant 0 : index
    %c0_171 = arith.constant 0 : index
    %612 = vector.load %arg18[%c0_170, %c0_171] : memref<128x512xbf16, #tpu.memory_space<vmem>>, vector<128x512xbf16>
    %cst_172 = arith.constant dense<0.000000e+00> : vector<8x512xf32>
    %613 = tpu.matmul %611, %612, %cst_172 {dimension_numbers = #tpu.dot_dimension_numbers<[1], [0], [0], [1], [0, 0, 1, 1], [], []>} : vector<8x128xbf16>, vector<128x512xbf16>, vector<8x512xf32> -> vector<8x512xf32>
    %614 = arith.addf %610, %613 : vector<8x512xf32>
    %615 = vector.broadcast %17 : vector<1x512xf32> to vector<8x512xf32>
    %616 = arith.addf %614, %615 : vector<8x512xf32>
    %617 = vector.extract_strided_slice %616 {offsets = [0, 0], sizes = [8, 128], strides = [1, 1]} : vector<8x512xf32> to vector<8x128xf32>
    %618 = arith.negf %617 : vector<8x128xf32>
    %619 = math.exp %618 : vector<8x128xf32>
    %cst_173 = arith.constant 1.000000e+00 : f32
    %620 = vector.broadcast %cst_173 : f32 to vector<8x128xf32>
    %621 = arith.addf %620, %619 : vector<8x128xf32>
    %622 = arith.divf %620, %621 : vector<8x128xf32>
    %623 = vector.extract_strided_slice %616 {offsets = [0, 128], sizes = [8, 128], strides = [1, 1]} : vector<8x512xf32> to vector<8x128xf32>
    %624 = arith.negf %623 : vector<8x128xf32>
    %625 = math.exp %624 : vector<8x128xf32>
    %cst_174 = arith.constant 1.000000e+00 : f32
    %626 = vector.broadcast %cst_174 : f32 to vector<8x128xf32>
    %627 = arith.addf %626, %625 : vector<8x128xf32>
    %628 = arith.divf %626, %627 : vector<8x128xf32>
    %629 = vector.extract_strided_slice %616 {offsets = [0, 256], sizes = [8, 128], strides = [1, 1]} : vector<8x512xf32> to vector<8x128xf32>
    %630 = math.tanh %629 : vector<8x128xf32>
    %631 = vector.extract_strided_slice %616 {offsets = [0, 384], sizes = [8, 128], strides = [1, 1]} : vector<8x512xf32> to vector<8x128xf32>
    %632 = arith.negf %631 : vector<8x128xf32>
    %633 = math.exp %632 : vector<8x128xf32>
    %cst_175 = arith.constant 1.000000e+00 : f32
    %634 = vector.broadcast %cst_175 : f32 to vector<8x128xf32>
    %635 = arith.addf %634, %633 : vector<8x128xf32>
    %636 = arith.divf %634, %635 : vector<8x128xf32>
    %637 = arith.mulf %628, %560 : vector<8x128xf32>
    %638 = arith.mulf %622, %630 : vector<8x128xf32>
    %639 = arith.addf %637, %638 : vector<8x128xf32>
    %640 = math.tanh %639 : vector<8x128xf32>
    %641 = arith.mulf %636, %640 : vector<8x128xf32>
    %c8_i32_176 = arith.constant 8 : i32
    %642 = arith.muli %c0_i32_156, %c8_i32_176 : i32
    %643 = tpu.assume_multiple %642, 8 : i32
    %644 = arith.truncf %641 : vector<8x128xf32> to vector<8x128xbf16>
    %645 = arith.index_cast %643 : i32 to index
    %c0_177 = arith.constant 0 : index
    %646 = vector.load %arg15[%645, %c0_177] : memref<64x128xbf16, #tpu.memory_space<vmem>>, vector<8x128xbf16>
    tpu.vector_store %arg15[%645, %c0_177], %644 {strides = array<i32>} : memref<64x128xbf16, #tpu.memory_space<vmem>>, vector<8x128xbf16>,
    %c1_i32_178 = arith.constant 1 : i32
    %c0_i32_179 = arith.constant 0 : i32
    %647 = arith.cmpi eq, %c1_i32_178, %c0_i32_179 : i32
    %c1_i32_180 = arith.constant 1 : i32
    %648 = arith.subi %c1_i32_178, %c1_i32_180 : i32
    %c7_i32_181 = arith.constant 7 : i32
    %649 = arith.select %647, %c7_i32_181, %648 : i32
    %c8_i32_182 = arith.constant 8 : i32
    %650 = arith.muli %649, %c8_i32_182 : i32
    %651 = tpu.assume_multiple %650, 8 : i32
    %652 = arith.index_cast %651 : i32 to index
    %c512_183 = arith.constant 512 : index
    %653 = vector.load %arg14[%652, %c512_183] : memref<64x1024xbf16, #tpu.memory_space<vmem>>, vector<8x512xbf16>
    %654 = arith.extf %653 : vector<8x512xbf16> to vector<8x512xf32>
    %655 = arith.truncf %607 : vector<8x128xf32> to vector<8x128xbf16>
    %c0_184 = arith.constant 0 : index
    %c0_185 = arith.constant 0 : index
    %656 = vector.load %arg16[%c0_184, %c0_185] : memref<128x512xbf16, #tpu.memory_space<vmem>>, vector<128x512xbf16>
    %cst_186 = arith.constant dense<0.000000e+00> : vector<8x512xf32>
    %657 = tpu.matmul %655, %656, %cst_186 {dimension_numbers = #tpu.dot_dimension_numbers<[1], [0], [0], [1], [0, 0, 1, 1], [], []>} : vector<8x128xbf16>, vector<128x512xbf16>, vector<8x512xf32> -> vector<8x512xf32>
    %658 = arith.addf %654, %657 : vector<8x512xf32>
    %659 = vector.extract_strided_slice %658 {offsets = [0, 0], sizes = [8, 128], strides = [1, 1]} : vector<8x512xf32> to vector<8x128xf32>
    %660 = arith.negf %659 : vector<8x128xf32>
    %661 = math.exp %660 : vector<8x128xf32>
    %cst_187 = arith.constant 1.000000e+00 : f32
    %662 = vector.broadcast %cst_187 : f32 to vector<8x128xf32>
    %663 = arith.addf %662, %661 : vector<8x128xf32>
    %664 = arith.divf %662, %663 : vector<8x128xf32>
    %665 = vector.extract_strided_slice %658 {offsets = [0, 128], sizes = [8, 128], strides = [1, 1]} : vector<8x512xf32> to vector<8x128xf32>
    %666 = arith.negf %665 : vector<8x128xf32>
    %667 = math.exp %666 : vector<8x128xf32>
    %cst_188 = arith.constant 1.000000e+00 : f32
    %668 = vector.broadcast %cst_188 : f32 to vector<8x128xf32>
    %669 = arith.addf %668, %667 : vector<8x128xf32>
    %670 = arith.divf %668, %669 : vector<8x128xf32>
    %671 = vector.extract_strided_slice %658 {offsets = [0, 256], sizes = [8, 128], strides = [1, 1]} : vector<8x512xf32> to vector<8x128xf32>
    %672 = math.tanh %671 : vector<8x128xf32>
    %673 = vector.extract_strided_slice %658 {offsets = [0, 384], sizes = [8, 128], strides = [1, 1]} : vector<8x512xf32> to vector<8x128xf32>
    %674 = arith.negf %673 : vector<8x128xf32>
    %675 = math.exp %674 : vector<8x128xf32>
    %cst_189 = arith.constant 1.000000e+00 : f32
    %676 = vector.broadcast %cst_189 : f32 to vector<8x128xf32>
    %677 = arith.addf %676, %675 : vector<8x128xf32>
    %678 = arith.divf %676, %677 : vector<8x128xf32>
    %679 = arith.mulf %670, %605 : vector<8x128xf32>
    %680 = arith.mulf %664, %672 : vector<8x128xf32>
    %681 = arith.addf %679, %680 : vector<8x128xf32>
    %682 = math.tanh %681 : vector<8x128xf32>
    %683 = arith.mulf %678, %682 : vector<8x128xf32>
    %684 = arith.truncf %683 : vector<8x128xf32> to vector<8x128xbf16>
    %c0_190 = arith.constant 0 : index
    %c0_191 = arith.constant 0 : index
    %685 = vector.load %arg17[%c0_190, %c0_191] : memref<128x512xbf16, #tpu.memory_space<vmem>>, vector<128x512xbf16>
    %cst_192 = arith.constant dense<0.000000e+00> : vector<8x512xf32>
    %686 = tpu.matmul %684, %685, %cst_192 {dimension_numbers = #tpu.dot_dimension_numbers<[1], [0], [0], [1], [0, 0, 1, 1], [], []>} : vector<8x128xbf16>, vector<128x512xbf16>, vector<8x512xf32> -> vector<8x512xf32>
    %687 = arith.truncf %641 : vector<8x128xf32> to vector<8x128xbf16>
    %c0_193 = arith.constant 0 : index
    %c0_194 = arith.constant 0 : index
    %688 = vector.load %arg18[%c0_193, %c0_194] : memref<128x512xbf16, #tpu.memory_space<vmem>>, vector<128x512xbf16>
    %cst_195 = arith.constant dense<0.000000e+00> : vector<8x512xf32>
    %689 = tpu.matmul %687, %688, %cst_195 {dimension_numbers = #tpu.dot_dimension_numbers<[1], [0], [0], [1], [0, 0, 1, 1], [], []>} : vector<8x128xbf16>, vector<128x512xbf16>, vector<8x512xf32> -> vector<8x512xf32>
    %690 = arith.addf %686, %689 : vector<8x512xf32>
    %691 = vector.broadcast %17 : vector<1x512xf32> to vector<8x512xf32>
    %692 = arith.addf %690, %691 : vector<8x512xf32>
    %693 = vector.extract_strided_slice %692 {offsets = [0, 0], sizes = [8, 128], strides = [1, 1]} : vector<8x512xf32> to vector<8x128xf32>
    %694 = arith.negf %693 : vector<8x128xf32>
    %695 = math.exp %694 : vector<8x128xf32>
    %cst_196 = arith.constant 1.000000e+00 : f32
    %696 = vector.broadcast %cst_196 : f32 to vector<8x128xf32>
    %697 = arith.addf %696, %695 : vector<8x128xf32>
    %698 = arith.divf %696, %697 : vector<8x128xf32>
    %699 = vector.extract_strided_slice %692 {offsets = [0, 128], sizes = [8, 128], strides = [1, 1]} : vector<8x512xf32> to vector<8x128xf32>
    %700 = arith.negf %699 : vector<8x128xf32>
    %701 = math.exp %700 : vector<8x128xf32>
    %cst_197 = arith.constant 1.000000e+00 : f32
    %702 = vector.broadcast %cst_197 : f32 to vector<8x128xf32>
    %703 = arith.addf %702, %701 : vector<8x128xf32>
    %704 = arith.divf %702, %703 : vector<8x128xf32>
    %705 = vector.extract_strided_slice %692 {offsets = [0, 256], sizes = [8, 128], strides = [1, 1]} : vector<8x512xf32> to vector<8x128xf32>
    %706 = math.tanh %705 : vector<8x128xf32>
    %707 = vector.extract_strided_slice %692 {offsets = [0, 384], sizes = [8, 128], strides = [1, 1]} : vector<8x512xf32> to vector<8x128xf32>
    %708 = arith.negf %707 : vector<8x128xf32>
    %709 = math.exp %708 : vector<8x128xf32>
    %cst_198 = arith.constant 1.000000e+00 : f32
    %710 = vector.broadcast %cst_198 : f32 to vector<8x128xf32>
    %711 = arith.addf %710, %709 : vector<8x128xf32>
    %712 = arith.divf %710, %711 : vector<8x128xf32>
    %713 = arith.mulf %704, %639 : vector<8x128xf32>
    %714 = arith.mulf %698, %706 : vector<8x128xf32>
    %715 = arith.addf %713, %714 : vector<8x128xf32>
    %716 = math.tanh %715 : vector<8x128xf32>
    %717 = arith.mulf %712, %716 : vector<8x128xf32>
    %c8_i32_199 = arith.constant 8 : i32
    %718 = arith.muli %c1_i32_178, %c8_i32_199 : i32
    %719 = tpu.assume_multiple %718, 8 : i32
    %720 = arith.truncf %717 : vector<8x128xf32> to vector<8x128xbf16>
    %721 = arith.index_cast %719 : i32 to index
    %c0_200 = arith.constant 0 : index
    %722 = vector.load %arg15[%721, %c0_200] : memref<64x128xbf16, #tpu.memory_space<vmem>>, vector<8x128xbf16>
    tpu.vector_store %arg15[%721, %c0_200], %720 {strides = array<i32>} : memref<64x128xbf16, #tpu.memory_space<vmem>>, vector<8x128xbf16>,
    %c2_i32_201 = arith.constant 2 : i32
    %c0_i32_202 = arith.constant 0 : i32
    %723 = arith.cmpi eq, %c2_i32_201, %c0_i32_202 : i32
    %c1_i32_203 = arith.constant 1 : i32
    %724 = arith.subi %c2_i32_201, %c1_i32_203 : i32
    %c7_i32_204 = arith.constant 7 : i32
    %725 = arith.select %723, %c7_i32_204, %724 : i32
    %c8_i32_205 = arith.constant 8 : i32
    %726 = arith.muli %725, %c8_i32_205 : i32
    %727 = tpu.assume_multiple %726, 8 : i32
    %728 = arith.index_cast %727 : i32 to index
    %c512_206 = arith.constant 512 : index
    %729 = vector.load %arg14[%728, %c512_206] : memref<64x1024xbf16, #tpu.memory_space<vmem>>, vector<8x512xbf16>
    %730 = arith.extf %729 : vector<8x512xbf16> to vector<8x512xf32>
    %731 = arith.truncf %683 : vector<8x128xf32> to vector<8x128xbf16>
    %c0_207 = arith.constant 0 : index
    %c0_208 = arith.constant 0 : index
    %732 = vector.load %arg16[%c0_207, %c0_208] : memref<128x512xbf16, #tpu.memory_space<vmem>>, vector<128x512xbf16>
    %cst_209 = arith.constant dense<0.000000e+00> : vector<8x512xf32>
    %733 = tpu.matmul %731, %732, %cst_209 {dimension_numbers = #tpu.dot_dimension_numbers<[1], [0], [0], [1], [0, 0, 1, 1], [], []>} : vector<8x128xbf16>, vector<128x512xbf16>, vector<8x512xf32> -> vector<8x512xf32>
    %734 = arith.addf %730, %733 : vector<8x512xf32>
    %735 = vector.extract_strided_slice %734 {offsets = [0, 0], sizes = [8, 128], strides = [1, 1]} : vector<8x512xf32> to vector<8x128xf32>
    %736 = arith.negf %735 : vector<8x128xf32>
    %737 = math.exp %736 : vector<8x128xf32>
    %cst_210 = arith.constant 1.000000e+00 : f32
    %738 = vector.broadcast %cst_210 : f32 to vector<8x128xf32>
    %739 = arith.addf %738, %737 : vector<8x128xf32>
    %740 = arith.divf %738, %739 : vector<8x128xf32>
    %741 = vector.extract_strided_slice %734 {offsets = [0, 128], sizes = [8, 128], strides = [1, 1]} : vector<8x512xf32> to vector<8x128xf32>
    %742 = arith.negf %741 : vector<8x128xf32>
    %743 = math.exp %742 : vector<8x128xf32>
    %cst_211 = arith.constant 1.000000e+00 : f32
    %744 = vector.broadcast %cst_211 : f32 to vector<8x128xf32>
    %745 = arith.addf %744, %743 : vector<8x128xf32>
    %746 = arith.divf %744, %745 : vector<8x128xf32>
    %747 = vector.extract_strided_slice %734 {offsets = [0, 256], sizes = [8, 128], strides = [1, 1]} : vector<8x512xf32> to vector<8x128xf32>
    %748 = math.tanh %747 : vector<8x128xf32>
    %749 = vector.extract_strided_slice %734 {offsets = [0, 384], sizes = [8, 128], strides = [1, 1]} : vector<8x512xf32> to vector<8x128xf32>
    %750 = arith.negf %749 : vector<8x128xf32>
    %751 = math.exp %750 : vector<8x128xf32>
    %cst_212 = arith.constant 1.000000e+00 : f32
    %752 = vector.broadcast %cst_212 : f32 to vector<8x128xf32>
    %753 = arith.addf %752, %751 : vector<8x128xf32>
    %754 = arith.divf %752, %753 : vector<8x128xf32>
    %755 = arith.mulf %746, %681 : vector<8x128xf32>
    %756 = arith.mulf %740, %748 : vector<8x128xf32>
    %757 = arith.addf %755, %756 : vector<8x128xf32>
    %758 = math.tanh %757 : vector<8x128xf32>
    %759 = arith.mulf %754, %758 : vector<8x128xf32>
    %760 = arith.truncf %759 : vector<8x128xf32> to vector<8x128xbf16>
    %c0_213 = arith.constant 0 : index
    %c0_214 = arith.constant 0 : index
    %761 = vector.load %arg17[%c0_213, %c0_214] : memref<128x512xbf16, #tpu.memory_space<vmem>>, vector<128x512xbf16>
    %cst_215 = arith.constant dense<0.000000e+00> : vector<8x512xf32>
    %762 = tpu.matmul %760, %761, %cst_215 {dimension_numbers = #tpu.dot_dimension_numbers<[1], [0], [0], [1], [0, 0, 1, 1], [], []>} : vector<8x128xbf16>, vector<128x512xbf16>, vector<8x512xf32> -> vector<8x512xf32>
    %763 = arith.truncf %717 : vector<8x128xf32> to vector<8x128xbf16>
    %c0_216 = arith.constant 0 : index
    %c0_217 = arith.constant 0 : index
    %764 = vector.load %arg18[%c0_216, %c0_217] : memref<128x512xbf16, #tpu.memory_space<vmem>>, vector<128x512xbf16>
    %cst_218 = arith.constant dense<0.000000e+00> : vector<8x512xf32>
    %765 = tpu.matmul %763, %764, %cst_218 {dimension_numbers = #tpu.dot_dimension_numbers<[1], [0], [0], [1], [0, 0, 1, 1], [], []>} : vector<8x128xbf16>, vector<128x512xbf16>, vector<8x512xf32> -> vector<8x512xf32>
    %766 = arith.addf %762, %765 : vector<8x512xf32>
    %767 = vector.broadcast %17 : vector<1x512xf32> to vector<8x512xf32>
    %768 = arith.addf %766, %767 : vector<8x512xf32>
    %769 = vector.extract_strided_slice %768 {offsets = [0, 0], sizes = [8, 128], strides = [1, 1]} : vector<8x512xf32> to vector<8x128xf32>
    %770 = arith.negf %769 : vector<8x128xf32>
    %771 = math.exp %770 : vector<8x128xf32>
    %cst_219 = arith.constant 1.000000e+00 : f32
    %772 = vector.broadcast %cst_219 : f32 to vector<8x128xf32>
    %773 = arith.addf %772, %771 : vector<8x128xf32>
    %774 = arith.divf %772, %773 : vector<8x128xf32>
    %775 = vector.extract_strided_slice %768 {offsets = [0, 128], sizes = [8, 128], strides = [1, 1]} : vector<8x512xf32> to vector<8x128xf32>
    %776 = arith.negf %775 : vector<8x128xf32>
    %777 = math.exp %776 : vector<8x128xf32>
    %cst_220 = arith.constant 1.000000e+00 : f32
    %778 = vector.broadcast %cst_220 : f32 to vector<8x128xf32>
    %779 = arith.addf %778, %777 : vector<8x128xf32>
    %780 = arith.divf %778, %779 : vector<8x128xf32>
    %781 = vector.extract_strided_slice %768 {offsets = [0, 256], sizes = [8, 128], strides = [1, 1]} : vector<8x512xf32> to vector<8x128xf32>
    %782 = math.tanh %781 : vector<8x128xf32>
    %783 = vector.extract_strided_slice %768 {offsets = [0, 384], sizes = [8, 128], strides = [1, 1]} : vector<8x512xf32> to vector<8x128xf32>
    %784 = arith.negf %783 : vector<8x128xf32>
    %785 = math.exp %784 : vector<8x128xf32>
    %cst_221 = arith.constant 1.000000e+00 : f32
    %786 = vector.broadcast %cst_221 : f32 to vector<8x128xf32>
    %787 = arith.addf %786, %785 : vector<8x128xf32>
    %788 = arith.divf %786, %787 : vector<8x128xf32>
    %789 = arith.mulf %780, %715 : vector<8x128xf32>
    %790 = arith.mulf %774, %782 : vector<8x128xf32>
    %791 = arith.addf %789, %790 : vector<8x128xf32>
    %792 = math.tanh %791 : vector<8x128xf32>
    %793 = arith.mulf %788, %792 : vector<8x128xf32>
    %c8_i32_222 = arith.constant 8 : i32
    %794 = arith.muli %c2_i32_201, %c8_i32_222 : i32
    %795 = tpu.assume_multiple %794, 8 : i32
    %796 = arith.truncf %793 : vector<8x128xf32> to vector<8x128xbf16>
    %797 = arith.index_cast %795 : i32 to index
    %c0_223 = arith.constant 0 : index
    %798 = vector.load %arg15[%797, %c0_223] : memref<64x128xbf16, #tpu.memory_space<vmem>>, vector<8x128xbf16>
    tpu.vector_store %arg15[%797, %c0_223], %796 {strides = array<i32>} : memref<64x128xbf16, #tpu.memory_space<vmem>>, vector<8x128xbf16>,
    %c3_i32_224 = arith.constant 3 : i32
    %c0_i32_225 = arith.constant 0 : i32
    %799 = arith.cmpi eq, %c3_i32_224, %c0_i32_225 : i32
    %c1_i32_226 = arith.constant 1 : i32
    %800 = arith.subi %c3_i32_224, %c1_i32_226 : i32
    %c7_i32_227 = arith.constant 7 : i32
    %801 = arith.select %799, %c7_i32_227, %800 : i32
    %c8_i32_228 = arith.constant 8 : i32
    %802 = arith.muli %801, %c8_i32_228 : i32
    %803 = tpu.assume_multiple %802, 8 : i32
    %804 = arith.index_cast %803 : i32 to index
    %c512_229 = arith.constant 512 : index
    %805 = vector.load %arg14[%804, %c512_229] : memref<64x1024xbf16, #tpu.memory_space<vmem>>, vector<8x512xbf16>
    %806 = arith.extf %805 : vector<8x512xbf16> to vector<8x512xf32>
    %807 = arith.truncf %759 : vector<8x128xf32> to vector<8x128xbf16>
    %c0_230 = arith.constant 0 : index
    %c0_231 = arith.constant 0 : index
    %808 = vector.load %arg16[%c0_230, %c0_231] : memref<128x512xbf16, #tpu.memory_space<vmem>>, vector<128x512xbf16>
    %cst_232 = arith.constant dense<0.000000e+00> : vector<8x512xf32>
    %809 = tpu.matmul %807, %808, %cst_232 {dimension_numbers = #tpu.dot_dimension_numbers<[1], [0], [0], [1], [0, 0, 1, 1], [], []>} : vector<8x128xbf16>, vector<128x512xbf16>, vector<8x512xf32> -> vector<8x512xf32>
    %810 = arith.addf %806, %809 : vector<8x512xf32>
    %811 = vector.extract_strided_slice %810 {offsets = [0, 0], sizes = [8, 128], strides = [1, 1]} : vector<8x512xf32> to vector<8x128xf32>
    %812 = arith.negf %811 : vector<8x128xf32>
    %813 = math.exp %812 : vector<8x128xf32>
    %cst_233 = arith.constant 1.000000e+00 : f32
    %814 = vector.broadcast %cst_233 : f32 to vector<8x128xf32>
    %815 = arith.addf %814, %813 : vector<8x128xf32>
    %816 = arith.divf %814, %815 : vector<8x128xf32>
    %817 = vector.extract_strided_slice %810 {offsets = [0, 128], sizes = [8, 128], strides = [1, 1]} : vector<8x512xf32> to vector<8x128xf32>
    %818 = arith.negf %817 : vector<8x128xf32>
    %819 = math.exp %818 : vector<8x128xf32>
    %cst_234 = arith.constant 1.000000e+00 : f32
    %820 = vector.broadcast %cst_234 : f32 to vector<8x128xf32>
    %821 = arith.addf %820, %819 : vector<8x128xf32>
    %822 = arith.divf %820, %821 : vector<8x128xf32>
    %823 = vector.extract_strided_slice %810 {offsets = [0, 256], sizes = [8, 128], strides = [1, 1]} : vector<8x512xf32> to vector<8x128xf32>
    %824 = math.tanh %823 : vector<8x128xf32>
    %825 = vector.extract_strided_slice %810 {offsets = [0, 384], sizes = [8, 128], strides = [1, 1]} : vector<8x512xf32> to vector<8x128xf32>
    %826 = arith.negf %825 : vector<8x128xf32>
    %827 = math.exp %826 : vector<8x128xf32>
    %cst_235 = arith.constant 1.000000e+00 : f32
    %828 = vector.broadcast %cst_235 : f32 to vector<8x128xf32>
    %829 = arith.addf %828, %827 : vector<8x128xf32>
    %830 = arith.divf %828, %829 : vector<8x128xf32>
    %831 = arith.mulf %822, %757 : vector<8x128xf32>
    %832 = arith.mulf %816, %824 : vector<8x128xf32>
    %833 = arith.addf %831, %832 : vector<8x128xf32>
    %834 = math.tanh %833 : vector<8x128xf32>
    %835 = arith.mulf %830, %834 : vector<8x128xf32>
    %836 = arith.truncf %835 : vector<8x128xf32> to vector<8x128xbf16>
    %c0_236 = arith.constant 0 : index
    %c0_237 = arith.constant 0 : index
    %837 = vector.load %arg17[%c0_236, %c0_237] : memref<128x512xbf16, #tpu.memory_space<vmem>>, vector<128x512xbf16>
    %cst_238 = arith.constant dense<0.000000e+00> : vector<8x512xf32>
    %838 = tpu.matmul %836, %837, %cst_238 {dimension_numbers = #tpu.dot_dimension_numbers<[1], [0], [0], [1], [0, 0, 1, 1], [], []>} : vector<8x128xbf16>, vector<128x512xbf16>, vector<8x512xf32> -> vector<8x512xf32>
    %839 = arith.truncf %793 : vector<8x128xf32> to vector<8x128xbf16>
    %c0_239 = arith.constant 0 : index
    %c0_240 = arith.constant 0 : index
    %840 = vector.load %arg18[%c0_239, %c0_240] : memref<128x512xbf16, #tpu.memory_space<vmem>>, vector<128x512xbf16>
    %cst_241 = arith.constant dense<0.000000e+00> : vector<8x512xf32>
    %841 = tpu.matmul %839, %840, %cst_241 {dimension_numbers = #tpu.dot_dimension_numbers<[1], [0], [0], [1], [0, 0, 1, 1], [], []>} : vector<8x128xbf16>, vector<128x512xbf16>, vector<8x512xf32> -> vector<8x512xf32>
    %842 = arith.addf %838, %841 : vector<8x512xf32>
    %843 = vector.broadcast %17 : vector<1x512xf32> to vector<8x512xf32>
    %844 = arith.addf %842, %843 : vector<8x512xf32>
    %845 = vector.extract_strided_slice %844 {offsets = [0, 0], sizes = [8, 128], strides = [1, 1]} : vector<8x512xf32> to vector<8x128xf32>
    %846 = arith.negf %845 : vector<8x128xf32>
    %847 = math.exp %846 : vector<8x128xf32>
    %cst_242 = arith.constant 1.000000e+00 : f32
    %848 = vector.broadcast %cst_242 : f32 to vector<8x128xf32>
    %849 = arith.addf %848, %847 : vector<8x128xf32>
    %850 = arith.divf %848, %849 : vector<8x128xf32>
    %851 = vector.extract_strided_slice %844 {offsets = [0, 128], sizes = [8, 128], strides = [1, 1]} : vector<8x512xf32> to vector<8x128xf32>
    %852 = arith.negf %851 : vector<8x128xf32>
    %853 = math.exp %852 : vector<8x128xf32>
    %cst_243 = arith.constant 1.000000e+00 : f32
    %854 = vector.broadcast %cst_243 : f32 to vector<8x128xf32>
    %855 = arith.addf %854, %853 : vector<8x128xf32>
    %856 = arith.divf %854, %855 : vector<8x128xf32>
    %857 = vector.extract_strided_slice %844 {offsets = [0, 256], sizes = [8, 128], strides = [1, 1]} : vector<8x512xf32> to vector<8x128xf32>
    %858 = math.tanh %857 : vector<8x128xf32>
    %859 = vector.extract_strided_slice %844 {offsets = [0, 384], sizes = [8, 128], strides = [1, 1]} : vector<8x512xf32> to vector<8x128xf32>
    %860 = arith.negf %859 : vector<8x128xf32>
    %861 = math.exp %860 : vector<8x128xf32>
    %cst_244 = arith.constant 1.000000e+00 : f32
    %862 = vector.broadcast %cst_244 : f32 to vector<8x128xf32>
    %863 = arith.addf %862, %861 : vector<8x128xf32>
    %864 = arith.divf %862, %863 : vector<8x128xf32>
    %865 = arith.mulf %856, %791 : vector<8x128xf32>
    %866 = arith.mulf %850, %858 : vector<8x128xf32>
    %867 = arith.addf %865, %866 : vector<8x128xf32>
    %868 = math.tanh %867 : vector<8x128xf32>
    %869 = arith.mulf %864, %868 : vector<8x128xf32>
    %c8_i32_245 = arith.constant 8 : i32
    %870 = arith.muli %c3_i32_224, %c8_i32_245 : i32
    %871 = tpu.assume_multiple %870, 8 : i32
    %872 = arith.truncf %869 : vector<8x128xf32> to vector<8x128xbf16>
    %873 = arith.index_cast %871 : i32 to index
    %c0_246 = arith.constant 0 : index
    %874 = vector.load %arg15[%873, %c0_246] : memref<64x128xbf16, #tpu.memory_space<vmem>>, vector<8x128xbf16>
    tpu.vector_store %arg15[%873, %c0_246], %872 {strides = array<i32>} : memref<64x128xbf16, #tpu.memory_space<vmem>>, vector<8x128xbf16>,
    %c4_i32_247 = arith.constant 4 : i32
    %c0_i32_248 = arith.constant 0 : i32
    %875 = arith.cmpi eq, %c4_i32_247, %c0_i32_248 : i32
    %c1_i32_249 = arith.constant 1 : i32
    %876 = arith.subi %c4_i32_247, %c1_i32_249 : i32
    %c7_i32_250 = arith.constant 7 : i32
    %877 = arith.select %875, %c7_i32_250, %876 : i32
    %c8_i32_251 = arith.constant 8 : i32
    %878 = arith.muli %877, %c8_i32_251 : i32
    %879 = tpu.assume_multiple %878, 8 : i32
    %880 = arith.index_cast %879 : i32 to index
    %c512_252 = arith.constant 512 : index
    %881 = vector.load %arg14[%880, %c512_252] : memref<64x1024xbf16, #tpu.memory_space<vmem>>, vector<8x512xbf16>
    %882 = arith.extf %881 : vector<8x512xbf16> to vector<8x512xf32>
    %883 = arith.truncf %835 : vector<8x128xf32> to vector<8x128xbf16>
    %c0_253 = arith.constant 0 : index
    %c0_254 = arith.constant 0 : index
    %884 = vector.load %arg16[%c0_253, %c0_254] : memref<128x512xbf16, #tpu.memory_space<vmem>>, vector<128x512xbf16>
    %cst_255 = arith.constant dense<0.000000e+00> : vector<8x512xf32>
    %885 = tpu.matmul %883, %884, %cst_255 {dimension_numbers = #tpu.dot_dimension_numbers<[1], [0], [0], [1], [0, 0, 1, 1], [], []>} : vector<8x128xbf16>, vector<128x512xbf16>, vector<8x512xf32> -> vector<8x512xf32>
    %886 = arith.addf %882, %885 : vector<8x512xf32>
    %887 = vector.extract_strided_slice %886 {offsets = [0, 0], sizes = [8, 128], strides = [1, 1]} : vector<8x512xf32> to vector<8x128xf32>
    %888 = arith.negf %887 : vector<8x128xf32>
    %889 = math.exp %888 : vector<8x128xf32>
    %cst_256 = arith.constant 1.000000e+00 : f32
    %890 = vector.broadcast %cst_256 : f32 to vector<8x128xf32>
    %891 = arith.addf %890, %889 : vector<8x128xf32>
    %892 = arith.divf %890, %891 : vector<8x128xf32>
    %893 = vector.extract_strided_slice %886 {offsets = [0, 128], sizes = [8, 128], strides = [1, 1]} : vector<8x512xf32> to vector<8x128xf32>
    %894 = arith.negf %893 : vector<8x128xf32>
    %895 = math.exp %894 : vector<8x128xf32>
    %cst_257 = arith.constant 1.000000e+00 : f32
    %896 = vector.broadcast %cst_257 : f32 to vector<8x128xf32>
    %897 = arith.addf %896, %895 : vector<8x128xf32>
    %898 = arith.divf %896, %897 : vector<8x128xf32>
    %899 = vector.extract_strided_slice %886 {offsets = [0, 256], sizes = [8, 128], strides = [1, 1]} : vector<8x512xf32> to vector<8x128xf32>
    %900 = math.tanh %899 : vector<8x128xf32>
    %901 = vector.extract_strided_slice %886 {offsets = [0, 384], sizes = [8, 128], strides = [1, 1]} : vector<8x512xf32> to vector<8x128xf32>
    %902 = arith.negf %901 : vector<8x128xf32>
    %903 = math.exp %902 : vector<8x128xf32>
    %cst_258 = arith.constant 1.000000e+00 : f32
    %904 = vector.broadcast %cst_258 : f32 to vector<8x128xf32>
    %905 = arith.addf %904, %903 : vector<8x128xf32>
    %906 = arith.divf %904, %905 : vector<8x128xf32>
    %907 = arith.mulf %898, %833 : vector<8x128xf32>
    %908 = arith.mulf %892, %900 : vector<8x128xf32>
    %909 = arith.addf %907, %908 : vector<8x128xf32>
    %910 = math.tanh %909 : vector<8x128xf32>
    %911 = arith.mulf %906, %910 : vector<8x128xf32>
    %912 = arith.truncf %911 : vector<8x128xf32> to vector<8x128xbf16>
    %c0_259 = arith.constant 0 : index
    %c0_260 = arith.constant 0 : index
    %913 = vector.load %arg17[%c0_259, %c0_260] : memref<128x512xbf16, #tpu.memory_space<vmem>>, vector<128x512xbf16>
    %cst_261 = arith.constant dense<0.000000e+00> : vector<8x512xf32>
    %914 = tpu.matmul %912, %913, %cst_261 {dimension_numbers = #tpu.dot_dimension_numbers<[1], [0], [0], [1], [0, 0, 1, 1], [], []>} : vector<8x128xbf16>, vector<128x512xbf16>, vector<8x512xf32> -> vector<8x512xf32>
    %915 = arith.truncf %869 : vector<8x128xf32> to vector<8x128xbf16>
    %c0_262 = arith.constant 0 : index
    %c0_263 = arith.constant 0 : index
    %916 = vector.load %arg18[%c0_262, %c0_263] : memref<128x512xbf16, #tpu.memory_space<vmem>>, vector<128x512xbf16>
    %cst_264 = arith.constant dense<0.000000e+00> : vector<8x512xf32>
    %917 = tpu.matmul %915, %916, %cst_264 {dimension_numbers = #tpu.dot_dimension_numbers<[1], [0], [0], [1], [0, 0, 1, 1], [], []>} : vector<8x128xbf16>, vector<128x512xbf16>, vector<8x512xf32> -> vector<8x512xf32>
    %918 = arith.addf %914, %917 : vector<8x512xf32>
    %919 = vector.broadcast %17 : vector<1x512xf32> to vector<8x512xf32>
    %920 = arith.addf %918, %919 : vector<8x512xf32>
    %921 = vector.extract_strided_slice %920 {offsets = [0, 0], sizes = [8, 128], strides = [1, 1]} : vector<8x512xf32> to vector<8x128xf32>
    %922 = arith.negf %921 : vector<8x128xf32>
    %923 = math.exp %922 : vector<8x128xf32>
    %cst_265 = arith.constant 1.000000e+00 : f32
    %924 = vector.broadcast %cst_265 : f32 to vector<8x128xf32>
    %925 = arith.addf %924, %923 : vector<8x128xf32>
    %926 = arith.divf %924, %925 : vector<8x128xf32>
    %927 = vector.extract_strided_slice %920 {offsets = [0, 128], sizes = [8, 128], strides = [1, 1]} : vector<8x512xf32> to vector<8x128xf32>
    %928 = arith.negf %927 : vector<8x128xf32>
    %929 = math.exp %928 : vector<8x128xf32>
    %cst_266 = arith.constant 1.000000e+00 : f32
    %930 = vector.broadcast %cst_266 : f32 to vector<8x128xf32>
    %931 = arith.addf %930, %929 : vector<8x128xf32>
    %932 = arith.divf %930, %931 : vector<8x128xf32>
    %933 = vector.extract_strided_slice %920 {offsets = [0, 256], sizes = [8, 128], strides = [1, 1]} : vector<8x512xf32> to vector<8x128xf32>
    %934 = math.tanh %933 : vector<8x128xf32>
    %935 = vector.extract_strided_slice %920 {offsets = [0, 384], sizes = [8, 128], strides = [1, 1]} : vector<8x512xf32> to vector<8x128xf32>
    %936 = arith.negf %935 : vector<8x128xf32>
    %937 = math.exp %936 : vector<8x128xf32>
    %cst_267 = arith.constant 1.000000e+00 : f32
    %938 = vector.broadcast %cst_267 : f32 to vector<8x128xf32>
    %939 = arith.addf %938, %937 : vector<8x128xf32>
    %940 = arith.divf %938, %939 : vector<8x128xf32>
    %941 = arith.mulf %932, %867 : vector<8x128xf32>
    %942 = arith.mulf %926, %934 : vector<8x128xf32>
    %943 = arith.addf %941, %942 : vector<8x128xf32>
    %944 = math.tanh %943 : vector<8x128xf32>
    %945 = arith.mulf %940, %944 : vector<8x128xf32>
    %c8_i32_268 = arith.constant 8 : i32
    %946 = arith.muli %c4_i32_247, %c8_i32_268 : i32
    %947 = tpu.assume_multiple %946, 8 : i32
    %948 = arith.truncf %945 : vector<8x128xf32> to vector<8x128xbf16>
    %949 = arith.index_cast %947 : i32 to index
    %c0_269 = arith.constant 0 : index
    %950 = vector.load %arg15[%949, %c0_269] : memref<64x128xbf16, #tpu.memory_space<vmem>>, vector<8x128xbf16>
    tpu.vector_store %arg15[%949, %c0_269], %948 {strides = array<i32>} : memref<64x128xbf16, #tpu.memory_space<vmem>>, vector<8x128xbf16>,
    %c5_i32_270 = arith.constant 5 : i32
    %c0_i32_271 = arith.constant 0 : i32
    %951 = arith.cmpi eq, %c5_i32_270, %c0_i32_271 : i32
    %c1_i32_272 = arith.constant 1 : i32
    %952 = arith.subi %c5_i32_270, %c1_i32_272 : i32
    %c7_i32_273 = arith.constant 7 : i32
    %953 = arith.select %951, %c7_i32_273, %952 : i32
    %c8_i32_274 = arith.constant 8 : i32
    %954 = arith.muli %953, %c8_i32_274 : i32
    %955 = tpu.assume_multiple %954, 8 : i32
    %956 = arith.index_cast %955 : i32 to index
    %c512_275 = arith.constant 512 : index
    %957 = vector.load %arg14[%956, %c512_275] : memref<64x1024xbf16, #tpu.memory_space<vmem>>, vector<8x512xbf16>
    %958 = arith.extf %957 : vector<8x512xbf16> to vector<8x512xf32>
    %959 = arith.truncf %911 : vector<8x128xf32> to vector<8x128xbf16>
    %c0_276 = arith.constant 0 : index
    %c0_277 = arith.constant 0 : index
    %960 = vector.load %arg16[%c0_276, %c0_277] : memref<128x512xbf16, #tpu.memory_space<vmem>>, vector<128x512xbf16>
    %cst_278 = arith.constant dense<0.000000e+00> : vector<8x512xf32>
    %961 = tpu.matmul %959, %960, %cst_278 {dimension_numbers = #tpu.dot_dimension_numbers<[1], [0], [0], [1], [0, 0, 1, 1], [], []>} : vector<8x128xbf16>, vector<128x512xbf16>, vector<8x512xf32> -> vector<8x512xf32>
    %962 = arith.addf %958, %961 : vector<8x512xf32>
    %963 = vector.extract_strided_slice %962 {offsets = [0, 0], sizes = [8, 128], strides = [1, 1]} : vector<8x512xf32> to vector<8x128xf32>
    %964 = arith.negf %963 : vector<8x128xf32>
    %965 = math.exp %964 : vector<8x128xf32>
    %cst_279 = arith.constant 1.000000e+00 : f32
    %966 = vector.broadcast %cst_279 : f32 to vector<8x128xf32>
    %967 = arith.addf %966, %965 : vector<8x128xf32>
    %968 = arith.divf %966, %967 : vector<8x128xf32>
    %969 = vector.extract_strided_slice %962 {offsets = [0, 128], sizes = [8, 128], strides = [1, 1]} : vector<8x512xf32> to vector<8x128xf32>
    %970 = arith.negf %969 : vector<8x128xf32>
    %971 = math.exp %970 : vector<8x128xf32>
    %cst_280 = arith.constant 1.000000e+00 : f32
    %972 = vector.broadcast %cst_280 : f32 to vector<8x128xf32>
    %973 = arith.addf %972, %971 : vector<8x128xf32>
    %974 = arith.divf %972, %973 : vector<8x128xf32>
    %975 = vector.extract_strided_slice %962 {offsets = [0, 256], sizes = [8, 128], strides = [1, 1]} : vector<8x512xf32> to vector<8x128xf32>
    %976 = math.tanh %975 : vector<8x128xf32>
    %977 = vector.extract_strided_slice %962 {offsets = [0, 384], sizes = [8, 128], strides = [1, 1]} : vector<8x512xf32> to vector<8x128xf32>
    %978 = arith.negf %977 : vector<8x128xf32>
    %979 = math.exp %978 : vector<8x128xf32>
    %cst_281 = arith.constant 1.000000e+00 : f32
    %980 = vector.broadcast %cst_281 : f32 to vector<8x128xf32>
    %981 = arith.addf %980, %979 : vector<8x128xf32>
    %982 = arith.divf %980, %981 : vector<8x128xf32>
    %983 = arith.mulf %974, %909 : vector<8x128xf32>
    %984 = arith.mulf %968, %976 : vector<8x128xf32>
    %985 = arith.addf %983, %984 : vector<8x128xf32>
    %986 = math.tanh %985 : vector<8x128xf32>
    %987 = arith.mulf %982, %986 : vector<8x128xf32>
    %988 = arith.truncf %987 : vector<8x128xf32> to vector<8x128xbf16>
    %c0_282 = arith.constant 0 : index
    %c0_283 = arith.constant 0 : index
    %989 = vector.load %arg17[%c0_282, %c0_283] : memref<128x512xbf16, #tpu.memory_space<vmem>>, vector<128x512xbf16>
    %cst_284 = arith.constant dense<0.000000e+00> : vector<8x512xf32>
    %990 = tpu.matmul %988, %989, %cst_284 {dimension_numbers = #tpu.dot_dimension_numbers<[1], [0], [0], [1], [0, 0, 1, 1], [], []>} : vector<8x128xbf16>, vector<128x512xbf16>, vector<8x512xf32> -> vector<8x512xf32>
    %991 = arith.truncf %945 : vector<8x128xf32> to vector<8x128xbf16>
    %c0_285 = arith.constant 0 : index
    %c0_286 = arith.constant 0 : index
    %992 = vector.load %arg18[%c0_285, %c0_286] : memref<128x512xbf16, #tpu.memory_space<vmem>>, vector<128x512xbf16>
    %cst_287 = arith.constant dense<0.000000e+00> : vector<8x512xf32>
    %993 = tpu.matmul %991, %992, %cst_287 {dimension_numbers = #tpu.dot_dimension_numbers<[1], [0], [0], [1], [0, 0, 1, 1], [], []>} : vector<8x128xbf16>, vector<128x512xbf16>, vector<8x512xf32> -> vector<8x512xf32>
    %994 = arith.addf %990, %993 : vector<8x512xf32>
    %995 = vector.broadcast %17 : vector<1x512xf32> to vector<8x512xf32>
    %996 = arith.addf %994, %995 : vector<8x512xf32>
    %997 = vector.extract_strided_slice %996 {offsets = [0, 0], sizes = [8, 128], strides = [1, 1]} : vector<8x512xf32> to vector<8x128xf32>
    %998 = arith.negf %997 : vector<8x128xf32>
    %999 = math.exp %998 : vector<8x128xf32>
    %cst_288 = arith.constant 1.000000e+00 : f32
    %1000 = vector.broadcast %cst_288 : f32 to vector<8x128xf32>
    %1001 = arith.addf %1000, %999 : vector<8x128xf32>
    %1002 = arith.divf %1000, %1001 : vector<8x128xf32>
    %1003 = vector.extract_strided_slice %996 {offsets = [0, 128], sizes = [8, 128], strides = [1, 1]} : vector<8x512xf32> to vector<8x128xf32>
    %1004 = arith.negf %1003 : vector<8x128xf32>
    %1005 = math.exp %1004 : vector<8x128xf32>
    %cst_289 = arith.constant 1.000000e+00 : f32
    %1006 = vector.broadcast %cst_289 : f32 to vector<8x128xf32>
    %1007 = arith.addf %1006, %1005 : vector<8x128xf32>
    %1008 = arith.divf %1006, %1007 : vector<8x128xf32>
    %1009 = vector.extract_strided_slice %996 {offsets = [0, 256], sizes = [8, 128], strides = [1, 1]} : vector<8x512xf32> to vector<8x128xf32>
    %1010 = math.tanh %1009 : vector<8x128xf32>
    %1011 = vector.extract_strided_slice %996 {offsets = [0, 384], sizes = [8, 128], strides = [1, 1]} : vector<8x512xf32> to vector<8x128xf32>
    %1012 = arith.negf %1011 : vector<8x128xf32>
    %1013 = math.exp %1012 : vector<8x128xf32>
    %cst_290 = arith.constant 1.000000e+00 : f32
    %1014 = vector.broadcast %cst_290 : f32 to vector<8x128xf32>
    %1015 = arith.addf %1014, %1013 : vector<8x128xf32>
    %1016 = arith.divf %1014, %1015 : vector<8x128xf32>
    %1017 = arith.mulf %1008, %943 : vector<8x128xf32>
    %1018 = arith.mulf %1002, %1010 : vector<8x128xf32>
    %1019 = arith.addf %1017, %1018 : vector<8x128xf32>
    %1020 = math.tanh %1019 : vector<8x128xf32>
    %1021 = arith.mulf %1016, %1020 : vector<8x128xf32>
    %c8_i32_291 = arith.constant 8 : i32
    %1022 = arith.muli %c5_i32_270, %c8_i32_291 : i32
    %1023 = tpu.assume_multiple %1022, 8 : i32
    %1024 = arith.truncf %1021 : vector<8x128xf32> to vector<8x128xbf16>
    %1025 = arith.index_cast %1023 : i32 to index
    %c0_292 = arith.constant 0 : index
    %1026 = vector.load %arg15[%1025, %c0_292] : memref<64x128xbf16, #tpu.memory_space<vmem>>, vector<8x128xbf16>
    tpu.vector_store %arg15[%1025, %c0_292], %1024 {strides = array<i32>} : memref<64x128xbf16, #tpu.memory_space<vmem>>, vector<8x128xbf16>,
    %c6_i32_293 = arith.constant 6 : i32
    %c0_i32_294 = arith.constant 0 : i32
    %1027 = arith.cmpi eq, %c6_i32_293, %c0_i32_294 : i32
    %c1_i32_295 = arith.constant 1 : i32
    %1028 = arith.subi %c6_i32_293, %c1_i32_295 : i32
    %c7_i32_296 = arith.constant 7 : i32
    %1029 = arith.select %1027, %c7_i32_296, %1028 : i32
    %c8_i32_297 = arith.constant 8 : i32
    %1030 = arith.muli %1029, %c8_i32_297 : i32
    %1031 = tpu.assume_multiple %1030, 8 : i32
    %1032 = arith.index_cast %1031 : i32 to index
    %c512_298 = arith.constant 512 : index
    %1033 = vector.load %arg14[%1032, %c512_298] : memref<64x1024xbf16, #tpu.memory_space<vmem>>, vector<8x512xbf16>
    %1034 = arith.extf %1033 : vector<8x512xbf16> to vector<8x512xf32>
    %1035 = arith.truncf %987 : vector<8x128xf32> to vector<8x128xbf16>
    %c0_299 = arith.constant 0 : index
    %c0_300 = arith.constant 0 : index
    %1036 = vector.load %arg16[%c0_299, %c0_300] : memref<128x512xbf16, #tpu.memory_space<vmem>>, vector<128x512xbf16>
    %cst_301 = arith.constant dense<0.000000e+00> : vector<8x512xf32>
    %1037 = tpu.matmul %1035, %1036, %cst_301 {dimension_numbers = #tpu.dot_dimension_numbers<[1], [0], [0], [1], [0, 0, 1, 1], [], []>} : vector<8x128xbf16>, vector<128x512xbf16>, vector<8x512xf32> -> vector<8x512xf32>
    %1038 = arith.addf %1034, %1037 : vector<8x512xf32>
    %1039 = vector.extract_strided_slice %1038 {offsets = [0, 0], sizes = [8, 128], strides = [1, 1]} : vector<8x512xf32> to vector<8x128xf32>
    %1040 = arith.negf %1039 : vector<8x128xf32>
    %1041 = math.exp %1040 : vector<8x128xf32>
    %cst_302 = arith.constant 1.000000e+00 : f32
    %1042 = vector.broadcast %cst_302 : f32 to vector<8x128xf32>
    %1043 = arith.addf %1042, %1041 : vector<8x128xf32>
    %1044 = arith.divf %1042, %1043 : vector<8x128xf32>
    %1045 = vector.extract_strided_slice %1038 {offsets = [0, 128], sizes = [8, 128], strides = [1, 1]} : vector<8x512xf32> to vector<8x128xf32>
    %1046 = arith.negf %1045 : vector<8x128xf32>
    %1047 = math.exp %1046 : vector<8x128xf32>
    %cst_303 = arith.constant 1.000000e+00 : f32
    %1048 = vector.broadcast %cst_303 : f32 to vector<8x128xf32>
    %1049 = arith.addf %1048, %1047 : vector<8x128xf32>
    %1050 = arith.divf %1048, %1049 : vector<8x128xf32>
    %1051 = vector.extract_strided_slice %1038 {offsets = [0, 256], sizes = [8, 128], strides = [1, 1]} : vector<8x512xf32> to vector<8x128xf32>
    %1052 = math.tanh %1051 : vector<8x128xf32>
    %1053 = vector.extract_strided_slice %1038 {offsets = [0, 384], sizes = [8, 128], strides = [1, 1]} : vector<8x512xf32> to vector<8x128xf32>
    %1054 = arith.negf %1053 : vector<8x128xf32>
    %1055 = math.exp %1054 : vector<8x128xf32>
    %cst_304 = arith.constant 1.000000e+00 : f32
    %1056 = vector.broadcast %cst_304 : f32 to vector<8x128xf32>
    %1057 = arith.addf %1056, %1055 : vector<8x128xf32>
    %1058 = arith.divf %1056, %1057 : vector<8x128xf32>
    %1059 = arith.mulf %1050, %985 : vector<8x128xf32>
    %1060 = arith.mulf %1044, %1052 : vector<8x128xf32>
    %1061 = arith.addf %1059, %1060 : vector<8x128xf32>
    %1062 = math.tanh %1061 : vector<8x128xf32>
    %1063 = arith.mulf %1058, %1062 : vector<8x128xf32>
    %1064 = arith.truncf %1063 : vector<8x128xf32> to vector<8x128xbf16>
    %c0_305 = arith.constant 0 : index
    %c0_306 = arith.constant 0 : index
    %1065 = vector.load %arg17[%c0_305, %c0_306] : memref<128x512xbf16, #tpu.memory_space<vmem>>, vector<128x512xbf16>
    %cst_307 = arith.constant dense<0.000000e+00> : vector<8x512xf32>
    %1066 = tpu.matmul %1064, %1065, %cst_307 {dimension_numbers = #tpu.dot_dimension_numbers<[1], [0], [0], [1], [0, 0, 1, 1], [], []>} : vector<8x128xbf16>, vector<128x512xbf16>, vector<8x512xf32> -> vector<8x512xf32>
    %1067 = arith.truncf %1021 : vector<8x128xf32> to vector<8x128xbf16>
    %c0_308 = arith.constant 0 : index
    %c0_309 = arith.constant 0 : index
    %1068 = vector.load %arg18[%c0_308, %c0_309] : memref<128x512xbf16, #tpu.memory_space<vmem>>, vector<128x512xbf16>
    %cst_310 = arith.constant dense<0.000000e+00> : vector<8x512xf32>
    %1069 = tpu.matmul %1067, %1068, %cst_310 {dimension_numbers = #tpu.dot_dimension_numbers<[1], [0], [0], [1], [0, 0, 1, 1], [], []>} : vector<8x128xbf16>, vector<128x512xbf16>, vector<8x512xf32> -> vector<8x512xf32>
    %1070 = arith.addf %1066, %1069 : vector<8x512xf32>
    %1071 = vector.broadcast %17 : vector<1x512xf32> to vector<8x512xf32>
    %1072 = arith.addf %1070, %1071 : vector<8x512xf32>
    %1073 = vector.extract_strided_slice %1072 {offsets = [0, 0], sizes = [8, 128], strides = [1, 1]} : vector<8x512xf32> to vector<8x128xf32>
    %1074 = arith.negf %1073 : vector<8x128xf32>
    %1075 = math.exp %1074 : vector<8x128xf32>
    %cst_311 = arith.constant 1.000000e+00 : f32
    %1076 = vector.broadcast %cst_311 : f32 to vector<8x128xf32>
    %1077 = arith.addf %1076, %1075 : vector<8x128xf32>
    %1078 = arith.divf %1076, %1077 : vector<8x128xf32>
    %1079 = vector.extract_strided_slice %1072 {offsets = [0, 128], sizes = [8, 128], strides = [1, 1]} : vector<8x512xf32> to vector<8x128xf32>
    %1080 = arith.negf %1079 : vector<8x128xf32>
    %1081 = math.exp %1080 : vector<8x128xf32>
    %cst_312 = arith.constant 1.000000e+00 : f32
    %1082 = vector.broadcast %cst_312 : f32 to vector<8x128xf32>
    %1083 = arith.addf %1082, %1081 : vector<8x128xf32>
    %1084 = arith.divf %1082, %1083 : vector<8x128xf32>
    %1085 = vector.extract_strided_slice %1072 {offsets = [0, 256], sizes = [8, 128], strides = [1, 1]} : vector<8x512xf32> to vector<8x128xf32>
    %1086 = math.tanh %1085 : vector<8x128xf32>
    %1087 = vector.extract_strided_slice %1072 {offsets = [0, 384], sizes = [8, 128], strides = [1, 1]} : vector<8x512xf32> to vector<8x128xf32>
    %1088 = arith.negf %1087 : vector<8x128xf32>
    %1089 = math.exp %1088 : vector<8x128xf32>
    %cst_313 = arith.constant 1.000000e+00 : f32
    %1090 = vector.broadcast %cst_313 : f32 to vector<8x128xf32>
    %1091 = arith.addf %1090, %1089 : vector<8x128xf32>
    %1092 = arith.divf %1090, %1091 : vector<8x128xf32>
    %1093 = arith.mulf %1084, %1019 : vector<8x128xf32>
    %1094 = arith.mulf %1078, %1086 : vector<8x128xf32>
    %1095 = arith.addf %1093, %1094 : vector<8x128xf32>
    %1096 = math.tanh %1095 : vector<8x128xf32>
    %1097 = arith.mulf %1092, %1096 : vector<8x128xf32>
    %c8_i32_314 = arith.constant 8 : i32
    %1098 = arith.muli %c6_i32_293, %c8_i32_314 : i32
    %1099 = tpu.assume_multiple %1098, 8 : i32
    %1100 = arith.truncf %1097 : vector<8x128xf32> to vector<8x128xbf16>
    %1101 = arith.index_cast %1099 : i32 to index
    %c0_315 = arith.constant 0 : index
    %1102 = vector.load %arg15[%1101, %c0_315] : memref<64x128xbf16, #tpu.memory_space<vmem>>, vector<8x128xbf16>
    tpu.vector_store %arg15[%1101, %c0_315], %1100 {strides = array<i32>} : memref<64x128xbf16, #tpu.memory_space<vmem>>, vector<8x128xbf16>,
    %c7_i32_316 = arith.constant 7 : i32
    %c0_i32_317 = arith.constant 0 : i32
    %1103 = arith.cmpi eq, %c7_i32_316, %c0_i32_317 : i32
    %c1_i32_318 = arith.constant 1 : i32
    %1104 = arith.subi %c7_i32_316, %c1_i32_318 : i32
    %c7_i32_319 = arith.constant 7 : i32
    %1105 = arith.select %1103, %c7_i32_319, %1104 : i32
    %c8_i32_320 = arith.constant 8 : i32
    %1106 = arith.muli %1105, %c8_i32_320 : i32
    %1107 = tpu.assume_multiple %1106, 8 : i32
    %1108 = arith.index_cast %1107 : i32 to index
    %c512_321 = arith.constant 512 : index
    %1109 = vector.load %arg14[%1108, %c512_321] : memref<64x1024xbf16, #tpu.memory_space<vmem>>, vector<8x512xbf16>
    %1110 = arith.extf %1109 : vector<8x512xbf16> to vector<8x512xf32>
    %1111 = arith.truncf %1063 : vector<8x128xf32> to vector<8x128xbf16>
    %c0_322 = arith.constant 0 : index
    %c0_323 = arith.constant 0 : index
    %1112 = vector.load %arg16[%c0_322, %c0_323] : memref<128x512xbf16, #tpu.memory_space<vmem>>, vector<128x512xbf16>
    %cst_324 = arith.constant dense<0.000000e+00> : vector<8x512xf32>
    %1113 = tpu.matmul %1111, %1112, %cst_324 {dimension_numbers = #tpu.dot_dimension_numbers<[1], [0], [0], [1], [0, 0, 1, 1], [], []>} : vector<8x128xbf16>, vector<128x512xbf16>, vector<8x512xf32> -> vector<8x512xf32>
    %1114 = arith.addf %1110, %1113 : vector<8x512xf32>
    %1115 = vector.extract_strided_slice %1114 {offsets = [0, 0], sizes = [8, 128], strides = [1, 1]} : vector<8x512xf32> to vector<8x128xf32>
    %1116 = arith.negf %1115 : vector<8x128xf32>
    %1117 = math.exp %1116 : vector<8x128xf32>
    %cst_325 = arith.constant 1.000000e+00 : f32
    %1118 = vector.broadcast %cst_325 : f32 to vector<8x128xf32>
    %1119 = arith.addf %1118, %1117 : vector<8x128xf32>
    %1120 = arith.divf %1118, %1119 : vector<8x128xf32>
    %1121 = vector.extract_strided_slice %1114 {offsets = [0, 128], sizes = [8, 128], strides = [1, 1]} : vector<8x512xf32> to vector<8x128xf32>
    %1122 = arith.negf %1121 : vector<8x128xf32>
    %1123 = math.exp %1122 : vector<8x128xf32>
    %cst_326 = arith.constant 1.000000e+00 : f32
    %1124 = vector.broadcast %cst_326 : f32 to vector<8x128xf32>
    %1125 = arith.addf %1124, %1123 : vector<8x128xf32>
    %1126 = arith.divf %1124, %1125 : vector<8x128xf32>
    %1127 = vector.extract_strided_slice %1114 {offsets = [0, 256], sizes = [8, 128], strides = [1, 1]} : vector<8x512xf32> to vector<8x128xf32>
    %1128 = math.tanh %1127 : vector<8x128xf32>
    %1129 = vector.extract_strided_slice %1114 {offsets = [0, 384], sizes = [8, 128], strides = [1, 1]} : vector<8x512xf32> to vector<8x128xf32>
    %1130 = arith.negf %1129 : vector<8x128xf32>
    %1131 = math.exp %1130 : vector<8x128xf32>
    %cst_327 = arith.constant 1.000000e+00 : f32
    %1132 = vector.broadcast %cst_327 : f32 to vector<8x128xf32>
    %1133 = arith.addf %1132, %1131 : vector<8x128xf32>
    %1134 = arith.divf %1132, %1133 : vector<8x128xf32>
    %1135 = arith.mulf %1126, %1061 : vector<8x128xf32>
    %1136 = arith.mulf %1120, %1128 : vector<8x128xf32>
    %1137 = arith.addf %1135, %1136 : vector<8x128xf32>
    %1138 = math.tanh %1137 : vector<8x128xf32>
    %1139 = arith.mulf %1134, %1138 : vector<8x128xf32>
    %1140 = arith.truncf %1139 : vector<8x128xf32> to vector<8x128xbf16>
    %c0_328 = arith.constant 0 : index
    %c0_329 = arith.constant 0 : index
    %1141 = vector.load %arg17[%c0_328, %c0_329] : memref<128x512xbf16, #tpu.memory_space<vmem>>, vector<128x512xbf16>
    %cst_330 = arith.constant dense<0.000000e+00> : vector<8x512xf32>
    %1142 = tpu.matmul %1140, %1141, %cst_330 {dimension_numbers = #tpu.dot_dimension_numbers<[1], [0], [0], [1], [0, 0, 1, 1], [], []>} : vector<8x128xbf16>, vector<128x512xbf16>, vector<8x512xf32> -> vector<8x512xf32>
    %1143 = arith.truncf %1097 : vector<8x128xf32> to vector<8x128xbf16>
    %c0_331 = arith.constant 0 : index
    %c0_332 = arith.constant 0 : index
    %1144 = vector.load %arg18[%c0_331, %c0_332] : memref<128x512xbf16, #tpu.memory_space<vmem>>, vector<128x512xbf16>
    %cst_333 = arith.constant dense<0.000000e+00> : vector<8x512xf32>
    %1145 = tpu.matmul %1143, %1144, %cst_333 {dimension_numbers = #tpu.dot_dimension_numbers<[1], [0], [0], [1], [0, 0, 1, 1], [], []>} : vector<8x128xbf16>, vector<128x512xbf16>, vector<8x512xf32> -> vector<8x512xf32>
    %1146 = arith.addf %1142, %1145 : vector<8x512xf32>
    %1147 = vector.broadcast %17 : vector<1x512xf32> to vector<8x512xf32>
    %1148 = arith.addf %1146, %1147 : vector<8x512xf32>
    %1149 = vector.extract_strided_slice %1148 {offsets = [0, 0], sizes = [8, 128], strides = [1, 1]} : vector<8x512xf32> to vector<8x128xf32>
    %1150 = arith.negf %1149 : vector<8x128xf32>
    %1151 = math.exp %1150 : vector<8x128xf32>
    %cst_334 = arith.constant 1.000000e+00 : f32
    %1152 = vector.broadcast %cst_334 : f32 to vector<8x128xf32>
    %1153 = arith.addf %1152, %1151 : vector<8x128xf32>
    %1154 = arith.divf %1152, %1153 : vector<8x128xf32>
    %1155 = vector.extract_strided_slice %1148 {offsets = [0, 128], sizes = [8, 128], strides = [1, 1]} : vector<8x512xf32> to vector<8x128xf32>
    %1156 = arith.negf %1155 : vector<8x128xf32>
    %1157 = math.exp %1156 : vector<8x128xf32>
    %cst_335 = arith.constant 1.000000e+00 : f32
    %1158 = vector.broadcast %cst_335 : f32 to vector<8x128xf32>
    %1159 = arith.addf %1158, %1157 : vector<8x128xf32>
    %1160 = arith.divf %1158, %1159 : vector<8x128xf32>
    %1161 = vector.extract_strided_slice %1148 {offsets = [0, 256], sizes = [8, 128], strides = [1, 1]} : vector<8x512xf32> to vector<8x128xf32>
    %1162 = math.tanh %1161 : vector<8x128xf32>
    %1163 = vector.extract_strided_slice %1148 {offsets = [0, 384], sizes = [8, 128], strides = [1, 1]} : vector<8x512xf32> to vector<8x128xf32>
    %1164 = arith.negf %1163 : vector<8x128xf32>
    %1165 = math.exp %1164 : vector<8x128xf32>
    %cst_336 = arith.constant 1.000000e+00 : f32
    %1166 = vector.broadcast %cst_336 : f32 to vector<8x128xf32>
    %1167 = arith.addf %1166, %1165 : vector<8x128xf32>
    %1168 = arith.divf %1166, %1167 : vector<8x128xf32>
    %1169 = arith.mulf %1160, %1095 : vector<8x128xf32>
    %1170 = arith.mulf %1154, %1162 : vector<8x128xf32>
    %1171 = arith.addf %1169, %1170 : vector<8x128xf32>
    %1172 = math.tanh %1171 : vector<8x128xf32>
    %1173 = arith.mulf %1168, %1172 : vector<8x128xf32>
    %c8_i32_337 = arith.constant 8 : i32
    %1174 = arith.muli %c7_i32_316, %c8_i32_337 : i32
    %1175 = tpu.assume_multiple %1174, 8 : i32
    %1176 = arith.truncf %1173 : vector<8x128xf32> to vector<8x128xbf16>
    %1177 = arith.index_cast %1175 : i32 to index
    %c0_338 = arith.constant 0 : index
    %1178 = vector.load %arg15[%1177, %c0_338] : memref<64x128xbf16, #tpu.memory_space<vmem>>, vector<8x128xbf16>
    tpu.vector_store %arg15[%1177, %c0_338], %1176 {strides = array<i32>} : memref<64x128xbf16, #tpu.memory_space<vmem>>, vector<8x128xbf16>,
    %c8_i32_339 = arith.constant 8 : i32
    %c0_340 = arith.constant 0 : index
    %c0_341 = arith.constant 0 : index
    %1179 = vector.load %arg15[%c0_340, %c0_341] : memref<64x128xbf16, #tpu.memory_space<vmem>>, vector<64x128xbf16>
    %c0_342 = arith.constant 0 : index
    %c0_343 = arith.constant 0 : index
    %1180 = vector.load %arg19[%c0_342, %c0_343] : memref<128x128xbf16, #tpu.memory_space<vmem>>, vector<128x128xbf16>
    %cst_344 = arith.constant dense<0.000000e+00> : vector<64x128xf32>
    %1181 = tpu.matmul %1179, %1180, %cst_344 {dimension_numbers = #tpu.dot_dimension_numbers<[1], [0], [0], [1], [0, 0, 1, 1], [], []>} : vector<64x128xbf16>, vector<128x128xbf16>, vector<64x128xf32> -> vector<64x128xf32>
    %c0_345 = arith.constant 0 : index
    %c0_346 = arith.constant 0 : index
    %1182 = vector.load %arg12[%c0_345, %c0_346] : memref<1x128xf32, #tpu.memory_space<vmem>>, vector<1x128xf32>
    %1183 = vector.broadcast %1182 : vector<1x128xf32> to vector<64x128xf32>
    %1184 = arith.addf %1181, %1183 : vector<64x128xf32>
    %c0_347 = arith.constant 0 : index
    %c0_348 = arith.constant 0 : index
    %1185 = vector.load %arg13[%c0_347, %c0_348] : memref<64x128xf32, #tpu.memory_space<vmem>>, vector<64x128xf32>
    tpu.vector_store %arg13[%c0_347, %c0_348], %1184 {strides = array<i32>} : memref<64x128xf32, #tpu.memory_space<vmem>>, vector<64x128xf32>,
    return
  }
}

</mosaic_0001>

<bundles_post_ra>
// kernel: _lambda_.1
= control target key start
LH: loop header
LB: loop body
LE: loop exit
PB: predicated region body
PF: predicated region fallthrough
CT: control target
= control target key end

     0   :  { %18 = vsyncpa [#allocation10], 0  ;;  %s17885_s0 = inlined_call_operand.vmem [shape: bf16[64,128], index: 0, kind: input, shape index: {}]   ;;  %s17886_s1 = inlined_call_operand.hbm [shape: bf16[128,1024], index: 1, kind: input, shape index: {}]   ;;  %s17887_s2 = inlined_call_operand.vmem [shape: f32[1,1024], index: 2, kind: input, shape index: {}]   ;;  %s17888_s3 = inlined_call_operand.hbm [shape: bf16[128,512], index: 3, kind: input, shape index: {}]   ;;  %s17889_s4 = inlined_call_operand.hbm [shape: bf16[128,512], index: 4, kind: input, shape index: {}]   ;;  %s17890_s5 = inlined_call_operand.hbm [shape: bf16[128,512], index: 5, kind: input, shape index: {}]   ;;  %s17891_s6 = inlined_call_operand.vmem [shape: f32[1,512], index: 6, kind: input, shape index: {}]   ;;  %s17892_s7 = inlined_call_operand.hbm [shape: bf16[128,512], index: 7, kind: input, shape index: {}]   ;;  %s17893_s8 = inlined_call_operand.hbm [shape: bf16[128,512], index: 8, kind: input, shape index: {}]   ;;  %s17894_s9 = inlined_call_operand.hbm [shape: bf16[128,512], index: 9, kind: input, shape index: {}]   ;;  %s17895_s10 = inlined_call_operand.vmem [shape: f32[1,512], index: 10, kind: input, shape index: {}]   ;;  %s17896_s11 = inlined_call_operand.vmem [shape: bf16[128,128], index: 11, kind: input, shape index: {}]   ;;  %s17897_s12 = inlined_call_operand.vmem [shape: f32[1,128], index: 12, kind: input, shape index: {}]   ;;  %s17898_s13 = inlined_call_operand.vmem [shape: f32[64,128], index: 13, kind: output, shape index: {}]  }
   0x1   :  { %19 = vsyncpa [#allocation12], 0 }
   0x2   :  { %20 = vsyncpa [#allocation15], 0  ;;  %s14430_s25 = smov [#allocation11]  }
   0x3   :  { %s42_s26 = sshll.u32 %s14430_s25, 4  ;;  %s43_s26 = int_to_ptr.vmem [resolvable:$true] %s42_s26 }
   0x4   :  { %s14284_s27 = scalar_lea.vmem %s43_s26, 4096  ;;  %p14289_p1 = scmp.lt.s32.totalorder %s43_s26, %s43_s26 }
   0x5   :  { %p14285_p0 = scmp.ne.s32.totalorder %s43_s26, %s14284_s27  ;;  %p14290_p2 = scmp.lt.s32.totalorder %s14284_s27, %s14284_s27 }
   0x7   :  { %p14291_p3 = por %p14290_p2, %p14289_p1 }
   0x9   :  { %p14292_p4 = pnand %p14291_p3, %p14285_p0 }
   0xb   :  { %14295 = shalt.err (!%p14292_p4)
}
   0xc   :  { %s14431_s28 = smov 256   ;;  %s14432_s29 = smov 16  }
   0xd   :  { %48 = dma.hbm_to_vmem [thread:$0]  %s17888_s3, 4096, %s43_s26, [#allocation12], %s14431_s28, %s14431_s28, %s14432_s29  }
   0xe   :  { %s14433_s15 = smov [#allocation9]  }
   0xf   :  { %s28_s16 = sshll.u32 %s14433_s15, 4  ;;  %s29_s16 = int_to_ptr.vmem [resolvable:$true] %s28_s16 }
  0x10   :  { %s14304_s17 = scalar_lea.vmem %s29_s16, 8192  ;;  %p14309_p6 = scmp.lt.s32.totalorder %s29_s16, %s29_s16 }
  0x11   :  { %p14305_p5 = scmp.ne.s32.totalorder %s29_s16, %s14304_s17  ;;  %p14310_p7 = scmp.lt.s32.totalorder %s14304_s17, %s14304_s17 }
  0x13   :  { %p14311_p8 = por %p14310_p7, %p14309_p6 }
  0x15   :  { %p14312_p9 = pnand %p14311_p8, %p14305_p5 }
  0x17   :  { %14315 = shalt.err (!%p14312_p9)
}
  0x18   :  { %s14434_s18 = smov 512   ;;  %s14435_s19 = smov 32  }
  0x19   :  { %34 = dma.hbm_to_vmem [thread:$0]  %s17886_s1, 8192, %s29_s16, [#allocation10], %s14434_s18, %s14434_s18, %s14435_s19  }
  0x1a   :  { %s14436_s22 = smov [#allocation13]   ;;  %s14437_s24 = smov [#allocation14]  }
  0x1b   :  { %s54_s23 = sshll.u32 %s14436_s22, 4  ;;  %s66_s3 = sshll.u32 %s14437_s24, 4  ;;  %s55_s23 = int_to_ptr.vmem [resolvable:$true] %s54_s23  ;;  %s67_s3 = int_to_ptr.vmem [resolvable:$true] %s66_s3 }
  0x1c   :  { %s14324_s25 = scalar_lea.vmem %s55_s23, 4096  ;;  %p14329_p11 = scmp.lt.s32.totalorder %s55_s23, %s55_s23 }
  0x1d   :  { %p14325_p10 = scmp.ne.s32.totalorder %s55_s23, %s14324_s25  ;;  %p14330_p12 = scmp.lt.s32.totalorder %s14324_s25, %s14324_s25 }
  0x1f   :  { %p14331_p13 = por %p14330_p12, %p14329_p11 }
  0x21   :  { %p14332_p0 = pnand %p14331_p13, %p14325_p10 }
  0x23   :  { %14335 = shalt.err (!%p14332_p0)
}
  0x24   :  { %60 = dma.hbm_to_vmem [thread:$0]  %s17889_s4, 4096, %s55_s23, [#allocation12], %s14431_s28, %s14431_s28, %s14432_s29  }
  0x25   :  { %s14344_s1 = scalar_lea.vmem %s67_s3, 4096  ;;  %p14349_p2 = scmp.lt.s32.totalorder %s67_s3, %s67_s3 }
  0x26   :  { %p14345_p1 = scmp.ne.s32.totalorder %s67_s3, %s14344_s1  ;;  %p14350_p3 = scmp.lt.s32.totalorder %s14344_s1, %s14344_s1 }
  0x28   :  { %p14351_p4 = por %p14350_p3, %p14349_p2 }
  0x2a   :  { %p14352_p5 = pnand %p14351_p4, %p14345_p1 }
  0x2c   :  { %14355 = shalt.err (!%p14352_p5)
}
  0x2d   :  { %72 = dma.hbm_to_vmem [thread:$0]  %s17890_s5, 4096, %s67_s3, [#allocation15], %s14431_s28, %s14431_s28, %s14432_s29  }
  0x2e   :  { %14416 = dma.done.wait [#allocation10], 8192  }
  0x2f   :  { %14417 = vsyncadd [#allocation10], 4294959104 }
  0x30   :  { %14418 = dma.done.wait [#allocation12], 8192  }
  0x31   :  { %14419 = vsyncadd [#allocation12], 4294959104 }
  0x32   :  { %14420 = dma.done.wait [#allocation15], 4096  }
  0x33   :  { %14421 = vsyncadd [#allocation15], 4294963200  ;;  %s14438_s4 = smov [#allocation4]   ;;  %s14439_s16 = smov [#allocation5]  }
  0x34   :  { %s99_s15 = sshll.u32 %s14438_s4, 4  ;;  %s111_s17 = sshll.u32 %s14439_s16, 4  ;;  %s100_s15 = int_to_ptr.vmem [resolvable:$true] %s99_s15  ;;  %s112_s17 = int_to_ptr.vmem [resolvable:$true] %s111_s17 }
  0x35   :  { %s14364_s18 = scalar_lea.vmem %s100_s15, 4096  ;;  %p14369_p7 = scmp.lt.s32.totalorder %s100_s15, %s100_s15 }
  0x36   :  { %p14365_p6 = scmp.ne.s32.totalorder %s100_s15, %s14364_s18  ;;  %p14370_p8 = scmp.lt.s32.totalorder %s14364_s18, %s14364_s18 }
  0x38   :  { %p14371_p9 = por %p14370_p8, %p14369_p7 }
  0x3a   :  { %p14372_p10 = pnand %p14371_p9, %p14365_p6 }
  0x3c   :  { %14375 = shalt.err (!%p14372_p10)  }
  0x3d   :  { %102 = dma.hbm_to_vmem [thread:$0]  %s17892_s7, 4096, %s100_s15, [#allocation8] }
  0x3e   :  { %s14384_s29 = scalar_lea.vmem %s112_s17, 4096  ;;  %p14389_p12 = scmp.lt.s32.totalorder %s112_s17, %s112_s17 }
  0x3f   :  { %p14385_p11 = scmp.ne.s32.totalorder %s112_s17, %s14384_s29  ;;  %p14390_p13 = scmp.lt.s32.totalorder %s14384_s29, %s14384_s29 }
  0x41   :  { %p14391_p0 = por %p14390_p13, %p14389_p12 }
  0x43   :  { %p14392_p1 = pnand %p14391_p0, %p14385_p11 }
  0x45   :  { %14395 = shalt.err (!%p14392_p1)  }
  0x46   :  { %114 = dma.hbm_to_vmem [thread:$0]  %s17893_s8, 4096, %s112_s17, [#allocation8 + $0x1]  ;;  %v161_v0 = vld [vmem:[%s17896_s11] sm:$0xff]  ;;  %v163_v1 = vld [vmem:[%s17896_s11 + $0x8] sm:$0xff]  ;;  %v165_v2 = vld [vmem:[%s17896_s11 + $0x10] sm:$0xff] }
  0x47   :  { %s14440_s21 = smov [#allocation6]  }
  0x48   :  { %s123_s22 = sshll.u32 %s14440_s21, 4  ;;  %s124_s22 = int_to_ptr.vmem [resolvable:$true] %s123_s22 }
  0x49   :  { %s14404_s27 = scalar_lea.vmem %s124_s22, 4096  ;;  %p14409_p3 = scmp.lt.s32.totalorder %s124_s22, %s124_s22 }
  0x4a   :  { %p14405_p2 = scmp.ne.s32.totalorder %s124_s22, %s14404_s27  ;;  %p14410_p4 = scmp.lt.s32.totalorder %s14404_s27, %s14404_s27 }
  0x4c   :  { %p14411_p5 = por %p14410_p4, %p14409_p3 }
  0x4e   :  { %p14412_p6 = pnand %p14411_p5, %p14405_p2 }
  0x50   :  { %14415 = shalt.err (!%p14412_p6)  }
  0x51   :  { %126 = dma.hbm_to_vmem [thread:$0]  %s17894_s9, 4096, %s124_s22, [#allocation8 + $0x2]  ;;  %162 = vst [vmem:[#allocation7] sm:$0xff] %v161_v0  ;;  %164 = vst [vmem:[#allocation7 + $0x8] sm:$0xff] %v163_v1  ;;  %v167_v3 = vld [vmem:[%s17896_s11 + $0x18] sm:$0xff]  ;;  %v169_v4 = vld [vmem:[%s17896_s11 + $0x20] sm:$0xff] }
  0x52   :  { %166 = vst [vmem:[#allocation7 + $0x10] sm:$0xff] %v165_v2  ;;  %v171_v5 = vld [vmem:[%s17896_s11 + $0x28] sm:$0xff]  ;;  %168 = vst [vmem:[#allocation7 + $0x18] sm:$0xff] %v167_v3  ;;  %v173_v6 = vld [vmem:[%s17896_s11 + $0x30] sm:$0xff] }
  0x53   :  { %170 = vst [vmem:[#allocation7 + $0x20] sm:$0xff] %v169_v4  ;;  %172 = vst [vmem:[#allocation7 + $0x28] sm:$0xff] %v171_v5  ;;  %v175_v7 = vld [vmem:[%s17896_s11 + $0x38] sm:$0xff] }
  0x54   :  { %174 = vst [vmem:[#allocation7 + $0x30] sm:$0xff] %v173_v6  ;;  %176 = vst [vmem:[#allocation7 + $0x38] sm:$0xff] %v175_v7 }
  0x55   :  { %184 = vsyncadd [#allocation8 + $0x3], 1024  ;;  %v249_v8 = vld [vmem:[#allocation9 + $0x1c0] sm:$0xff]  ;;  %v251_v11 = vld [vmem:[#allocation9 + $0x1d0] sm:$0xff]  ;;  %v17899_v15 = vmov 0  }
  0x56   :  { %v253_v9 = vld [vmem:[#allocation9 + $0x1e0] sm:$0xff]  ;;  %v255_v12 = vld [vmem:[#allocation9 + $0x1f0] sm:$0xff]  ;;  %675 = vmatprep.mubr.bf16.mxu1 %v17899_v15  ;;  %821 = vmatprep.mubr.bf16.mxu0 %v17899_v15  ;;  %v250_v7 = vld [vmem:[#allocation9 + $0x1c8] sm:$0xff] }
  0x57   :  { %v11683_v10 = vcombine.high %v249_v8, %v253_v9  ;;  %v11682_v13 = vcombine.low %v249_v8, %v253_v9  ;;  %v241_v14 = vld [vmem:[#allocation9 + $0x180] sm:$0xff]  ;;  %v11687_v16 = vcombine.high %v251_v11, %v255_v12  ;;  %v11686_v17 = vcombine.low %v251_v11, %v255_v12  ;;  %v243_v19 = vld [vmem:[#allocation9 + $0x190] sm:$0xff]  ;;  %v254_v9 = vld [vmem:[#allocation9 + $0x1e8] sm:$0xff] }
  0x58   :  { %v245_v18 = vld [vmem:[#allocation9 + $0x1a0] sm:$0xff]  ;;  %v247_v20 = vld [vmem:[#allocation9 + $0x1b0] sm:$0xff]  ;;  %v11685_v12 = vcombine.high %v250_v7, %v254_v9 }
  0x59   :  { %643 = vmatprep.subr.bf16.mxu1 %v11683_v10  ;;  %v11675_v21 = vcombine.high %v241_v14, %v245_v18  ;;  %v11679_v22 = vcombine.high %v243_v19, %v247_v20  ;;  %v233_v23 = vld [vmem:[#allocation9 + $0x140] sm:$0xff]  ;;  %v235_v25 = vld [vmem:[#allocation9 + $0x150] sm:$0xff]  ;;  %789 = vmatprep.subr.bf16.mxu0 %v11687_v16  ;;  %v11674_v26 = vcombine.low %v241_v14, %v245_v18  ;;  %v242_v14 = vld [vmem:[#allocation9 + $0x188] sm:$0xff] }
  0x5a   :  { %v237_v24 = vld [vmem:[#allocation9 + $0x160] sm:$0xff]  ;;  %644 = vmatpush1.bf16.msra.mxu1 %v11682_v13  ;;  %v239_v27 = vld [vmem:[#allocation9 + $0x170] sm:$0xff]  ;;  %790 = vmatpush1.bf16.msra.mxu0 %v11686_v17  ;;  %v11678_v28 = vcombine.low %v243_v19, %v247_v20  ;;  %v246_v16 = vld [vmem:[#allocation9 + $0x1a8] sm:$0xff]  ;;  %v11684_v18 = vcombine.low %v250_v7, %v254_v9 }
  0x5b   :  { %645 = vmatprep.subr.bf16.mxu1 %v11675_v21  ;;  %v11667_v29 = vcombine.high %v233_v23, %v237_v24  ;;  %791 = vmatprep.subr.bf16.mxu0 %v11679_v22  ;;  %v11671_v30 = vcombine.high %v235_v25, %v239_v27  ;;  %v225_v31 = vld [vmem:[#allocation9 + $0x100] sm:$0xff]  ;;  %v227_v33 = vld [vmem:[#allocation9 + $0x110] sm:$0xff]  ;;  %v11666_v35 = vcombine.low %v233_v23, %v237_v24  ;;  %v234_v22 = vld [vmem:[#allocation9 + $0x148] sm:$0xff] }
  0x5c   :  { %v229_v32 = vld [vmem:[#allocation9 + $0x120] sm:$0xff]  ;;  %v231_v34 = vld [vmem:[#allocation9 + $0x130] sm:$0xff]  ;;  %v11670_v36 = vcombine.low %v235_v25, %v239_v27  ;;  %v11677_v20 = vcombine.high %v242_v14, %v246_v16  ;;  %v238_v23 = vld [vmem:[#allocation9 + $0x168] sm:$0xff]  ;;  %v11676_v24 = vcombine.low %v242_v14, %v246_v16 }
  0x5d   :  { %v11659_v37 = vcombine.high %v225_v31, %v229_v32  ;;  %v11663_v38 = vcombine.high %v227_v33, %v231_v34  ;;  %v217_v39 = vld [vmem:[#allocation9 + $0xc0] sm:$0xff]  ;;  %v219_v41 = vld [vmem:[#allocation9 + $0xd0] sm:$0xff]  ;;  %v11658_v43 = vcombine.low %v225_v31, %v229_v32  ;;  %v11662_v45 = vcombine.low %v227_v33, %v231_v34  ;;  %v240_v7 = vld [vmem:[#allocation9 + $0x178] sm:$0xff] }
  0x5e   :  { %646 = vmatpush1.bf16.msra.mxu1 %v11674_v26  ;;  %792 = vmatpush1.bf16.msra.mxu0 %v11678_v28  ;;  %v221_v40 = vld [vmem:[#allocation9 + $0xe0] sm:$0xff]  ;;  %v223_v42 = vld [vmem:[#allocation9 + $0xf0] sm:$0xff]  ;;  %v11669_v26 = vcombine.high %v234_v22, %v238_v23  ;;  %v226_v28 = vld [vmem:[#allocation9 + $0x108] sm:$0xff]  ;;  %v11668_v31 = vcombine.low %v234_v22, %v238_v23 }
  0x5f   :  { %647 = vmatprep.subr.bf16.mxu1 %v11667_v29  ;;  %793 = vmatprep.subr.bf16.mxu0 %v11671_v30  ;;  %v14571_v44 = vld [vmem:[%s17895_s10] sm:$0xf]  ;;  %v11651_v46 = vcombine.high %v217_v39, %v221_v40  ;;  %v11655_v47 = vcombine.high %v219_v41, %v223_v42  ;;  %v211_v50 = vld [vmem:[#allocation9 + $0x90] sm:$0xff]  ;;  %v11650_v52 = vcombine.low %v217_v39, %v221_v40  ;;  %v230_v29 = vld [vmem:[#allocation9 + $0x128] sm:$0xff] }
  0x60   :  { %18324 = vst [vmem:[#allocation32_spill] sm:$0xff] %v14571_v44  ;;  %v209_v48 = vld [vmem:[#allocation9 + $0x80] sm:$0xff]  ;;  %v215_v51 = vld [vmem:[#allocation9 + $0xb0] sm:$0xff]  ;;  %v11654_v53 = vcombine.low %v219_v41, %v223_v42  ;;  %v14588_v30 = vld [vmem:[%s17885_s0 + $0x8] sm:$0xff]   ;;  %v11661_v33 = vcombine.high %v226_v28, %v230_v29 }
  0x61   :  { %v213_v49 = vld [vmem:[#allocation9 + $0xa0] sm:$0xff]  ;;  %v11647_v56 = vcombine.high %v211_v50, %v215_v51  ;;  %v203_v58 = vld [vmem:[#allocation9 + $0x50] sm:$0xff]  ;;  %v11646_v61 = vcombine.low %v211_v50, %v215_v51  ;;  %v210_v41 = vld [vmem:[#allocation9 + $0x88] sm:$0xff] }
  0x62   :  { %648 = vmatpush1.bf16.msra.mxu1 %v11666_v35  ;;  %794 = vmatpush1.bf16.msra.mxu0 %v11670_v36  ;;  %v11643_v54 = vcombine.high %v209_v48, %v213_v49  ;;  %v201_v55 = vld [vmem:[#allocation9 + $0x40] sm:$0xff]  ;;  %v207_v59 = vld [vmem:[#allocation9 + $0x70] sm:$0xff]  ;;  %v11642_v60 = vcombine.low %v209_v48, %v213_v49  ;;  %v218_v35 = vld [vmem:[#allocation9 + $0xc8] sm:$0xff] }
  0x63   :  { %649 = vmatprep.subr.bf16.mxu1 %v11659_v37  ;;  %795 = vmatprep.subr.bf16.mxu0 %v11663_v38  ;;  %v205_v57 = vld [vmem:[#allocation9 + $0x60] sm:$0xff]  ;;  %v11639_v63 = vcombine.high %v203_v58, %v207_v59  ;;  %v195_v2 = vld [vmem:[#allocation9 + $0x10] sm:$0xff]  ;;  %v11638_v5 = vcombine.low %v203_v58, %v207_v59  ;;  %v222_v36 = vld [vmem:[#allocation9 + $0xe8] sm:$0xff]  ;;  %v11660_v37 = vcombine.low %v226_v28, %v230_v29 }
  0x64   :  { %v11635_v62 = vcombine.high %v201_v55, %v205_v57  ;;  %v193_v0 = vld [vmem:[#allocation9] sm:$0xff]  ;;  %v199_v3 = vld [vmem:[#allocation9 + $0x30] sm:$0xff]  ;;  %v11634_v4 = vcombine.low %v201_v55, %v205_v57  ;;  %v11653_v39 = vcombine.high %v218_v35, %v222_v36  ;;  %v214_v42 = vld [vmem:[#allocation9 + $0xa8] sm:$0xff] }
  0x65   :  { %v197_v1 = vld [vmem:[#allocation9 + $0x20] sm:$0xff]  ;;  %v11631_v8 = vcombine.high %v195_v2, %v199_v3  ;;  %v11630_v11 = vcombine.low %v195_v2, %v199_v3  ;;  %v202_v48 = vld [vmem:[#allocation9 + $0x48] sm:$0xff]  ;;  %v11645_v50 = vcombine.high %v210_v41, %v214_v42  ;;  %v244_v2 = vld [vmem:[#allocation9 + $0x198] sm:$0xff] }
  0x66   :  { %650 = vmatpush1.bf16.msra.mxu1 %v11658_v43  ;;  %796 = vmatpush1.bf16.msra.mxu0 %v11662_v45  ;;  %v11627_v6 = vcombine.high %v193_v0, %v197_v1  ;;  %v11626_v10 = vcombine.low %v193_v0, %v197_v1  ;;  %v14573_v13 = vld [vmem:[#allocation11 + $0xe4] ss:$16 sps:$4 sm:$0xff]   ;;  %v12782_v19 = vld [vmem:[#allocation11 + $0xe0] ss:$16 sps:$4 sm:$0xff]   ;;  %v206_v49 = vld [vmem:[#allocation9 + $0x68] sm:$0xff] }
  0x67   :  { %651 = vmatprep.subr.bf16.mxu1 %v11651_v46  ;;  %797 = vmatprep.subr.bf16.mxu0 %v11655_v47  ;;  %v14578_v17 = vld [vmem:[%s17885_s0] sm:$0xff]   ;;  %v14597_v43 = vld [vmem:[%s17885_s0 + $0x10] sm:$0xff]   ;;  %v11652_v46 = vcombine.low %v218_v35, %v222_v36  ;;  %v198_v55 = vld [vmem:[#allocation9 + $0x28] sm:$0xff]  ;;  %v11637_v57 = vcombine.high %v202_v48, %v206_v49  ;;  %v11636_v59 = vcombine.low %v202_v48, %v206_v49 }
  0x68   :  { %v12783_v21 = vld [vmem:[#allocation11 + $0xc4] ss:$16 sps:$4 sm:$0xff]   ;;  %v12785_v25 = vld [vmem:[#allocation11 + $0xc0] ss:$16 sps:$4 sm:$0xff]   ;;  %v248_v3 = vld [vmem:[#allocation9 + $0x1b8] sm:$0xff] }
  0x69   :  { %v12787_v27 = vld [vmem:[#allocation11 + $0xa4] ss:$16 sps:$4 sm:$0xff]   ;;  %v12789_v32 = vld [vmem:[#allocation11 + $0xa0] ss:$16 sps:$4 sm:$0xff]   ;;  %v11680_v9 = vcombine.low %v244_v2, %v248_v3  ;;  %v212_v22 = vld [vmem:[#allocation9 + $0x98] sm:$0xff] }
  0x6a   :  { %652 = vmatpush1.bf16.msra.mxu1 %v11650_v52  ;;  %798 = vmatpush1.bf16.msra.mxu0 %v11654_v53  ;;  %v12790_v34 = vld [vmem:[#allocation11 + $0x84] ss:$16 sps:$4 sm:$0xff]   ;;  %v12792_v38 = vld [vmem:[#allocation11 + $0x80] ss:$16 sps:$4 sm:$0xff]   ;;  %v11644_v52 = vcombine.low %v210_v41, %v214_v42  ;;  %v216_v23 = vld [vmem:[#allocation9 + $0xb8] sm:$0xff] }
  0x6b   :  { %653 = vmatprep.subr.bf16.mxu1 %v11643_v54  ;;  %799 = vmatprep.subr.bf16.mxu0 %v11647_v56  ;;  %v12794_v40 = vld [vmem:[#allocation11 + $0x64] ss:$16 sps:$4 sm:$0xff]   ;;  %v12796_v45 = vld [vmem:[#allocation11 + $0x60] ss:$16 sps:$4 sm:$0xff]   ;;  %v194_v54 = vld [vmem:[#allocation9 + $0x8] sm:$0xff]  ;;  %v11648_v28 = vcombine.low %v212_v22, %v216_v23 }
  0x6c   :  { %v12797_v47 = vld [vmem:[#allocation11 + $0x44] ss:$16 sps:$4 sm:$0xff]   ;;  %v12799_v51 = vld [vmem:[#allocation11 + $0x40] ss:$16 sps:$4 sm:$0xff]   ;;  %v14604_v56 = vld [vmem:[%s17885_s0 + $0x18] sm:$0xff]   ;;  %v11628_v1 = vcombine.low %v194_v54, %v198_v55 }
  0x6d   :  { %v12801_v53 = vld [vmem:[#allocation11 + $0x24] ss:$16 sps:$4 sm:$0xff]   ;;  %v12803_v58 = vld [vmem:[#allocation11 + $0x20] ss:$16 sps:$4 sm:$0xff]   ;;  %v14622_v36 = vld [vmem:[#allocation11 + $0xec] ss:$16 sps:$4 sm:$0xff]  }
  0x6e   :  { %654 = vmatpush1.bf16.msra.mxu1 %v11642_v60  ;;  %800 = vmatpush1.bf16.msra.mxu0 %v11646_v61  ;;  %v12804_v60 = vld [vmem:[#allocation11 + $0x4] ss:$16 sps:$4 sm:$0xff]   ;;  %v252_v61 = vld [vmem:[#allocation9 + $0x1d8] sm:$0xff]  ;;  %v12806_v0 = vld [vmem:[#allocation11] ss:$16 sps:$4 sm:$0xff]  }
  0x6f   :  { %655 = vmatprep.subr.bf16.mxu1 %v11635_v62  ;;  %801 = vmatprep.subr.bf16.mxu0 %v11639_v63  ;;  %v256_v62 = vld [vmem:[#allocation9 + $0x1f8] sm:$0xff]  ;;  %v11629_v63 = vcombine.high %v194_v54, %v198_v55  ;;  %v14688_v54 = vld [vmem:[#allocation14 + $0xc4] ss:$16 sps:$4 sm:$0xff]  }
  0x70   :  { %v14638_v41 = vld [vmem:[#allocation11 + $0xa8] ss:$16 sps:$4 sm:$0xff]   ;;  %v14641_v42 = vld [vmem:[#allocation11 + $0x8c] ss:$16 sps:$4 sm:$0xff]  }
  0x71   :  { %v14663_v48 = vld [vmem:[#allocation11 + $0x2c] ss:$16 sps:$4 sm:$0xff]   ;;  %v14666_v49 = vld [vmem:[#allocation11 + $0x28] ss:$16 sps:$4 sm:$0xff]  }
  0x72   :  { %656 = vmatpush1.bf16.msra.mxu1 %v11634_v4  ;;  %802 = vmatpush1.bf16.msra.mxu0 %v11638_v5  ;;  %v11689_v4 = vcombine.high %v252_v61, %v256_v62  ;;  %v11688_v5 = vcombine.low %v252_v61, %v256_v62  ;;  %v14690_v55 = vld [vmem:[#allocation14 + $0xe8] ss:$16 sps:$4 sm:$0xff]   ;;  %v14710_v61 = vld [vmem:[#allocation14 + $0xac] ss:$16 sps:$4 sm:$0xff]   ;;  %v14712_v62 = vld [vmem:[#allocation14 + $0x84] ss:$16 sps:$4 sm:$0xff]  }
  0x73   :  { %657 = vmatprep.subr.bf16.mxu1 %v11627_v6  ;;  %803 = vmatprep.subr.bf16.mxu0 %v11631_v8  ;;  %v236_v6 = vld [vmem:[#allocation9 + $0x158] sm:$0xff]  ;;  %v11681_v8 = vcombine.high %v244_v2, %v248_v3  ;;  %v14724_v2 = vld [vmem:[#allocation14 + $0x64] ss:$16 sps:$4 sm:$0xff]  }
  0x74   :  { %v11672_v14 = vcombine.low %v236_v6, %v240_v7  ;;  %v14726_v3 = vld [vmem:[#allocation14 + $0x88] ss:$16 sps:$4 sm:$0xff]   ;;  %v14818_v44 = vld [vmem:[#allocation13 + $0x8c] ss:$16 sps:$4 sm:$0xff]  }
  0x75   :  { %18350 = vst [vmem:[#allocation58_spill] sm:$0xff] %v14818_v44 }
  0x76   :  { %658 = vmatpush1.bf16.msra.mxu1 %v11626_v10  ;;  %804 = vmatpush1.bf16.msra.mxu0 %v11630_v11  ;;  %v11673_v10 = vcombine.high %v236_v6, %v240_v7  ;;  %v228_v11 = vld [vmem:[#allocation9 + $0x118] sm:$0xff]  ;;  %v14736_v6 = vld [vmem:[#allocation14 + $0x44] ss:$16 sps:$4 sm:$0xff]  }
  0x77   :  { %716 = vmatprep.subr.bf16.mxu1 %v11685_v12  ;;  %1362 = vmatprep.subr.bf16.mxu0 %v14573_v13  ;;  %v232_v12 = vld [vmem:[#allocation9 + $0x138] sm:$0xff]  ;;  %18325 = vst [vmem:[#allocation33_spill] sm:$0xff] %v14736_v6 }
  0x78   :  { %v11665_v16 = vcombine.high %v228_v11, %v232_v12  ;;  %v14738_v7 = vld [vmem:[#allocation14 + $0x68] ss:$16 sps:$4 sm:$0xff]  }
  0x79   :  { %676 = vmatmul.mubr.bf16.vlgmr.msra.gmra.mxu1 %v14578_v17  ;;  %822 = vmatmul.mubr.bf16.vlgmr.msra.gmra.mxu0 %v14578_v17 }
  0x7a   :  { %717 = vmatpush1.bf16.msra.mxu1 %v11684_v18  ;;  %1363 = vmatpush1.bf16.msra.mxu0 %v12782_v19  ;;  %v220_v18 = vld [vmem:[#allocation9 + $0xd8] sm:$0xff] }
  0x7b   :  { %718 = vmatprep.subr.bf16.mxu1 %v11677_v20  ;;  %1364 = vmatprep.subr.bf16.mxu0 %v12783_v21  ;;  %v224_v19 = vld [vmem:[#allocation9 + $0xf8] sm:$0xff]  ;;  %v11664_v20 = vcombine.low %v228_v11, %v232_v12  ;;  %v14752_v12 = vld [vmem:[#allocation14 + $0x20] ss:$16 sps:$4 sm:$0xff]  }
  0x7c   :  { %685 = vmatprep.mubr.bf16.mxu1 %v17899_v15  ;;  %831 = vmatprep.mubr.bf16.mxu0 %v17899_v15  ;;  %v11657_v21 = vcombine.high %v220_v18, %v224_v19  ;;  %v14750_v11 = vld [vmem:[#allocation14 + $0x48] ss:$16 sps:$4 sm:$0xff]   ;;  %18330 = vst [vmem:[#allocation38_spill] sm:$0xff] %v14752_v12 }
  0x7d   :  { %18329 = vst [vmem:[#allocation37_spill] sm:$0xff] %v14750_v11 }
  0x7e   :  { %719 = vmatpush1.bf16.msra.mxu1 %v11676_v24  ;;  %1365 = vmatpush1.bf16.msra.mxu0 %v12785_v25  ;;  %v11656_v24 = vcombine.low %v220_v18, %v224_v19  ;;  %v11649_v25 = vcombine.high %v212_v22, %v216_v23  ;;  %v14762_v18 = vld [vmem:[#allocation14 + $0x28] ss:$16 sps:$4 sm:$0xff]   ;;  %v14764_v19 = vld [vmem:[#allocation14] ss:$16 sps:$4 sm:$0xff]   ;;  %v14778_v22 = vld [vmem:[#allocation13 + $0xe4] ss:$16 sps:$4 sm:$0xff]  }
  0x7f   :  { %720 = vmatprep.subr.bf16.mxu1 %v11669_v26  ;;  %1366 = vmatprep.subr.bf16.mxu0 %v12787_v27  ;;  %v204_v26 = vld [vmem:[#allocation9 + $0x58] sm:$0xff]  ;;  %18333 = vst [vmem:[#allocation41_spill] sm:$0xff] %v14762_v18  ;;  %18334 = vst [vmem:[#allocation42_spill] sm:$0xff] %v14764_v19 }
  0x80   :  { %v208_v27 = vld [vmem:[#allocation9 + $0x78] sm:$0xff]  ;;  %18337 = vst [vmem:[#allocation45_spill] sm:$0xff] %v14778_v22 }
  0x81   :  { %686 = vmatmul.mubr.bf16.gmra.mxu1 %v14588_v30  ;;  %832 = vmatmul.mubr.bf16.gmra.mxu0 %v14588_v30  ;;  %v11641_v29 = vcombine.high %v204_v26, %v208_v27  ;;  %v14780_v23 = vld [vmem:[#allocation13 + $0xec] ss:$16 sps:$4 sm:$0xff]  }
  0x82   :  { %721 = vmatpush1.bf16.msra.mxu1 %v11668_v31  ;;  %1367 = vmatpush1.bf16.msra.mxu0 %v12789_v32  ;;  %v196_v31 = vld [vmem:[#allocation9 + $0x18] sm:$0xff]  ;;  %18338 = vst [vmem:[#allocation46_spill] sm:$0xff] %v14780_v23 }
  0x83   :  { %722 = vmatprep.subr.bf16.mxu1 %v11661_v33  ;;  %1368 = vmatprep.subr.bf16.mxu0 %v12790_v34  ;;  %v200_v32 = vld [vmem:[#allocation9 + $0x38] sm:$0xff]  ;;  %v11640_v33 = vcombine.low %v204_v26, %v208_v27  ;;  %v14791_v26 = vld [vmem:[#allocation13 + $0xc4] ss:$16 sps:$4 sm:$0xff]  }
  0x84   :  { %695 = vmatprep.mubr.bf16.mxu1 %v17899_v15  ;;  %841 = vmatprep.mubr.bf16.mxu0 %v17899_v15  ;;  %v11633_v34 = vcombine.high %v196_v31, %v200_v32  ;;  %v11632_v35 = vcombine.low %v196_v31, %v200_v32  ;;  %18341 = vst [vmem:[#allocation49_spill] sm:$0xff] %v14791_v26  ;;  %v14793_v27 = vld [vmem:[#allocation13 + $0xcc] ss:$16 sps:$4 sm:$0xff]   ;;  %v14804_v31 = vld [vmem:[#allocation13 + $0xa4] ss:$16 sps:$4 sm:$0xff]  }
  0x85   :  { %18342 = vst [vmem:[#allocation50_spill] sm:$0xff] %v14793_v27  ;;  %18345 = vst [vmem:[#allocation53_spill] sm:$0xff] %v14804_v31  ;;  %v14806_v32 = vld [vmem:[#allocation13 + $0xac] ss:$16 sps:$4 sm:$0xff]  }
  0x86   :  { %723 = vmatpush1.bf16.msra.mxu1 %v11660_v37  ;;  %1369 = vmatpush1.bf16.msra.mxu0 %v12792_v38  ;;  %v14624_v37 = vld [vmem:[#allocation11 + $0xe8] ss:$16 sps:$4 sm:$0xff]   ;;  %v14627_v38 = vld [vmem:[#allocation11 + $0xcc] ss:$16 sps:$4 sm:$0xff]   ;;  %18346 = vst [vmem:[#allocation54_spill] sm:$0xff] %v14806_v32 }
  0x87   :  { %724 = vmatprep.subr.bf16.mxu1 %v11653_v39  ;;  %1370 = vmatprep.subr.bf16.mxu0 %v12794_v40  ;;  %v14631_v39 = vld [vmem:[#allocation11 + $0xc8] ss:$16 sps:$4 sm:$0xff]   ;;  %v14635_v40 = vld [vmem:[#allocation11 + $0xac] ss:$16 sps:$4 sm:$0xff]  }
  0x89   :  { %696 = vmatmul.mubr.bf16.gmra.mxu1 %v14597_v43  ;;  %842 = vmatmul.mubr.bf16.gmra.mxu0 %v14597_v43 }
  0x8a   :  { %725 = vmatpush1.bf16.msra.mxu1 %v11652_v46  ;;  %1371 = vmatpush1.bf16.msra.mxu0 %v12796_v45  ;;  %v14649_v45 = vld [vmem:[#allocation11 + $0x6c] ss:$16 sps:$4 sm:$0xff]   ;;  %v14652_v46 = vld [vmem:[#allocation11 + $0x68] ss:$16 sps:$4 sm:$0xff]  }
  0x8b   :  { %726 = vmatprep.subr.bf16.mxu1 %v11645_v50  ;;  %1372 = vmatprep.subr.bf16.mxu0 %v12797_v47  ;;  %v14655_v47 = vld [vmem:[#allocation11 + $0x4c] ss:$16 sps:$4 sm:$0xff]  }
  0x8c   :  { %705 = vmatprep.mubr.bf16.mxu1 %v17899_v15  ;;  %851 = vmatprep.mubr.bf16.mxu0 %v17899_v15  ;;  %v14669_v50 = vld [vmem:[#allocation11 + $0xc] ss:$16 sps:$4 sm:$0xff]  }
  0x8e   :  { %727 = vmatpush1.bf16.msra.mxu1 %v11644_v52  ;;  %1373 = vmatpush1.bf16.msra.mxu0 %v12799_v51  ;;  %v14680_v51 = vld [vmem:[#allocation14 + $0xe4] ss:$16 sps:$4 sm:$0xff]   ;;  %v14682_v52 = vld [vmem:[#allocation14 + $0xe0] ss:$16 sps:$4 sm:$0xff]  }
  0x8f   :  { %728 = vmatprep.subr.bf16.mxu1 %v11637_v57  ;;  %1374 = vmatprep.subr.bf16.mxu0 %v12801_v53  ;;  %v14686_v53 = vld [vmem:[#allocation14 + $0xec] ss:$16 sps:$4 sm:$0xff]  }
  0x90   :  { %v14698_v57 = vld [vmem:[#allocation14 + $0xcc] ss:$16 sps:$4 sm:$0xff]  }
  0x91   :  { %706 = vmatmul.mubr.bf16.gmra.mxu1 %v14604_v56  ;;  %852 = vmatmul.mubr.bf16.gmra.mxu0 %v14604_v56 }
  0x92   :  { %729 = vmatpush1.bf16.msra.mxu1 %v11636_v59  ;;  %1375 = vmatpush1.bf16.msra.mxu0 %v12803_v58  ;;  %v14700_v58 = vld [vmem:[#allocation14 + $0xa4] ss:$16 sps:$4 sm:$0xff]   ;;  %v14702_v59 = vld [vmem:[#allocation14 + $0xc8] ss:$16 sps:$4 sm:$0xff]  }
  0x93   :  { %730 = vmatprep.subr.bf16.mxu1 %v11629_v63  ;;  %1376 = vmatprep.subr.bf16.mxu0 %v12804_v60  ;;  %v14704_v60 = vld [vmem:[#allocation14 + $0xa0] ss:$16 sps:$4 sm:$0xff]   ;;  %v14714_v63 = vld [vmem:[#allocation14 + $0xa8] ss:$16 sps:$4 sm:$0xff]  }
  0x94   :  { %748 = vmatprep.mubr.bf16.mxu1 %v17899_v15  ;;  %1394 = vmatprep.mubr.bf16.mxu0 %v17899_v15 }
  0x96   :  { %731 = vmatpush1.bf16.msra.mxu1 %v11628_v1  ;;  %1377 = vmatpush1.bf16.msra.mxu0 %v12806_v0  ;;  %v14716_v0 = vld [vmem:[#allocation14 + $0x80] ss:$16 sps:$4 sm:$0xff]   ;;  %v14722_v1 = vld [vmem:[#allocation14 + $0x8c] ss:$16 sps:$4 sm:$0xff]  }
  0x97   :  { %862 = vmatprep.subr.bf16.mxu1 %v11689_v4  ;;  %1697 = vmatprep.subr.bf16.mxu0 %v14680_v51  ;;  %v14728_v4 = vld [vmem:[#allocation14 + $0x60] ss:$16 sps:$4 sm:$0xff]  }
  0x99   :  { %749 = vmatmul.mubr.bf16.vlgmr.msra.gmra.mxu1 %v14578_v17  ;;  %1395 = vmatmul.mubr.bf16.vlgmr.msra.gmra.mxu0 %v17899_v15 }
  0x9a   :  { %863 = vmatpush1.bf16.msra.mxu1 %v11688_v5  ;;  %758 = vmatprep.mubr.bf16.mxu1 %v17899_v15  ;;  %v14734_v5 = vld [vmem:[#allocation14 + $0x6c] ss:$16 sps:$4 sm:$0xff]  }
  0x9b   :  { %864 = vmatprep.subr.bf16.mxu1 %v11681_v8  ;;  %1729 = vmatprep.mubr.bf16.mxu0 %v17899_v15  ;;  %v14740_v8 = vld [vmem:[#allocation14 + $0x40] ss:$16 sps:$4 sm:$0xff]  }
  0x9c   :  { %1698 = vmatpush1.bf16.msra.mxu0 %v14682_v52  ;;  %18326 = vst [vmem:[#allocation34_spill] sm:$0xff] %v14740_v8 }
  0x9d   :  { %1699 = vmatprep.subr.bf16.mxu0 %v14688_v54 }
  0x9e   :  { %865 = vmatpush1.bf16.msra.mxu1 %v11680_v9  ;;  %v14746_v9 = vld [vmem:[#allocation14 + $0x4c] ss:$16 sps:$4 sm:$0xff]  }
  0x9f   :  { %866 = vmatprep.subr.bf16.mxu1 %v11673_v10  ;;  %18327 = vst [vmem:[#allocation35_spill] sm:$0xff] %v14746_v9  ;;  %v14748_v10 = vld [vmem:[#allocation14 + $0x24] ss:$16 sps:$4 sm:$0xff]  }
  0xa0   :  { %18328 = vst [vmem:[#allocation36_spill] sm:$0xff] %v14748_v10 }
  0xa1   :  { %759 = vmatmul.mubr.bf16.gmra.mxu1 %v14588_v30 }
  0xa2   :  { %867 = vmatpush1.bf16.msra.mxu1 %v11672_v14  ;;  %768 = vmatprep.mubr.bf16.mxu1 %v17899_v15  ;;  %v14758_v14 = vld [vmem:[#allocation14 + $0x2c] ss:$16 sps:$4 sm:$0xff]  }
  0xa3   :  { %868 = vmatprep.subr.bf16.mxu1 %v11665_v16  ;;  %18331 = vst [vmem:[#allocation39_spill] sm:$0xff] %v14758_v14  ;;  %v14760_v16 = vld [vmem:[#allocation14 + $0x4] ss:$16 sps:$4 sm:$0xff]  }
  0xa4   :  { %18332 = vst [vmem:[#allocation40_spill] sm:$0xff] %v14760_v16 }
  0xa6   :  { %869 = vmatpush1.bf16.msra.mxu1 %v11664_v20  ;;  %v14770_v20 = vld [vmem:[#allocation14 + $0xc] ss:$16 sps:$4 sm:$0xff]  }
  0xa7   :  { %870 = vmatprep.subr.bf16.mxu1 %v11657_v21  ;;  %18335 = vst [vmem:[#allocation43_spill] sm:$0xff] %v14770_v20  ;;  %v14772_v21 = vld [vmem:[#allocation14 + $0x8] ss:$16 sps:$4 sm:$0xff]  }
  0xa8   :  { %18336 = vst [vmem:[#allocation44_spill] sm:$0xff] %v14772_v21 }
  0xa9   :  { %769 = vmatmul.mubr.bf16.gmra.mxu1 %v14597_v43 }
  0xaa   :  { %871 = vmatpush1.bf16.msra.mxu1 %v11656_v24  ;;  %778 = vmatprep.mubr.bf16.mxu1 %v17899_v15  ;;  %v14782_v24 = vld [vmem:[#allocation13 + $0xe0] ss:$16 sps:$4 sm:$0xff]  }
  0xab   :  { %872 = vmatprep.subr.bf16.mxu1 %v11649_v25  ;;  %18339 = vst [vmem:[#allocation47_spill] sm:$0xff] %v14782_v24  ;;  %v14784_v25 = vld [vmem:[#allocation13 + $0xe8] ss:$16 sps:$4 sm:$0xff]  }
  0xac   :  { %18340 = vst [vmem:[#allocation48_spill] sm:$0xff] %v14784_v25 }
  0xae   :  { %873 = vmatpush1.bf16.msra.mxu1 %v11648_v28  ;;  %v14796_v28 = vld [vmem:[#allocation13 + $0xc0] ss:$16 sps:$4 sm:$0xff]  }
  0xaf   :  { %874 = vmatprep.subr.bf16.mxu1 %v11641_v29  ;;  %18343 = vst [vmem:[#allocation51_spill] sm:$0xff] %v14796_v28  ;;  %v14798_v29 = vld [vmem:[#allocation13 + $0xc8] ss:$16 sps:$4 sm:$0xff]  }
  0xb0   :  { %18344 = vst [vmem:[#allocation52_spill] sm:$0xff] %v14798_v29 }
  0xb1   :  { %779 = vmatmul.mubr.bf16.gmra.mxu1 %v14604_v56 }
  0xb2   :  { %875 = vmatpush1.bf16.msra.mxu1 %v11640_v33  ;;  %894 = vmatprep.mubr.bf16.mxu1 %v17899_v15  ;;  %v14808_v33 = vld [vmem:[#allocation13 + $0xa0] ss:$16 sps:$4 sm:$0xff]  }
  0xb3   :  { %876 = vmatprep.subr.bf16.mxu1 %v11633_v34  ;;  %18347 = vst [vmem:[#allocation55_spill] sm:$0xff] %v14808_v33  ;;  %v14810_v34 = vld [vmem:[#allocation13 + $0xa8] ss:$16 sps:$4 sm:$0xff]  }
  0xb4   :  { %18348 = vst [vmem:[#allocation56_spill] sm:$0xff] %v14810_v34 }
  0xb6   :  { %877 = vmatpush1.bf16.msra.mxu1 %v11632_v35  ;;  %v259_v35 = vlaneseq }
  0xb7   :  { %1403 = vmatprep.subr.bf16.mxu1 %v14622_v36 }
  0xb9   :  { %895 = vmatmul.mubr.bf16.vlgmr.msra.gmra.mxu1 %v14578_v17  ;;  %v14645_v17 = vld [vmem:[#allocation11 + $0x88] ss:$16 sps:$4 sm:$0xff]  }
  0xba   :  { %1404 = vmatpush1.bf16.msra.mxu1 %v14624_v37  ;;  %904 = vmatprep.mubr.bf16.mxu1 %v17899_v15 }
  0xbb   :  { %1405 = vmatprep.subr.bf16.mxu1 %v14627_v38 }
  0xbe   :  { %1406 = vmatpush1.bf16.msra.mxu1 %v14631_v39 }
  0xbf   :  { %1407 = vmatprep.subr.bf16.mxu1 %v14635_v40 }
  0xc1   :  { %905 = vmatmul.mubr.bf16.gmra.mxu1 %v14588_v30  ;;  %v14659_v30 = vld [vmem:[#allocation11 + $0x48] ss:$16 sps:$4 sm:$0xff]  }
  0xc2   :  { %1408 = vmatpush1.bf16.msra.mxu1 %v14638_v41  ;;  %914 = vmatprep.mubr.bf16.mxu1 %v17899_v15 }
  0xc3   :  { %1409 = vmatprep.subr.bf16.mxu1 %v14641_v42 }
  0xc6   :  { %1410 = vmatpush1.bf16.msra.mxu1 %v14645_v17 }
  0xc7   :  { %1411 = vmatprep.subr.bf16.mxu1 %v14649_v45 }
  0xc9   :  { %915 = vmatmul.mubr.bf16.gmra.mxu1 %v14597_v43  ;;  %v14673_v43 = vld [vmem:[#allocation11 + $0x8] ss:$16 sps:$4 sm:$0xff]  }
  0xca   :  { %1412 = vmatpush1.bf16.msra.mxu1 %v14652_v46  ;;  %924 = vmatprep.mubr.bf16.mxu1 %v17899_v15 }
  0xcb   :  { %1413 = vmatprep.subr.bf16.mxu1 %v14655_v47 }
  0xce   :  { %1414 = vmatpush1.bf16.msra.mxu1 %v14659_v30 }
  0xcf   :  { %1415 = vmatprep.subr.bf16.mxu1 %v14663_v48 }
  0xd1   :  { %925 = vmatmul.mubr.bf16.gmra.mxu1 %v14604_v56  ;;  %v14692_v56 = vld [vmem:[#allocation14 + $0xc0] ss:$16 sps:$4 sm:$0xff]  }
  0xd2   :  { %1416 = vmatpush1.bf16.msra.mxu1 %v14666_v49  ;;  %1435 = vmatprep.mubr.bf16.mxu1 %v17899_v15 }
  0xd3   :  { %1417 = vmatprep.subr.bf16.mxu1 %v14669_v50  ;;  %1700 = vmatpush1.bf16.msra.mxu0 %v14692_v56 }
  0xd4   :  { %1701 = vmatprep.subr.bf16.mxu0 %v14700_v58 }
  0xd6   :  { %1418 = vmatpush1.bf16.msra.mxu1 %v14673_v43 }
  0xd7   :  { %1738 = vmatprep.subr.bf16.mxu1 %v14686_v53  ;;  %1702 = vmatpush1.bf16.msra.mxu0 %v14704_v60 }
  0xd8   :  { %1703 = vmatprep.subr.bf16.mxu0 %v14712_v62 }
  0xd9   :  { %1436 = vmatmul.mubr.bf16.vlgmr.msra.gmra.mxu1 %v17899_v15 }
  0xda   :  { %1770 = vmatprep.mubr.bf16.mxu1 %v17899_v15  ;;  %1739 = vmatpush1.bf16.msra.mxu1 %v14690_v55 }
  0xdb   :  { %1740 = vmatprep.subr.bf16.mxu1 %v14698_v57  ;;  %1704 = vmatpush1.bf16.msra.mxu0 %v14716_v0 }
  0xdc   :  { %1705 = vmatprep.subr.bf16.mxu0 %v14724_v2 }
  0xde   :  { %1741 = vmatpush1.bf16.msra.mxu1 %v14702_v59 }
  0xdf   :  { %1742 = vmatprep.subr.bf16.mxu1 %v14710_v61  ;;  %1706 = vmatpush1.bf16.msra.mxu0 %v14728_v4 }
  0xe0   :  { %1707 = vmatprep.subr.bf16.mxu0 %v14736_v6 }
  0xe2   :  { %1743 = vmatpush1.bf16.msra.mxu1 %v14714_v63 }
  0xe3   :  { %1744 = vmatprep.subr.bf16.mxu1 %v14722_v1  ;;  %1708 = vmatpush1.bf16.msra.mxu0 %v14740_v8 }
  0xe4   :  { %1709 = vmatprep.subr.bf16.mxu0 %v14748_v10 }
  0xe6   :  { %1745 = vmatpush1.bf16.msra.mxu1 %v14726_v3 }
  0xe7   :  { %1746 = vmatprep.subr.bf16.mxu1 %v14734_v5  ;;  %1710 = vmatpush1.bf16.msra.mxu0 %v14752_v12 }
  0xe8   :  { %1711 = vmatprep.subr.bf16.mxu0 %v14760_v16 }
  0xea   :  { %1747 = vmatpush1.bf16.msra.mxu1 %v14738_v7 }
  0xeb   :  { %1748 = vmatprep.subr.bf16.mxu1 %v14746_v9  ;;  %1712 = vmatpush1.bf16.msra.mxu0 %v14764_v19 }
  0xec   :  { %1939 = vmatprep.subr.bf16.mxu0 %v14778_v22 }
  0xee   :  { %1749 = vmatpush1.bf16.msra.mxu1 %v14750_v11  ;;  %1730 = vmatmul.mubr.bf16.vlgmr.msra.gmra.mxu0 %v17899_v15 }
  0xef   :  { %1750 = vmatprep.subr.bf16.mxu1 %v14758_v14  ;;  %1971 = vmatprep.mubr.bf16.mxu0 %v17899_v15 }
  0xf0   :  { %1940 = vmatpush1.bf16.msra.mxu0 %v14782_v24  ;;  %v14867_v24 = vld [vmem:[#allocation13 + $0x2c] ss:$16 sps:$4 sm:$0xff]  }
  0xf1   :  { %1941 = vmatprep.subr.bf16.mxu0 %v14791_v26  ;;  %v14838_v26 = vld [vmem:[#allocation13 + $0x44] ss:$16 sps:$4 sm:$0xff]   ;;  %18364 = vst [vmem:[#allocation72_spill] sm:$0xff] %v14867_v24 }
  0xf2   :  { %1751 = vmatpush1.bf16.msra.mxu1 %v14762_v18  ;;  %18357 = vst [vmem:[#allocation65_spill] sm:$0xff] %v14838_v26 }
  0xf3   :  { %1752 = vmatprep.subr.bf16.mxu1 %v14770_v20 }
  0xf4   :  { %1942 = vmatpush1.bf16.msra.mxu0 %v14796_v28  ;;  %v14822_v28 = vld [vmem:[#allocation13 + $0x88] ss:$16 sps:$4 sm:$0xff]  }
  0xf5   :  { %1943 = vmatprep.subr.bf16.mxu0 %v14804_v31  ;;  %18352 = vst [vmem:[#allocation60_spill] sm:$0xff] %v14822_v28  ;;  %v14826_v31 = vshrl.u32 %v259_v35, 7 }
  0xf6   :  { %1753 = vmatpush1.bf16.msra.mxu1 %v14772_v21 }
  0xf7   :  { %1980 = vmatprep.subr.bf16.mxu1 %v14780_v23  ;;  %v277_v35 = vsub.s32 4, %v14826_v31 }
  0xf8   :  { %1944 = vmatpush1.bf16.msra.mxu0 %v14808_v33  ;;  %v14830_v33 = vld [vmem:[#allocation13 + $0x64] ss:$16 sps:$4 sm:$0xff]  }
  0xf9   :  { %1771 = vmatmul.mubr.bf16.vlgmr.msra.gmra.mxu1 %v17899_v15  ;;  %18353 = vst [vmem:[#allocation61_spill] sm:$0xff] %v14830_v33 }
  0xfa   :  { %1981 = vmatpush1.bf16.msra.mxu1 %v14784_v25  ;;  %2012 = vmatprep.mubr.bf16.mxu1 %v17899_v15  ;;  %v14816_v15 = vld [vmem:[#allocation13 + $0x84] ss:$16 sps:$4 sm:$0xff]   ;;  %v14840_v25 = vld [vmem:[#allocation13 + $0x4c] ss:$16 sps:$4 sm:$0xff]  }
  0xfb   :  { %1982 = vmatprep.subr.bf16.mxu1 %v14793_v27  ;;  %18349 = vst [vmem:[#allocation57_spill] sm:$0xff] %v14816_v15  ;;  %1945 = vmatprep.subr.bf16.mxu0 %v14816_v15  ;;  %v14836_v27 = vld [vmem:[#allocation13 + $0x68] ss:$16 sps:$4 sm:$0xff]   ;;  %18358 = vst [vmem:[#allocation66_spill] sm:$0xff] %v14840_v25 }
  0xfc   :  { %18356 = vst [vmem:[#allocation64_spill] sm:$0xff] %v14836_v27  ;;  %v14856_v15 = vld [vmem:[#allocation13 + $0x48] ss:$16 sps:$4 sm:$0xff]  }
  0xfd   :  { %18362 = vst [vmem:[#allocation70_spill] sm:$0xff] %v14856_v15 }
  0xfe   :  { %1983 = vmatpush1.bf16.msra.mxu1 %v14798_v29  ;;  %v14820_v29 = vld [vmem:[#allocation13 + $0x80] ss:$16 sps:$4 sm:$0xff]  }
  0xff   :  { %1984 = vmatprep.subr.bf16.mxu1 %v14806_v32  ;;  %18351 = vst [vmem:[#allocation59_spill] sm:$0xff] %v14820_v29  ;;  %1946 = vmatpush1.bf16.msra.mxu0 %v14820_v29  ;;  %v14834_v32 = vld [vmem:[#allocation13 + $0x60] ss:$16 sps:$4 sm:$0xff]   ;;  %v14849_v29 = vsub.s32 0, %v14826_v31 }
 0x100   :  { %18355 = vst [vmem:[#allocation63_spill] sm:$0xff] %v14834_v32  ;;  %1947 = vmatprep.subr.bf16.mxu0 %v14830_v33  ;;  %v14858_v33 = vld [vmem:[#allocation13 + $0x24] ss:$16 sps:$4 sm:$0xff]  }
 0x101   :  { %18360 = vst [vmem:[#allocation68_spill] sm:$0xff] %v14849_v29  ;;  %18363 = vst [vmem:[#allocation71_spill] sm:$0xff] %v14858_v33 }
 0x102   :  { %1985 = vmatpush1.bf16.msra.mxu1 %v14810_v34  ;;  %v14832_v34 = vld [vmem:[#allocation13 + $0x6c] ss:$16 sps:$4 sm:$0xff]  }
 0x103   :  { %1986 = vmatprep.subr.bf16.mxu1 %v14818_v44  ;;  %18354 = vst [vmem:[#allocation62_spill] sm:$0xff] %v14832_v34  ;;  %1948 = vmatpush1.bf16.msra.mxu0 %v14834_v32  ;;  %v14852_v44 = vsub.s32 1, %v14826_v31  ;;  %v14863_v32 = vld [vmem:[%s17887_s2] sm:$0xff] }
 0x104   :  { %1949 = vmatprep.subr.bf16.mxu0 %v14838_v26  ;;  %v14870_v23 = vrot.slane %v14863_v32, %v277_v35  ;;  %v14873_v26 = vld [vmem:[#allocation13 + $0x20] ss:$16 sps:$4 sm:$0xff]   ;;  %v14887_v35 = vld [vmem:[#allocation13 + $0x4] ss:$16 sps:$4 sm:$0xff]  }
 0x105   :  { %18361 = vst [vmem:[#allocation69_spill] sm:$0xff] %v14852_v44  ;;  %18365 = vst [vmem:[#allocation73_spill] sm:$0xff] %v14873_v26  ;;  %v14881_v22 = vrot.slane %v14863_v32, %v14852_v44 }
 0x106   :  { %1987 = vmatpush1.bf16.msra.mxu1 %v14822_v28  ;;  %v14846_v28 = vld [vmem:[#allocation13 + $0x40] ss:$16 sps:$4 sm:$0xff]   ;;  %18367 = vst [vmem:[#allocation75_spill] sm:$0xff] %v14887_v35 }
 0x107   :  { %1988 = vmatprep.subr.bf16.mxu1 %v14832_v34  ;;  %18359 = vst [vmem:[#allocation67_spill] sm:$0xff] %v14846_v28  ;;  %v281_v34 = vsub.s32 5, %v14826_v31  ;;  %1950 = vmatpush1.bf16.msra.mxu0 %v14846_v28 }
 0x108   :  { %1951 = vmatprep.subr.bf16.mxu0 %v14858_v33 }
 0x109   :  { %v14890_v28 = vrot.slane %v14863_v32, %v281_v34  ;;  %v14903_v34 = vld [vmem:[#allocation13 + $0x8] ss:$16 sps:$4 sm:$0xff]  }
 0x10a   :  { %1989 = vmatpush1.bf16.msra.mxu1 %v14836_v27  ;;  %v14877_v27 = vrot.slane %v14863_v32, %v14849_v29  ;;  %v14893_v29 = vld [vmem:[#allocation13 + $0xc] ss:$16 sps:$4 sm:$0xff]   ;;  %18370 = vst [vmem:[#allocation78_spill] sm:$0xff] %v14903_v34 }
 0x10b   :  { %1990 = vmatprep.subr.bf16.mxu1 %v14840_v25  ;;  %v14885_v25 = vld [vmem:[#allocation13 + $0x28] ss:$16 sps:$4 sm:$0xff]   ;;  %18368 = vst [vmem:[#allocation76_spill] sm:$0xff] %v14893_v29  ;;  %1952 = vmatpush1.bf16.msra.mxu0 %v14873_v26 }
 0x10c   :  { %18366 = vst [vmem:[#allocation74_spill] sm:$0xff] %v14885_v25  ;;  %1953 = vmatprep.subr.bf16.mxu0 %v14887_v35 }
 0x10e   :  { %1991 = vmatpush1.bf16.msra.mxu1 %v14856_v15  ;;  %v14897_v15 = vld [vmem:[#allocation13] ss:$16 sps:$4 sm:$0xff]  }
 0x10f   :  { %1992 = vmatprep.subr.bf16.mxu1 %v14867_v24  ;;  %18369 = vst [vmem:[#allocation77_spill] sm:$0xff] %v14897_v15  ;;  %1954 = vmatpush1.bf16.msra.mxu0 %v14897_v15 }
 0x110   :  { %2079 = vmatprep.subr.bf16.mxu0 %v14573_v13 }
 0x112   :  { %1993 = vmatpush1.bf16.msra.mxu1 %v14885_v25 }
 0x113   :  { %1994 = vmatprep.subr.bf16.mxu1 %v14893_v29 }
 0x116   :  { %1995 = vmatpush1.bf16.msra.mxu1 %v14903_v34 }
 0x117   :  { %2120 = vmatprep.subr.bf16.mxu1 %v14622_v36 }
 0x139   :  { %v677_v21 = vpop.f32.mrf.mxu1  ;;  %v823_v19 = vpop.f32.mrf.mxu0 }
 0x13a   :  { %v824_v44 = vadd.f32 %v823_v19, %v14870_v23  ;;  %v678_v33 = vadd.f32 %v677_v21, %v14877_v27 }
 0x13b   :  { %v679_v20 = vpop.f32.mrf.mxu1  ;;  %v825_v18 = vpop.f32.mrf.mxu0 }
 0x13c   :  { %v680_v16 = vadd.f32 %v679_v20, %v14881_v22  ;;  %v826_v24 = vadd.f32 %v825_v18, %v14890_v28 }
 0x13d   :  { %v681_v12 = vpop.f32.mrf.mxu1  ;;  %v827_v14 = vpop.f32.mrf.mxu0 }
 0x13e   :  { %v14907_v19 = vpack.c.bf16 %v680_v16, %v678_v33  ;;  %v682_v26 = vadd.f32 %v681_v12, %v14877_v27  ;;  %v14910_v21 = vpack.c.bf16 %v826_v24, %v824_v44  ;;  %v828_v20 = vadd.f32 %v827_v14, %v14870_v23 }
 0x13f   :  { %v683_v10 = vpop.f32.mrf.mxu1  ;;  %v829_v25 = vpop.f32.mrf.mxu0 }
 0x140   :  { %18371 = vst [vmem:[#allocation79_spill] sm:$0xff] %v14910_v21  ;;  %v684_v35 = vadd.f32 %v683_v10, %v14881_v22  ;;  %v830_v16 = vadd.f32 %v829_v25, %v14890_v28 }
 0x141   :  { %v687_v18 = vpop.f32.mrf.mxu1  ;;  %v833_v14 = vpop.f32.mrf.mxu0 }
 0x142   :  { %v14919_v12 = vpack.c.bf16 %v684_v35, %v682_v26  ;;  %v688_v44 = vadd.f32 %v687_v18, %v14877_v27  ;;  %v14922_v24 = vpack.c.bf16 %v830_v16, %v828_v20  ;;  %v834_v33 = vadd.f32 %v833_v14, %v14870_v23 }
 0x143   :  { %v689_v10 = vpop.f32.mrf.mxu1  ;;  %v835_v34 = vpop.f32.mrf.mxu0 }
 0x144   :  { %18372 = vst [vmem:[#allocation80_spill] sm:$0xff] %v14919_v12  ;;  %18373 = vst [vmem:[#allocation81_spill] sm:$0xff] %v14922_v24  ;;  %v690_v21 = vadd.f32 %v689_v10, %v14881_v22  ;;  %v836_v13 = vadd.f32 %v835_v34, %v14890_v28 }
 0x145   :  { %v691_v15 = vpop.f32.mrf.mxu1  ;;  %v837_v26 = vpop.f32.mrf.mxu0 }
 0x146   :  { %v14927_v25 = vpack.c.bf16 %v690_v21, %v688_v44  ;;  %v692_v36 = vadd.f32 %v691_v15, %v14877_v27  ;;  %v14930_v35 = vpack.c.bf16 %v836_v13, %v834_v33  ;;  %v838_v18 = vadd.f32 %v837_v26, %v14870_v23 }
 0x147   :  { %v693_v20 = vpop.f32.mrf.mxu1  ;;  %v839_v14 = vpop.f32.mrf.mxu0 }
 0x148   :  { %18374 = vst [vmem:[#allocation82_spill] sm:$0xff] %v14927_v25  ;;  %18375 = vst [vmem:[#allocation83_spill] sm:$0xff] %v14930_v35  ;;  %v694_v16 = vadd.f32 %v693_v20, %v14881_v22  ;;  %v840_v24 = vadd.f32 %v839_v14, %v14890_v28 }
 0x149   :  { %v697_v10 = vpop.f32.mrf.mxu1  ;;  %v843_v21 = vpop.f32.mrf.mxu0 }
 0x14a   :  { %v14935_v29 = vpack.c.bf16 %v694_v16, %v692_v36  ;;  %v698_v34 = vadd.f32 %v697_v10, %v14877_v27  ;;  %v14938_v44 = vpack.c.bf16 %v840_v24, %v838_v18  ;;  %v844_v15 = vadd.f32 %v843_v21, %v14870_v23 }
 0x14b   :  { %v699_v33 = vpop.f32.mrf.mxu1  ;;  %v845_v26 = vpop.f32.mrf.mxu0 }
 0x14c   :  { %18376 = vst [vmem:[#allocation84_spill] sm:$0xff] %v14935_v29  ;;  %18377 = vst [vmem:[#allocation85_spill] sm:$0xff] %v14938_v44  ;;  %v700_v13 = vadd.f32 %v699_v33, %v14881_v22  ;;  %v846_v35 = vadd.f32 %v845_v26, %v14890_v28 }
 0x14d   :  { %v701_v20 = vpop.f32.mrf.mxu1  ;;  %v847_v36 = vpop.f32.mrf.mxu0 }
 0x14e   :  { %v14943_v25 = vpack.c.bf16 %v700_v13, %v698_v34  ;;  %v702_v14 = vadd.f32 %v701_v20, %v14877_v27  ;;  %v14946_v16 = vpack.c.bf16 %v846_v35, %v844_v15  ;;  %v848_v10 = vadd.f32 %v847_v36, %v14870_v23 }
 0x14f   :  { %v703_v24 = vpop.f32.mrf.mxu1  ;;  %v849_v21 = vpop.f32.mrf.mxu0 }
 0x150   :  { %18378 = vst [vmem:[#allocation86_spill] sm:$0xff] %v14943_v25  ;;  %18379 = vst [vmem:[#allocation87_spill] sm:$0xff] %v14946_v16  ;;  %v704_v18 = vadd.f32 %v703_v24, %v14881_v22  ;;  %v850_v44 = vadd.f32 %v849_v21, %v14890_v28 }
 0x151   :  { %v707_v33 = vpop.f32.mrf.mxu1  ;;  %v853_v34 = vpop.f32.mrf.mxu0 }
 0x152   :  { %v14951_v29 = vpack.c.bf16 %v704_v18, %v702_v14  ;;  %v708_v26 = vadd.f32 %v707_v33, %v14877_v27  ;;  %v14954_v13 = vpack.c.bf16 %v850_v44, %v848_v10  ;;  %v854_v20 = vadd.f32 %v853_v34, %v14870_v23 }
 0x153   :  { %v709_v35 = vpop.f32.mrf.mxu1  ;;  %v855_v36 = vpop.f32.mrf.mxu0 }
 0x154   :  { %18380 = vst [vmem:[#allocation88_spill] sm:$0xff] %v14951_v29  ;;  %18381 = vst [vmem:[#allocation89_spill] sm:$0xff] %v14954_v13  ;;  %v710_v15 = vadd.f32 %v709_v35, %v14881_v22  ;;  %v856_v16 = vadd.f32 %v855_v36, %v14890_v28  ;;  %v14967_v13 = vsub.s32 2, %v14826_v31 }
 0x155   :  { %v711_v24 = vpop.f32.mrf.mxu1  ;;  %v857_v14 = vpop.f32.mrf.mxu0 }
 0x156   :  { %v14959_v25 = vpack.c.bf16 %v710_v15, %v708_v26  ;;  %v712_v21 = vadd.f32 %v711_v24, %v14877_v27  ;;  %v14962_v18 = vpack.c.bf16 %v856_v16, %v854_v20  ;;  %v858_v33 = vadd.f32 %v857_v14, %v14870_v23  ;;  %18384 = vst [vmem:[#allocation92_spill] sm:$0xff] %v14967_v13 }
 0x157   :  { %v713_v44 = vpop.f32.mrf.mxu1  ;;  %v859_v34 = vpop.f32.mrf.mxu0  ;;  %v14975_v27 = vsub.s32 3, %v14826_v31 }
 0x158   :  { %18382 = vst [vmem:[#allocation90_spill] sm:$0xff] %v14959_v25  ;;  %18383 = vst [vmem:[#allocation91_spill] sm:$0xff] %v14962_v18  ;;  %v714_v10 = vadd.f32 %v713_v44, %v14881_v22  ;;  %v860_v35 = vadd.f32 %v859_v34, %v14890_v28  ;;  %v14983_v22 = vrot.slane %v14863_v32, %v14967_v13 }
 0x159   :  { %v14970_v36 = vpop.f32.mrf.mxu1  ;;  %v1396_v15 = vpop.f32.mrf.mxu0  ;;  %18386 = vst [vmem:[#allocation94_spill] sm:$0xff] %v14975_v27  ;;  %v14987_v28 = vrot.slane %v14863_v32, %v14975_v27 }
 0x15a   :  { %v14972_v26 = vpack.c.bf16 %v714_v10, %v712_v21  ;;  %v14977_v16 = vpack.c.bf16 %v860_v35, %v858_v33 }
 0x15b   :  { %v14979_v23 = vpop.f32.mrf.mxu1  ;;  %v1398_v20 = vpop.f32.mrf.mxu0 }
 0x15c   :  { %18385 = vst [vmem:[#allocation93_spill] sm:$0xff] %v14972_v26  ;;  %18387 = vst [vmem:[#allocation95_spill] sm:$0xff] %v14977_v16 }
 0x15d   :  { %v754_v24 = vpop.f32.mrf.mxu1  ;;  %v1400_v14 = vpop.f32.mrf.mxu0 }
 0x15e   :  { %v755_v21 = vadd.f32 %v754_v24, %v14983_v22 }
 0x15f   :  { %v756_v44 = vpop.f32.mrf.mxu1  ;;  %v1401_v33 = vpop.f32.mrf.mxu0 }
 0x160   :  { %v757_v10 = vadd.f32 %v756_v44, %v14987_v28 }
 0x161   :  { %v760_v34 = vpop.f32.mrf.mxu1 }
 0x162   :  { %v14991_v35 = vpack.c.bf16 %v757_v10, %v755_v21  ;;  %v761_v18 = vadd.f32 %v760_v34, %v14983_v22 }
 0x163   :  { %v762_v16 = vpop.f32.mrf.mxu1 }
 0x164   :  { %18388 = vst [vmem:[#allocation96_spill] sm:$0xff] %v14991_v35  ;;  %v763_v26 = vadd.f32 %v762_v16, %v14987_v28 }
 0x165   :  { %v764_v25 = vpop.f32.mrf.mxu1 }
 0x166   :  { %v14995_v29 = vpack.c.bf16 %v763_v26, %v761_v18  ;;  %v765_v12 = vadd.f32 %v764_v25, %v14983_v22 }
 0x167   :  { %v766_v13 = vpop.f32.mrf.mxu1 }
 0x168   :  { %18389 = vst [vmem:[#allocation97_spill] sm:$0xff] %v14995_v29  ;;  %v767_v24 = vadd.f32 %v766_v13, %v14987_v28 }
 0x169   :  { %v770_v14 = vpop.f32.mrf.mxu1 }
 0x16a   :  { %v14999_v27 = vpack.c.bf16 %v767_v24, %v765_v12  ;;  %v771_v44 = vadd.f32 %v770_v14, %v14983_v22  ;;  %v285_v14 = vsub.s32 6, %v14826_v31 }
 0x16b   :  { %v772_v21 = vpop.f32.mrf.mxu1 }
 0x16c   :  { %18390 = vst [vmem:[#allocation98_spill] sm:$0xff] %v14999_v27  ;;  %v773_v10 = vadd.f32 %v772_v21, %v14987_v28  ;;  %v289_v21 = vsub.s32 7, %v14826_v31 }
 0x16d   :  { %v774_v33 = vpop.f32.mrf.mxu1 }
 0x16e   :  { %v15003_v34 = vpack.c.bf16 %v773_v10, %v771_v44  ;;  %v775_v16 = vadd.f32 %v774_v33, %v14983_v22 }
 0x16f   :  { %v776_v18 = vpop.f32.mrf.mxu1 }
 0x170   :  { %18391 = vst [vmem:[#allocation99_spill] sm:$0xff] %v15003_v34  ;;  %v777_v26 = vadd.f32 %v776_v18, %v14987_v28  ;;  %v1167_v34 = vunpack.c.h.bf16 %v14907_v19 }
 0x171   :  { %v780_v25 = vpop.f32.mrf.mxu1 }
 0x172   :  { %v15007_v29 = vpack.c.bf16 %v777_v26, %v775_v16  ;;  %v781_v13 = vadd.f32 %v780_v25, %v14983_v22  ;;  %v286_v16 = vrot.slane %v14863_v32, %v285_v14  ;;  %v290_v26 = vrot.slane %v14863_v32, %v289_v21 }
 0x173   :  { %v782_v12 = vpop.f32.mrf.mxu1 }
 0x174   :  { %18392 = vst [vmem:[#allocation100_spill] sm:$0xff] %v15007_v29  ;;  %v783_v24 = vadd.f32 %v782_v12, %v14987_v28 }
 0x175   :  { %v784_v27 = vpop.f32.mrf.mxu1 }
 0x176   :  { %v15013_v44 = vpack.c.bf16 %v783_v24, %v781_v13  ;;  %v785_v10 = vadd.f32 %v784_v27, %v14983_v22  ;;  %v1166_v13 = vunpack.c.l.bf16 %v14907_v19 }
 0x177   :  { %v786_v33 = vpop.f32.mrf.mxu1 }
 0x178   :  { %18393 = vst [vmem:[#allocation101_spill] sm:$0xff] %v15013_v44  ;;  %v787_v18 = vadd.f32 %v786_v33, %v14987_v28  ;;  %v1445_v44 = vadd.f32 %v1398_v20, %v1167_v34  ;;  %v1444_v11 = vadd.f32 %v1396_v15, %v1166_v13 }
 0x179   :  { %v896_v25 = vpop.f32.mrf.mxu1 }
 0x17a   :  { %v15019_v29 = vpack.c.bf16 %v787_v18, %v785_v10  ;;  %v897_v35 = vadd.f32 %v896_v25, %v286_v16  ;;  %v11755_v32 = vmul.f32 -1.442695, %v1445_v44  ;;  %v11754_v10 = vmul.f32 -1.442695, %v1444_v11 }
 0x17b   :  { %v898_v12 = vpop.f32.mrf.mxu1 }
 0x17c   :  { %18394 = vst [vmem:[#allocation102_spill] sm:$0xff] %v15019_v29  ;;  %v899_v31 = vadd.f32 %v898_v12, %v290_v26  ;;  %12927 = vpow2.f32 %v11755_v32 }
 0x17d   :  { %v900_v24 = vpop.f32.mrf.mxu1  ;;  %12929 = vpow2.f32 %v11754_v10 }
 0x17e   :  { %v15023_v27 = vpack.c.bf16 %v899_v31, %v897_v35  ;;  %v901_v8 = vadd.f32 %v900_v24, %v286_v16 }
 0x17f   :  { %v902_v33 = vpop.f32.mrf.mxu1 }
 0x180   :  { %18395 = vst [vmem:[#allocation103_spill] sm:$0xff] %v15023_v27  ;;  %v903_v14 = vadd.f32 %v902_v33, %v290_v26  ;;  %v15333_v27 = vld [vmem:[#allocation14 + $0x68] ss:$16 sps:$4 sm:$0xff]  }
 0x181   :  { %v906_v9 = vpop.f32.mrf.mxu1 }
 0x182   :  { %v15025_v21 = vpack.c.bf16 %v903_v14, %v901_v8  ;;  %v907_v29 = vadd.f32 %v906_v9, %v286_v16  ;;  %v753_v9 = vadd.f32 %v14979_v23, %v14987_v28  ;;  %v751_v14 = vadd.f32 %v14970_v36, %v14983_v22 }
 0x183   :  { %v908_v18 = vpop.f32.mrf.mxu1 }
 0x184   :  { %18396 = vst [vmem:[#allocation104_spill] sm:$0xff] %v15025_v21  ;;  %v909_v6 = vadd.f32 %v908_v18, %v290_v26  ;;  %v15330_v21 = vld [vmem:[#allocation14 + $0x60] ss:$16 sps:$4 sm:$0xff]  }
 0x185   :  { %v910_v25 = vpop.f32.mrf.mxu1 }
 0x186   :  { %v15027_v12 = vpack.c.bf16 %v909_v6, %v907_v29  ;;  %v911_v20 = vadd.f32 %v910_v25, %v286_v16 }
 0x187   :  { %v912_v19 = vpop.f32.mrf.mxu1 }
 0x188   :  { %18397 = vst [vmem:[#allocation105_spill] sm:$0xff] %v15027_v12  ;;  %v913_v35 = vadd.f32 %v912_v19, %v290_v26  ;;  %v12700_v19 = vpack.c.bf16 %v753_v9, %v751_v14  ;;  %v15327_v12 = vld [vmem:[#allocation14 + $0x6c] ss:$16 sps:$4 sm:$0xff]  }
 0x189   :  { %v916_v15 = vpop.f32.mrf.mxu1  ;;  %v12928_v10 = vpop.eup %12927 }
 0x18a   :  { %v15029_v34 = vpack.c.bf16 %v913_v35, %v911_v20  ;;  %v917_v13 = vadd.f32 %v916_v15, %v286_v16  ;;  %v12930_v25 = vpop.eup %12929 }
 0x18b   :  { %v918_v31 = vpop.f32.mrf.mxu1 }
 0x18c   :  { %18398 = vst [vmem:[#allocation106_spill] sm:$0xff] %v15029_v34  ;;  %v919_v44 = vadd.f32 %v918_v31, %v290_v26  ;;  %v1457_v31 = vadd.f32 1.0, %v12928_v10  ;;  %v15324_v34 = vld [vmem:[#allocation14 + $0x64] ss:$16 sps:$4 sm:$0xff]  }
 0x18d   :  { %v920_v8 = vpop.f32.mrf.mxu1 }
 0x18e   :  { %v15031_v24 = vpack.c.bf16 %v919_v44, %v917_v13  ;;  %v921_v33 = vadd.f32 %v920_v8, %v286_v16  ;;  %v1451_v44 = vadd.f32 1.0, %v12930_v25  ;;  %12931 = vrcp.f32 %v1457_v31 }
 0x18f   :  { %v922_v11 = vpop.f32.mrf.mxu1 }
 0x190   :  { %18399 = vst [vmem:[#allocation107_spill] sm:$0xff] %v15031_v24  ;;  %v923_v6 = vadd.f32 %v922_v11, %v290_v26  ;;  %v1168_v11 = vunpack.c.l.bf16 %v12700_v19  ;;  %12933 = vrcp.f32 %v1451_v44 }
 0x191   :  { %v926_v29 = vpop.f32.mrf.mxu1 }
 0x192   :  { %v15037_v32 = vpack.c.bf16 %v923_v6, %v921_v33  ;;  %v927_v20 = vadd.f32 %v926_v29, %v286_v16  ;;  %v1169_v33 = vunpack.c.h.bf16 %v12700_v19 }
 0x193   :  { %v928_v18 = vpop.f32.mrf.mxu1 }
 0x194   :  { %18400 = vst [vmem:[#allocation108_spill] sm:$0xff] %v15037_v32  ;;  %v929_v35 = vadd.f32 %v928_v18, %v290_v26  ;;  %v15321_v32 = vld [vmem:[#allocation14 + $0x88] ss:$16 sps:$4 sm:$0xff]  }
 0x195   :  { %v930_v15 = vpop.f32.mrf.mxu1 }
 0x196   :  { %v15039_v13 = vpack.c.bf16 %v929_v35, %v927_v20  ;;  %v931_v28 = vadd.f32 %v930_v15, %v286_v16 }
 0x197   :  { %v932_v23 = vpop.f32.mrf.mxu1 }
 0x198   :  { %18401 = vst [vmem:[#allocation109_spill] sm:$0xff] %v15039_v13  ;;  %v933_v8 = vadd.f32 %v932_v23, %v290_v26  ;;  %v15318_v13 = vld [vmem:[#allocation14 + $0x80] ss:$16 sps:$4 sm:$0xff]  }
 0x199   :  { %v1437_v24 = vpop.f32.mrf.mxu1 }
 0x19a   :  { %v15041_v36 = vpack.c.bf16 %v933_v8, %v931_v28  ;;  %v1446_v22 = vadd.f32 %v1437_v24, %v1168_v11  ;;  %v15046_v28 = vld [vmem:[#allocation11 + $0xe0] ss:$16 sps:$4 sm:$0xff]   ;;  %v15050_v8 = vld [vmem:[#allocation11 + $0xc4] ss:$16 sps:$4 sm:$0xff]   ;;  %v18403_v11 = vmov 0  }
 0x19b   :  { %v1439_v6 = vpop.f32.mrf.mxu1  ;;  %v12932_v18 = vpop.eup %12931 }
 0x19c   :  { %18402 = vst [vmem:[#allocation110_spill] sm:$0xff] %v15041_v36  ;;  %12935 = vtanh.f32 %v1446_v22  ;;  %v1447_v9 = vadd.f32 %v1439_v6, %v1169_v33  ;;  %v1467_v16 = vmul.f32 0.0, %v12932_v18  ;;  %v15056_v22 = vld [vmem:[#allocation11 + $0xc0] ss:$16 sps:$4 sm:$0xff]   ;;  %v15060_v33 = vld [vmem:[#allocation11 + $0xa4] ss:$16 sps:$4 sm:$0xff]  }
 0x19d   :  { %v1441_v29 = vpop.f32.mrf.mxu1  ;;  %v12934_v25 = vpop.eup %12933  ;;  %v15072_v6 = vld [vmem:[#allocation11 + $0x80] ss:$16 sps:$4 sm:$0xff]   ;;  %v15348_v36 = vld [vmem:[#allocation14 + $0x24] ss:$16 sps:$4 sm:$0xff]  }
 0x19e   :  { %v11756_v14 = vmul.f32 -1.442695, %v1447_v9 }
 0x19f   :  { %v1442_v10 = vpop.f32.mrf.mxu1 }
 0x1a0   :  { %12937 = vpow2.f32 %v11756_v14  ;;  %v18419_v10 = vld [vmem:[#allocation69_spill] sm:$0xff] }
 0x1a9   :  { %v12936_v20 = vpop.eup %12935 }
 0x1aa   :  { %v1468_v26 = vmul.f32 %v12936_v20, %v12934_v25 }
 0x1ac   :  { %v15043_v35 = vadd.f32 %v1468_v26, %v1467_v16 }
 0x1ad   :  { %v12938_v15 = vpop.eup %12937 }
 0x1ae   :  { %v1464_v31 = vadd.f32 1.0, %v12938_v15  ;;  %12939 = vtanh.f32 %v15043_v35 }
 0x1b0   :  { %12941 = vrcp.f32 %v1464_v31 }
 0x1b9   :  { %v1772_v9 = vpop.f32.mrf.mxu1 }
 0x1bb   :  { %v12940_v24 = vpop.eup %12939  ;;  %v1774_v29 = vpop.f32.mrf.mxu1 }
 0x1bd   :  { %v12942_v19 = vpop.eup %12941 }
 0x1be   :  { %v1471_v44 = vmul.f32 %v12942_v19, %v12940_v24 }
 0x1c0   :  { %v1472_v23 = vpack.c.bf16 %v1471_v44, %v1471_v44 }
 0x1c2   :  { %1972 = vmatmul.mubr.bf16.vlgmr.msra.gmra.mxu0 %v1472_v23  ;;  %2013 = vmatmul.mubr.bf16.vlgmr.msra.gmra.mxu1 %v1472_v23 }
 0x1c3   :  { %2080 = vmatpush1.bf16.msra.mxu0 %v15046_v28  ;;  %2121 = vmatpush1.bf16.msra.mxu1 %v14624_v37  ;;  %v15064_v37 = vld [vmem:[#allocation11 + $0xa0] ss:$16 sps:$4 sm:$0xff]  }
 0x1c4   :  { %2081 = vmatprep.subr.bf16.mxu0 %v15050_v8  ;;  %2122 = vmatprep.subr.bf16.mxu1 %v14627_v38  ;;  %v15068_v38 = vld [vmem:[#allocation11 + $0x84] ss:$16 sps:$4 sm:$0xff]  }
 0x1c5   :  { %2111 = vmatprep.mubr.bf16.mxu0 %v18403_v11  ;;  %2152 = vmatprep.mubr.bf16.mxu1 %v18403_v11 }
 0x1c7   :  { %2082 = vmatpush1.bf16.msra.mxu0 %v15056_v22  ;;  %2123 = vmatpush1.bf16.msra.mxu1 %v14631_v39  ;;  %v15076_v39 = vld [vmem:[#allocation11 + $0x64] ss:$16 sps:$4 sm:$0xff]  }
 0x1c8   :  { %2083 = vmatprep.subr.bf16.mxu0 %v15060_v33  ;;  %2124 = vmatprep.subr.bf16.mxu1 %v14635_v40  ;;  %v15080_v40 = vld [vmem:[#allocation11 + $0x60] ss:$16 sps:$4 sm:$0xff]  }
 0x1cb   :  { %2084 = vmatpush1.bf16.msra.mxu0 %v15064_v37  ;;  %2125 = vmatpush1.bf16.msra.mxu1 %v14638_v41  ;;  %v15084_v41 = vld [vmem:[#allocation11 + $0x44] ss:$16 sps:$4 sm:$0xff]  }
 0x1cc   :  { %2085 = vmatprep.subr.bf16.mxu0 %v15068_v38  ;;  %2126 = vmatprep.subr.bf16.mxu1 %v14641_v42  ;;  %v15088_v42 = vld [vmem:[#allocation11 + $0x40] ss:$16 sps:$4 sm:$0xff]  }
 0x1cf   :  { %2086 = vmatpush1.bf16.msra.mxu0 %v15072_v6  ;;  %2127 = vmatpush1.bf16.msra.mxu1 %v14645_v17  ;;  %v15092_v17 = vld [vmem:[#allocation11 + $0x24] ss:$16 sps:$4 sm:$0xff]  }
 0x1d0   :  { %2087 = vmatprep.subr.bf16.mxu0 %v15076_v39  ;;  %2128 = vmatprep.subr.bf16.mxu1 %v14649_v45  ;;  %v15096_v45 = vld [vmem:[#allocation11 + $0x20] ss:$16 sps:$4 sm:$0xff]  }
 0x1d3   :  { %2088 = vmatpush1.bf16.msra.mxu0 %v15080_v40  ;;  %2129 = vmatpush1.bf16.msra.mxu1 %v14652_v46  ;;  %v15100_v46 = vld [vmem:[#allocation11 + $0x4] ss:$16 sps:$4 sm:$0xff]  }
 0x1d4   :  { %2089 = vmatprep.subr.bf16.mxu0 %v15084_v41  ;;  %2130 = vmatprep.subr.bf16.mxu1 %v14655_v47  ;;  %v1731_v47 = vpop.f32.mrf.mxu0 }
 0x1d7   :  { %2090 = vmatpush1.bf16.msra.mxu0 %v15088_v42  ;;  %2131 = vmatpush1.bf16.msra.mxu1 %v14659_v30  ;;  %v15104_v30 = vld [vmem:[#allocation11] ss:$16 sps:$4 sm:$0xff]  }
 0x1d8   :  { %2091 = vmatprep.subr.bf16.mxu0 %v15092_v17  ;;  %2132 = vmatprep.subr.bf16.mxu1 %v14663_v48  ;;  %v1733_v48 = vpop.f32.mrf.mxu0 }
 0x1db   :  { %2092 = vmatpush1.bf16.msra.mxu0 %v15096_v45  ;;  %2133 = vmatpush1.bf16.msra.mxu1 %v14666_v49  ;;  %v1735_v49 = vpop.f32.mrf.mxu0 }
 0x1dc   :  { %2093 = vmatprep.subr.bf16.mxu0 %v15100_v46  ;;  %2134 = vmatprep.subr.bf16.mxu1 %v14669_v50 }
 0x1dd   :  { %v1736_v50 = vpop.f32.mrf.mxu0 }
 0x1df   :  { %2094 = vmatpush1.bf16.msra.mxu0 %v15104_v30  ;;  %2135 = vmatpush1.bf16.msra.mxu1 %v14673_v43  ;;  %v1776_v43 = vpop.f32.mrf.mxu1 }
 0x1e0   :  { %2191 = vmatprep.subr.bf16.mxu0 %v14680_v51  ;;  %2232 = vmatprep.subr.bf16.mxu1 %v14686_v53  ;;  %v18405_v53 = vld [vmem:[#allocation35_spill] sm:$0xff] }
 0x1e1   :  { %v1777_v51 = vpop.f32.mrf.mxu1 }
 0x1e2   :  { %2112 = vmatmul.mubr.bf16.vlgmr.msra.gmra.mxu0 %v1472_v23  ;;  %2153 = vmatmul.mubr.bf16.vlgmr.msra.gmra.mxu1 %v1472_v23 }
 0x1e3   :  { %2192 = vmatpush1.bf16.msra.mxu0 %v14682_v52  ;;  %2233 = vmatpush1.bf16.msra.mxu1 %v14690_v55  ;;  %v18404_v52 = vld [vmem:[#allocation33_spill] sm:$0xff] }
 0x1e4   :  { %2193 = vmatprep.subr.bf16.mxu0 %v14688_v54  ;;  %2234 = vmatprep.subr.bf16.mxu1 %v14698_v57  ;;  %v18406_v54 = vld [vmem:[#allocation34_spill] sm:$0xff]  ;;  %v18407_v55 = vld [vmem:[#allocation37_spill] sm:$0xff]  ;;  %v18409_v57 = vld [vmem:[#allocation39_spill] sm:$0xff] }
 0x1e5   :  { %2223 = vmatprep.mubr.bf16.mxu0 %v18403_v11  ;;  %2264 = vmatprep.mubr.bf16.mxu1 %v18403_v11 }
 0x1e7   :  { %2194 = vmatpush1.bf16.msra.mxu0 %v14692_v56  ;;  %2235 = vmatpush1.bf16.msra.mxu1 %v14702_v59  ;;  %v18408_v56 = vld [vmem:[#allocation36_spill] sm:$0xff]  ;;  %v18411_v59 = vld [vmem:[#allocation41_spill] sm:$0xff] }
 0x1e8   :  { %2195 = vmatprep.subr.bf16.mxu0 %v14700_v58  ;;  %2236 = vmatprep.subr.bf16.mxu1 %v14710_v61  ;;  %v18410_v58 = vld [vmem:[#allocation38_spill] sm:$0xff]  ;;  %v18413_v61 = vld [vmem:[#allocation43_spill] sm:$0xff] }
 0x1eb   :  { %2196 = vmatpush1.bf16.msra.mxu0 %v14704_v60  ;;  %2237 = vmatpush1.bf16.msra.mxu1 %v14714_v63  ;;  %v18412_v60 = vld [vmem:[#allocation40_spill] sm:$0xff] }
 0x1ec   :  { %2197 = vmatprep.subr.bf16.mxu0 %v14712_v62  ;;  %2238 = vmatprep.subr.bf16.mxu1 %v14722_v1  ;;  %v18414_v62 = vld [vmem:[#allocation42_spill] sm:$0xff]  ;;  %v18415_v63 = vld [vmem:[#allocation44_spill] sm:$0xff] }
 0x1ed   :  { %v18417_v1 = vld [vmem:[#allocation46_spill] sm:$0xff] }
 0x1ef   :  { %2198 = vmatpush1.bf16.msra.mxu0 %v14716_v0  ;;  %2239 = vmatpush1.bf16.msra.mxu1 %v14726_v3  ;;  %v18416_v0 = vld [vmem:[#allocation45_spill] sm:$0xff]  ;;  %v18418_v3 = vld [vmem:[#allocation68_spill] sm:$0xff] }
 0x1f0   :  { %2199 = vmatprep.subr.bf16.mxu0 %v14724_v2  ;;  %2240 = vmatprep.subr.bf16.mxu1 %v14734_v5  ;;  %v1159_v2 = vld [vmem:[%s17891_s6] sm:$0xf] }
 0x1f1   :  { %v15151_v18 = vrot.slane %v1159_v2, %v18419_v10  ;;  %v15342_v10 = vld [vmem:[#allocation14 + $0x40] ss:$16 sps:$4 sm:$0xff]  }
 0x1f3   :  { %2200 = vmatpush1.bf16.msra.mxu0 %v14728_v4  ;;  %2241 = vmatpush1.bf16.msra.mxu1 %v14738_v7  ;;  %v15148_v4 = vrot.slane %v1159_v2, %v18418_v3  ;;  %v15345_v3 = vld [vmem:[#allocation14 + $0x48] ss:$16 sps:$4 sm:$0xff]  }
 0x1f4   :  { %2201 = vmatprep.subr.bf16.mxu0 %v18404_v52  ;;  %2242 = vmatprep.subr.bf16.mxu1 %v18405_v53  ;;  %v18421_v53 = vld [vmem:[#allocation92_spill] sm:$0xff] }
 0x1f7   :  { %2202 = vmatpush1.bf16.msra.mxu0 %v18406_v54  ;;  %2243 = vmatpush1.bf16.msra.mxu1 %v18407_v55  ;;  %v15160_v54 = vrot.slane %v1159_v2, %v18421_v53  ;;  %v15336_v53 = vld [vmem:[#allocation14 + $0x44] ss:$16 sps:$4 sm:$0xff]  }
 0x1f8   :  { %2203 = vmatprep.subr.bf16.mxu0 %v18408_v56  ;;  %2244 = vmatprep.subr.bf16.mxu1 %v18409_v57 }
 0x1fb   :  { %2204 = vmatpush1.bf16.msra.mxu0 %v18410_v58  ;;  %2245 = vmatpush1.bf16.msra.mxu1 %v18411_v59 }
 0x1fc   :  { %2205 = vmatprep.subr.bf16.mxu0 %v18412_v60  ;;  %2246 = vmatprep.subr.bf16.mxu1 %v18413_v61 }
 0x1ff   :  { %2206 = vmatpush1.bf16.msra.mxu0 %v18414_v62  ;;  %2247 = vmatpush1.bf16.msra.mxu1 %v18415_v63 }
 0x200   :  { %2273 = vmatprep.subr.bf16.mxu0 %v18416_v0  ;;  %2314 = vmatprep.subr.bf16.mxu1 %v18417_v1 }
 0x282   :  { %v1973_v5 = vpop.f32.mrf.mxu0  ;;  %v2014_v7 = vpop.f32.mrf.mxu1 }
 0x283   :  { %v1974_v14 = vadd.f32 %v1973_v5, %v1731_v47  ;;  %v18420_v47 = vld [vmem:[#allocation94_spill] sm:$0xff]  ;;  %v2015_v52 = vadd.f32 %v2014_v7, %v1772_v9 }
 0x284   :  { %v1975_v25 = vpop.f32.mrf.mxu0  ;;  %v2016_v20 = vpop.f32.mrf.mxu1  ;;  %v15156_v43 = vrot.slane %v1159_v2, %v18420_v47  ;;  %v15339_v47 = vld [vmem:[#allocation14 + $0x4c] ss:$16 sps:$4 sm:$0xff]  }
 0x285   :  { %v2042_v16 = vadd.f32 %v15148_v4, %v1974_v14  ;;  %v1976_v26 = vadd.f32 %v1975_v25, %v1733_v48  ;;  %v2017_v50 = vadd.f32 %v2016_v20, %v1774_v29  ;;  %v2044_v56 = vadd.f32 %v15160_v54, %v2015_v52  ;;  %v18422_v29 = vld [vmem:[#allocation80_spill] sm:$0xff] }
 0x286   :  { %v1977_v15 = vpop.f32.mrf.mxu0  ;;  %v2018_v31 = vpop.f32.mrf.mxu1  ;;  %v2075_v60 = vunpack.c.l.bf16 %v18422_v29  ;;  %v2076_v9 = vunpack.c.h.bf16 %v18422_v29  ;;  %18468 = vst [vmem:[#allocation80_spill] sm:$0xff] %v15318_v13 }
 0x287   :  { %v11821_v24 = vmul.f32 -1.442695, %v2042_v16  ;;  %v2043_v19 = vadd.f32 %v15151_v18, %v1976_v26  ;;  %v2045_v51 = vadd.f32 %v15156_v43, %v2017_v50  ;;  %v18423_v50 = vld [vmem:[#allocation96_spill] sm:$0xff] }
 0x288   :  { %v1978_v44 = vpop.f32.mrf.mxu0  ;;  %v2019_v23 = vpop.f32.mrf.mxu1  ;;  %18469 = vst [vmem:[#allocation96_spill] sm:$0xff] %v15321_v32 }
 0x289   :  { %12943 = vpow2.f32 %v11821_v24  ;;  %v11822_v49 = vmul.f32 -1.442695, %v2043_v19  ;;  %v11823_v48 = vmul.f32 -1.442695, %v2045_v51  ;;  %v2078_v51 = vunpack.c.h.bf16 %v18423_v50 }
 0x28b   :  { %12945 = vpow2.f32 %v11822_v49 }
 0x28c   :  { %12947 = vpow2.f32 %v11823_v48  ;;  %v2077_v48 = vunpack.c.l.bf16 %v18423_v50 }
 0x296   :  { %v12944_v55 = vpop.eup %12943 }
 0x297   :  { %v2049_v57 = vadd.f32 1.0, %v12944_v55 }
 0x298   :  { %v12946_v58 = vpop.eup %12945 }
 0x299   :  { %12949 = vrcp.f32 %v2049_v57  ;;  %v2055_v59 = vadd.f32 1.0, %v12946_v58  ;;  %v12948_v2 = vpop.eup %12947 }
 0x29a   :  { %12951 = vtanh.f32 %v2044_v56  ;;  %v2062_v31 = vadd.f32 1.0, %v12948_v2  ;;  %v18427_v2 = vld [vmem:[#allocation50_spill] sm:$0xff] }
 0x29b   :  { %12953 = vrcp.f32 %v2055_v59  ;;  %18473 = vst [vmem:[#allocation50_spill] sm:$0xff] %v15333_v27 }
 0x2a2   :  { %v2113_v61 = vpop.f32.mrf.mxu0  ;;  %v2154_v62 = vpop.f32.mrf.mxu1 }
 0x2a3   :  { %v2161_v63 = vadd.f32 %v2113_v61, %v2075_v60  ;;  %v2163_v55 = vadd.f32 %v2154_v62, %v2077_v48  ;;  %v18426_v62 = vld [vmem:[#allocation49_spill] sm:$0xff]  ;;  %v18436_v48 = vld [vmem:[#allocation59_spill] sm:$0xff] }
 0x2a4   :  { %v2115_v0 = vpop.f32.mrf.mxu0  ;;  %v2156_v1 = vpop.f32.mrf.mxu1  ;;  %18472 = vst [vmem:[#allocation49_spill] sm:$0xff] %v15330_v21 }
 0x2a5   :  { %v11824_v5 = vmul.f32 -1.442695, %v2161_v63  ;;  %v2162_v7 = vadd.f32 %v2115_v0, %v2076_v9  ;;  %v2164_v52 = vadd.f32 %v2156_v1, %v2078_v51  ;;  %v18424_v0 = vld [vmem:[#allocation47_spill] sm:$0xff]  ;;  %v18425_v1 = vld [vmem:[#allocation48_spill] sm:$0xff]  ;;  %v18434_v51 = vld [vmem:[#allocation57_spill] sm:$0xff] }
 0x2a6   :  { %v12950_v14 = vpop.eup %12949  ;;  %v2117_v25 = vpop.f32.mrf.mxu0  ;;  %18470 = vst [vmem:[#allocation47_spill] sm:$0xff] %v15324_v34  ;;  %18471 = vst [vmem:[#allocation48_spill] sm:$0xff] %v15327_v12 }
 0x2a7   :  { %v2158_v20 = vpop.f32.mrf.mxu1  ;;  %v12952_v16 = vpop.eup %12951  ;;  %12955 = vpow2.f32 %v11824_v5  ;;  %v11825_v26 = vmul.f32 -1.442695, %v2162_v7  ;;  %v11826_v56 = vmul.f32 -1.442695, %v2164_v52  ;;  %v18428_v25 = vld [vmem:[#allocation51_spill] sm:$0xff]  ;;  %v18435_v52 = vld [vmem:[#allocation58_spill] sm:$0xff] }
 0x2a8   :  { %v12954_v15 = vpop.eup %12953  ;;  %v2118_v24 = vpop.f32.mrf.mxu0  ;;  %v2066_v23 = vmul.f32 %v12952_v16, %v12950_v14  ;;  %v18429_v20 = vld [vmem:[#allocation52_spill] sm:$0xff]  ;;  %18474 = vst [vmem:[#allocation51_spill] sm:$0xff] %v15336_v53 }
 0x2a9   :  { %v2159_v19 = vpop.f32.mrf.mxu1  ;;  %v2065_v44 = vmul.f32 0.0, %v12954_v15  ;;  %12957 = vpow2.f32 %v11825_v26  ;;  %v18430_v26 = vld [vmem:[#allocation53_spill] sm:$0xff]  ;;  %v18431_v15 = vld [vmem:[#allocation54_spill] sm:$0xff]  ;;  %18475 = vst [vmem:[#allocation52_spill] sm:$0xff] %v15339_v47 }
 0x2aa   :  { %12959 = vrcp.f32 %v2062_v31  ;;  %18476 = vst [vmem:[#allocation53_spill] sm:$0xff] %v15342_v10  ;;  %18477 = vst [vmem:[#allocation54_spill] sm:$0xff] %v15345_v3 }
 0x2ab   :  { %v15165_v49 = vadd.f32 %v2066_v23, %v2065_v44  ;;  %v18432_v44 = vld [vmem:[#allocation55_spill] sm:$0xff]  ;;  %v18433_v23 = vld [vmem:[#allocation56_spill] sm:$0xff] }
 0x2ac   :  { %18478 = vst [vmem:[#allocation55_spill] sm:$0xff] %v15348_v36 }
 0x2ad   :  { %12961 = vtanh.f32 %v15165_v49 }
 0x2ae   :  { %12963 = vtanh.f32 %v2163_v55  ;;  %v18437_v55 = vld [vmem:[#allocation60_spill] sm:$0xff] }
 0x2af   :  { %12965 = vpow2.f32 %v11826_v56  ;;  %v18438_v56 = vld [vmem:[#allocation61_spill] sm:$0xff] }
 0x2b4   :  { %v12956_v57 = vpop.eup %12955 }
 0x2b5   :  { %v2168_v58 = vadd.f32 1.0, %v12956_v57  ;;  %v18440_v57 = vld [vmem:[#allocation63_spill] sm:$0xff] }
 0x2b6   :  { %v12958_v59 = vpop.eup %12957 }
 0x2b7   :  { %12967 = vrcp.f32 %v2168_v58  ;;  %v2174_v29 = vadd.f32 1.0, %v12958_v59  ;;  %v12960_v60 = vpop.eup %12959  ;;  %v18441_v58 = vld [vmem:[#allocation64_spill] sm:$0xff]  ;;  %v18442_v59 = vld [vmem:[#allocation65_spill] sm:$0xff] }
 0x2b9   :  { %12969 = vrcp.f32 %v2174_v29  ;;  %v18443_v29 = vld [vmem:[#allocation66_spill] sm:$0xff] }
 0x2ba   :  { %v12962_v61 = vpop.eup %12961 }
 0x2bb   :  { %v2069_v63 = vmul.f32 %v12962_v61, %v12960_v60  ;;  %v12964_v5 = vpop.eup %12963  ;;  %v18444_v60 = vld [vmem:[#allocation67_spill] sm:$0xff]  ;;  %v18445_v61 = vld [vmem:[#allocation70_spill] sm:$0xff] }
 0x2bc   :  { %v12966_v7 = vpop.eup %12965 }
 0x2bd   :  { %v2190_v9 = vpack.c.bf16 %v2069_v63, %v2069_v63  ;;  %v2181_v24 = vadd.f32 1.0, %v12966_v7  ;;  %v18446_v63 = vld [vmem:[#allocation71_spill] sm:$0xff]  ;;  %v18451_v7 = vld [vmem:[#allocation76_spill] sm:$0xff] }
 0x2bf   :  { %2224 = vmatmul.mubr.bf16.vlgmr.msra.gmra.mxu0 %v2190_v9  ;;  %2265 = vmatmul.mubr.bf16.vlgmr.msra.gmra.mxu1 %v2190_v9  ;;  %12971 = vrcp.f32 %v2181_v24  ;;  %v18447_v9 = vld [vmem:[#allocation72_spill] sm:$0xff]  ;;  %v15217_v24 = vld [vmem:[#allocation11 + $0xcc] ss:$16 sps:$4 sm:$0xff]  }
 0x2c0   :  { %2274 = vmatpush1.bf16.msra.mxu0 %v18424_v0  ;;  %2315 = vmatpush1.bf16.msra.mxu1 %v18425_v1 }
 0x2c1   :  { %2275 = vmatprep.subr.bf16.mxu0 %v18426_v62  ;;  %2316 = vmatprep.subr.bf16.mxu1 %v18427_v2  ;;  %v18448_v62 = vld [vmem:[#allocation73_spill] sm:$0xff]  ;;  %v18449_v2 = vld [vmem:[#allocation74_spill] sm:$0xff] }
 0x2c2   :  { %2305 = vmatprep.mubr.bf16.mxu0 %v18403_v11  ;;  %2346 = vmatprep.mubr.bf16.mxu1 %v18403_v11 }
 0x2c4   :  { %v12968_v14 = vpop.eup %12967  ;;  %2276 = vmatpush1.bf16.msra.mxu0 %v18428_v25  ;;  %2317 = vmatpush1.bf16.msra.mxu1 %v18429_v20  ;;  %v18452_v25 = vld [vmem:[#allocation77_spill] sm:$0xff]  ;;  %v18453_v20 = vld [vmem:[#allocation78_spill] sm:$0xff] }
 0x2c5   :  { %v2185_v16 = vmul.f32 %v12968_v14, %v12964_v5  ;;  %2277 = vmatprep.subr.bf16.mxu0 %v18430_v26  ;;  %2318 = vmatprep.subr.bf16.mxu1 %v18431_v15  ;;  %v18450_v5 = vld [vmem:[#allocation75_spill] sm:$0xff]  ;;  %v15206_v26 = vld [vmem:[#allocation11 + $0xe4] ss:$16 sps:$4 sm:$0xff]  }
 0x2c6   :  { %v12970_v31 = vpop.eup %12969  ;;  %v15209_v15 = vld [vmem:[#allocation11 + $0xec] ss:$16 sps:$4 sm:$0xff]  }
 0x2c7   :  { %v2184_v19 = vmul.f32 %v12970_v31, %v15043_v35  ;;  %v18439_v35 = vld [vmem:[#allocation62_spill] sm:$0xff]  ;;  %v15213_v31 = vld [vmem:[#allocation11 + $0xe8] ss:$16 sps:$4 sm:$0xff]  }
 0x2c8   :  { %2278 = vmatpush1.bf16.msra.mxu0 %v18432_v44  ;;  %2319 = vmatpush1.bf16.msra.mxu1 %v18433_v23  ;;  %v15227_v44 = vld [vmem:[#allocation11 + $0xac] ss:$16 sps:$4 sm:$0xff]   ;;  %v15231_v23 = vld [vmem:[#allocation11 + $0xa8] ss:$16 sps:$4 sm:$0xff]  }
 0x2c9   :  { %v15183_v50 = vadd.f32 %v2185_v16, %v2184_v19  ;;  %2279 = vmatprep.subr.bf16.mxu0 %v18434_v51  ;;  %2320 = vmatprep.subr.bf16.mxu1 %v18435_v52  ;;  %v15223_v19 = vld [vmem:[#allocation11 + $0xc8] ss:$16 sps:$4 sm:$0xff]   ;;  %v15235_v51 = vld [vmem:[#allocation11 + $0x8c] ss:$16 sps:$4 sm:$0xff]  }
 0x2ca   :  { %v15239_v52 = vld [vmem:[#allocation11 + $0x88] ss:$16 sps:$4 sm:$0xff]  }
 0x2cb   :  { %12973 = vtanh.f32 %v15183_v50 }
 0x2cc   :  { %2280 = vmatpush1.bf16.msra.mxu0 %v18436_v48  ;;  %2321 = vmatpush1.bf16.msra.mxu1 %v18437_v55  ;;  %v12972_v0 = vpop.eup %12971  ;;  %v15243_v48 = vld [vmem:[#allocation11 + $0x6c] ss:$16 sps:$4 sm:$0xff]   ;;  %v15247_v55 = vld [vmem:[#allocation11 + $0x68] ss:$16 sps:$4 sm:$0xff]  }
 0x2cd   :  { %2281 = vmatprep.subr.bf16.mxu0 %v18438_v56  ;;  %2322 = vmatprep.subr.bf16.mxu1 %v18439_v35  ;;  %v15251_v56 = vld [vmem:[#allocation11 + $0x4c] ss:$16 sps:$4 sm:$0xff]   ;;  %v15255_v35 = vld [vmem:[#allocation11 + $0x48] ss:$16 sps:$4 sm:$0xff]  }
 0x2d0   :  { %2282 = vmatpush1.bf16.msra.mxu0 %v18440_v57  ;;  %2323 = vmatpush1.bf16.msra.mxu1 %v18441_v58  ;;  %v15259_v57 = vld [vmem:[#allocation11 + $0x2c] ss:$16 sps:$4 sm:$0xff]   ;;  %v15263_v58 = vld [vmem:[#allocation11 + $0x28] ss:$16 sps:$4 sm:$0xff]  }
 0x2d1   :  { %2283 = vmatprep.subr.bf16.mxu0 %v18442_v59  ;;  %2324 = vmatprep.subr.bf16.mxu1 %v18443_v29  ;;  %v15267_v59 = vld [vmem:[#allocation11 + $0xc] ss:$16 sps:$4 sm:$0xff]   ;;  %v15271_v29 = vld [vmem:[#allocation11 + $0x8] ss:$16 sps:$4 sm:$0xff]  }
 0x2d4   :  { %2284 = vmatpush1.bf16.msra.mxu0 %v18444_v60  ;;  %2325 = vmatpush1.bf16.msra.mxu1 %v18445_v61  ;;  %v15274_v60 = vld [vmem:[#allocation14 + $0xe4] ss:$16 sps:$4 sm:$0xff]   ;;  %v15277_v61 = vld [vmem:[#allocation14 + $0xec] ss:$16 sps:$4 sm:$0xff]  }
 0x2d5   :  { %2285 = vmatprep.subr.bf16.mxu0 %v18446_v63  ;;  %2326 = vmatprep.subr.bf16.mxu1 %v18447_v9  ;;  %18454 = vst [vmem:[#allocation33_spill] sm:$0xff] %v15274_v60  ;;  %18455 = vst [vmem:[#allocation35_spill] sm:$0xff] %v15277_v61  ;;  %v15280_v63 = vld [vmem:[#allocation14 + $0xe0] ss:$16 sps:$4 sm:$0xff]   ;;  %v15283_v9 = vld [vmem:[#allocation14 + $0xe8] ss:$16 sps:$4 sm:$0xff]  }
 0x2d6   :  { %18456 = vst [vmem:[#allocation34_spill] sm:$0xff] %v15280_v63  ;;  %18457 = vst [vmem:[#allocation37_spill] sm:$0xff] %v15283_v9 }
 0x2d8   :  { %v12974_v1 = vpop.eup %12973  ;;  %2286 = vmatpush1.bf16.msra.mxu0 %v18448_v62  ;;  %2327 = vmatpush1.bf16.msra.mxu1 %v18449_v2  ;;  %v15294_v62 = vld [vmem:[#allocation14 + $0xc0] ss:$16 sps:$4 sm:$0xff]   ;;  %v15297_v2 = vld [vmem:[#allocation14 + $0xc8] ss:$16 sps:$4 sm:$0xff]  }
 0x2d9   :  { %2287 = vmatprep.subr.bf16.mxu0 %v18450_v5  ;;  %2328 = vmatprep.subr.bf16.mxu1 %v18451_v7  ;;  %v2188_v14 = vmul.f32 %v12974_v1, %v12972_v0  ;;  %v15286_v0 = vld [vmem:[#allocation14 + $0xc4] ss:$16 sps:$4 sm:$0xff]   ;;  %v15289_v1 = vld [vmem:[#allocation14 + $0xcc] ss:$16 sps:$4 sm:$0xff]   ;;  %18460 = vst [vmem:[#allocation38_spill] sm:$0xff] %v15294_v62  ;;  %18461 = vst [vmem:[#allocation41_spill] sm:$0xff] %v15297_v2 }
 0x2da   :  { %18458 = vst [vmem:[#allocation36_spill] sm:$0xff] %v15286_v0  ;;  %18459 = vst [vmem:[#allocation39_spill] sm:$0xff] %v15289_v1  ;;  %v15300_v5 = vld [vmem:[#allocation14 + $0xa4] ss:$16 sps:$4 sm:$0xff]   ;;  %v15303_v7 = vld [vmem:[#allocation14 + $0xac] ss:$16 sps:$4 sm:$0xff]  }
 0x2db   :  { %v2189_v16 = vpack.c.bf16 %v2188_v14, %v2188_v14  ;;  %18462 = vst [vmem:[#allocation40_spill] sm:$0xff] %v15300_v5  ;;  %18463 = vst [vmem:[#allocation43_spill] sm:$0xff] %v15303_v7  ;;  %v15306_v14 = vld [vmem:[#allocation14 + $0xa0] ss:$16 sps:$4 sm:$0xff]  }
 0x2dc   :  { %2288 = vmatpush1.bf16.msra.mxu0 %v18452_v25  ;;  %2329 = vmatpush1.bf16.msra.mxu1 %v18453_v20  ;;  %18464 = vst [vmem:[#allocation42_spill] sm:$0xff] %v15306_v14  ;;  %v15309_v25 = vld [vmem:[#allocation14 + $0xa8] ss:$16 sps:$4 sm:$0xff]   ;;  %v15312_v20 = vld [vmem:[#allocation14 + $0x84] ss:$16 sps:$4 sm:$0xff]  }
 0x2dd   :  { %2392 = vmatprep.subr.bf16.mxu0 %v15206_v26  ;;  %2433 = vmatprep.subr.bf16.mxu1 %v15209_v15  ;;  %18465 = vst [vmem:[#allocation44_spill] sm:$0xff] %v15309_v25  ;;  %18466 = vst [vmem:[#allocation45_spill] sm:$0xff] %v15312_v20 }
 0x2df   :  { %2306 = vmatmul.mubr.bf16.vlgmr.msra.gmra.mxu0 %v2189_v16  ;;  %2347 = vmatmul.mubr.bf16.vlgmr.msra.gmra.mxu1 %v2189_v16 }
 0x2e0   :  { %2393 = vmatpush1.bf16.msra.mxu0 %v15046_v28  ;;  %2434 = vmatpush1.bf16.msra.mxu1 %v15213_v31 }
 0x2e1   :  { %2394 = vmatprep.subr.bf16.mxu0 %v15050_v8  ;;  %2435 = vmatprep.subr.bf16.mxu1 %v15217_v24 }
 0x2e2   :  { %2424 = vmatprep.mubr.bf16.mxu0 %v18403_v11  ;;  %2465 = vmatprep.mubr.bf16.mxu1 %v18403_v11 }
 0x2e4   :  { %2395 = vmatpush1.bf16.msra.mxu0 %v15056_v22  ;;  %2436 = vmatpush1.bf16.msra.mxu1 %v15223_v19 }
 0x2e5   :  { %2396 = vmatprep.subr.bf16.mxu0 %v15060_v33  ;;  %2437 = vmatprep.subr.bf16.mxu1 %v15227_v44 }
 0x2e8   :  { %2397 = vmatpush1.bf16.msra.mxu0 %v15064_v37  ;;  %2438 = vmatpush1.bf16.msra.mxu1 %v15231_v23 }
 0x2e9   :  { %2398 = vmatprep.subr.bf16.mxu0 %v15068_v38  ;;  %2439 = vmatprep.subr.bf16.mxu1 %v15235_v51 }
 0x2ec   :  { %2399 = vmatpush1.bf16.msra.mxu0 %v15072_v6  ;;  %2440 = vmatpush1.bf16.msra.mxu1 %v15239_v52 }
 0x2ed   :  { %2400 = vmatprep.subr.bf16.mxu0 %v15076_v39  ;;  %2441 = vmatprep.subr.bf16.mxu1 %v15243_v48 }
 0x2f0   :  { %2401 = vmatpush1.bf16.msra.mxu0 %v15080_v40  ;;  %2442 = vmatpush1.bf16.msra.mxu1 %v15247_v55 }
 0x2f1   :  { %2402 = vmatprep.subr.bf16.mxu0 %v15084_v41  ;;  %2443 = vmatprep.subr.bf16.mxu1 %v15251_v56 }
 0x2f4   :  { %2403 = vmatpush1.bf16.msra.mxu0 %v15088_v42  ;;  %2444 = vmatpush1.bf16.msra.mxu1 %v15255_v35 }
 0x2f5   :  { %2404 = vmatprep.subr.bf16.mxu0 %v15092_v17  ;;  %2445 = vmatprep.subr.bf16.mxu1 %v15259_v57 }
 0x2f8   :  { %2405 = vmatpush1.bf16.msra.mxu0 %v15096_v45  ;;  %2446 = vmatpush1.bf16.msra.mxu1 %v15263_v58 }
 0x2f9   :  { %2406 = vmatprep.subr.bf16.mxu0 %v15100_v46  ;;  %2447 = vmatprep.subr.bf16.mxu1 %v15267_v59 }
 0x2fc   :  { %2407 = vmatpush1.bf16.msra.mxu0 %v15104_v30  ;;  %2448 = vmatpush1.bf16.msra.mxu1 %v15271_v29 }
 0x2fd   :  { %2504 = vmatprep.subr.bf16.mxu0 %v15274_v60  ;;  %2545 = vmatprep.subr.bf16.mxu1 %v15277_v61 }
 0x2ff   :  { %2425 = vmatmul.mubr.bf16.vlgmr.msra.gmra.mxu0 %v2189_v16  ;;  %2466 = vmatmul.mubr.bf16.vlgmr.msra.gmra.mxu1 %v2189_v16  ;;  %v15315_v16 = vld [vmem:[#allocation14 + $0x8c] ss:$16 sps:$4 sm:$0xff]  }
 0x300   :  { %2505 = vmatpush1.bf16.msra.mxu0 %v15280_v63  ;;  %2546 = vmatpush1.bf16.msra.mxu1 %v15283_v9  ;;  %18467 = vst [vmem:[#allocation46_spill] sm:$0xff] %v15315_v16 }
 0x301   :  { %2506 = vmatprep.subr.bf16.mxu0 %v15286_v0  ;;  %2547 = vmatprep.subr.bf16.mxu1 %v15289_v1 }
 0x302   :  { %2536 = vmatprep.mubr.bf16.mxu0 %v18403_v11  ;;  %2577 = vmatprep.mubr.bf16.mxu1 %v18403_v11 }
 0x304   :  { %2507 = vmatpush1.bf16.msra.mxu0 %v15294_v62  ;;  %2548 = vmatpush1.bf16.msra.mxu1 %v15297_v2 }
 0x305   :  { %2508 = vmatprep.subr.bf16.mxu0 %v15300_v5  ;;  %2549 = vmatprep.subr.bf16.mxu1 %v15303_v7 }
 0x308   :  { %2509 = vmatpush1.bf16.msra.mxu0 %v15306_v14  ;;  %2550 = vmatpush1.bf16.msra.mxu1 %v15309_v25 }
 0x309   :  { %2510 = vmatprep.subr.bf16.mxu0 %v15312_v20  ;;  %2551 = vmatprep.subr.bf16.mxu1 %v15315_v16 }
 0x30c   :  { %2511 = vmatpush1.bf16.msra.mxu0 %v15318_v13  ;;  %2552 = vmatpush1.bf16.msra.mxu1 %v15321_v32 }
 0x30d   :  { %2512 = vmatprep.subr.bf16.mxu0 %v15324_v34  ;;  %2553 = vmatprep.subr.bf16.mxu1 %v15327_v12 }
 0x310   :  { %2513 = vmatpush1.bf16.msra.mxu0 %v15330_v21  ;;  %2554 = vmatpush1.bf16.msra.mxu1 %v15333_v27  ;;  %v15351_v27 = vld [vmem:[#allocation14 + $0x2c] ss:$16 sps:$4 sm:$0xff]  }
 0x311   :  { %2514 = vmatprep.subr.bf16.mxu0 %v15336_v53  ;;  %2555 = vmatprep.subr.bf16.mxu1 %v15339_v47  ;;  %18479 = vst [vmem:[#allocation56_spill] sm:$0xff] %v15351_v27  ;;  %v15354_v53 = vld [vmem:[#allocation14 + $0x20] ss:$16 sps:$4 sm:$0xff]   ;;  %v15357_v47 = vld [vmem:[#allocation14 + $0x28] ss:$16 sps:$4 sm:$0xff]  }
 0x312   :  { %18480 = vst [vmem:[#allocation57_spill] sm:$0xff] %v15354_v53  ;;  %18481 = vst [vmem:[#allocation58_spill] sm:$0xff] %v15357_v47 }
 0x314   :  { %2515 = vmatpush1.bf16.msra.mxu0 %v15342_v10  ;;  %2556 = vmatpush1.bf16.msra.mxu1 %v15345_v3  ;;  %v15360_v10 = vld [vmem:[#allocation14 + $0x4] ss:$16 sps:$4 sm:$0xff]   ;;  %v15363_v3 = vld [vmem:[#allocation14 + $0xc] ss:$16 sps:$4 sm:$0xff]  }
 0x315   :  { %2516 = vmatprep.subr.bf16.mxu0 %v15348_v36  ;;  %2557 = vmatprep.subr.bf16.mxu1 %v15351_v27  ;;  %18482 = vst [vmem:[#allocation59_spill] sm:$0xff] %v15360_v10  ;;  %18483 = vst [vmem:[#allocation60_spill] sm:$0xff] %v15363_v3  ;;  %v15366_v36 = vld [vmem:[#allocation14] ss:$16 sps:$4 sm:$0xff]   ;;  %v15369_v27 = vld [vmem:[#allocation14 + $0x8] ss:$16 sps:$4 sm:$0xff]  }
 0x316   :  { %18484 = vst [vmem:[#allocation61_spill] sm:$0xff] %v15366_v36  ;;  %18485 = vst [vmem:[#allocation62_spill] sm:$0xff] %v15369_v27 }
 0x318   :  { %2517 = vmatpush1.bf16.msra.mxu0 %v15354_v53  ;;  %2558 = vmatpush1.bf16.msra.mxu1 %v15357_v47  ;;  %v15372_v53 = vld [vmem:[#allocation13 + $0xe4] ss:$16 sps:$4 sm:$0xff]   ;;  %v15375_v47 = vld [vmem:[#allocation13 + $0xec] ss:$16 sps:$4 sm:$0xff]  }
 0x319   :  { %2518 = vmatprep.subr.bf16.mxu0 %v15360_v10  ;;  %2559 = vmatprep.subr.bf16.mxu1 %v15363_v3  ;;  %18486 = vst [vmem:[#allocation63_spill] sm:$0xff] %v15372_v53  ;;  %18487 = vst [vmem:[#allocation64_spill] sm:$0xff] %v15375_v47 }
 0x31c   :  { %2519 = vmatpush1.bf16.msra.mxu0 %v15366_v36  ;;  %2560 = vmatpush1.bf16.msra.mxu1 %v15369_v27 }
 0x31d   :  { %2586 = vmatprep.subr.bf16.mxu0 %v15372_v53  ;;  %2627 = vmatprep.subr.bf16.mxu1 %v15375_v47 }
 0x37f   :  { %v2225_v10 = vpop.f32.mrf.mxu0  ;;  %v2266_v21 = vpop.f32.mrf.mxu1 }
 0x381   :  { %v2227_v12 = vpop.f32.mrf.mxu0  ;;  %v2268_v3 = vpop.f32.mrf.mxu1 }
 0x383   :  { %v2229_v34 = vpop.f32.mrf.mxu0  ;;  %v2270_v32 = vpop.f32.mrf.mxu1 }
 0x385   :  { %v2230_v13 = vpop.f32.mrf.mxu0  ;;  %v2271_v36 = vpop.f32.mrf.mxu1 }
 0x39f   :  { %v2307_v16 = vpop.f32.mrf.mxu0  ;;  %v2348_v20 = vpop.f32.mrf.mxu1 }
 0x3a0   :  { %v2308_v25 = vadd.f32 %v2307_v16, %v2225_v10  ;;  %v2349_v36 = vadd.f32 %v2348_v20, %v2266_v21 }
 0x3a1   :  { %v2309_v27 = vpop.f32.mrf.mxu0  ;;  %v2350_v14 = vpop.f32.mrf.mxu1 }
 0x3a2   :  { %v2355_v7 = vadd.f32 %v2308_v25, %v15148_v4  ;;  %v2310_v53 = vadd.f32 %v2309_v27, %v2227_v12  ;;  %v2351_v32 = vadd.f32 %v2350_v14, %v2268_v3  ;;  %v2357_v9 = vadd.f32 %v2349_v36, %v15160_v54 }
 0x3a3   :  { %v2311_v5 = vpop.f32.mrf.mxu0  ;;  %v2352_v2 = vpop.f32.mrf.mxu1 }
 0x3a4   :  { %v11827_v62 = vmul.f32 -1.442695, %v2355_v7  ;;  %v2356_v47 = vadd.f32 %v2310_v53, %v15151_v18  ;;  %v2358_v13 = vadd.f32 %v2351_v32, %v15156_v43  ;;  %v18488_v53 = vld [vmem:[#allocation82_spill] sm:$0xff] }
 0x3a5   :  { %v2312_v1 = vpop.f32.mrf.mxu0  ;;  %v2353_v0 = vpop.f32.mrf.mxu1  ;;  %v2389_v3 = vunpack.c.h.bf16 %v18488_v53 }
 0x3a6   :  { %12975 = vpow2.f32 %v11827_v62  ;;  %v11828_v34 = vmul.f32 -1.442695, %v2356_v47  ;;  %v11829_v10 = vmul.f32 -1.442695, %v2358_v13  ;;  %v2388_v0 = vunpack.c.l.bf16 %v18488_v53 }
 0x3a8   :  { %12977 = vpow2.f32 %v11828_v34 }
 0x3a9   :  { %12979 = vpow2.f32 %v11829_v10 }
 0x3b3   :  { %v12976_v16 = vpop.eup %12975 }
 0x3b4   :  { %v2362_v25 = vadd.f32 1.0, %v12976_v16 }
 0x3b5   :  { %v12978_v27 = vpop.eup %12977 }
 0x3b6   :  { %12981 = vrcp.f32 %v2362_v25  ;;  %v2368_v12 = vadd.f32 1.0, %v12978_v27  ;;  %v12980_v5 = vpop.eup %12979 }
 0x3b7   :  { %12983 = vtanh.f32 %v2357_v9  ;;  %v2375_v10 = vadd.f32 1.0, %v12980_v5 }
 0x3b8   :  { %12985 = vrcp.f32 %v2368_v12 }
 0x3bf   :  { %v2426_v1 = vpop.f32.mrf.mxu0  ;;  %v2467_v47 = vpop.f32.mrf.mxu1 }
 0x3c0   :  { %v2474_v62 = vadd.f32 %v2426_v1, %v2388_v0  ;;  %v18489_v0 = vld [vmem:[#allocation97_spill] sm:$0xff] }
 0x3c1   :  { %v2428_v2 = vpop.f32.mrf.mxu0  ;;  %v2469_v21 = vpop.f32.mrf.mxu1  ;;  %v2391_v1 = vunpack.c.h.bf16 %v18489_v0 }
 0x3c2   :  { %v11830_v7 = vmul.f32 -1.442695, %v2474_v62  ;;  %v2475_v14 = vadd.f32 %v2428_v2, %v2389_v3  ;;  %v2390_v3 = vunpack.c.l.bf16 %v18489_v0  ;;  %v15407_v0 = vld [vmem:[#allocation13 + $0xc8] ss:$16 sps:$4 sm:$0xff]  }
 0x3c3   :  { %v12982_v20 = vpop.eup %12981  ;;  %v2430_v34 = vpop.f32.mrf.mxu0  ;;  %v2477_v62 = vadd.f32 %v2469_v21, %v2391_v1  ;;  %v15396_v21 = vld [vmem:[#allocation13 + $0xc4] ss:$16 sps:$4 sm:$0xff]  }
 0x3c4   :  { %v2471_v32 = vpop.f32.mrf.mxu1  ;;  %v12984_v13 = vpop.eup %12983  ;;  %12987 = vpow2.f32 %v11830_v7  ;;  %v11831_v36 = vmul.f32 -1.442695, %v2475_v14  ;;  %v2476_v2 = vadd.f32 %v2467_v47, %v2390_v3  ;;  %v15393_v47 = vld [vmem:[#allocation13 + $0xe8] ss:$16 sps:$4 sm:$0xff]   ;;  %v15413_v3 = vld [vmem:[#allocation13 + $0xac] ss:$16 sps:$4 sm:$0xff]  }
 0x3c5   :  { %v12986_v9 = vpop.eup %12985  ;;  %v2431_v16 = vpop.f32.mrf.mxu0  ;;  %v2379_v27 = vmul.f32 %v12984_v13, %v12982_v20  ;;  %v11832_v7 = vmul.f32 -1.442695, %v2477_v62  ;;  %v15410_v62 = vld [vmem:[#allocation13 + $0xa4] ss:$16 sps:$4 sm:$0xff]  }
 0x3c6   :  { %v2472_v25 = vpop.f32.mrf.mxu1  ;;  %v2378_v12 = vmul.f32 %v12986_v9, %v15165_v49  ;;  %12989 = vpow2.f32 %v11831_v36  ;;  %v15390_v9 = vld [vmem:[#allocation13 + $0xe0] ss:$16 sps:$4 sm:$0xff]  }
 0x3c7   :  { %12991 = vrcp.f32 %v2375_v10  ;;  %v15399_v10 = vld [vmem:[#allocation13 + $0xcc] ss:$16 sps:$4 sm:$0xff]  }
 0x3c8   :  { %v15385_v53 = vadd.f32 %v2379_v27, %v2378_v12  ;;  %v15404_v12 = vld [vmem:[#allocation13 + $0xc0] ss:$16 sps:$4 sm:$0xff]  }
 0x3ca   :  { %12993 = vtanh.f32 %v15385_v53 }
 0x3cb   :  { %12995 = vtanh.f32 %v2476_v2 }
 0x3cc   :  { %12997 = vpow2.f32 %v11832_v7 }
 0x3d1   :  { %v12988_v14 = vpop.eup %12987 }
 0x3d2   :  { %v2481_v5 = vadd.f32 1.0, %v12988_v14 }
 0x3d3   :  { %v12990_v34 = vpop.eup %12989 }
 0x3d4   :  { %12999 = vrcp.f32 %v2481_v5  ;;  %v2487_v49 = vadd.f32 1.0, %v12990_v34  ;;  %v12992_v20 = vpop.eup %12991  ;;  %v15417_v5 = vld [vmem:[#allocation13 + $0xa0] ss:$16 sps:$4 sm:$0xff]   ;;  %v15420_v34 = vld [vmem:[#allocation13 + $0xa8] ss:$16 sps:$4 sm:$0xff]  }
 0x3d6   :  { %13001 = vrcp.f32 %v2487_v49 }
 0x3d7   :  { %v12994_v32 = vpop.eup %12993 }
 0x3d8   :  { %v2382_v13 = vmul.f32 %v12994_v32, %v12992_v20  ;;  %v12996_v16 = vpop.eup %12995  ;;  %v15425_v20 = vld [vmem:[#allocation13 + $0x84] ss:$16 sps:$4 sm:$0xff]   ;;  %v15428_v32 = vld [vmem:[#allocation13 + $0x8c] ss:$16 sps:$4 sm:$0xff]  }
 0x3d9   :  { %v12998_v25 = vpop.eup %12997 }
 0x3da   :  { %v2503_v36 = vpack.c.bf16 %v2382_v13, %v2382_v13  ;;  %v2494_v7 = vadd.f32 1.0, %v12998_v25  ;;  %v15435_v13 = vld [vmem:[#allocation13 + $0x88] ss:$16 sps:$4 sm:$0xff]   ;;  %v15444_v25 = vld [vmem:[#allocation13 + $0x60] ss:$16 sps:$4 sm:$0xff]  }
 0x3db   :  { %18491 = vst [vmem:[#allocation66_spill] sm:$0xff] %v15435_v13  ;;  %18494 = vst [vmem:[#allocation71_spill] sm:$0xff] %v15444_v25 }
 0x3dc   :  { %2537 = vmatmul.mubr.bf16.vlgmr.msra.gmra.mxu0 %v2503_v36  ;;  %2578 = vmatmul.mubr.bf16.vlgmr.msra.gmra.mxu1 %v2503_v36  ;;  %13003 = vrcp.f32 %v2494_v7  ;;  %v15438_v36 = vld [vmem:[#allocation13 + $0x64] ss:$16 sps:$4 sm:$0xff]   ;;  %v15456_v7 = vld [vmem:[#allocation13 + $0x40] ss:$16 sps:$4 sm:$0xff]  }
 0x3dd   :  { %2587 = vmatpush1.bf16.msra.mxu0 %v15390_v9  ;;  %2628 = vmatpush1.bf16.msra.mxu1 %v15393_v47  ;;  %18492 = vst [vmem:[#allocation67_spill] sm:$0xff] %v15438_v36  ;;  %18498 = vst [vmem:[#allocation75_spill] sm:$0xff] %v15456_v7 }
 0x3de   :  { %2588 = vmatprep.subr.bf16.mxu0 %v15396_v21  ;;  %2629 = vmatprep.subr.bf16.mxu1 %v15399_v10 }
 0x3df   :  { %2618 = vmatprep.mubr.bf16.mxu0 %v18403_v11  ;;  %2659 = vmatprep.mubr.bf16.mxu1 %v18403_v11 }
 0x3e1   :  { %v13000_v27 = vpop.eup %12999  ;;  %2589 = vmatpush1.bf16.msra.mxu0 %v15404_v12  ;;  %2630 = vmatpush1.bf16.msra.mxu1 %v15407_v0 }
 0x3e2   :  { %v2498_v1 = vmul.f32 %v13000_v27, %v12996_v16  ;;  %2590 = vmatprep.subr.bf16.mxu0 %v15410_v62  ;;  %2631 = vmatprep.subr.bf16.mxu1 %v15413_v3  ;;  %v15441_v16 = vld [vmem:[#allocation13 + $0x6c] ss:$16 sps:$4 sm:$0xff]   ;;  %v15447_v27 = vld [vmem:[#allocation13 + $0x68] ss:$16 sps:$4 sm:$0xff]  }
 0x3e3   :  { %v13002_v2 = vpop.eup %13001  ;;  %18493 = vst [vmem:[#allocation70_spill] sm:$0xff] %v15441_v16  ;;  %18495 = vst [vmem:[#allocation72_spill] sm:$0xff] %v15447_v27 }
 0x3e4   :  { %v2497_v14 = vmul.f32 %v13002_v2, %v15183_v50  ;;  %v15432_v50 = vld [vmem:[#allocation13 + $0x80] ss:$16 sps:$4 sm:$0xff]   ;;  %v15453_v2 = vld [vmem:[#allocation13 + $0x4c] ss:$16 sps:$4 sm:$0xff]  }
 0x3e5   :  { %2591 = vmatpush1.bf16.msra.mxu0 %v15417_v5  ;;  %2632 = vmatpush1.bf16.msra.mxu1 %v15420_v34  ;;  %18490 = vst [vmem:[#allocation65_spill] sm:$0xff] %v15432_v50  ;;  %18497 = vst [vmem:[#allocation74_spill] sm:$0xff] %v15453_v2 }
 0x3e6   :  { %v15423_v49 = vadd.f32 %v2498_v1, %v2497_v14  ;;  %2592 = vmatprep.subr.bf16.mxu0 %v15425_v20  ;;  %2633 = vmatprep.subr.bf16.mxu1 %v15428_v32  ;;  %v15450_v1 = vld [vmem:[#allocation13 + $0x44] ss:$16 sps:$4 sm:$0xff]   ;;  %v15459_v14 = vld [vmem:[#allocation13 + $0x48] ss:$16 sps:$4 sm:$0xff]  }
 0x3e7   :  { %18496 = vst [vmem:[#allocation73_spill] sm:$0xff] %v15450_v1  ;;  %18499 = vst [vmem:[#allocation76_spill] sm:$0xff] %v15459_v14 }
 0x3e8   :  { %13005 = vtanh.f32 %v15423_v49 }
 0x3e9   :  { %2593 = vmatpush1.bf16.msra.mxu0 %v15432_v50  ;;  %2634 = vmatpush1.bf16.msra.mxu1 %v15435_v13  ;;  %v15480_v13 = vld [vmem:[#allocation13] ss:$16 sps:$4 sm:$0xff]   ;;  %v15483_v50 = vld [vmem:[#allocation13 + $0x8] ss:$16 sps:$4 sm:$0xff]  }
 0x3ea   :  { %2594 = vmatprep.subr.bf16.mxu0 %v15438_v36  ;;  %2635 = vmatprep.subr.bf16.mxu1 %v15441_v16  ;;  %v15468_v36 = vld [vmem:[#allocation13 + $0x20] ss:$16 sps:$4 sm:$0xff]  }
 0x3ed   :  { %2595 = vmatpush1.bf16.msra.mxu0 %v15444_v25  ;;  %2636 = vmatpush1.bf16.msra.mxu1 %v15447_v27  ;;  %v15462_v25 = vld [vmem:[#allocation13 + $0x24] ss:$16 sps:$4 sm:$0xff]   ;;  %v15465_v27 = vld [vmem:[#allocation13 + $0x2c] ss:$16 sps:$4 sm:$0xff]  }
 0x3ee   :  { %2596 = vmatprep.subr.bf16.mxu0 %v15450_v1  ;;  %2637 = vmatprep.subr.bf16.mxu1 %v15453_v2  ;;  %18500 = vst [vmem:[#allocation77_spill] sm:$0xff] %v15462_v25  ;;  %18501 = vst [vmem:[#allocation78_spill] sm:$0xff] %v15465_v27  ;;  %v13004_v1 = vpop.eup %13003  ;;  %v15471_v2 = vld [vmem:[#allocation13 + $0x28] ss:$16 sps:$4 sm:$0xff]  }
 0x3f1   :  { %2597 = vmatpush1.bf16.msra.mxu0 %v15456_v7  ;;  %2638 = vmatpush1.bf16.msra.mxu1 %v15459_v14  ;;  %v15474_v7 = vld [vmem:[#allocation13 + $0x4] ss:$16 sps:$4 sm:$0xff]   ;;  %v15477_v14 = vld [vmem:[#allocation13 + $0xc] ss:$16 sps:$4 sm:$0xff]  }
 0x3f2   :  { %2598 = vmatprep.subr.bf16.mxu0 %v15462_v25  ;;  %2639 = vmatprep.subr.bf16.mxu1 %v15465_v27 }
 0x3f5   :  { %v13006_v16 = vpop.eup %13005  ;;  %2599 = vmatpush1.bf16.msra.mxu0 %v15468_v36  ;;  %2640 = vmatpush1.bf16.msra.mxu1 %v15471_v2 }
 0x3f6   :  { %2600 = vmatprep.subr.bf16.mxu0 %v15474_v7  ;;  %2641 = vmatprep.subr.bf16.mxu1 %v15477_v14  ;;  %v2501_v25 = vmul.f32 %v13006_v16, %v13004_v1  ;;  %v18517_v16 = vld [vmem:[#allocation49_spill] sm:$0xff]  ;;  %v18520_v1 = vld [vmem:[#allocation52_spill] sm:$0xff] }
 0x3f8   :  { %v2502_v27 = vpack.c.bf16 %v2501_v25, %v2501_v25  ;;  %v18518_v25 = vld [vmem:[#allocation50_spill] sm:$0xff] }
 0x3f9   :  { %2601 = vmatpush1.bf16.msra.mxu0 %v15480_v13  ;;  %2642 = vmatpush1.bf16.msra.mxu1 %v15483_v50 }
 0x3fa   :  { %2705 = vmatprep.subr.bf16.mxu0 %v15206_v26  ;;  %2746 = vmatprep.subr.bf16.mxu1 %v15209_v15 }
 0x3fc   :  { %2619 = vmatmul.mubr.bf16.vlgmr.msra.gmra.mxu0 %v2502_v27  ;;  %2660 = vmatmul.mubr.bf16.vlgmr.msra.gmra.mxu1 %v2502_v27 }
 0x3fd   :  { %2706 = vmatpush1.bf16.msra.mxu0 %v15046_v28  ;;  %2747 = vmatpush1.bf16.msra.mxu1 %v15213_v31  ;;  %v18502_v28 = vld [vmem:[#allocation37_spill] sm:$0xff] }
 0x3fe   :  { %2707 = vmatprep.subr.bf16.mxu0 %v15050_v8  ;;  %2748 = vmatprep.subr.bf16.mxu1 %v15217_v24  ;;  %v18503_v8 = vld [vmem:[#allocation36_spill] sm:$0xff] }
 0x3ff   :  { %2737 = vmatprep.mubr.bf16.mxu0 %v18403_v11  ;;  %2778 = vmatprep.mubr.bf16.mxu1 %v18403_v11 }
 0x401   :  { %2708 = vmatpush1.bf16.msra.mxu0 %v15056_v22  ;;  %2749 = vmatpush1.bf16.msra.mxu1 %v15223_v19  ;;  %v18504_v22 = vld [vmem:[#allocation39_spill] sm:$0xff] }
 0x402   :  { %2709 = vmatprep.subr.bf16.mxu0 %v15060_v33  ;;  %2750 = vmatprep.subr.bf16.mxu1 %v15227_v44  ;;  %v18505_v33 = vld [vmem:[#allocation38_spill] sm:$0xff] }
 0x405   :  { %2710 = vmatpush1.bf16.msra.mxu0 %v15064_v37  ;;  %2751 = vmatpush1.bf16.msra.mxu1 %v15231_v23  ;;  %v18506_v37 = vld [vmem:[#allocation41_spill] sm:$0xff] }
 0x406   :  { %2711 = vmatprep.subr.bf16.mxu0 %v15068_v38  ;;  %2752 = vmatprep.subr.bf16.mxu1 %v15235_v51  ;;  %v18507_v38 = vld [vmem:[#allocation40_spill] sm:$0xff] }
 0x409   :  { %2712 = vmatpush1.bf16.msra.mxu0 %v15072_v6  ;;  %2753 = vmatpush1.bf16.msra.mxu1 %v15239_v52  ;;  %v18508_v6 = vld [vmem:[#allocation43_spill] sm:$0xff] }
 0x40a   :  { %2713 = vmatprep.subr.bf16.mxu0 %v15076_v39  ;;  %2754 = vmatprep.subr.bf16.mxu1 %v15243_v48  ;;  %v18509_v39 = vld [vmem:[#allocation42_spill] sm:$0xff] }
 0x40d   :  { %2714 = vmatpush1.bf16.msra.mxu0 %v15080_v40  ;;  %2755 = vmatpush1.bf16.msra.mxu1 %v15247_v55  ;;  %v18510_v40 = vld [vmem:[#allocation44_spill] sm:$0xff] }
 0x40e   :  { %2715 = vmatprep.subr.bf16.mxu0 %v15084_v41  ;;  %2756 = vmatprep.subr.bf16.mxu1 %v15251_v56  ;;  %v18511_v41 = vld [vmem:[#allocation45_spill] sm:$0xff] }
 0x411   :  { %2716 = vmatpush1.bf16.msra.mxu0 %v15088_v42  ;;  %2757 = vmatpush1.bf16.msra.mxu1 %v15255_v35  ;;  %v18512_v42 = vld [vmem:[#allocation46_spill] sm:$0xff] }
 0x412   :  { %2717 = vmatprep.subr.bf16.mxu0 %v15092_v17  ;;  %2758 = vmatprep.subr.bf16.mxu1 %v15259_v57  ;;  %v18513_v17 = vld [vmem:[#allocation80_spill] sm:$0xff] }
 0x415   :  { %2718 = vmatpush1.bf16.msra.mxu0 %v15096_v45  ;;  %2759 = vmatpush1.bf16.msra.mxu1 %v15263_v58  ;;  %v18514_v45 = vld [vmem:[#allocation96_spill] sm:$0xff] }
 0x416   :  { %2719 = vmatprep.subr.bf16.mxu0 %v15100_v46  ;;  %2760 = vmatprep.subr.bf16.mxu1 %v15267_v59  ;;  %v18515_v46 = vld [vmem:[#allocation47_spill] sm:$0xff] }
 0x419   :  { %2720 = vmatpush1.bf16.msra.mxu0 %v15104_v30  ;;  %2761 = vmatpush1.bf16.msra.mxu1 %v15271_v29  ;;  %v18516_v30 = vld [vmem:[#allocation48_spill] sm:$0xff] }
 0x41a   :  { %2817 = vmatprep.subr.bf16.mxu0 %v15274_v60  ;;  %2858 = vmatprep.subr.bf16.mxu1 %v15277_v61 }
 0x41c   :  { %2738 = vmatmul.mubr.bf16.vlgmr.msra.gmra.mxu0 %v2502_v27  ;;  %2779 = vmatmul.mubr.bf16.vlgmr.msra.gmra.mxu1 %v2502_v27  ;;  %v18519_v27 = vld [vmem:[#allocation51_spill] sm:$0xff] }
 0x41d   :  { %2818 = vmatpush1.bf16.msra.mxu0 %v15280_v63  ;;  %2859 = vmatpush1.bf16.msra.mxu1 %v18502_v28 }
 0x41e   :  { %2819 = vmatprep.subr.bf16.mxu0 %v18503_v8  ;;  %2860 = vmatprep.subr.bf16.mxu1 %v18504_v22 }
 0x41f   :  { %2849 = vmatprep.mubr.bf16.mxu0 %v18403_v11  ;;  %2890 = vmatprep.mubr.bf16.mxu1 %v18403_v11 }
 0x421   :  { %2820 = vmatpush1.bf16.msra.mxu0 %v18505_v33  ;;  %2861 = vmatpush1.bf16.msra.mxu1 %v18506_v37 }
 0x422   :  { %2821 = vmatprep.subr.bf16.mxu0 %v18507_v38  ;;  %2862 = vmatprep.subr.bf16.mxu1 %v18508_v6 }
 0x425   :  { %2822 = vmatpush1.bf16.msra.mxu0 %v18509_v39  ;;  %2863 = vmatpush1.bf16.msra.mxu1 %v18510_v40  ;;  %v18521_v40 = vld [vmem:[#allocation53_spill] sm:$0xff] }
 0x426   :  { %2823 = vmatprep.subr.bf16.mxu0 %v18511_v41  ;;  %2864 = vmatprep.subr.bf16.mxu1 %v18512_v42  ;;  %v18522_v41 = vld [vmem:[#allocation54_spill] sm:$0xff]  ;;  %v18523_v42 = vld [vmem:[#allocation55_spill] sm:$0xff] }
 0x429   :  { %2824 = vmatpush1.bf16.msra.mxu0 %v18513_v17  ;;  %2865 = vmatpush1.bf16.msra.mxu1 %v18514_v45  ;;  %v18524_v17 = vld [vmem:[#allocation56_spill] sm:$0xff]  ;;  %v18525_v45 = vld [vmem:[#allocation57_spill] sm:$0xff] }
 0x42a   :  { %2825 = vmatprep.subr.bf16.mxu0 %v18515_v46  ;;  %2866 = vmatprep.subr.bf16.mxu1 %v18516_v30  ;;  %v18526_v46 = vld [vmem:[#allocation58_spill] sm:$0xff]  ;;  %v18527_v30 = vld [vmem:[#allocation59_spill] sm:$0xff] }
 0x42d   :  { %2826 = vmatpush1.bf16.msra.mxu0 %v18517_v16  ;;  %2867 = vmatpush1.bf16.msra.mxu1 %v18518_v25  ;;  %v18528_v16 = vld [vmem:[#allocation60_spill] sm:$0xff]  ;;  %v18529_v25 = vld [vmem:[#allocation61_spill] sm:$0xff] }
 0x42e   :  { %2827 = vmatprep.subr.bf16.mxu0 %v18519_v27  ;;  %2868 = vmatprep.subr.bf16.mxu1 %v18520_v1  ;;  %v18530_v27 = vld [vmem:[#allocation62_spill] sm:$0xff]  ;;  %v18531_v1 = vld [vmem:[#allocation63_spill] sm:$0xff] }
 0x431   :  { %2828 = vmatpush1.bf16.msra.mxu0 %v18521_v40  ;;  %2869 = vmatpush1.bf16.msra.mxu1 %v18522_v41  ;;  %v18532_v40 = vld [vmem:[#allocation64_spill] sm:$0xff] }
 0x432   :  { %2829 = vmatprep.subr.bf16.mxu0 %v18523_v42  ;;  %2870 = vmatprep.subr.bf16.mxu1 %v18524_v17 }
 0x435   :  { %2830 = vmatpush1.bf16.msra.mxu0 %v18525_v45  ;;  %2871 = vmatpush1.bf16.msra.mxu1 %v18526_v46 }
 0x436   :  { %2831 = vmatprep.subr.bf16.mxu0 %v18527_v30  ;;  %2872 = vmatprep.subr.bf16.mxu1 %v18528_v16 }
 0x439   :  { %2832 = vmatpush1.bf16.msra.mxu0 %v18529_v25  ;;  %2873 = vmatpush1.bf16.msra.mxu1 %v18530_v27 }
 0x43a   :  { %2899 = vmatprep.subr.bf16.mxu0 %v18531_v1  ;;  %2940 = vmatprep.subr.bf16.mxu1 %v18532_v40 }
 0x49c   :  { %v2538_v41 = vpop.f32.mrf.mxu0  ;;  %v2579_v42 = vpop.f32.mrf.mxu1 }
 0x49e   :  { %v2540_v39 = vpop.f32.mrf.mxu0  ;;  %v2581_v17 = vpop.f32.mrf.mxu1 }
 0x4a0   :  { %v2542_v6 = vpop.f32.mrf.mxu0  ;;  %v2583_v45 = vpop.f32.mrf.mxu1 }
 0x4a2   :  { %v2543_v38 = vpop.f32.mrf.mxu0  ;;  %v2584_v46 = vpop.f32.mrf.mxu1 }
 0x4bc   :  { %v2620_v37 = vpop.f32.mrf.mxu0  ;;  %v2661_v30 = vpop.f32.mrf.mxu1 }
 0x4bd   :  { %v2621_v33 = vadd.f32 %v2620_v37, %v2538_v41  ;;  %v2662_v46 = vadd.f32 %v2661_v30, %v2579_v42 }
 0x4be   :  { %v2622_v16 = vpop.f32.mrf.mxu0  ;;  %v2663_v22 = vpop.f32.mrf.mxu1 }
 0x4bf   :  { %v2668_v25 = vadd.f32 %v2621_v33, %v15148_v4  ;;  %v2623_v27 = vadd.f32 %v2622_v16, %v2540_v39  ;;  %v2664_v38 = vadd.f32 %v2663_v22, %v2581_v17  ;;  %v2670_v60 = vadd.f32 %v2662_v46, %v15160_v54 }
 0x4c0   :  { %v2624_v8 = vpop.f32.mrf.mxu0  ;;  %v2665_v1 = vpop.f32.mrf.mxu1 }
 0x4c1   :  { %v11833_v28 = vmul.f32 -1.442695, %v2668_v25  ;;  %v2669_v40 = vadd.f32 %v2623_v27, %v15151_v18  ;;  %v2671_v45 = vadd.f32 %v2664_v38, %v15156_v43 }
 0x4c2   :  { %v2625_v63 = vpop.f32.mrf.mxu0  ;;  %v2666_v61 = vpop.f32.mrf.mxu1 }
 0x4c3   :  { %13007 = vpow2.f32 %v11833_v28  ;;  %v11834_v6 = vmul.f32 -1.442695, %v2669_v40  ;;  %v11835_v37 = vmul.f32 -1.442695, %v2671_v45  ;;  %v18533_v63 = vld [vmem:[#allocation84_spill] sm:$0xff] }
 0x4c4   :  { %v2701_v61 = vunpack.c.l.bf16 %v18533_v63  ;;  %v2702_v22 = vunpack.c.h.bf16 %v18533_v63 }
 0x4c5   :  { %13009 = vpow2.f32 %v11834_v6 }
 0x4c6   :  { %13011 = vpow2.f32 %v11835_v37 }
 0x4d0   :  { %v13008_v41 = vpop.eup %13007 }
 0x4d1   :  { %v2675_v33 = vadd.f32 1.0, %v13008_v41 }
 0x4d2   :  { %v13010_v39 = vpop.eup %13009 }
 0x4d3   :  { %13013 = vrcp.f32 %v2675_v33  ;;  %v2681_v8 = vadd.f32 1.0, %v13010_v39  ;;  %v13012_v30 = vpop.eup %13011 }
 0x4d4   :  { %13015 = vtanh.f32 %v2670_v60  ;;  %v2688_v37 = vadd.f32 1.0, %v13012_v30 }
 0x4d5   :  { %13017 = vrcp.f32 %v2681_v8 }
 0x4dc   :  { %v2739_v28 = vpop.f32.mrf.mxu0  ;;  %v2780_v40 = vpop.f32.mrf.mxu1 }
 0x4dd   :  { %v2787_v16 = vadd.f32 %v2739_v28, %v2701_v61  ;;  %v18534_v61 = vld [vmem:[#allocation98_spill] sm:$0xff] }
 0x4de   :  { %v2741_v17 = vpop.f32.mrf.mxu0  ;;  %v2782_v42 = vpop.f32.mrf.mxu1  ;;  %v2704_v28 = vunpack.c.h.bf16 %v18534_v61 }
 0x4df   :  { %v11836_v25 = vmul.f32 -1.442695, %v2787_v16  ;;  %v2788_v27 = vadd.f32 %v2741_v17, %v2702_v22  ;;  %v2703_v22 = vunpack.c.l.bf16 %v18534_v61  ;;  %v18535_v61 = vld [vmem:[#allocation65_spill] sm:$0xff] }
 0x4e0   :  { %v13014_v1 = vpop.eup %13013  ;;  %v2743_v6 = vpop.f32.mrf.mxu0  ;;  %v2790_v16 = vadd.f32 %v2782_v42, %v2704_v28  ;;  %v18536_v28 = vld [vmem:[#allocation66_spill] sm:$0xff] }
 0x4e1   :  { %v2784_v38 = vpop.f32.mrf.mxu1  ;;  %v13016_v45 = vpop.eup %13015  ;;  %13019 = vpow2.f32 %v11836_v25  ;;  %v11837_v46 = vmul.f32 -1.442695, %v2788_v27  ;;  %v2789_v17 = vadd.f32 %v2780_v40, %v2703_v22  ;;  %v18539_v22 = vld [vmem:[#allocation71_spill] sm:$0xff] }
 0x4e2   :  { %v13018_v60 = vpop.eup %13017  ;;  %v2744_v41 = vpop.f32.mrf.mxu0  ;;  %v2692_v39 = vmul.f32 %v13016_v45, %v13014_v1  ;;  %v11838_v25 = vmul.f32 -1.442695, %v2790_v16  ;;  %v18537_v16 = vld [vmem:[#allocation67_spill] sm:$0xff] }
 0x4e3   :  { %v2785_v33 = vpop.f32.mrf.mxu1  ;;  %v2691_v8 = vmul.f32 %v13018_v60, %v15385_v53  ;;  %13021 = vpow2.f32 %v11837_v46 }
 0x4e4   :  { %13023 = vrcp.f32 %v2688_v37 }
 0x4e5   :  { %v15563_v63 = vadd.f32 %v2692_v39, %v2691_v8 }
 0x4e7   :  { %13025 = vtanh.f32 %v15563_v63 }
 0x4e8   :  { %13027 = vtanh.f32 %v2789_v17  ;;  %v18540_v17 = vld [vmem:[#allocation72_spill] sm:$0xff] }
 0x4e9   :  { %13029 = vpow2.f32 %v11838_v25  ;;  %v18541_v25 = vld [vmem:[#allocation73_spill] sm:$0xff] }
 0x4ee   :  { %v13020_v27 = vpop.eup %13019 }
 0x4ef   :  { %v2794_v30 = vadd.f32 1.0, %v13020_v27  ;;  %v18542_v27 = vld [vmem:[#allocation74_spill] sm:$0xff] }
 0x4f0   :  { %v13022_v6 = vpop.eup %13021 }
 0x4f1   :  { %13031 = vrcp.f32 %v2794_v30  ;;  %v2800_v53 = vadd.f32 1.0, %v13022_v6  ;;  %v13024_v1 = vpop.eup %13023  ;;  %v18543_v30 = vld [vmem:[#allocation75_spill] sm:$0xff]  ;;  %v18544_v6 = vld [vmem:[#allocation76_spill] sm:$0xff] }
 0x4f3   :  { %13033 = vrcp.f32 %v2800_v53  ;;  %v18545_v53 = vld [vmem:[#allocation77_spill] sm:$0xff] }
 0x4f4   :  { %v13026_v38 = vpop.eup %13025 }
 0x4f5   :  { %v2695_v45 = vmul.f32 %v13026_v38, %v13024_v1  ;;  %v13028_v40 = vpop.eup %13027  ;;  %v18546_v1 = vld [vmem:[#allocation78_spill] sm:$0xff] }
 0x4f6   :  { %v13030_v42 = vpop.eup %13029 }
 0x4f7   :  { %v2816_v46 = vpack.c.bf16 %v2695_v45, %v2695_v45  ;;  %v2807_v33 = vadd.f32 1.0, %v13030_v42  ;;  %v15606_v42 = vld [vmem:[#allocation11 + $0xe0] ss:$16 sps:$4 sm:$0xff]  }
 0x4f9   :  { %2850 = vmatmul.mubr.bf16.vlgmr.msra.gmra.mxu0 %v2816_v46  ;;  %2891 = vmatmul.mubr.bf16.vlgmr.msra.gmra.mxu1 %v2816_v46  ;;  %13035 = vrcp.f32 %v2807_v33  ;;  %v18561_v33 = vld [vmem:[#allocation36_spill] sm:$0xff] }
 0x4fa   :  { %2900 = vmatpush1.bf16.msra.mxu0 %v15390_v9  ;;  %2941 = vmatpush1.bf16.msra.mxu1 %v15393_v47 }
 0x4fb   :  { %2901 = vmatprep.subr.bf16.mxu0 %v15396_v21  ;;  %2942 = vmatprep.subr.bf16.mxu1 %v15399_v10 }
 0x4fc   :  { %2931 = vmatprep.mubr.bf16.mxu0 %v18403_v11  ;;  %2972 = vmatprep.mubr.bf16.mxu1 %v18403_v11 }
 0x4fe   :  { %v13032_v60 = vpop.eup %13031  ;;  %2902 = vmatpush1.bf16.msra.mxu0 %v15404_v12  ;;  %2943 = vmatpush1.bf16.msra.mxu1 %v15407_v0 }
 0x4ff   :  { %v2811_v37 = vmul.f32 %v13032_v60, %v13028_v40  ;;  %2903 = vmatprep.subr.bf16.mxu0 %v15410_v62  ;;  %2944 = vmatprep.subr.bf16.mxu1 %v15413_v3  ;;  %v15610_v60 = vld [vmem:[#allocation11 + $0xc4] ss:$16 sps:$4 sm:$0xff]  }
 0x500   :  { %v13034_v41 = vpop.eup %13033 }
 0x501   :  { %v2810_v39 = vmul.f32 %v13034_v41, %v15423_v49  ;;  %v18538_v49 = vld [vmem:[#allocation70_spill] sm:$0xff] }
 0x502   :  { %2904 = vmatpush1.bf16.msra.mxu0 %v15417_v5  ;;  %2945 = vmatpush1.bf16.msra.mxu1 %v15420_v34  ;;  %v18559_v41 = vld [vmem:[#allocation34_spill] sm:$0xff] }
 0x503   :  { %v15581_v8 = vadd.f32 %v2811_v37, %v2810_v39  ;;  %2905 = vmatprep.subr.bf16.mxu0 %v15425_v20  ;;  %2946 = vmatprep.subr.bf16.mxu1 %v15428_v32  ;;  %v15632_v37 = vld [vmem:[#allocation11 + $0x80] ss:$16 sps:$4 sm:$0xff]   ;;  %v18562_v39 = vld [vmem:[#allocation39_spill] sm:$0xff] }
 0x504   :  { %18548 = vst [vmem:[#allocation97_spill] sm:$0xff] %v15632_v37 }
 0x505   :  { %13037 = vtanh.f32 %v15581_v8 }
 0x506   :  { %2906 = vmatpush1.bf16.msra.mxu0 %v18535_v61  ;;  %2947 = vmatpush1.bf16.msra.mxu1 %v18536_v28  ;;  %v13036_v38 = vpop.eup %13035 }
 0x507   :  { %2907 = vmatprep.subr.bf16.mxu0 %v18537_v16  ;;  %2948 = vmatprep.subr.bf16.mxu1 %v18538_v49 }
 0x50a   :  { %2908 = vmatpush1.bf16.msra.mxu0 %v18539_v22  ;;  %2949 = vmatpush1.bf16.msra.mxu1 %v18540_v17 }
 0x50b   :  { %2909 = vmatprep.subr.bf16.mxu0 %v18541_v25  ;;  %2950 = vmatprep.subr.bf16.mxu1 %v18542_v27 }
 0x50e   :  { %2910 = vmatpush1.bf16.msra.mxu0 %v18543_v30  ;;  %2951 = vmatpush1.bf16.msra.mxu1 %v18544_v6 }
 0x50f   :  { %2911 = vmatprep.subr.bf16.mxu0 %v18545_v53  ;;  %2952 = vmatprep.subr.bf16.mxu1 %v18546_v1 }
 0x512   :  { %v13038_v45 = vpop.eup %13037  ;;  %2912 = vmatpush1.bf16.msra.mxu0 %v15468_v36  ;;  %2953 = vmatpush1.bf16.msra.mxu1 %v15471_v2 }
 0x513   :  { %2913 = vmatprep.subr.bf16.mxu0 %v15474_v7  ;;  %2954 = vmatprep.subr.bf16.mxu1 %v15477_v14  ;;  %v2814_v46 = vmul.f32 %v13038_v45, %v13036_v38  ;;  %v18565_v38 = vld [vmem:[#allocation40_spill] sm:$0xff]  ;;  %v18566_v45 = vld [vmem:[#allocation43_spill] sm:$0xff] }
 0x515   :  { %v2815_v40 = vpack.c.bf16 %v2814_v46, %v2814_v46  ;;  %v18567_v46 = vld [vmem:[#allocation42_spill] sm:$0xff] }
 0x516   :  { %2914 = vmatpush1.bf16.msra.mxu0 %v15480_v13  ;;  %2955 = vmatpush1.bf16.msra.mxu1 %v15483_v50 }
 0x517   :  { %3018 = vmatprep.subr.bf16.mxu0 %v15206_v26  ;;  %3059 = vmatprep.subr.bf16.mxu1 %v15209_v15  ;;  %v15616_v26 = vld [vmem:[#allocation11 + $0xc0] ss:$16 sps:$4 sm:$0xff]   ;;  %v15620_v15 = vld [vmem:[#allocation11 + $0xa4] ss:$16 sps:$4 sm:$0xff]  }
 0x519   :  { %2932 = vmatmul.mubr.bf16.vlgmr.msra.gmra.mxu0 %v2815_v40  ;;  %2973 = vmatmul.mubr.bf16.vlgmr.msra.gmra.mxu1 %v2815_v40 }
 0x51a   :  { %3019 = vmatpush1.bf16.msra.mxu0 %v15606_v42  ;;  %3060 = vmatpush1.bf16.msra.mxu1 %v15213_v31  ;;  %v15624_v31 = vld [vmem:[#allocation11 + $0xa0] ss:$16 sps:$4 sm:$0xff]  }
 0x51b   :  { %3020 = vmatprep.subr.bf16.mxu0 %v15610_v60  ;;  %3061 = vmatprep.subr.bf16.mxu1 %v15217_v24  ;;  %v15628_v24 = vld [vmem:[#allocation11 + $0x84] ss:$16 sps:$4 sm:$0xff]  }
 0x51c   :  { %3050 = vmatprep.mubr.bf16.mxu0 %v18403_v11  ;;  %3091 = vmatprep.mubr.bf16.mxu1 %v18403_v11  ;;  %18547 = vst [vmem:[#allocation82_spill] sm:$0xff] %v15628_v24 }
 0x51e   :  { %3021 = vmatpush1.bf16.msra.mxu0 %v15616_v26  ;;  %3062 = vmatpush1.bf16.msra.mxu1 %v15223_v19  ;;  %v15636_v19 = vld [vmem:[#allocation11 + $0x64] ss:$16 sps:$4 sm:$0xff]  }
 0x51f   :  { %3022 = vmatprep.subr.bf16.mxu0 %v15620_v15  ;;  %3063 = vmatprep.subr.bf16.mxu1 %v15227_v44  ;;  %18549 = vst [vmem:[#allocation84_spill] sm:$0xff] %v15636_v19  ;;  %v15640_v44 = vld [vmem:[#allocation11 + $0x60] ss:$16 sps:$4 sm:$0xff]  }
 0x520   :  { %18550 = vst [vmem:[#allocation98_spill] sm:$0xff] %v15640_v44 }
 0x522   :  { %3023 = vmatpush1.bf16.msra.mxu0 %v15624_v31  ;;  %3064 = vmatpush1.bf16.msra.mxu1 %v15231_v23  ;;  %v15644_v23 = vld [vmem:[#allocation11 + $0x44] ss:$16 sps:$4 sm:$0xff]  }
 0x523   :  { %3024 = vmatprep.subr.bf16.mxu0 %v15628_v24  ;;  %3065 = vmatprep.subr.bf16.mxu1 %v15235_v51  ;;  %18551 = vst [vmem:[#allocation65_spill] sm:$0xff] %v15644_v23  ;;  %v15648_v51 = vld [vmem:[#allocation11 + $0x40] ss:$16 sps:$4 sm:$0xff]  }
 0x524   :  { %18552 = vst [vmem:[#allocation66_spill] sm:$0xff] %v15648_v51 }
 0x526   :  { %3025 = vmatpush1.bf16.msra.mxu0 %v15632_v37  ;;  %3066 = vmatpush1.bf16.msra.mxu1 %v15239_v52  ;;  %v15652_v52 = vld [vmem:[#allocation11 + $0x24] ss:$16 sps:$4 sm:$0xff]  }
 0x527   :  { %3026 = vmatprep.subr.bf16.mxu0 %v15636_v19  ;;  %3067 = vmatprep.subr.bf16.mxu1 %v15243_v48  ;;  %18553 = vst [vmem:[#allocation67_spill] sm:$0xff] %v15652_v52  ;;  %v15656_v48 = vld [vmem:[#allocation11 + $0x20] ss:$16 sps:$4 sm:$0xff]  }
 0x528   :  { %18554 = vst [vmem:[#allocation70_spill] sm:$0xff] %v15656_v48 }
 0x52a   :  { %3027 = vmatpush1.bf16.msra.mxu0 %v15640_v44  ;;  %3068 = vmatpush1.bf16.msra.mxu1 %v15247_v55  ;;  %v15660_v55 = vld [vmem:[#allocation11 + $0x4] ss:$16 sps:$4 sm:$0xff]  }
 0x52b   :  { %3028 = vmatprep.subr.bf16.mxu0 %v15644_v23  ;;  %3069 = vmatprep.subr.bf16.mxu1 %v15251_v56  ;;  %18555 = vst [vmem:[#allocation71_spill] sm:$0xff] %v15660_v55  ;;  %v15664_v56 = vld [vmem:[#allocation11] ss:$16 sps:$4 sm:$0xff]  }
 0x52c   :  { %18556 = vst [vmem:[#allocation72_spill] sm:$0xff] %v15664_v56 }
 0x52e   :  { %3029 = vmatpush1.bf16.msra.mxu0 %v15648_v51  ;;  %3070 = vmatpush1.bf16.msra.mxu1 %v15255_v35  ;;  %v18557_v35 = vld [vmem:[#allocation33_spill] sm:$0xff] }
 0x52f   :  { %3030 = vmatprep.subr.bf16.mxu0 %v15652_v52  ;;  %3071 = vmatprep.subr.bf16.mxu1 %v15259_v57  ;;  %v18558_v57 = vld [vmem:[#allocation35_spill] sm:$0xff] }
 0x532   :  { %3031 = vmatpush1.bf16.msra.mxu0 %v15656_v48  ;;  %3072 = vmatpush1.bf16.msra.mxu1 %v15263_v58  ;;  %v18560_v58 = vld [vmem:[#allocation37_spill] sm:$0xff] }
 0x533   :  { %3032 = vmatprep.subr.bf16.mxu0 %v15660_v55  ;;  %3073 = vmatprep.subr.bf16.mxu1 %v15267_v59  ;;  %v18563_v59 = vld [vmem:[#allocation38_spill] sm:$0xff] }
 0x536   :  { %3033 = vmatpush1.bf16.msra.mxu0 %v15664_v56  ;;  %3074 = vmatpush1.bf16.msra.mxu1 %v15271_v29  ;;  %v18564_v29 = vld [vmem:[#allocation41_spill] sm:$0xff] }
 0x537   :  { %3130 = vmatprep.subr.bf16.mxu0 %v18557_v35  ;;  %3171 = vmatprep.subr.bf16.mxu1 %v18558_v57  ;;  %v18569_v35 = vld [vmem:[#allocation45_spill] sm:$0xff]  ;;  %v18570_v57 = vld [vmem:[#allocation46_spill] sm:$0xff] }
 0x539   :  { %3051 = vmatmul.mubr.bf16.vlgmr.msra.gmra.mxu0 %v2815_v40  ;;  %3092 = vmatmul.mubr.bf16.vlgmr.msra.gmra.mxu1 %v2815_v40  ;;  %v18568_v40 = vld [vmem:[#allocation44_spill] sm:$0xff] }
 0x53a   :  { %3131 = vmatpush1.bf16.msra.mxu0 %v18559_v41  ;;  %3172 = vmatpush1.bf16.msra.mxu1 %v18560_v58  ;;  %v18571_v41 = vld [vmem:[#allocation80_spill] sm:$0xff] }
 0x53b   :  { %3132 = vmatprep.subr.bf16.mxu0 %v18561_v33  ;;  %3173 = vmatprep.subr.bf16.mxu1 %v18562_v39  ;;  %v18572_v58 = vld [vmem:[#allocation96_spill] sm:$0xff]  ;;  %v18573_v33 = vld [vmem:[#allocation47_spill] sm:$0xff] }
 0x53c   :  { %3162 = vmatprep.mubr.bf16.mxu0 %v18403_v11  ;;  %3203 = vmatprep.mubr.bf16.mxu1 %v18403_v11  ;;  %v18574_v39 = vld [vmem:[#allocation48_spill] sm:$0xff] }
 0x53e   :  { %3133 = vmatpush1.bf16.msra.mxu0 %v18563_v59  ;;  %3174 = vmatpush1.bf16.msra.mxu1 %v18564_v29  ;;  %v18575_v59 = vld [vmem:[#allocation49_spill] sm:$0xff]  ;;  %v18576_v29 = vld [vmem:[#allocation50_spill] sm:$0xff] }
 0x53f   :  { %3134 = vmatprep.subr.bf16.mxu0 %v18565_v38  ;;  %3175 = vmatprep.subr.bf16.mxu1 %v18566_v45  ;;  %v18577_v38 = vld [vmem:[#allocation51_spill] sm:$0xff]  ;;  %v18578_v45 = vld [vmem:[#allocation52_spill] sm:$0xff] }
 0x542   :  { %3135 = vmatpush1.bf16.msra.mxu0 %v18567_v46  ;;  %3176 = vmatpush1.bf16.msra.mxu1 %v18568_v40  ;;  %v18579_v46 = vld [vmem:[#allocation53_spill] sm:$0xff]  ;;  %v18580_v40 = vld [vmem:[#allocation54_spill] sm:$0xff] }
 0x543   :  { %3136 = vmatprep.subr.bf16.mxu0 %v18569_v35  ;;  %3177 = vmatprep.subr.bf16.mxu1 %v18570_v57  ;;  %v18581_v35 = vld [vmem:[#allocation55_spill] sm:$0xff]  ;;  %v18582_v57 = vld [vmem:[#allocation56_spill] sm:$0xff] }
 0x546   :  { %3137 = vmatpush1.bf16.msra.mxu0 %v18571_v41  ;;  %3178 = vmatpush1.bf16.msra.mxu1 %v18572_v58  ;;  %v18583_v41 = vld [vmem:[#allocation57_spill] sm:$0xff]  ;;  %v18584_v58 = vld [vmem:[#allocation58_spill] sm:$0xff] }
 0x547   :  { %3138 = vmatprep.subr.bf16.mxu0 %v18573_v33  ;;  %3179 = vmatprep.subr.bf16.mxu1 %v18574_v39  ;;  %v18585_v33 = vld [vmem:[#allocation59_spill] sm:$0xff]  ;;  %v18586_v39 = vld [vmem:[#allocation60_spill] sm:$0xff] }
 0x54a   :  { %3139 = vmatpush1.bf16.msra.mxu0 %v18575_v59  ;;  %3180 = vmatpush1.bf16.msra.mxu1 %v18576_v29  ;;  %v18587_v59 = vld [vmem:[#allocation61_spill] sm:$0xff]  ;;  %v18588_v29 = vld [vmem:[#allocation62_spill] sm:$0xff] }
 0x54b   :  { %3140 = vmatprep.subr.bf16.mxu0 %v18577_v38  ;;  %3181 = vmatprep.subr.bf16.mxu1 %v18578_v45  ;;  %v18589_v38 = vld [vmem:[#allocation63_spill] sm:$0xff]  ;;  %v18590_v45 = vld [vmem:[#allocation64_spill] sm:$0xff] }
 0x54e   :  { %3141 = vmatpush1.bf16.msra.mxu0 %v18579_v46  ;;  %3182 = vmatpush1.bf16.msra.mxu1 %v18580_v40 }
 0x54f   :  { %3142 = vmatprep.subr.bf16.mxu0 %v18581_v35  ;;  %3183 = vmatprep.subr.bf16.mxu1 %v18582_v57 }
 0x552   :  { %3143 = vmatpush1.bf16.msra.mxu0 %v18583_v41  ;;  %3184 = vmatpush1.bf16.msra.mxu1 %v18584_v58 }
 0x553   :  { %3144 = vmatprep.subr.bf16.mxu0 %v18585_v33  ;;  %3185 = vmatprep.subr.bf16.mxu1 %v18586_v39 }
 0x556   :  { %3145 = vmatpush1.bf16.msra.mxu0 %v18587_v59  ;;  %3186 = vmatpush1.bf16.msra.mxu1 %v18588_v29 }
 0x557   :  { %3212 = vmatprep.subr.bf16.mxu0 %v18589_v38  ;;  %3253 = vmatprep.subr.bf16.mxu1 %v18590_v45 }
 0x5b9   :  { %v2851_v46 = vpop.f32.mrf.mxu0  ;;  %v2892_v40 = vpop.f32.mrf.mxu1 }
 0x5bb   :  { %v2853_v35 = vpop.f32.mrf.mxu0  ;;  %v2894_v57 = vpop.f32.mrf.mxu1 }
 0x5bd   :  { %v2855_v56 = vpop.f32.mrf.mxu0  ;;  %v2896_v41 = vpop.f32.mrf.mxu1 }
 0x5bf   :  { %v2856_v55 = vpop.f32.mrf.mxu0  ;;  %v2897_v58 = vpop.f32.mrf.mxu1 }
 0x5d9   :  { %v2933_v48 = vpop.f32.mrf.mxu0  ;;  %v2974_v33 = vpop.f32.mrf.mxu1 }
 0x5da   :  { %v2934_v52 = vadd.f32 %v2933_v48, %v2851_v46  ;;  %v2975_v58 = vadd.f32 %v2974_v33, %v2892_v40 }
 0x5db   :  { %v2935_v39 = vpop.f32.mrf.mxu0  ;;  %v2976_v51 = vpop.f32.mrf.mxu1 }
 0x5dc   :  { %v2981_v59 = vadd.f32 %v2934_v52, %v15148_v4  ;;  %v2936_v29 = vadd.f32 %v2935_v39, %v2853_v35  ;;  %v2977_v55 = vadd.f32 %v2976_v51, %v2894_v57  ;;  %v2983_v24 = vadd.f32 %v2975_v58, %v15160_v54 }
 0x5dd   :  { %v2937_v23 = vpop.f32.mrf.mxu0  ;;  %v2978_v38 = vpop.f32.mrf.mxu1 }
 0x5de   :  { %v11839_v44 = vmul.f32 -1.442695, %v2981_v59  ;;  %v2982_v45 = vadd.f32 %v2936_v29, %v15151_v18  ;;  %v2984_v41 = vadd.f32 %v2977_v55, %v15156_v43 }
 0x5df   :  { %v2938_v19 = vpop.f32.mrf.mxu0  ;;  %v2979_v37 = vpop.f32.mrf.mxu1 }
 0x5e0   :  { %13039 = vpow2.f32 %v11839_v44  ;;  %v11840_v56 = vmul.f32 -1.442695, %v2982_v45  ;;  %v11841_v48 = vmul.f32 -1.442695, %v2984_v41  ;;  %v18591_v19 = vld [vmem:[#allocation86_spill] sm:$0xff] }
 0x5e1   :  { %v3014_v37 = vunpack.c.l.bf16 %v18591_v19  ;;  %v3015_v51 = vunpack.c.h.bf16 %v18591_v19 }
 0x5e2   :  { %13041 = vpow2.f32 %v11840_v56 }
 0x5e3   :  { %13043 = vpow2.f32 %v11841_v48 }
 0x5ed   :  { %v13040_v46 = vpop.eup %13039 }
 0x5ee   :  { %v2988_v52 = vadd.f32 1.0, %v13040_v46 }
 0x5ef   :  { %v13042_v35 = vpop.eup %13041 }
 0x5f0   :  { %13045 = vrcp.f32 %v2988_v52  ;;  %v2994_v23 = vadd.f32 1.0, %v13042_v35  ;;  %v13044_v33 = vpop.eup %13043 }
 0x5f1   :  { %13047 = vtanh.f32 %v2983_v24  ;;  %v3001_v48 = vadd.f32 1.0, %v13044_v33 }
 0x5f2   :  { %13049 = vrcp.f32 %v2994_v23 }
 0x5f9   :  { %v3052_v44 = vpop.f32.mrf.mxu0  ;;  %v3093_v39 = vpop.f32.mrf.mxu1 }
 0x5fa   :  { %v3100_v59 = vadd.f32 %v3052_v44, %v3014_v37  ;;  %v18592_v37 = vld [vmem:[#allocation99_spill] sm:$0xff] }
 0x5fb   :  { %v3054_v57 = vpop.f32.mrf.mxu0  ;;  %v3095_v40 = vpop.f32.mrf.mxu1  ;;  %v3017_v44 = vunpack.c.h.bf16 %v18592_v37 }
 0x5fc   :  { %v11842_v29 = vmul.f32 -1.442695, %v3100_v59  ;;  %v3101_v38 = vadd.f32 %v3054_v57, %v3015_v51  ;;  %v3016_v51 = vunpack.c.l.bf16 %v18592_v37  ;;  %v15820_v37 = vld [vmem:[#allocation14 + $0xe4] ss:$16 sps:$4 sm:$0xff]  }
 0x5fd   :  { %v13046_v45 = vpop.eup %13045  ;;  %v3056_v56 = vpop.f32.mrf.mxu0  ;;  %v3103_v59 = vadd.f32 %v3095_v40, %v3017_v44  ;;  %18603 = vst [vmem:[#allocation73_spill] sm:$0xff] %v15820_v37  ;;  %v15823_v44 = vld [vmem:[#allocation14 + $0xec] ss:$16 sps:$4 sm:$0xff]  }
 0x5fe   :  { %v3097_v55 = vpop.f32.mrf.mxu1  ;;  %v13048_v41 = vpop.eup %13047  ;;  %13051 = vpow2.f32 %v11842_v29  ;;  %v11843_v58 = vmul.f32 -1.442695, %v3101_v38  ;;  %v3102_v57 = vadd.f32 %v3093_v39, %v3016_v51  ;;  %18604 = vst [vmem:[#allocation74_spill] sm:$0xff] %v15823_v44  ;;  %v15829_v51 = vld [vmem:[#allocation14 + $0xe8] ss:$16 sps:$4 sm:$0xff]  }
 0x5ff   :  { %v13050_v24 = vpop.eup %13049  ;;  %v3057_v46 = vpop.f32.mrf.mxu0  ;;  %v3005_v35 = vmul.f32 %v13048_v41, %v13046_v45  ;;  %v11844_v29 = vmul.f32 -1.442695, %v3103_v59  ;;  %v15826_v59 = vld [vmem:[#allocation14 + $0xe0] ss:$16 sps:$4 sm:$0xff]   ;;  %18606 = vst [vmem:[#allocation76_spill] sm:$0xff] %v15829_v51 }
 0x600   :  { %v3098_v52 = vpop.f32.mrf.mxu1  ;;  %v3004_v23 = vmul.f32 %v13050_v24, %v15563_v63  ;;  %13053 = vpow2.f32 %v11843_v58  ;;  %v18601_v46 = vld [vmem:[#allocation71_spill] sm:$0xff]  ;;  %18605 = vst [vmem:[#allocation75_spill] sm:$0xff] %v15826_v59 }
 0x601   :  { %13055 = vrcp.f32 %v3001_v48  ;;  %v15813_v52 = vld [vmem:[#allocation11 + $0xc] ss:$16 sps:$4 sm:$0xff]  }
 0x602   :  { %v15711_v19 = vadd.f32 %v3005_v35, %v3004_v23  ;;  %v18602_v35 = vld [vmem:[#allocation72_spill] sm:$0xff]  ;;  %v15817_v23 = vld [vmem:[#allocation11 + $0x8] ss:$16 sps:$4 sm:$0xff]  }
 0x604   :  { %13057 = vtanh.f32 %v15711_v19 }
 0x605   :  { %13059 = vtanh.f32 %v3102_v57  ;;  %v15832_v57 = vld [vmem:[#allocation14 + $0xc4] ss:$16 sps:$4 sm:$0xff]  }
 0x606   :  { %13061 = vpow2.f32 %v11844_v29  ;;  %18607 = vst [vmem:[#allocation77_spill] sm:$0xff] %v15832_v57  ;;  %v15835_v29 = vld [vmem:[#allocation14 + $0xcc] ss:$16 sps:$4 sm:$0xff]  }
 0x607   :  { %18608 = vst [vmem:[#allocation78_spill] sm:$0xff] %v15835_v29 }
 0x60b   :  { %v13052_v38 = vpop.eup %13051 }
 0x60c   :  { %v3107_v33 = vadd.f32 1.0, %v13052_v38  ;;  %v15840_v38 = vld [vmem:[#allocation14 + $0xc0] ss:$16 sps:$4 sm:$0xff]  }
 0x60d   :  { %v13054_v56 = vpop.eup %13053  ;;  %18609 = vst [vmem:[#allocation33_spill] sm:$0xff] %v15840_v38 }
 0x60e   :  { %13063 = vrcp.f32 %v3107_v33  ;;  %v3113_v63 = vadd.f32 1.0, %v13054_v56  ;;  %v13056_v45 = vpop.eup %13055  ;;  %v15843_v33 = vld [vmem:[#allocation14 + $0xc8] ss:$16 sps:$4 sm:$0xff]   ;;  %v15846_v56 = vld [vmem:[#allocation14 + $0xa4] ss:$16 sps:$4 sm:$0xff]  }
 0x60f   :  { %18610 = vst [vmem:[#allocation35_spill] sm:$0xff] %v15843_v33  ;;  %18611 = vst [vmem:[#allocation34_spill] sm:$0xff] %v15846_v56 }
 0x610   :  { %13065 = vrcp.f32 %v3113_v63  ;;  %v15849_v63 = vld [vmem:[#allocation14 + $0xac] ss:$16 sps:$4 sm:$0xff]  }
 0x611   :  { %v13058_v55 = vpop.eup %13057  ;;  %18612 = vst [vmem:[#allocation37_spill] sm:$0xff] %v15849_v63 }
 0x612   :  { %v3008_v41 = vmul.f32 %v13058_v55, %v13056_v45  ;;  %v13060_v39 = vpop.eup %13059  ;;  %v15852_v45 = vld [vmem:[#allocation14 + $0xa0] ss:$16 sps:$4 sm:$0xff]   ;;  %v15855_v55 = vld [vmem:[#allocation14 + $0xa8] ss:$16 sps:$4 sm:$0xff]  }
 0x613   :  { %v13062_v40 = vpop.eup %13061  ;;  %18613 = vst [vmem:[#allocation36_spill] sm:$0xff] %v15852_v45  ;;  %18614 = vst [vmem:[#allocation39_spill] sm:$0xff] %v15855_v55 }
 0x614   :  { %v3129_v58 = vpack.c.bf16 %v3008_v41, %v3008_v41  ;;  %v15858_v41 = vld [vmem:[#allocation14 + $0x84] ss:$16 sps:$4 sm:$0xff]  }
 0x615   :  { %18615 = vst [vmem:[#allocation38_spill] sm:$0xff] %v15858_v41 }
 0x616   :  { %3163 = vmatmul.mubr.bf16.vlgmr.msra.gmra.mxu0 %v3129_v58  ;;  %3204 = vmatmul.mubr.bf16.vlgmr.msra.gmra.mxu1 %v3129_v58  ;;  %v15861_v58 = vld [vmem:[#allocation14 + $0x8c] ss:$16 sps:$4 sm:$0xff]  }
 0x617   :  { %3213 = vmatpush1.bf16.msra.mxu0 %v15390_v9  ;;  %3254 = vmatpush1.bf16.msra.mxu1 %v15393_v47  ;;  %v3120_v47 = vadd.f32 1.0, %v13062_v40  ;;  %18616 = vst [vmem:[#allocation41_spill] sm:$0xff] %v15861_v58  ;;  %v15867_v40 = vld [vmem:[#allocation14 + $0x88] ss:$16 sps:$4 sm:$0xff]  }
 0x618   :  { %3214 = vmatprep.subr.bf16.mxu0 %v15396_v21  ;;  %3255 = vmatprep.subr.bf16.mxu1 %v15399_v10  ;;  %18618 = vst [vmem:[#allocation43_spill] sm:$0xff] %v15867_v40 }
 0x619   :  { %3244 = vmatprep.mubr.bf16.mxu0 %v18403_v11  ;;  %3285 = vmatprep.mubr.bf16.mxu1 %v18403_v11  ;;  %13067 = vrcp.f32 %v3120_v47  ;;  %v15879_v47 = vld [vmem:[#allocation14 + $0x68] ss:$16 sps:$4 sm:$0xff]  }
 0x61a   :  { %18622 = vst [vmem:[#allocation46_spill] sm:$0xff] %v15879_v47 }
 0x61b   :  { %v13064_v24 = vpop.eup %13063  ;;  %3215 = vmatpush1.bf16.msra.mxu0 %v15404_v12  ;;  %3256 = vmatpush1.bf16.msra.mxu1 %v15407_v0 }
 0x61c   :  { %v3124_v48 = vmul.f32 %v13064_v24, %v13060_v39  ;;  %3216 = vmatprep.subr.bf16.mxu0 %v15410_v62  ;;  %3257 = vmatprep.subr.bf16.mxu1 %v15413_v3  ;;  %v15864_v39 = vld [vmem:[#allocation14 + $0x80] ss:$16 sps:$4 sm:$0xff]   ;;  %v15870_v24 = vld [vmem:[#allocation14 + $0x64] ss:$16 sps:$4 sm:$0xff]  }
 0x61d   :  { %v13066_v9 = vpop.eup %13065  ;;  %18617 = vst [vmem:[#allocation40_spill] sm:$0xff] %v15864_v39  ;;  %18619 = vst [vmem:[#allocation42_spill] sm:$0xff] %v15870_v24 }
 0x61e   :  { %v3123_v21 = vmul.f32 %v13066_v9, %v15581_v8  ;;  %v15785_v8 = vld [vmem:[#allocation11 + $0x88] ss:$16 sps:$4 sm:$0xff]   ;;  %v15876_v9 = vld [vmem:[#allocation14 + $0x60] ss:$16 sps:$4 sm:$0xff]  }
 0x61f   :  { %3217 = vmatpush1.bf16.msra.mxu0 %v15417_v5  ;;  %3258 = vmatpush1.bf16.msra.mxu1 %v15420_v34  ;;  %v15752_v5 = vld [vmem:[#allocation11 + $0xe4] ss:$16 sps:$4 sm:$0xff]   ;;  %v15755_v34 = vld [vmem:[#allocation11 + $0xec] ss:$16 sps:$4 sm:$0xff]   ;;  %18621 = vst [vmem:[#allocation45_spill] sm:$0xff] %v15876_v9 }
 0x620   :  { %v15729_v10 = vadd.f32 %v3124_v48, %v3123_v21  ;;  %3218 = vmatprep.subr.bf16.mxu0 %v15425_v20  ;;  %3259 = vmatprep.subr.bf16.mxu1 %v15428_v32  ;;  %v15759_v20 = vld [vmem:[#allocation11 + $0xe8] ss:$16 sps:$4 sm:$0xff]   ;;  %v15763_v32 = vld [vmem:[#allocation11 + $0xcc] ss:$16 sps:$4 sm:$0xff]   ;;  %v15882_v21 = vld [vmem:[#allocation14 + $0x44] ss:$16 sps:$4 sm:$0xff]  }
 0x621   :  { %v15873_v48 = vld [vmem:[#allocation14 + $0x6c] ss:$16 sps:$4 sm:$0xff]   ;;  %18623 = vst [vmem:[#allocation80_spill] sm:$0xff] %v15882_v21 }
 0x622   :  { %13069 = vtanh.f32 %v15729_v10  ;;  %18620 = vst [vmem:[#allocation44_spill] sm:$0xff] %v15873_v48 }
 0x623   :  { %3219 = vmatpush1.bf16.msra.mxu0 %v18535_v61  ;;  %3260 = vmatpush1.bf16.msra.mxu1 %v18536_v28  ;;  %v18595_v61 = vld [vmem:[#allocation84_spill] sm:$0xff]  ;;  %v15789_v28 = vld [vmem:[#allocation11 + $0x6c] ss:$16 sps:$4 sm:$0xff]  }
 0x624   :  { %3220 = vmatprep.subr.bf16.mxu0 %v18537_v16  ;;  %3261 = vmatprep.subr.bf16.mxu1 %v18538_v49  ;;  %v18596_v16 = vld [vmem:[#allocation98_spill] sm:$0xff]  ;;  %v15793_v49 = vld [vmem:[#allocation11 + $0x68] ss:$16 sps:$4 sm:$0xff]  }
 0x626   :  { %v13068_v12 = vpop.eup %13067 }
 0x627   :  { %3221 = vmatpush1.bf16.msra.mxu0 %v18539_v22  ;;  %3262 = vmatpush1.bf16.msra.mxu1 %v18540_v17  ;;  %v18597_v22 = vld [vmem:[#allocation65_spill] sm:$0xff] }
 0x628   :  { %3222 = vmatprep.subr.bf16.mxu0 %v18541_v25  ;;  %3263 = vmatprep.subr.bf16.mxu1 %v18542_v27  ;;  %v15797_v17 = vld [vmem:[#allocation11 + $0x4c] ss:$16 sps:$4 sm:$0xff]   ;;  %v18598_v25 = vld [vmem:[#allocation66_spill] sm:$0xff]  ;;  %v15801_v27 = vld [vmem:[#allocation11 + $0x48] ss:$16 sps:$4 sm:$0xff]  }
 0x62b   :  { %3223 = vmatpush1.bf16.msra.mxu0 %v18543_v30  ;;  %3264 = vmatpush1.bf16.msra.mxu1 %v18544_v6  ;;  %v18599_v30 = vld [vmem:[#allocation67_spill] sm:$0xff] }
 0x62c   :  { %3224 = vmatprep.subr.bf16.mxu0 %v18545_v53  ;;  %3265 = vmatprep.subr.bf16.mxu1 %v18546_v1  ;;  %v15805_v6 = vld [vmem:[#allocation11 + $0x2c] ss:$16 sps:$4 sm:$0xff]   ;;  %v18600_v53 = vld [vmem:[#allocation70_spill] sm:$0xff]  ;;  %v15809_v1 = vld [vmem:[#allocation11 + $0x28] ss:$16 sps:$4 sm:$0xff]  }
 0x62f   :  { %v13070_v0 = vpop.eup %13069  ;;  %3225 = vmatpush1.bf16.msra.mxu0 %v15468_v36  ;;  %3266 = vmatpush1.bf16.msra.mxu1 %v15471_v2  ;;  %v15777_v36 = vld [vmem:[#allocation11 + $0xa8] ss:$16 sps:$4 sm:$0xff]   ;;  %v18593_v2 = vld [vmem:[#allocation82_spill] sm:$0xff] }
 0x630   :  { %3226 = vmatprep.subr.bf16.mxu0 %v15474_v7  ;;  %3267 = vmatprep.subr.bf16.mxu1 %v15477_v14  ;;  %v3127_v62 = vmul.f32 %v13070_v0, %v13068_v12  ;;  %v15781_v7 = vld [vmem:[#allocation11 + $0x8c] ss:$16 sps:$4 sm:$0xff]   ;;  %v15888_v0 = vld [vmem:[#allocation14 + $0x40] ss:$16 sps:$4 sm:$0xff]  }
 0x631   :  { %v18594_v14 = vld [vmem:[#allocation97_spill] sm:$0xff]  ;;  %18625 = vst [vmem:[#allocation47_spill] sm:$0xff] %v15888_v0 }
 0x632   :  { %v3128_v3 = vpack.c.bf16 %v3127_v62, %v3127_v62  ;;  %v15885_v12 = vld [vmem:[#allocation14 + $0x4c] ss:$16 sps:$4 sm:$0xff]   ;;  %v15891_v62 = vld [vmem:[#allocation14 + $0x48] ss:$16 sps:$4 sm:$0xff]  }
 0x633   :  { %3227 = vmatpush1.bf16.msra.mxu0 %v15480_v13  ;;  %3268 = vmatpush1.bf16.msra.mxu1 %v15483_v50  ;;  %v15769_v50 = vld [vmem:[#allocation11 + $0xc8] ss:$16 sps:$4 sm:$0xff]   ;;  %v15773_v13 = vld [vmem:[#allocation11 + $0xac] ss:$16 sps:$4 sm:$0xff]   ;;  %18624 = vst [vmem:[#allocation96_spill] sm:$0xff] %v15885_v12  ;;  %18626 = vst [vmem:[#allocation48_spill] sm:$0xff] %v15891_v62 }
 0x634   :  { %3331 = vmatprep.subr.bf16.mxu0 %v15752_v5  ;;  %3372 = vmatprep.subr.bf16.mxu1 %v15755_v34 }
 0x636   :  { %3245 = vmatmul.mubr.bf16.vlgmr.msra.gmra.mxu0 %v3128_v3  ;;  %3286 = vmatmul.mubr.bf16.vlgmr.msra.gmra.mxu1 %v3128_v3 }
 0x637   :  { %3332 = vmatpush1.bf16.msra.mxu0 %v15606_v42  ;;  %3373 = vmatpush1.bf16.msra.mxu1 %v15759_v20 }
 0x638   :  { %3333 = vmatprep.subr.bf16.mxu0 %v15610_v60  ;;  %3374 = vmatprep.subr.bf16.mxu1 %v15763_v32 }
 0x639   :  { %3363 = vmatprep.mubr.bf16.mxu0 %v18403_v11  ;;  %3404 = vmatprep.mubr.bf16.mxu1 %v18403_v11 }
 0x63b   :  { %3334 = vmatpush1.bf16.msra.mxu0 %v15616_v26  ;;  %3375 = vmatpush1.bf16.msra.mxu1 %v15769_v50 }
 0x63c   :  { %3335 = vmatprep.subr.bf16.mxu0 %v15620_v15  ;;  %3376 = vmatprep.subr.bf16.mxu1 %v15773_v13 }
 0x63f   :  { %3336 = vmatpush1.bf16.msra.mxu0 %v15624_v31  ;;  %3377 = vmatpush1.bf16.msra.mxu1 %v15777_v36 }
 0x640   :  { %3337 = vmatprep.subr.bf16.mxu0 %v18593_v2  ;;  %3378 = vmatprep.subr.bf16.mxu1 %v15781_v7 }
 0x643   :  { %3338 = vmatpush1.bf16.msra.mxu0 %v18594_v14  ;;  %3379 = vmatpush1.bf16.msra.mxu1 %v15785_v8 }
 0x644   :  { %3339 = vmatprep.subr.bf16.mxu0 %v18595_v61  ;;  %3380 = vmatprep.subr.bf16.mxu1 %v15789_v28 }
 0x647   :  { %3340 = vmatpush1.bf16.msra.mxu0 %v18596_v16  ;;  %3381 = vmatpush1.bf16.msra.mxu1 %v15793_v49 }
 0x648   :  { %3341 = vmatprep.subr.bf16.mxu0 %v18597_v22  ;;  %3382 = vmatprep.subr.bf16.mxu1 %v15797_v17 }
 0x64b   :  { %3342 = vmatpush1.bf16.msra.mxu0 %v18598_v25  ;;  %3383 = vmatpush1.bf16.msra.mxu1 %v15801_v27 }
 0x64c   :  { %3343 = vmatprep.subr.bf16.mxu0 %v18599_v30  ;;  %3384 = vmatprep.subr.bf16.mxu1 %v15805_v6 }
 0x64f   :  { %3344 = vmatpush1.bf16.msra.mxu0 %v18600_v53  ;;  %3385 = vmatpush1.bf16.msra.mxu1 %v15809_v1 }
 0x650   :  { %3345 = vmatprep.subr.bf16.mxu0 %v18601_v46  ;;  %3386 = vmatprep.subr.bf16.mxu1 %v15813_v52 }
 0x653   :  { %3346 = vmatpush1.bf16.msra.mxu0 %v18602_v35  ;;  %3387 = vmatpush1.bf16.msra.mxu1 %v15817_v23 }
 0x654   :  { %3443 = vmatprep.subr.bf16.mxu0 %v15820_v37  ;;  %3484 = vmatprep.subr.bf16.mxu1 %v15823_v44 }
 0x656   :  { %3364 = vmatmul.mubr.bf16.vlgmr.msra.gmra.mxu0 %v3128_v3  ;;  %3405 = vmatmul.mubr.bf16.vlgmr.msra.gmra.mxu1 %v3128_v3  ;;  %v15894_v3 = vld [vmem:[#allocation14 + $0x24] ss:$16 sps:$4 sm:$0xff]  }
 0x657   :  { %3444 = vmatpush1.bf16.msra.mxu0 %v15826_v59  ;;  %3485 = vmatpush1.bf16.msra.mxu1 %v15829_v51  ;;  %18627 = vst [vmem:[#allocation49_spill] sm:$0xff] %v15894_v3 }
 0x658   :  { %3445 = vmatprep.subr.bf16.mxu0 %v15832_v57  ;;  %3486 = vmatprep.subr.bf16.mxu1 %v15835_v29 }
 0x659   :  { %3475 = vmatprep.mubr.bf16.mxu0 %v18403_v11  ;;  %3516 = vmatprep.mubr.bf16.mxu1 %v18403_v11 }
 0x65b   :  { %3446 = vmatpush1.bf16.msra.mxu0 %v15840_v38  ;;  %3487 = vmatpush1.bf16.msra.mxu1 %v15843_v33 }
 0x65c   :  { %3447 = vmatprep.subr.bf16.mxu0 %v15846_v56  ;;  %3488 = vmatprep.subr.bf16.mxu1 %v15849_v63 }
 0x65f   :  { %3448 = vmatpush1.bf16.msra.mxu0 %v15852_v45  ;;  %3489 = vmatpush1.bf16.msra.mxu1 %v15855_v55 }
 0x660   :  { %3449 = vmatprep.subr.bf16.mxu0 %v15858_v41  ;;  %3490 = vmatprep.subr.bf16.mxu1 %v15861_v58 }
 0x663   :  { %3450 = vmatpush1.bf16.msra.mxu0 %v15864_v39  ;;  %3491 = vmatpush1.bf16.msra.mxu1 %v15867_v40 }
 0x664   :  { %3451 = vmatprep.subr.bf16.mxu0 %v15870_v24  ;;  %3492 = vmatprep.subr.bf16.mxu1 %v15873_v48 }
 0x667   :  { %3452 = vmatpush1.bf16.msra.mxu0 %v15876_v9  ;;  %3493 = vmatpush1.bf16.msra.mxu1 %v15879_v47  ;;  %v15897_v47 = vld [vmem:[#allocation14 + $0x2c] ss:$16 sps:$4 sm:$0xff]  }
 0x668   :  { %3453 = vmatprep.subr.bf16.mxu0 %v15882_v21  ;;  %3494 = vmatprep.subr.bf16.mxu1 %v15885_v12  ;;  %18628 = vst [vmem:[#allocation50_spill] sm:$0xff] %v15897_v47  ;;  %v15900_v21 = vld [vmem:[#allocation14 + $0x20] ss:$16 sps:$4 sm:$0xff]   ;;  %v15903_v12 = vld [vmem:[#allocation14 + $0x28] ss:$16 sps:$4 sm:$0xff]  }
 0x669   :  { %18629 = vst [vmem:[#allocation51_spill] sm:$0xff] %v15900_v21  ;;  %18630 = vst [vmem:[#allocation52_spill] sm:$0xff] %v15903_v12 }
 0x66b   :  { %3454 = vmatpush1.bf16.msra.mxu0 %v15888_v0  ;;  %3495 = vmatpush1.bf16.msra.mxu1 %v15891_v62  ;;  %v15906_v0 = vld [vmem:[#allocation14 + $0x4] ss:$16 sps:$4 sm:$0xff]   ;;  %v15909_v62 = vld [vmem:[#allocation14 + $0xc] ss:$16 sps:$4 sm:$0xff]  }
 0x66c   :  { %3455 = vmatprep.subr.bf16.mxu0 %v15894_v3  ;;  %3496 = vmatprep.subr.bf16.mxu1 %v15897_v47  ;;  %18631 = vst [vmem:[#allocation53_spill] sm:$0xff] %v15906_v0  ;;  %18632 = vst [vmem:[#allocation54_spill] sm:$0xff] %v15909_v62  ;;  %v15912_v3 = vld [vmem:[#allocation14] ss:$16 sps:$4 sm:$0xff]   ;;  %v15915_v47 = vld [vmem:[#allocation14 + $0x8] ss:$16 sps:$4 sm:$0xff]  }
 0x66d   :  { %18633 = vst [vmem:[#allocation55_spill] sm:$0xff] %v15912_v3  ;;  %18634 = vst [vmem:[#allocation56_spill] sm:$0xff] %v15915_v47 }
 0x66f   :  { %3456 = vmatpush1.bf16.msra.mxu0 %v15900_v21  ;;  %3497 = vmatpush1.bf16.msra.mxu1 %v15903_v12  ;;  %v15918_v21 = vld [vmem:[#allocation13 + $0xe4] ss:$16 sps:$4 sm:$0xff]   ;;  %v15921_v12 = vld [vmem:[#allocation13 + $0xec] ss:$16 sps:$4 sm:$0xff]  }
 0x670   :  { %3457 = vmatprep.subr.bf16.mxu0 %v15906_v0  ;;  %3498 = vmatprep.subr.bf16.mxu1 %v15909_v62  ;;  %18635 = vst [vmem:[#allocation57_spill] sm:$0xff] %v15918_v21  ;;  %18636 = vst [vmem:[#allocation58_spill] sm:$0xff] %v15921_v12 }
 0x673   :  { %3458 = vmatpush1.bf16.msra.mxu0 %v15912_v3  ;;  %3499 = vmatpush1.bf16.msra.mxu1 %v15915_v47 }
 0x674   :  { %3525 = vmatprep.subr.bf16.mxu0 %v15918_v21  ;;  %3566 = vmatprep.subr.bf16.mxu1 %v15921_v12 }
 0x6d6   :  { %v3164_v0 = vpop.f32.mrf.mxu0  ;;  %v3205_v9 = vpop.f32.mrf.mxu1 }
 0x6d8   :  { %v3166_v48 = vpop.f32.mrf.mxu0  ;;  %v3207_v62 = vpop.f32.mrf.mxu1 }
 0x6da   :  { %v3168_v24 = vpop.f32.mrf.mxu0  ;;  %v3209_v40 = vpop.f32.mrf.mxu1 }
 0x6dc   :  { %v3169_v39 = vpop.f32.mrf.mxu0  ;;  %v3210_v3 = vpop.f32.mrf.mxu1 }
 0x6f6   :  { %v3246_v58 = vpop.f32.mrf.mxu0  ;;  %v3287_v41 = vpop.f32.mrf.mxu1 }
 0x6f7   :  { %v3247_v55 = vadd.f32 %v3246_v58, %v3164_v0  ;;  %v3288_v3 = vadd.f32 %v3287_v41, %v3205_v9 }
 0x6f8   :  { %v3248_v47 = vpop.f32.mrf.mxu0  ;;  %v3289_v45 = vpop.f32.mrf.mxu1 }
 0x6f9   :  { %v3294_v63 = vadd.f32 %v3247_v55, %v15148_v4  ;;  %v3249_v21 = vadd.f32 %v3248_v47, %v3166_v48  ;;  %v3290_v39 = vadd.f32 %v3289_v45, %v3207_v62  ;;  %v3296_v51 = vadd.f32 %v3288_v3, %v15160_v54 }
 0x6fa   :  { %v3250_v56 = vpop.f32.mrf.mxu0  ;;  %v3291_v33 = vpop.f32.mrf.mxu1 }
 0x6fb   :  { %v11845_v38 = vmul.f32 -1.442695, %v3294_v63  ;;  %v3295_v12 = vadd.f32 %v3249_v21, %v15151_v18  ;;  %v3297_v40 = vadd.f32 %v3290_v39, %v15156_v43 }
 0x6fc   :  { %v3251_v29 = vpop.f32.mrf.mxu0  ;;  %v3292_v57 = vpop.f32.mrf.mxu1 }
 0x6fd   :  { %13071 = vpow2.f32 %v11845_v38  ;;  %v11846_v24 = vmul.f32 -1.442695, %v3295_v12  ;;  %v11847_v58 = vmul.f32 -1.442695, %v3297_v40  ;;  %v18637_v29 = vld [vmem:[#allocation88_spill] sm:$0xff] }
 0x6fe   :  { %v3327_v57 = vunpack.c.l.bf16 %v18637_v29  ;;  %v3328_v45 = vunpack.c.h.bf16 %v18637_v29 }
 0x6ff   :  { %13073 = vpow2.f32 %v11846_v24 }
 0x700   :  { %13075 = vpow2.f32 %v11847_v58 }
 0x70a   :  { %v13072_v0 = vpop.eup %13071 }
 0x70b   :  { %v3301_v55 = vadd.f32 1.0, %v13072_v0 }
 0x70c   :  { %v13074_v48 = vpop.eup %13073 }
 0x70d   :  { %13077 = vrcp.f32 %v3301_v55  ;;  %v3307_v33 = vadd.f32 1.0, %v13074_v48  ;;  %v13076_v9 = vpop.eup %13075 }
 0x70e   :  { %13079 = vtanh.f32 %v3296_v51  ;;  %v3314_v58 = vadd.f32 1.0, %v13076_v9 }
 0x70f   :  { %13081 = vrcp.f32 %v3307_v33 }
 0x716   :  { %v3365_v38 = vpop.f32.mrf.mxu0  ;;  %v3406_v56 = vpop.f32.mrf.mxu1 }
 0x717   :  { %v3413_v63 = vadd.f32 %v3365_v38, %v3327_v57  ;;  %v18638_v57 = vld [vmem:[#allocation100_spill] sm:$0xff] }
 0x718   :  { %v3367_v47 = vpop.f32.mrf.mxu0  ;;  %v3408_v41 = vpop.f32.mrf.mxu1  ;;  %v3330_v38 = vunpack.c.h.bf16 %v18638_v57 }
 0x719   :  { %v11848_v21 = vmul.f32 -1.442695, %v3413_v63  ;;  %v3414_v12 = vadd.f32 %v3367_v47, %v3328_v45  ;;  %v3329_v45 = vunpack.c.l.bf16 %v18638_v57  ;;  %v15953_v57 = vld [vmem:[#allocation13 + $0xc8] ss:$16 sps:$4 sm:$0xff]  }
 0x71a   :  { %v13078_v62 = vpop.eup %13077  ;;  %v3369_v24 = vpop.f32.mrf.mxu0  ;;  %v3416_v63 = vadd.f32 %v3408_v41, %v3330_v38  ;;  %v15942_v41 = vld [vmem:[#allocation13 + $0xc4] ss:$16 sps:$4 sm:$0xff]  }
 0x71b   :  { %v3410_v39 = vpop.f32.mrf.mxu1  ;;  %v13080_v40 = vpop.eup %13079  ;;  %13083 = vpow2.f32 %v11848_v21  ;;  %v11849_v3 = vmul.f32 -1.442695, %v3414_v12  ;;  %v3415_v47 = vadd.f32 %v3406_v56, %v3329_v45  ;;  %v15939_v56 = vld [vmem:[#allocation13 + $0xe8] ss:$16 sps:$4 sm:$0xff]   ;;  %v15959_v45 = vld [vmem:[#allocation13 + $0xac] ss:$16 sps:$4 sm:$0xff]  }
 0x71c   :  { %v13082_v51 = vpop.eup %13081  ;;  %v3370_v0 = vpop.f32.mrf.mxu0  ;;  %v3318_v48 = vmul.f32 %v13080_v40, %v13078_v62  ;;  %v11850_v21 = vmul.f32 -1.442695, %v3416_v63  ;;  %v15956_v63 = vld [vmem:[#allocation13 + $0xa4] ss:$16 sps:$4 sm:$0xff]  }
 0x71d   :  { %v3411_v55 = vpop.f32.mrf.mxu1  ;;  %v3317_v33 = vmul.f32 %v13082_v51, %v15711_v19  ;;  %13085 = vpow2.f32 %v11849_v3  ;;  %v15936_v51 = vld [vmem:[#allocation13 + $0xe0] ss:$16 sps:$4 sm:$0xff]  }
 0x71e   :  { %13087 = vrcp.f32 %v3314_v58  ;;  %v15945_v58 = vld [vmem:[#allocation13 + $0xcc] ss:$16 sps:$4 sm:$0xff]  }
 0x71f   :  { %v15931_v29 = vadd.f32 %v3318_v48, %v3317_v33  ;;  %v15950_v33 = vld [vmem:[#allocation13 + $0xc0] ss:$16 sps:$4 sm:$0xff]  }
 0x721   :  { %13089 = vtanh.f32 %v15931_v29 }
 0x722   :  { %13091 = vtanh.f32 %v3415_v47 }
 0x723   :  { %13093 = vpow2.f32 %v11850_v21 }
 0x728   :  { %v13084_v12 = vpop.eup %13083 }
 0x729   :  { %v3420_v9 = vadd.f32 1.0, %v13084_v12 }
 0x72a   :  { %v13086_v24 = vpop.eup %13085 }
 0x72b   :  { %13095 = vrcp.f32 %v3420_v9  ;;  %v3426_v19 = vadd.f32 1.0, %v13086_v24  ;;  %v13088_v62 = vpop.eup %13087  ;;  %v15963_v9 = vld [vmem:[#allocation13 + $0xa0] ss:$16 sps:$4 sm:$0xff]   ;;  %v15966_v24 = vld [vmem:[#allocation13 + $0xa8] ss:$16 sps:$4 sm:$0xff]  }
 0x72d   :  { %13097 = vrcp.f32 %v3426_v19 }
 0x72e   :  { %v13090_v39 = vpop.eup %13089 }
 0x72f   :  { %v3321_v40 = vmul.f32 %v13090_v39, %v13088_v62  ;;  %v13092_v0 = vpop.eup %13091  ;;  %v15971_v62 = vld [vmem:[#allocation13 + $0x84] ss:$16 sps:$4 sm:$0xff]   ;;  %v15974_v39 = vld [vmem:[#allocation13 + $0x8c] ss:$16 sps:$4 sm:$0xff]  }
 0x730   :  { %v13094_v55 = vpop.eup %13093 }
 0x731   :  { %v3442_v3 = vpack.c.bf16 %v3321_v40, %v3321_v40  ;;  %v3433_v21 = vadd.f32 1.0, %v13094_v55  ;;  %v15981_v40 = vld [vmem:[#allocation13 + $0x88] ss:$16 sps:$4 sm:$0xff]   ;;  %v15990_v55 = vld [vmem:[#allocation13 + $0x60] ss:$16 sps:$4 sm:$0xff]  }
 0x732   :  { %18640 = vst [vmem:[#allocation60_spill] sm:$0xff] %v15981_v40  ;;  %18643 = vst [vmem:[#allocation63_spill] sm:$0xff] %v15990_v55 }
 0x733   :  { %3476 = vmatmul.mubr.bf16.vlgmr.msra.gmra.mxu0 %v3442_v3  ;;  %3517 = vmatmul.mubr.bf16.vlgmr.msra.gmra.mxu1 %v3442_v3  ;;  %13099 = vrcp.f32 %v3433_v21  ;;  %v15984_v3 = vld [vmem:[#allocation13 + $0x64] ss:$16 sps:$4 sm:$0xff]   ;;  %v16002_v21 = vld [vmem:[#allocation13 + $0x40] ss:$16 sps:$4 sm:$0xff]  }
 0x734   :  { %3526 = vmatpush1.bf16.msra.mxu0 %v15936_v51  ;;  %3567 = vmatpush1.bf16.msra.mxu1 %v15939_v56  ;;  %18641 = vst [vmem:[#allocation61_spill] sm:$0xff] %v15984_v3  ;;  %18647 = vst [vmem:[#allocation82_spill] sm:$0xff] %v16002_v21 }
 0x735   :  { %3527 = vmatprep.subr.bf16.mxu0 %v15942_v41  ;;  %3568 = vmatprep.subr.bf16.mxu1 %v15945_v58 }
 0x736   :  { %3557 = vmatprep.mubr.bf16.mxu0 %v18403_v11  ;;  %3598 = vmatprep.mubr.bf16.mxu1 %v18403_v11 }
 0x738   :  { %v13096_v48 = vpop.eup %13095  ;;  %3528 = vmatpush1.bf16.msra.mxu0 %v15950_v33  ;;  %3569 = vmatpush1.bf16.msra.mxu1 %v15953_v57 }
 0x739   :  { %v3437_v38 = vmul.f32 %v13096_v48, %v13092_v0  ;;  %3529 = vmatprep.subr.bf16.mxu0 %v15956_v63  ;;  %3570 = vmatprep.subr.bf16.mxu1 %v15959_v45  ;;  %v15987_v0 = vld [vmem:[#allocation13 + $0x6c] ss:$16 sps:$4 sm:$0xff]   ;;  %v15993_v48 = vld [vmem:[#allocation13 + $0x68] ss:$16 sps:$4 sm:$0xff]  }
 0x73a   :  { %v13098_v47 = vpop.eup %13097  ;;  %18642 = vst [vmem:[#allocation62_spill] sm:$0xff] %v15987_v0  ;;  %18644 = vst [vmem:[#allocation64_spill] sm:$0xff] %v15993_v48 }
 0x73b   :  { %v3436_v12 = vmul.f32 %v13098_v47, %v15729_v10  ;;  %v15978_v10 = vld [vmem:[#allocation13 + $0x80] ss:$16 sps:$4 sm:$0xff]   ;;  %v15999_v47 = vld [vmem:[#allocation13 + $0x4c] ss:$16 sps:$4 sm:$0xff]  }
 0x73c   :  { %3530 = vmatpush1.bf16.msra.mxu0 %v15963_v9  ;;  %3571 = vmatpush1.bf16.msra.mxu1 %v15966_v24  ;;  %18639 = vst [vmem:[#allocation59_spill] sm:$0xff] %v15978_v10  ;;  %18646 = vst [vmem:[#allocation99_spill] sm:$0xff] %v15999_v47 }
 0x73d   :  { %v15969_v19 = vadd.f32 %v3437_v38, %v3436_v12  ;;  %3531 = vmatprep.subr.bf16.mxu0 %v15971_v62  ;;  %3572 = vmatprep.subr.bf16.mxu1 %v15974_v39  ;;  %v15996_v38 = vld [vmem:[#allocation13 + $0x44] ss:$16 sps:$4 sm:$0xff]   ;;  %v16005_v12 = vld [vmem:[#allocation13 + $0x48] ss:$16 sps:$4 sm:$0xff]  }
 0x73e   :  { %18645 = vst [vmem:[#allocation86_spill] sm:$0xff] %v15996_v38  ;;  %18648 = vst [vmem:[#allocation97_spill] sm:$0xff] %v16005_v12 }
 0x73f   :  { %13101 = vtanh.f32 %v15969_v19 }
 0x740   :  { %3532 = vmatpush1.bf16.msra.mxu0 %v15978_v10  ;;  %3573 = vmatpush1.bf16.msra.mxu1 %v15981_v40  ;;  %v16026_v40 = vld [vmem:[#allocation13] ss:$16 sps:$4 sm:$0xff]   ;;  %v16029_v10 = vld [vmem:[#allocation13 + $0x8] ss:$16 sps:$4 sm:$0xff]  }
 0x741   :  { %3533 = vmatprep.subr.bf16.mxu0 %v15984_v3  ;;  %3574 = vmatprep.subr.bf16.mxu1 %v15987_v0  ;;  %v16014_v3 = vld [vmem:[#allocation13 + $0x20] ss:$16 sps:$4 sm:$0xff]  }
 0x744   :  { %3534 = vmatpush1.bf16.msra.mxu0 %v15990_v55  ;;  %3575 = vmatpush1.bf16.msra.mxu1 %v15993_v48  ;;  %v16008_v55 = vld [vmem:[#allocation13 + $0x24] ss:$16 sps:$4 sm:$0xff]   ;;  %v16011_v48 = vld [vmem:[#allocation13 + $0x2c] ss:$16 sps:$4 sm:$0xff]  }
 0x745   :  { %3535 = vmatprep.subr.bf16.mxu0 %v15996_v38  ;;  %3576 = vmatprep.subr.bf16.mxu1 %v15999_v47  ;;  %18649 = vst [vmem:[#allocation84_spill] sm:$0xff] %v16008_v55  ;;  %18650 = vst [vmem:[#allocation98_spill] sm:$0xff] %v16011_v48  ;;  %v13100_v38 = vpop.eup %13099  ;;  %v16017_v47 = vld [vmem:[#allocation13 + $0x28] ss:$16 sps:$4 sm:$0xff]  }
 0x748   :  { %3536 = vmatpush1.bf16.msra.mxu0 %v16002_v21  ;;  %3577 = vmatpush1.bf16.msra.mxu1 %v16005_v12  ;;  %v16020_v21 = vld [vmem:[#allocation13 + $0x4] ss:$16 sps:$4 sm:$0xff]   ;;  %v16023_v12 = vld [vmem:[#allocation13 + $0xc] ss:$16 sps:$4 sm:$0xff]  }
 0x749   :  { %3537 = vmatprep.subr.bf16.mxu0 %v16008_v55  ;;  %3578 = vmatprep.subr.bf16.mxu1 %v16011_v48 }
 0x74c   :  { %v13102_v0 = vpop.eup %13101  ;;  %3538 = vmatpush1.bf16.msra.mxu0 %v16014_v3  ;;  %3579 = vmatpush1.bf16.msra.mxu1 %v16017_v47 }
 0x74d   :  { %3539 = vmatprep.subr.bf16.mxu0 %v16020_v21  ;;  %3580 = vmatprep.subr.bf16.mxu1 %v16023_v12  ;;  %v3440_v55 = vmul.f32 %v13102_v0, %v13100_v38  ;;  %v18666_v0 = vld [vmem:[#allocation45_spill] sm:$0xff]  ;;  %v18669_v38 = vld [vmem:[#allocation96_spill] sm:$0xff] }
 0x74f   :  { %v3441_v48 = vpack.c.bf16 %v3440_v55, %v3440_v55  ;;  %v18667_v55 = vld [vmem:[#allocation46_spill] sm:$0xff] }
 0x750   :  { %3540 = vmatpush1.bf16.msra.mxu0 %v16026_v40  ;;  %3581 = vmatpush1.bf16.msra.mxu1 %v16029_v10 }
 0x751   :  { %3644 = vmatprep.subr.bf16.mxu0 %v15752_v5  ;;  %3685 = vmatprep.subr.bf16.mxu1 %v15755_v34 }
 0x753   :  { %3558 = vmatmul.mubr.bf16.vlgmr.msra.gmra.mxu0 %v3441_v48  ;;  %3599 = vmatmul.mubr.bf16.vlgmr.msra.gmra.mxu1 %v3441_v48 }
 0x754   :  { %3645 = vmatpush1.bf16.msra.mxu0 %v15606_v42  ;;  %3686 = vmatpush1.bf16.msra.mxu1 %v15759_v20  ;;  %v18651_v42 = vld [vmem:[#allocation76_spill] sm:$0xff] }
 0x755   :  { %3646 = vmatprep.subr.bf16.mxu0 %v15610_v60  ;;  %3687 = vmatprep.subr.bf16.mxu1 %v15763_v32  ;;  %v18652_v60 = vld [vmem:[#allocation77_spill] sm:$0xff] }
 0x756   :  { %3676 = vmatprep.mubr.bf16.mxu0 %v18403_v11  ;;  %3717 = vmatprep.mubr.bf16.mxu1 %v18403_v11 }
 0x758   :  { %3647 = vmatpush1.bf16.msra.mxu0 %v15616_v26  ;;  %3688 = vmatpush1.bf16.msra.mxu1 %v15769_v50  ;;  %v18653_v26 = vld [vmem:[#allocation78_spill] sm:$0xff] }
 0x759   :  { %3648 = vmatprep.subr.bf16.mxu0 %v15620_v15  ;;  %3689 = vmatprep.subr.bf16.mxu1 %v15773_v13  ;;  %v18654_v15 = vld [vmem:[#allocation33_spill] sm:$0xff] }
 0x75c   :  { %3649 = vmatpush1.bf16.msra.mxu0 %v15624_v31  ;;  %3690 = vmatpush1.bf16.msra.mxu1 %v15777_v36  ;;  %v18655_v31 = vld [vmem:[#allocation35_spill] sm:$0xff] }
 0x75d   :  { %3650 = vmatprep.subr.bf16.mxu0 %v18593_v2  ;;  %3691 = vmatprep.subr.bf16.mxu1 %v15781_v7  ;;  %v18656_v2 = vld [vmem:[#allocation34_spill] sm:$0xff] }
 0x760   :  { %3651 = vmatpush1.bf16.msra.mxu0 %v18594_v14  ;;  %3692 = vmatpush1.bf16.msra.mxu1 %v15785_v8  ;;  %v18657_v14 = vld [vmem:[#allocation37_spill] sm:$0xff] }
 0x761   :  { %3652 = vmatprep.subr.bf16.mxu0 %v18595_v61  ;;  %3693 = vmatprep.subr.bf16.mxu1 %v15789_v28  ;;  %v18658_v61 = vld [vmem:[#allocation36_spill] sm:$0xff] }
 0x764   :  { %3653 = vmatpush1.bf16.msra.mxu0 %v18596_v16  ;;  %3694 = vmatpush1.bf16.msra.mxu1 %v15793_v49  ;;  %v18659_v16 = vld [vmem:[#allocation39_spill] sm:$0xff] }
 0x765   :  { %3654 = vmatprep.subr.bf16.mxu0 %v18597_v22  ;;  %3695 = vmatprep.subr.bf16.mxu1 %v15797_v17  ;;  %v18660_v22 = vld [vmem:[#allocation38_spill] sm:$0xff] }
 0x768   :  { %3655 = vmatpush1.bf16.msra.mxu0 %v18598_v25  ;;  %3696 = vmatpush1.bf16.msra.mxu1 %v15801_v27  ;;  %v18661_v25 = vld [vmem:[#allocation41_spill] sm:$0xff] }
 0x769   :  { %3656 = vmatprep.subr.bf16.mxu0 %v18599_v30  ;;  %3697 = vmatprep.subr.bf16.mxu1 %v15805_v6  ;;  %v18662_v30 = vld [vmem:[#allocation40_spill] sm:$0xff] }
 0x76c   :  { %3657 = vmatpush1.bf16.msra.mxu0 %v18600_v53  ;;  %3698 = vmatpush1.bf16.msra.mxu1 %v15809_v1  ;;  %v18663_v53 = vld [vmem:[#allocation43_spill] sm:$0xff] }
 0x76d   :  { %3658 = vmatprep.subr.bf16.mxu0 %v18601_v46  ;;  %3699 = vmatprep.subr.bf16.mxu1 %v15813_v52  ;;  %v18664_v46 = vld [vmem:[#allocation42_spill] sm:$0xff] }
 0x770   :  { %3659 = vmatpush1.bf16.msra.mxu0 %v18602_v35  ;;  %3700 = vmatpush1.bf16.msra.mxu1 %v15817_v23  ;;  %v18665_v35 = vld [vmem:[#allocation44_spill] sm:$0xff] }
 0x771   :  { %3756 = vmatprep.subr.bf16.mxu0 %v15820_v37  ;;  %3797 = vmatprep.subr.bf16.mxu1 %v15823_v44 }
 0x773   :  { %3677 = vmatmul.mubr.bf16.vlgmr.msra.gmra.mxu0 %v3441_v48  ;;  %3718 = vmatmul.mubr.bf16.vlgmr.msra.gmra.mxu1 %v3441_v48  ;;  %v18668_v48 = vld [vmem:[#allocation80_spill] sm:$0xff] }
 0x774   :  { %3757 = vmatpush1.bf16.msra.mxu0 %v15826_v59  ;;  %3798 = vmatpush1.bf16.msra.mxu1 %v18651_v42 }
 0x775   :  { %3758 = vmatprep.subr.bf16.mxu0 %v18652_v60  ;;  %3799 = vmatprep.subr.bf16.mxu1 %v18653_v26 }
 0x776   :  { %3788 = vmatprep.mubr.bf16.mxu0 %v18403_v11  ;;  %3829 = vmatprep.mubr.bf16.mxu1 %v18403_v11 }
 0x778   :  { %3759 = vmatpush1.bf16.msra.mxu0 %v18654_v15  ;;  %3800 = vmatpush1.bf16.msra.mxu1 %v18655_v31 }
 0x779   :  { %3760 = vmatprep.subr.bf16.mxu0 %v18656_v2  ;;  %3801 = vmatprep.subr.bf16.mxu1 %v18657_v14 }
 0x77c   :  { %3761 = vmatpush1.bf16.msra.mxu0 %v18658_v61  ;;  %3802 = vmatpush1.bf16.msra.mxu1 %v18659_v16  ;;  %v18670_v16 = vld [vmem:[#allocation47_spill] sm:$0xff] }
 0x77d   :  { %3762 = vmatprep.subr.bf16.mxu0 %v18660_v22  ;;  %3803 = vmatprep.subr.bf16.mxu1 %v18661_v25  ;;  %v18671_v22 = vld [vmem:[#allocation48_spill] sm:$0xff]  ;;  %v18672_v25 = vld [vmem:[#allocation49_spill] sm:$0xff] }
 0x780   :  { %3763 = vmatpush1.bf16.msra.mxu0 %v18662_v30  ;;  %3804 = vmatpush1.bf16.msra.mxu1 %v18663_v53  ;;  %v18673_v30 = vld [vmem:[#allocation50_spill] sm:$0xff]  ;;  %v18674_v53 = vld [vmem:[#allocation51_spill] sm:$0xff] }
 0x781   :  { %3764 = vmatprep.subr.bf16.mxu0 %v18664_v46  ;;  %3805 = vmatprep.subr.bf16.mxu1 %v18665_v35  ;;  %v18675_v46 = vld [vmem:[#allocation52_spill] sm:$0xff]  ;;  %v18676_v35 = vld [vmem:[#allocation53_spill] sm:$0xff] }
 0x784   :  { %3765 = vmatpush1.bf16.msra.mxu0 %v18666_v0  ;;  %3806 = vmatpush1.bf16.msra.mxu1 %v18667_v55  ;;  %v18677_v0 = vld [vmem:[#allocation54_spill] sm:$0xff]  ;;  %v18678_v55 = vld [vmem:[#allocation55_spill] sm:$0xff] }
 0x785   :  { %3766 = vmatprep.subr.bf16.mxu0 %v18668_v48  ;;  %3807 = vmatprep.subr.bf16.mxu1 %v18669_v38  ;;  %v18679_v48 = vld [vmem:[#allocation56_spill] sm:$0xff]  ;;  %v18680_v38 = vld [vmem:[#allocation57_spill] sm:$0xff] }
 0x788   :  { %3767 = vmatpush1.bf16.msra.mxu0 %v18670_v16  ;;  %3808 = vmatpush1.bf16.msra.mxu1 %v18671_v22  ;;  %v18681_v16 = vld [vmem:[#allocation58_spill] sm:$0xff] }
 0x789   :  { %3768 = vmatprep.subr.bf16.mxu0 %v18672_v25  ;;  %3809 = vmatprep.subr.bf16.mxu1 %v18673_v30 }
 0x78c   :  { %3769 = vmatpush1.bf16.msra.mxu0 %v18674_v53  ;;  %3810 = vmatpush1.bf16.msra.mxu1 %v18675_v46 }
 0x78d   :  { %3770 = vmatprep.subr.bf16.mxu0 %v18676_v35  ;;  %3811 = vmatprep.subr.bf16.mxu1 %v18677_v0 }
 0x790   :  { %3771 = vmatpush1.bf16.msra.mxu0 %v18678_v55  ;;  %3812 = vmatpush1.bf16.msra.mxu1 %v18679_v48 }
 0x791   :  { %3838 = vmatprep.subr.bf16.mxu0 %v18680_v38  ;;  %3879 = vmatprep.subr.bf16.mxu1 %v18681_v16 }
 0x7f3   :  { %v3477_v22 = vpop.f32.mrf.mxu0  ;;  %v3518_v25 = vpop.f32.mrf.mxu1 }
 0x7f5   :  { %v3479_v61 = vpop.f32.mrf.mxu0  ;;  %v3520_v30 = vpop.f32.mrf.mxu1 }
 0x7f7   :  { %v3481_v14 = vpop.f32.mrf.mxu0  ;;  %v3522_v53 = vpop.f32.mrf.mxu1 }
 0x7f9   :  { %v3482_v2 = vpop.f32.mrf.mxu0  ;;  %v3523_v46 = vpop.f32.mrf.mxu1 }
 0x813   :  { %v3559_v31 = vpop.f32.mrf.mxu0  ;;  %v3600_v35 = vpop.f32.mrf.mxu1 }
 0x814   :  { %v3560_v15 = vadd.f32 %v3559_v31, %v3477_v22  ;;  %v3601_v46 = vadd.f32 %v3600_v35, %v3518_v25 }
 0x815   :  { %v3561_v0 = vpop.f32.mrf.mxu0  ;;  %v3602_v26 = vpop.f32.mrf.mxu1 }
 0x816   :  { %v3607_v55 = vadd.f32 %v3560_v15, %v15148_v4  ;;  %v3562_v48 = vadd.f32 %v3561_v0, %v3479_v61  ;;  %v3603_v2 = vadd.f32 %v3602_v26, %v3520_v30  ;;  %v3609_v37 = vadd.f32 %v3601_v46, %v15160_v54 }
 0x817   :  { %v3563_v60 = vpop.f32.mrf.mxu0  ;;  %v3604_v38 = vpop.f32.mrf.mxu1 }
 0x818   :  { %v11851_v42 = vmul.f32 -1.442695, %v3607_v55  ;;  %v3608_v16 = vadd.f32 %v3562_v48, %v15151_v18  ;;  %v3610_v53 = vadd.f32 %v3603_v2, %v15156_v43 }
 0x819   :  { %v3564_v59 = vpop.f32.mrf.mxu0  ;;  %v3605_v44 = vpop.f32.mrf.mxu1 }
 0x81a   :  { %13103 = vpow2.f32 %v11851_v42  ;;  %v11852_v14 = vmul.f32 -1.442695, %v3608_v16  ;;  %v11853_v31 = vmul.f32 -1.442695, %v3610_v53  ;;  %v18682_v59 = vld [vmem:[#allocation90_spill] sm:$0xff] }
 0x81b   :  { %v3640_v44 = vunpack.c.l.bf16 %v18682_v59  ;;  %v3641_v26 = vunpack.c.h.bf16 %v18682_v59 }
 0x81c   :  { %13105 = vpow2.f32 %v11852_v14 }
 0x81d   :  { %13107 = vpow2.f32 %v11853_v31 }
 0x827   :  { %v13104_v22 = vpop.eup %13103 }
 0x828   :  { %v3614_v15 = vadd.f32 1.0, %v13104_v22 }
 0x829   :  { %v13106_v61 = vpop.eup %13105 }
 0x82a   :  { %13109 = vrcp.f32 %v3614_v15  ;;  %v3620_v60 = vadd.f32 1.0, %v13106_v61  ;;  %v13108_v35 = vpop.eup %13107 }
 0x82b   :  { %13111 = vtanh.f32 %v3609_v37  ;;  %v3627_v31 = vadd.f32 1.0, %v13108_v35 }
 0x82c   :  { %13113 = vrcp.f32 %v3620_v60 }
 0x833   :  { %v3678_v42 = vpop.f32.mrf.mxu0  ;;  %v3719_v16 = vpop.f32.mrf.mxu1 }
 0x834   :  { %v3726_v0 = vadd.f32 %v3678_v42, %v3640_v44  ;;  %v18683_v44 = vld [vmem:[#allocation101_spill] sm:$0xff] }
 0x835   :  { %v3680_v30 = vpop.f32.mrf.mxu0  ;;  %v3721_v25 = vpop.f32.mrf.mxu1  ;;  %v3643_v42 = vunpack.c.h.bf16 %v18683_v44 }
 0x836   :  { %v11854_v55 = vmul.f32 -1.442695, %v3726_v0  ;;  %v3727_v48 = vadd.f32 %v3680_v30, %v3641_v26  ;;  %v3642_v26 = vunpack.c.l.bf16 %v18683_v44  ;;  %v18684_v44 = vld [vmem:[#allocation59_spill] sm:$0xff] }
 0x837   :  { %v13110_v38 = vpop.eup %13109  ;;  %v3682_v14 = vpop.f32.mrf.mxu0  ;;  %v3729_v0 = vadd.f32 %v3721_v25, %v3643_v42  ;;  %v18685_v42 = vld [vmem:[#allocation60_spill] sm:$0xff] }
 0x838   :  { %v3723_v2 = vpop.f32.mrf.mxu1  ;;  %v13112_v53 = vpop.eup %13111  ;;  %13115 = vpow2.f32 %v11854_v55  ;;  %v11855_v46 = vmul.f32 -1.442695, %v3727_v48  ;;  %v3728_v30 = vadd.f32 %v3719_v16, %v3642_v26  ;;  %v18688_v26 = vld [vmem:[#allocation63_spill] sm:$0xff] }
 0x839   :  { %v13114_v37 = vpop.eup %13113  ;;  %v3683_v22 = vpop.f32.mrf.mxu0  ;;  %v3631_v61 = vmul.f32 %v13112_v53, %v13110_v38  ;;  %v11856_v55 = vmul.f32 -1.442695, %v3729_v0  ;;  %v18686_v0 = vld [vmem:[#allocation61_spill] sm:$0xff] }
 0x83a   :  { %v3724_v15 = vpop.f32.mrf.mxu1  ;;  %v3630_v60 = vmul.f32 %v13114_v37, %v15931_v29  ;;  %13117 = vpow2.f32 %v11855_v46 }
 0x83b   :  { %13119 = vrcp.f32 %v3627_v31 }
 0x83c   :  { %v16109_v59 = vadd.f32 %v3631_v61, %v3630_v60 }
 0x83e   :  { %13121 = vtanh.f32 %v16109_v59 }
 0x83f   :  { %13123 = vtanh.f32 %v3728_v30  ;;  %v18689_v30 = vld [vmem:[#allocation64_spill] sm:$0xff] }
 0x840   :  { %13125 = vpow2.f32 %v11856_v55  ;;  %v18690_v55 = vld [vmem:[#allocation86_spill] sm:$0xff] }
 0x845   :  { %v13116_v48 = vpop.eup %13115 }
 0x846   :  { %v3733_v35 = vadd.f32 1.0, %v13116_v48  ;;  %v18691_v48 = vld [vmem:[#allocation99_spill] sm:$0xff] }
 0x847   :  { %v13118_v14 = vpop.eup %13117 }
 0x848   :  { %13127 = vrcp.f32 %v3733_v35  ;;  %v3739_v29 = vadd.f32 1.0, %v13118_v14  ;;  %v13120_v38 = vpop.eup %13119  ;;  %v18692_v35 = vld [vmem:[#allocation82_spill] sm:$0xff]  ;;  %v18693_v14 = vld [vmem:[#allocation97_spill] sm:$0xff] }
 0x84a   :  { %13129 = vrcp.f32 %v3739_v29  ;;  %v18694_v29 = vld [vmem:[#allocation84_spill] sm:$0xff] }
 0x84b   :  { %v13122_v2 = vpop.eup %13121 }
 0x84c   :  { %v3634_v53 = vmul.f32 %v13122_v2, %v13120_v38  ;;  %v13124_v16 = vpop.eup %13123  ;;  %v18695_v38 = vld [vmem:[#allocation98_spill] sm:$0xff] }
 0x84d   :  { %v13126_v25 = vpop.eup %13125 }
 0x84e   :  { %v3755_v46 = vpack.c.bf16 %v3634_v53, %v3634_v53  ;;  %v3746_v15 = vadd.f32 1.0, %v13126_v25  ;;  %v13375_v25 = vld [vmem:[#allocation11 + $0xe0] ss:$16 sps:$4 sm:$0xff]  }
 0x850   :  { %3789 = vmatmul.mubr.bf16.vlgmr.msra.gmra.mxu0 %v3755_v46  ;;  %3830 = vmatmul.mubr.bf16.vlgmr.msra.gmra.mxu1 %v3755_v46  ;;  %13131 = vrcp.f32 %v3746_v15  ;;  %v18697_v15 = vld [vmem:[#allocation74_spill] sm:$0xff] }
 0x851   :  { %3839 = vmatpush1.bf16.msra.mxu0 %v15936_v51  ;;  %3880 = vmatpush1.bf16.msra.mxu1 %v15939_v56 }
 0x852   :  { %3840 = vmatprep.subr.bf16.mxu0 %v15942_v41  ;;  %3881 = vmatprep.subr.bf16.mxu1 %v15945_v58 }
 0x853   :  { %3870 = vmatprep.mubr.bf16.mxu0 %v18403_v11  ;;  %3911 = vmatprep.mubr.bf16.mxu1 %v18403_v11 }
 0x855   :  { %v13128_v37 = vpop.eup %13127  ;;  %3841 = vmatpush1.bf16.msra.mxu0 %v15950_v33  ;;  %3882 = vmatpush1.bf16.msra.mxu1 %v15953_v57 }
 0x856   :  { %v3750_v31 = vmul.f32 %v13128_v37, %v13124_v16  ;;  %3842 = vmatprep.subr.bf16.mxu0 %v15956_v63  ;;  %3883 = vmatprep.subr.bf16.mxu1 %v15959_v45  ;;  %v13376_v37 = vld [vmem:[#allocation11 + $0xc4] ss:$16 sps:$4 sm:$0xff]  }
 0x857   :  { %v13130_v22 = vpop.eup %13129 }
 0x858   :  { %v3749_v61 = vmul.f32 %v13130_v22, %v15969_v19  ;;  %v18687_v19 = vld [vmem:[#allocation62_spill] sm:$0xff] }
 0x859   :  { %3843 = vmatpush1.bf16.msra.mxu0 %v15963_v9  ;;  %3884 = vmatpush1.bf16.msra.mxu1 %v15966_v24  ;;  %v13382_v22 = vld [vmem:[#allocation11 + $0x64] ss:$16 sps:$4 sm:$0xff]  }
 0x85a   :  { %v16127_v60 = vadd.f32 %v3750_v31, %v3749_v61  ;;  %3844 = vmatprep.subr.bf16.mxu0 %v15971_v62  ;;  %3885 = vmatprep.subr.bf16.mxu1 %v15974_v39  ;;  %v13377_v31 = vld [vmem:[#allocation11 + $0xc0] ss:$16 sps:$4 sm:$0xff]   ;;  %v18700_v61 = vld [vmem:[#allocation77_spill] sm:$0xff] }
 0x85c   :  { %13133 = vtanh.f32 %v16127_v60 }
 0x85d   :  { %3845 = vmatpush1.bf16.msra.mxu0 %v18684_v44  ;;  %3886 = vmatpush1.bf16.msra.mxu1 %v18685_v42  ;;  %v13132_v2 = vpop.eup %13131 }
 0x85e   :  { %3846 = vmatprep.subr.bf16.mxu0 %v18686_v0  ;;  %3887 = vmatprep.subr.bf16.mxu1 %v18687_v19 }
 0x861   :  { %3847 = vmatpush1.bf16.msra.mxu0 %v18688_v26  ;;  %3888 = vmatpush1.bf16.msra.mxu1 %v18689_v30 }
 0x862   :  { %3848 = vmatprep.subr.bf16.mxu0 %v18690_v55  ;;  %3889 = vmatprep.subr.bf16.mxu1 %v18691_v48 }
 0x865   :  { %3849 = vmatpush1.bf16.msra.mxu0 %v18692_v35  ;;  %3890 = vmatpush1.bf16.msra.mxu1 %v18693_v14 }
 0x866   :  { %3850 = vmatprep.subr.bf16.mxu0 %v18694_v29  ;;  %3891 = vmatprep.subr.bf16.mxu1 %v18695_v38 }
 0x869   :  { %v13134_v53 = vpop.eup %13133  ;;  %3851 = vmatpush1.bf16.msra.mxu0 %v16014_v3  ;;  %3892 = vmatpush1.bf16.msra.mxu1 %v16017_v47 }
 0x86a   :  { %3852 = vmatprep.subr.bf16.mxu0 %v16020_v21  ;;  %3893 = vmatprep.subr.bf16.mxu1 %v16023_v12  ;;  %v3753_v46 = vmul.f32 %v13134_v53, %v13132_v2  ;;  %v18704_v2 = vld [vmem:[#allocation34_spill] sm:$0xff]  ;;  %v18705_v53 = vld [vmem:[#allocation37_spill] sm:$0xff] }
 0x86c   :  { %v3754_v16 = vpack.c.bf16 %v3753_v46, %v3753_v46  ;;  %v18706_v46 = vld [vmem:[#allocation36_spill] sm:$0xff] }
 0x86d   :  { %3853 = vmatpush1.bf16.msra.mxu0 %v16026_v40  ;;  %3894 = vmatpush1.bf16.msra.mxu1 %v16029_v10 }
 0x86e   :  { %3957 = vmatprep.subr.bf16.mxu0 %v15752_v5  ;;  %3998 = vmatprep.subr.bf16.mxu1 %v15755_v34  ;;  %v13378_v5 = vld [vmem:[#allocation11 + $0xa4] ss:$16 sps:$4 sm:$0xff]   ;;  %v13379_v34 = vld [vmem:[#allocation11 + $0xa0] ss:$16 sps:$4 sm:$0xff]  }
 0x870   :  { %3871 = vmatmul.mubr.bf16.vlgmr.msra.gmra.mxu0 %v3754_v16  ;;  %3912 = vmatmul.mubr.bf16.vlgmr.msra.gmra.mxu1 %v3754_v16 }
 0x871   :  { %3958 = vmatpush1.bf16.msra.mxu0 %v13375_v25  ;;  %3999 = vmatpush1.bf16.msra.mxu1 %v15759_v20  ;;  %v13380_v20 = vld [vmem:[#allocation11 + $0x84] ss:$16 sps:$4 sm:$0xff]  }
 0x872   :  { %3959 = vmatprep.subr.bf16.mxu0 %v13376_v37  ;;  %4000 = vmatprep.subr.bf16.mxu1 %v15763_v32  ;;  %v13381_v32 = vld [vmem:[#allocation11 + $0x80] ss:$16 sps:$4 sm:$0xff]   ;;  %v18709_v37 = vld [vmem:[#allocation41_spill] sm:$0xff] }
 0x873   :  { %3989 = vmatprep.mubr.bf16.mxu0 %v18403_v11  ;;  %4030 = vmatprep.mubr.bf16.mxu1 %v18403_v11  ;;  %v18708_v25 = vld [vmem:[#allocation38_spill] sm:$0xff] }
 0x875   :  { %3960 = vmatpush1.bf16.msra.mxu0 %v13377_v31  ;;  %4001 = vmatpush1.bf16.msra.mxu1 %v15769_v50  ;;  %v13383_v50 = vld [vmem:[#allocation11 + $0x60] ss:$16 sps:$4 sm:$0xff]  }
 0x876   :  { %3961 = vmatprep.subr.bf16.mxu0 %v13378_v5  ;;  %4002 = vmatprep.subr.bf16.mxu1 %v15773_v13  ;;  %v13384_v13 = vld [vmem:[#allocation11 + $0x44] ss:$16 sps:$4 sm:$0xff]   ;;  %v18711_v5 = vld [vmem:[#allocation43_spill] sm:$0xff] }
 0x877   :  { %v18710_v31 = vld [vmem:[#allocation40_spill] sm:$0xff] }
 0x879   :  { %3962 = vmatpush1.bf16.msra.mxu0 %v13379_v34  ;;  %4003 = vmatpush1.bf16.msra.mxu1 %v15777_v36  ;;  %v13385_v36 = vld [vmem:[#allocation11 + $0x40] ss:$16 sps:$4 sm:$0xff]  }
 0x87a   :  { %3963 = vmatprep.subr.bf16.mxu0 %v13380_v20  ;;  %4004 = vmatprep.subr.bf16.mxu1 %v15781_v7  ;;  %v13386_v7 = vld [vmem:[#allocation11 + $0x24] ss:$16 sps:$4 sm:$0xff]  }
 0x87b   :  { %v18712_v34 = vld [vmem:[#allocation42_spill] sm:$0xff]  ;;  %v18713_v20 = vld [vmem:[#allocation44_spill] sm:$0xff] }
 0x87d   :  { %3964 = vmatpush1.bf16.msra.mxu0 %v13381_v32  ;;  %4005 = vmatpush1.bf16.msra.mxu1 %v15785_v8  ;;  %v13387_v8 = vld [vmem:[#allocation11 + $0x20] ss:$16 sps:$4 sm:$0xff]   ;;  %v18714_v32 = vld [vmem:[#allocation45_spill] sm:$0xff] }
 0x87e   :  { %3965 = vmatprep.subr.bf16.mxu0 %v13382_v22  ;;  %4006 = vmatprep.subr.bf16.mxu1 %v15789_v28  ;;  %v13388_v28 = vld [vmem:[#allocation11 + $0x4] ss:$16 sps:$4 sm:$0xff]  }
 0x87f   :  { %v18715_v22 = vld [vmem:[#allocation46_spill] sm:$0xff] }
 0x881   :  { %3966 = vmatpush1.bf16.msra.mxu0 %v13383_v50  ;;  %4007 = vmatpush1.bf16.msra.mxu1 %v15793_v49  ;;  %v13389_v49 = vld [vmem:[#allocation11] ss:$16 sps:$4 sm:$0xff]  }
 0x882   :  { %3967 = vmatprep.subr.bf16.mxu0 %v13384_v13  ;;  %4008 = vmatprep.subr.bf16.mxu1 %v15797_v17  ;;  %v18696_v17 = vld [vmem:[#allocation73_spill] sm:$0xff]  ;;  %v18716_v50 = vld [vmem:[#allocation80_spill] sm:$0xff] }
 0x883   :  { %v18717_v13 = vld [vmem:[#allocation96_spill] sm:$0xff] }
 0x885   :  { %3968 = vmatpush1.bf16.msra.mxu0 %v13385_v36  ;;  %4009 = vmatpush1.bf16.msra.mxu1 %v15801_v27  ;;  %v18698_v27 = vld [vmem:[#allocation75_spill] sm:$0xff] }
 0x886   :  { %3969 = vmatprep.subr.bf16.mxu0 %v13386_v7  ;;  %4010 = vmatprep.subr.bf16.mxu1 %v15805_v6  ;;  %v18699_v6 = vld [vmem:[#allocation76_spill] sm:$0xff]  ;;  %v18718_v36 = vld [vmem:[#allocation47_spill] sm:$0xff] }
 0x887   :  { %v18719_v7 = vld [vmem:[#allocation48_spill] sm:$0xff] }
 0x889   :  { %3970 = vmatpush1.bf16.msra.mxu0 %v13387_v8  ;;  %4011 = vmatpush1.bf16.msra.mxu1 %v15809_v1  ;;  %v18701_v1 = vld [vmem:[#allocation78_spill] sm:$0xff]  ;;  %v18720_v8 = vld [vmem:[#allocation49_spill] sm:$0xff] }
 0x88a   :  { %3971 = vmatprep.subr.bf16.mxu0 %v13388_v28  ;;  %4012 = vmatprep.subr.bf16.mxu1 %v15813_v52  ;;  %v18702_v52 = vld [vmem:[#allocation33_spill] sm:$0xff]  ;;  %v18721_v28 = vld [vmem:[#allocation50_spill] sm:$0xff] }
 0x88d   :  { %3972 = vmatpush1.bf16.msra.mxu0 %v13389_v49  ;;  %4013 = vmatpush1.bf16.msra.mxu1 %v15817_v23  ;;  %v18703_v23 = vld [vmem:[#allocation35_spill] sm:$0xff] }
 0x88e   :  { %4069 = vmatprep.subr.bf16.mxu0 %v18696_v17  ;;  %4110 = vmatprep.subr.bf16.mxu1 %v18697_v15  ;;  %v18722_v49 = vld [vmem:[#allocation51_spill] sm:$0xff]  ;;  %v18723_v17 = vld [vmem:[#allocation52_spill] sm:$0xff]  ;;  %v18724_v15 = vld [vmem:[#allocation53_spill] sm:$0xff] }
 0x890   :  { %3990 = vmatmul.mubr.bf16.vlgmr.msra.gmra.mxu0 %v3754_v16  ;;  %4031 = vmatmul.mubr.bf16.vlgmr.msra.gmra.mxu1 %v3754_v16  ;;  %v18707_v16 = vld [vmem:[#allocation39_spill] sm:$0xff] }
 0x891   :  { %4070 = vmatpush1.bf16.msra.mxu0 %v18698_v27  ;;  %4111 = vmatpush1.bf16.msra.mxu1 %v18699_v6  ;;  %v18725_v27 = vld [vmem:[#allocation54_spill] sm:$0xff]  ;;  %v18726_v6 = vld [vmem:[#allocation55_spill] sm:$0xff] }
 0x892   :  { %4071 = vmatprep.subr.bf16.mxu0 %v18700_v61  ;;  %4112 = vmatprep.subr.bf16.mxu1 %v18701_v1  ;;  %v18727_v61 = vld [vmem:[#allocation56_spill] sm:$0xff]  ;;  %v18728_v1 = vld [vmem:[#allocation57_spill] sm:$0xff] }
 0x893   :  { %4101 = vmatprep.mubr.bf16.mxu0 %v18403_v11  ;;  %4142 = vmatprep.mubr.bf16.mxu1 %v18403_v11 }
 0x895   :  { %4072 = vmatpush1.bf16.msra.mxu0 %v18702_v52  ;;  %4113 = vmatpush1.bf16.msra.mxu1 %v18703_v23  ;;  %v18729_v52 = vld [vmem:[#allocation58_spill] sm:$0xff] }
 0x896   :  { %4073 = vmatprep.subr.bf16.mxu0 %v18704_v2  ;;  %4114 = vmatprep.subr.bf16.mxu1 %v18705_v53 }
 0x899   :  { %4074 = vmatpush1.bf16.msra.mxu0 %v18706_v46  ;;  %4115 = vmatpush1.bf16.msra.mxu1 %v18707_v16 }
 0x89a   :  { %4075 = vmatprep.subr.bf16.mxu0 %v18708_v25  ;;  %4116 = vmatprep.subr.bf16.mxu1 %v18709_v37 }
 0x89d   :  { %4076 = vmatpush1.bf16.msra.mxu0 %v18710_v31  ;;  %4117 = vmatpush1.bf16.msra.mxu1 %v18711_v5 }
 0x89e   :  { %4077 = vmatprep.subr.bf16.mxu0 %v18712_v34  ;;  %4118 = vmatprep.subr.bf16.mxu1 %v18713_v20 }
 0x8a1   :  { %4078 = vmatpush1.bf16.msra.mxu0 %v18714_v32  ;;  %4119 = vmatpush1.bf16.msra.mxu1 %v18715_v22 }
 0x8a2   :  { %4079 = vmatprep.subr.bf16.mxu0 %v18716_v50  ;;  %4120 = vmatprep.subr.bf16.mxu1 %v18717_v13 }
 0x8a5   :  { %4080 = vmatpush1.bf16.msra.mxu0 %v18718_v36  ;;  %4121 = vmatpush1.bf16.msra.mxu1 %v18719_v7 }
 0x8a6   :  { %4081 = vmatprep.subr.bf16.mxu0 %v18720_v8  ;;  %4122 = vmatprep.subr.bf16.mxu1 %v18721_v28 }
 0x8a9   :  { %4082 = vmatpush1.bf16.msra.mxu0 %v18722_v49  ;;  %4123 = vmatpush1.bf16.msra.mxu1 %v18723_v17 }
 0x8aa   :  { %4083 = vmatprep.subr.bf16.mxu0 %v18724_v15  ;;  %4124 = vmatprep.subr.bf16.mxu1 %v18725_v27 }
 0x8ad   :  { %4084 = vmatpush1.bf16.msra.mxu0 %v18726_v6  ;;  %4125 = vmatpush1.bf16.msra.mxu1 %v18727_v61 }
 0x8ae   :  { %4151 = vmatprep.subr.bf16.mxu0 %v18728_v1  ;;  %4192 = vmatprep.subr.bf16.mxu1 %v18729_v52 }
 0x910   :  { %v3790_v23 = vpop.f32.mrf.mxu0  ;;  %v3831_v2 = vpop.f32.mrf.mxu1 }
 0x912   :  { %v3792_v53 = vpop.f32.mrf.mxu0  ;;  %v3833_v46 = vpop.f32.mrf.mxu1 }
 0x914   :  { %v3794_v16 = vpop.f32.mrf.mxu0  ;;  %v3835_v25 = vpop.f32.mrf.mxu1 }
 0x916   :  { %v3795_v37 = vpop.f32.mrf.mxu0  ;;  %v3836_v31 = vpop.f32.mrf.mxu1 }
 0x917   :  { %v18730_v37 = vld [vmem:[#allocation93_spill] sm:$0xff] }
 0x918   :  { %v3953_v31 = vunpack.c.l.bf16 %v18730_v37 }
 0x930   :  { %v3872_v5 = vpop.f32.mrf.mxu0  ;;  %v3913_v34 = vpop.f32.mrf.mxu1 }
 0x931   :  { %v3873_v20 = vadd.f32 %v3872_v5, %v3790_v23  ;;  %v3914_v61 = vadd.f32 %v3913_v34, %v3831_v2 }
 0x932   :  { %v3874_v32 = vpop.f32.mrf.mxu0  ;;  %v3915_v22 = vpop.f32.mrf.mxu1 }
 0x933   :  { %v3920_v50 = vadd.f32 %v3873_v20, %v15148_v4  ;;  %v3875_v13 = vadd.f32 %v3874_v32, %v3792_v53  ;;  %v3916_v27 = vadd.f32 %v3915_v22, %v3833_v46  ;;  %v3922_v23 = vadd.f32 %v3914_v61, %v15160_v54 }
 0x934   :  { %v3876_v36 = vpop.f32.mrf.mxu0  ;;  %v3917_v7 = vpop.f32.mrf.mxu1  ;;  %v3954_v46 = vunpack.c.h.bf16 %v18730_v37 }
 0x935   :  { %v11857_v8 = vmul.f32 -1.442695, %v3920_v50  ;;  %v3921_v28 = vadd.f32 %v3875_v13, %v15151_v18  ;;  %v3923_v6 = vadd.f32 %v3916_v27, %v15156_v43 }
 0x936   :  { %v3877_v49 = vpop.f32.mrf.mxu0  ;;  %v3918_v17 = vpop.f32.mrf.mxu1 }
 0x937   :  { %13135 = vpow2.f32 %v11857_v8  ;;  %v11858_v15 = vmul.f32 -1.442695, %v3921_v28  ;;  %v11859_v1 = vmul.f32 -1.442695, %v3923_v6 }
 0x939   :  { %13137 = vpow2.f32 %v11858_v15 }
 0x93a   :  { %13139 = vpow2.f32 %v11859_v1 }
 0x944   :  { %v13136_v52 = vpop.eup %13135 }
 0x945   :  { %v3927_v16 = vadd.f32 1.0, %v13136_v52 }
 0x946   :  { %v13138_v53 = vpop.eup %13137 }
 0x947   :  { %13141 = vrcp.f32 %v3927_v16  ;;  %v3933_v25 = vadd.f32 1.0, %v13138_v53  ;;  %v13140_v34 = vpop.eup %13139 }
 0x948   :  { %13143 = vtanh.f32 %v3922_v23  ;;  %v3940_v15 = vadd.f32 1.0, %v13140_v34  ;;  %v18731_v23 = vld [vmem:[#allocation102_spill] sm:$0xff] }
 0x949   :  { %13145 = vrcp.f32 %v3933_v25  ;;  %v3956_v16 = vunpack.c.h.bf16 %v18731_v23  ;;  %v3955_v25 = vunpack.c.l.bf16 %v18731_v23 }
 0x950   :  { %v3991_v5 = vpop.f32.mrf.mxu0  ;;  %v4032_v20 = vpop.f32.mrf.mxu1 }
 0x951   :  { %v4039_v32 = vadd.f32 %v3991_v5, %v3953_v31  ;;  %v4041_v37 = vadd.f32 %v4032_v20, %v3955_v25 }
 0x952   :  { %v3993_v22 = vpop.f32.mrf.mxu0  ;;  %v4034_v2 = vpop.f32.mrf.mxu1 }
 0x953   :  { %v11860_v50 = vmul.f32 -1.442695, %v4039_v32  ;;  %v4040_v13 = vadd.f32 %v3993_v22, %v3954_v46  ;;  %v4042_v53 = vadd.f32 %v4034_v2, %v3956_v16 }
 0x954   :  { %v13142_v36 = vpop.eup %13141  ;;  %v3995_v7 = vpop.f32.mrf.mxu0 }
 0x955   :  { %v4036_v8 = vpop.f32.mrf.mxu1  ;;  %v13144_v28 = vpop.eup %13143  ;;  %13147 = vpow2.f32 %v11860_v50  ;;  %v11861_v49 = vmul.f32 -1.442695, %v4040_v13  ;;  %v11862_v31 = vmul.f32 -1.442695, %v4042_v53 }
 0x956   :  { %v13146_v17 = vpop.eup %13145  ;;  %v3996_v27 = vpop.f32.mrf.mxu0  ;;  %v3944_v61 = vmul.f32 %v13144_v28, %v13142_v36 }
 0x957   :  { %v4037_v6 = vpop.f32.mrf.mxu1  ;;  %v3943_v1 = vmul.f32 %v13146_v17, %v16109_v59  ;;  %13149 = vpow2.f32 %v11861_v49 }
 0x958   :  { %13151 = vrcp.f32 %v3940_v15 }
 0x959   :  { %v16212_v52 = vadd.f32 %v3944_v61, %v3943_v1 }
 0x95b   :  { %13153 = vtanh.f32 %v16212_v52 }
 0x95c   :  { %13155 = vtanh.f32 %v4041_v37 }
 0x95d   :  { %13157 = vpow2.f32 %v11862_v31 }
 0x962   :  { %v13148_v5 = vpop.eup %13147 }
 0x963   :  { %v4046_v32 = vadd.f32 1.0, %v13148_v5 }
 0x964   :  { %v13150_v46 = vpop.eup %13149 }
 0x965   :  { %13159 = vrcp.f32 %v4046_v32  ;;  %v4052_v59 = vadd.f32 1.0, %v13150_v46  ;;  %v13152_v22 = vpop.eup %13151 }
 0x967   :  { %13161 = vrcp.f32 %v4052_v59 }
 0x968   :  { %v13154_v34 = vpop.eup %13153 }
 0x969   :  { %v3947_v50 = vmul.f32 %v13154_v34, %v13152_v22  ;;  %v13156_v20 = vpop.eup %13155 }
 0x96a   :  { %v13158_v2 = vpop.eup %13157 }
 0x96b   :  { %v4068_v13 = vpack.c.bf16 %v3947_v50, %v3947_v50 }
 0x96d   :  { %4102 = vmatmul.mubr.bf16.vlgmr.msra.gmra.mxu0 %v4068_v13  ;;  %4143 = vmatmul.mubr.bf16.vlgmr.msra.gmra.mxu1 %v4068_v13 }
 0x96e   :  { %4152 = vmatpush1.bf16.msra.mxu0 %v15936_v51  ;;  %4193 = vmatpush1.bf16.msra.mxu1 %v15939_v56  ;;  %v4059_v56 = vadd.f32 1.0, %v13158_v2 }
 0x96f   :  { %4153 = vmatprep.subr.bf16.mxu0 %v15942_v41  ;;  %4194 = vmatprep.subr.bf16.mxu1 %v15945_v58 }
 0x970   :  { %4183 = vmatprep.mubr.bf16.mxu0 %v18403_v11  ;;  %4224 = vmatprep.mubr.bf16.mxu1 %v18403_v11  ;;  %13163 = vrcp.f32 %v4059_v56 }
 0x972   :  { %v13160_v36 = vpop.eup %13159  ;;  %4154 = vmatpush1.bf16.msra.mxu0 %v15950_v33  ;;  %4195 = vmatpush1.bf16.msra.mxu1 %v15953_v57 }
 0x973   :  { %v4063_v7 = vmul.f32 %v13160_v36, %v13156_v20  ;;  %4155 = vmatprep.subr.bf16.mxu0 %v15956_v63  ;;  %4196 = vmatprep.subr.bf16.mxu1 %v15959_v45 }
 0x974   :  { %v13162_v51 = vpop.eup %13161 }
 0x975   :  { %v4062_v41 = vmul.f32 %v13162_v51, %v16127_v60 }
 0x976   :  { %4156 = vmatpush1.bf16.msra.mxu0 %v15963_v9  ;;  %4197 = vmatpush1.bf16.msra.mxu1 %v15966_v24 }
 0x977   :  { %v16230_v58 = vadd.f32 %v4063_v7, %v4062_v41  ;;  %4157 = vmatprep.subr.bf16.mxu0 %v15971_v62  ;;  %4198 = vmatprep.subr.bf16.mxu1 %v15974_v39 }
 0x979   :  { %13165 = vtanh.f32 %v16230_v58 }
 0x97a   :  { %4158 = vmatpush1.bf16.msra.mxu0 %v18684_v44  ;;  %4199 = vmatpush1.bf16.msra.mxu1 %v18685_v42 }
 0x97b   :  { %4159 = vmatprep.subr.bf16.mxu0 %v18686_v0  ;;  %4200 = vmatprep.subr.bf16.mxu1 %v18687_v19 }
 0x97d   :  { %v13164_v33 = vpop.eup %13163 }
 0x97e   :  { %4160 = vmatpush1.bf16.msra.mxu0 %v18688_v26  ;;  %4201 = vmatpush1.bf16.msra.mxu1 %v18689_v30 }
 0x97f   :  { %4161 = vmatprep.subr.bf16.mxu0 %v18690_v55  ;;  %4202 = vmatprep.subr.bf16.mxu1 %v18691_v48 }
 0x982   :  { %4162 = vmatpush1.bf16.msra.mxu0 %v18692_v35  ;;  %4203 = vmatpush1.bf16.msra.mxu1 %v18693_v14 }
 0x983   :  { %4163 = vmatprep.subr.bf16.mxu0 %v18694_v29  ;;  %4204 = vmatprep.subr.bf16.mxu1 %v18695_v38 }
 0x986   :  { %v13166_v57 = vpop.eup %13165  ;;  %4164 = vmatpush1.bf16.msra.mxu0 %v16014_v3  ;;  %4205 = vmatpush1.bf16.msra.mxu1 %v16017_v47 }
 0x987   :  { %4165 = vmatprep.subr.bf16.mxu0 %v16020_v21  ;;  %4206 = vmatprep.subr.bf16.mxu1 %v16023_v12  ;;  %v4066_v63 = vmul.f32 %v13166_v57, %v13164_v33 }
 0x989   :  { %v16251_v45 = vpack.c.bf16 %v4066_v63, %v4066_v63 }
 0x98a   :  { %4166 = vmatpush1.bf16.msra.mxu0 %v16026_v40  ;;  %4207 = vmatpush1.bf16.msra.mxu1 %v16029_v10 }
 0x98d   :  { %4184 = vmatmul.mubr.bf16.vlgmr.msra.gmra.mxu0 %v16251_v45  ;;  %4225 = vmatmul.mubr.bf16.vlgmr.msra.gmra.mxu1 %v16251_v45 }
 0xa2d   :  { %v4103_v9 = vpop.f32.mrf.mxu0  ;;  %v4144_v24 = vpop.f32.mrf.mxu1 }
 0xa2f   :  { %v4105_v62 = vpop.f32.mrf.mxu0  ;;  %v4146_v39 = vpop.f32.mrf.mxu1 }
 0xa31   :  { %v4107_v3 = vpop.f32.mrf.mxu0  ;;  %v4148_v47 = vpop.f32.mrf.mxu1 }
 0xa33   :  { %v4108_v21 = vpop.f32.mrf.mxu0  ;;  %v4149_v60 = vpop.f32.mrf.mxu1 }
 0xa4d   :  { %v4185_v12 = vpop.f32.mrf.mxu0  ;;  %v4226_v44 = vpop.f32.mrf.mxu1 }
 0xa4e   :  { %v4186_v42 = vadd.f32 %v4185_v12, %v4103_v9  ;;  %v4227_v28 = vadd.f32 %v4226_v44, %v4144_v24 }
 0xa4f   :  { %v4187_v0 = vpop.f32.mrf.mxu0  ;;  %v4228_v19 = vpop.f32.mrf.mxu1 }
 0xa50   :  { %v4233_v40 = vadd.f32 %v4186_v42, %v15148_v4  ;;  %v4188_v10 = vadd.f32 %v4187_v0, %v4105_v62  ;;  %v4229_v38 = vadd.f32 %v4228_v19, %v4146_v39  ;;  %v4235_v15 = vadd.f32 %v4227_v28, %v15160_v54 }
 0xa51   :  { %v4189_v26 = vpop.f32.mrf.mxu0  ;;  %v4230_v30 = vpop.f32.mrf.mxu1 }
 0xa52   :  { %v11863_v55 = vmul.f32 -1.442695, %v4233_v40  ;;  %v4234_v48 = vadd.f32 %v4188_v10, %v15151_v18  ;;  %v4236_v8 = vadd.f32 %v4229_v38, %v15156_v43 }
 0xa53   :  { %v4190_v35 = vpop.f32.mrf.mxu0  ;;  %v4231_v14 = vpop.f32.mrf.mxu1 }
 0xa54   :  { %13167 = vpow2.f32 %v11863_v55  ;;  %v11864_v29 = vmul.f32 -1.442695, %v4234_v48  ;;  %v11865_v49 = vmul.f32 -1.442695, %v4236_v8 }
 0xa56   :  { %13169 = vpow2.f32 %v11864_v29 }
 0xa57   :  { %13171 = vpow2.f32 %v11865_v49 }
 0xa61   :  { %v13168_v17 = vpop.eup %13167 }
 0xa62   :  { %v4240_v4 = vadd.f32 1.0, %v13168_v17 }
 0xa63   :  { %v13170_v27 = vpop.eup %13169 }
 0xa64   :  { %13173 = vrcp.f32 %v4240_v4  ;;  %v4246_v6 = vadd.f32 1.0, %v13170_v27  ;;  %v13172_v18 = vpop.eup %13171 }
 0xa65   :  { %13175 = vtanh.f32 %v4235_v15  ;;  %v4253_v16 = vadd.f32 1.0, %v13172_v18 }
 0xa66   :  { %13177 = vrcp.f32 %v4246_v6 }
 0xa67   :  { %13179 = vrcp.f32 %v4253_v16 }
 0xa71   :  { %v13174_v61 = vpop.eup %13173 }
 0xa72   :  { %v13176_v1 = vpop.eup %13175 }
 0xa73   :  { %v13178_v23 = vpop.eup %13177  ;;  %v4257_v53 = vmul.f32 %v13176_v1, %v13174_v61 }
 0xa74   :  { %v4256_v43 = vmul.f32 %v13178_v23, %v16212_v52  ;;  %v13180_v54 = vpop.eup %13179 }
 0xa76   :  { %v16262_v25 = vadd.f32 %v4257_v53, %v4256_v43 }
 0xa78   :  { %13181 = vtanh.f32 %v16262_v25 }
 0xa85   :  { %v13182_v37 = vpop.eup %13181 }
 0xa86   :  { %v16265_v31 = vmul.f32 %v13182_v37, %v13180_v54 }
 0xa87   :  { %14422 = dma.done.wait [#allocation8], 4096 }
 0xa88   :  { %14423 = vsyncadd [#allocation8], 4294963200 }
 0xa89   :  { %14424 = dma.done.wait [#allocation8 + $0x1], 4096 }
 0xa8a   :  { %14425 = vsyncadd [#allocation8 + $0x1], 4294963200 }
 0xa8b   :  { %14426 = dma.done.wait [#allocation8 + $0x2], 4096 }
 0xa8c   :  { %14427 = vsyncadd [#allocation8 + $0x2], 4294963200 }
 0xa8d   :  { %14428 = dma.done.wait [#allocation8 + $0x3], 1024 }
 0xa8e   :  { %14429 = vsyncadd [#allocation8 + $0x3], 4294966272  ;;  %4502 = vmatprep.mubr.bf16.mxu0 %v18403_v11  ;;  %4543 = vmatprep.mubr.bf16.mxu1 %v18403_v11  ;;  %v13390_v52 = vld [vmem:[#allocation4 + $0xe4] ss:$16 sps:$4 sm:$0xff]   ;;  %v13392_v5 = vld [vmem:[#allocation4 + $0xe0] ss:$16 sps:$4 sm:$0xff]  }
 0xa8f   :  { %4470 = vmatprep.subr.bf16.mxu0 %v13390_v52  ;;  %v13393_v32 = vld [vmem:[#allocation4 + $0xc4] ss:$16 sps:$4 sm:$0xff]   ;;  %v13395_v46 = vld [vmem:[#allocation4 + $0xc0] ss:$16 sps:$4 sm:$0xff]   ;;  %v13401_v22 = vld [vmem:[#allocation4 + $0xec] ss:$16 sps:$4 sm:$0xff]  }
 0xa90   :  { %4471 = vmatpush1.bf16.msra.mxu0 %v13392_v5  ;;  %v13396_v59 = vld [vmem:[#allocation4 + $0xa4] ss:$16 sps:$4 sm:$0xff]   ;;  %v13404_v34 = vld [vmem:[#allocation4 + $0xe8] ss:$16 sps:$4 sm:$0xff]   ;;  %v13398_v50 = vld [vmem:[#allocation4 + $0xa0] ss:$16 sps:$4 sm:$0xff]   ;;  %4511 = vmatprep.subr.bf16.mxu1 %v13401_v22 }
 0xa91   :  { %4472 = vmatprep.subr.bf16.mxu0 %v13393_v32  ;;  %v13399_v13 = vld [vmem:[#allocation4 + $0x84] ss:$16 sps:$4 sm:$0xff]   ;;  %4512 = vmatpush1.bf16.msra.mxu1 %v13404_v34  ;;  %v13407_v20 = vld [vmem:[#allocation4 + $0xcc] ss:$16 sps:$4 sm:$0xff]   ;;  %v13410_v2 = vld [vmem:[#allocation4 + $0xc8] ss:$16 sps:$4 sm:$0xff]   ;;  %v4613_v32 = vpack.c.bf16 %v16265_v31, %v16265_v31 }
 0xa92   :  { %4513 = vmatprep.subr.bf16.mxu1 %v13407_v20  ;;  %v13403_v36 = vld [vmem:[#allocation4 + $0x80] ss:$16 sps:$4 sm:$0xff]   ;;  %v13405_v7 = vld [vmem:[#allocation4 + $0x64] ss:$16 sps:$4 sm:$0xff]   ;;  %v13413_v51 = vld [vmem:[#allocation4 + $0xac] ss:$16 sps:$4 sm:$0xff]  }
 0xa93   :  { %v13416_v56 = vld [vmem:[#allocation4 + $0xa8] ss:$16 sps:$4 sm:$0xff]   ;;  %v13419_v41 = vld [vmem:[#allocation4 + $0x8c] ss:$16 sps:$4 sm:$0xff]   ;;  %v13409_v33 = vld [vmem:[#allocation4 + $0x60] ss:$16 sps:$4 sm:$0xff]  }
 0xa94   :  { %4473 = vmatpush1.bf16.msra.mxu0 %v13395_v46  ;;  %v13411_v57 = vld [vmem:[#allocation4 + $0x44] ss:$16 sps:$4 sm:$0xff]   ;;  %v13422_v63 = vld [vmem:[#allocation4 + $0x88] ss:$16 sps:$4 sm:$0xff]   ;;  %v13425_v9 = vld [vmem:[#allocation4 + $0x6c] ss:$16 sps:$4 sm:$0xff]  }
 0xa95   :  { %4474 = vmatprep.subr.bf16.mxu0 %v13396_v59  ;;  %4514 = vmatpush1.bf16.msra.mxu1 %v13410_v2  ;;  %v13415_v24 = vld [vmem:[#allocation4 + $0x40] ss:$16 sps:$4 sm:$0xff]   ;;  %v13417_v62 = vld [vmem:[#allocation4 + $0x24] ss:$16 sps:$4 sm:$0xff]   ;;  %v13428_v39 = vld [vmem:[#allocation4 + $0x68] ss:$16 sps:$4 sm:$0xff]  }
 0xa96   :  { %4515 = vmatprep.subr.bf16.mxu1 %v13413_v51  ;;  %v13429_v3 = vld [vmem:[#allocation4 + $0x4c] ss:$16 sps:$4 sm:$0xff]   ;;  %v13421_v47 = vld [vmem:[#allocation4 + $0x20] ss:$16 sps:$4 sm:$0xff]   ;;  %v13423_v21 = vld [vmem:[#allocation4 + $0x4] ss:$16 sps:$4 sm:$0xff]  }
 0xa97   :  { %v13431_v60 = vld [vmem:[#allocation4 + $0x48] ss:$16 sps:$4 sm:$0xff]   ;;  %v13432_v12 = vld [vmem:[#allocation4 + $0x2c] ss:$16 sps:$4 sm:$0xff]   ;;  %v13427_v44 = vld [vmem:[#allocation4] ss:$16 sps:$4 sm:$0xff]  }
 0xa98   :  { %4475 = vmatpush1.bf16.msra.mxu0 %v13398_v50  ;;  %v13434_v42 = vld [vmem:[#allocation4 + $0x28] ss:$16 sps:$4 sm:$0xff]   ;;  %v13435_v0 = vld [vmem:[#allocation4 + $0xc] ss:$16 sps:$4 sm:$0xff]   ;;  %v13440_v19 = vld [vmem:[#allocation6 + $0xe4] ss:$16 sps:$4 sm:$0xff]  }
 0xa99   :  { %4476 = vmatprep.subr.bf16.mxu0 %v13399_v13  ;;  %4516 = vmatpush1.bf16.msra.mxu1 %v13416_v56  ;;  %v13438_v40 = vld [vmem:[#allocation6 + $0xe0] ss:$16 sps:$4 sm:$0xff]   ;;  %v13437_v10 = vld [vmem:[#allocation4 + $0x8] ss:$16 sps:$4 sm:$0xff]   ;;  %v13443_v26 = vld [vmem:[#allocation6 + $0xc4] ss:$16 sps:$4 sm:$0xff]  }
 0xa9a   :  { %4517 = vmatprep.subr.bf16.mxu1 %v13419_v41  ;;  %v13446_v30 = vld [vmem:[#allocation6 + $0xec] ss:$16 sps:$4 sm:$0xff]   ;;  %v13441_v55 = vld [vmem:[#allocation6 + $0xc0] ss:$16 sps:$4 sm:$0xff]   ;;  %v13444_v48 = vld [vmem:[#allocation6 + $0xe8] ss:$16 sps:$4 sm:$0xff]  }
 0xa9b   :  { %v13449_v35 = vld [vmem:[#allocation6 + $0xa4] ss:$16 sps:$4 sm:$0xff]   ;;  %v13452_v14 = vld [vmem:[#allocation6 + $0xcc] ss:$16 sps:$4 sm:$0xff]   ;;  %v13447_v29 = vld [vmem:[#allocation6 + $0xa0] ss:$16 sps:$4 sm:$0xff]  }
 0xa9c   :  { %4477 = vmatpush1.bf16.msra.mxu0 %v13403_v36  ;;  %v13450_v38 = vld [vmem:[#allocation6 + $0xc8] ss:$16 sps:$4 sm:$0xff]   ;;  %v16273_v8 = vld [vmem:[#allocation6 + $0x84] ss:$16 sps:$4 sm:$0xff]   ;;  %v16275_v28 = vld [vmem:[#allocation6 + $0xac] ss:$16 sps:$4 sm:$0xff]  }
 0xa9d   :  { %4478 = vmatprep.subr.bf16.mxu0 %v13405_v7  ;;  %4518 = vmatpush1.bf16.msra.mxu1 %v13422_v63  ;;  %v16277_v49 = vld [vmem:[#allocation6 + $0x80] ss:$16 sps:$4 sm:$0xff]   ;;  %v16279_v17 = vld [vmem:[#allocation6 + $0xa8] ss:$16 sps:$4 sm:$0xff]   ;;  %v16287_v15 = vld [vmem:[#allocation6 + $0x8c] ss:$16 sps:$4 sm:$0xff]  }
 0xa9e   :  { %4519 = vmatprep.subr.bf16.mxu1 %v13425_v9  ;;  %v16289_v4 = vld [vmem:[#allocation6 + $0x60] ss:$16 sps:$4 sm:$0xff]   ;;  %v16291_v27 = vld [vmem:[#allocation6 + $0x88] ss:$16 sps:$4 sm:$0xff]   ;;  %v16297_v6 = vld [vmem:[#allocation6 + $0x44] ss:$16 sps:$4 sm:$0xff]  }
 0xa9f   :  { %v16299_v18 = vld [vmem:[#allocation6 + $0x6c] ss:$16 sps:$4 sm:$0xff]   ;;  %v16301_v61 = vld [vmem:[#allocation6 + $0x40] ss:$16 sps:$4 sm:$0xff]   ;;  %v16303_v1 = vld [vmem:[#allocation6 + $0x68] ss:$16 sps:$4 sm:$0xff]  }
 0xaa0   :  { %4479 = vmatpush1.bf16.msra.mxu0 %v13409_v33  ;;  %v16309_v23 = vld [vmem:[#allocation6 + $0x24] ss:$16 sps:$4 sm:$0xff]   ;;  %v16311_v16 = vld [vmem:[#allocation6 + $0x4c] ss:$16 sps:$4 sm:$0xff]   ;;  %v16313_v53 = vld [vmem:[#allocation6 + $0x20] ss:$16 sps:$4 sm:$0xff]  }
 0xaa1   :  { %4480 = vmatprep.subr.bf16.mxu0 %v13411_v57  ;;  %4520 = vmatpush1.bf16.msra.mxu1 %v13428_v39  ;;  %v16315_v43 = vld [vmem:[#allocation6 + $0x48] ss:$16 sps:$4 sm:$0xff]   ;;  %v16321_v54 = vld [vmem:[#allocation6 + $0x4] ss:$16 sps:$4 sm:$0xff]   ;;  %v16323_v37 = vld [vmem:[#allocation6 + $0x2c] ss:$16 sps:$4 sm:$0xff]  }
 0xaa2   :  { %4521 = vmatprep.subr.bf16.mxu1 %v13429_v3  ;;  %v16325_v52 = vld [vmem:[#allocation6] ss:$16 sps:$4 sm:$0xff]   ;;  %v16327_v5 = vld [vmem:[#allocation6 + $0x28] ss:$16 sps:$4 sm:$0xff]   ;;  %v16335_v46 = vld [vmem:[#allocation6 + $0xc] ss:$16 sps:$4 sm:$0xff]  }
 0xaa3   :  { %v16337_v59 = vld [vmem:[#allocation6 + $0x8] ss:$16 sps:$4 sm:$0xff]   ;;  %v16342_v22 = vld [vmem:[#allocation5 + $0xe4] ss:$16 sps:$4 sm:$0xff]   ;;  %v16344_v34 = vld [vmem:[#allocation5 + $0xec] ss:$16 sps:$4 sm:$0xff]  }
 0xaa4   :  { %4481 = vmatpush1.bf16.msra.mxu0 %v13415_v24  ;;  %v16346_v50 = vld [vmem:[#allocation5 + $0xe0] ss:$16 sps:$4 sm:$0xff]   ;;  %v16348_v13 = vld [vmem:[#allocation5 + $0xe8] ss:$16 sps:$4 sm:$0xff]   ;;  %v16354_v31 = vld [vmem:[#allocation5 + $0xc4] ss:$16 sps:$4 sm:$0xff]  }
 0xaa5   :  { %4482 = vmatprep.subr.bf16.mxu0 %v13417_v62  ;;  %4522 = vmatpush1.bf16.msra.mxu1 %v13431_v60  ;;  %v16356_v20 = vld [vmem:[#allocation5 + $0xcc] ss:$16 sps:$4 sm:$0xff]   ;;  %v16359_v2 = vld [vmem:[#allocation5 + $0xc0] ss:$16 sps:$4 sm:$0xff]   ;;  %v16361_v36 = vld [vmem:[#allocation5 + $0xc8] ss:$16 sps:$4 sm:$0xff]  }
 0xaa6   :  { %4523 = vmatprep.subr.bf16.mxu1 %v13432_v12  ;;  %v16367_v7 = vld [vmem:[#allocation5 + $0xa4] ss:$16 sps:$4 sm:$0xff]   ;;  %v16369_v51 = vld [vmem:[#allocation5 + $0xac] ss:$16 sps:$4 sm:$0xff]   ;;  %v16371_v56 = vld [vmem:[#allocation5 + $0xa0] ss:$16 sps:$4 sm:$0xff]  }
 0xaa7   :  { %v16373_v41 = vld [vmem:[#allocation5 + $0xa8] ss:$16 sps:$4 sm:$0xff]   ;;  %v16379_v33 = vld [vmem:[#allocation5 + $0x84] ss:$16 sps:$4 sm:$0xff]   ;;  %v16381_v57 = vld [vmem:[#allocation5 + $0x8c] ss:$16 sps:$4 sm:$0xff]  }
 0xaa8   :  { %4483 = vmatpush1.bf16.msra.mxu0 %v13421_v47  ;;  %v16383_v63 = vld [vmem:[#allocation5 + $0x80] ss:$16 sps:$4 sm:$0xff]   ;;  %v16385_v9 = vld [vmem:[#allocation5 + $0x88] ss:$16 sps:$4 sm:$0xff]   ;;  %v16391_v24 = vld [vmem:[#allocation5 + $0x64] ss:$16 sps:$4 sm:$0xff]  }
 0xaa9   :  { %4484 = vmatprep.subr.bf16.mxu0 %v13423_v21  ;;  %4524 = vmatpush1.bf16.msra.mxu1 %v13434_v42  ;;  %v16393_v62 = vld [vmem:[#allocation5 + $0x6c] ss:$16 sps:$4 sm:$0xff]   ;;  %v16395_v39 = vld [vmem:[#allocation5 + $0x60] ss:$16 sps:$4 sm:$0xff]   ;;  %v16397_v3 = vld [vmem:[#allocation5 + $0x68] ss:$16 sps:$4 sm:$0xff]  }
 0xaaa   :  { %4525 = vmatprep.subr.bf16.mxu1 %v13435_v0  ;;  %18732 = vst [vmem:[#allocation65_spill] sm:$0xff] %v16397_v3  ;;  %v16401_v47 = vld [vmem:[#allocation5 + $0x44] ss:$16 sps:$4 sm:$0xff]   ;;  %v16403_v21 = vld [vmem:[#allocation5 + $0x4c] ss:$16 sps:$4 sm:$0xff]  }
 0xaab   :  { %18733 = vst [vmem:[#allocation66_spill] sm:$0xff] %v16401_v47  ;;  %18734 = vst [vmem:[#allocation67_spill] sm:$0xff] %v16403_v21  ;;  %v16406_v60 = vld [vmem:[#allocation5 + $0x40] ss:$16 sps:$4 sm:$0xff]   ;;  %v16410_v12 = vld [vmem:[#allocation5 + $0x48] ss:$16 sps:$4 sm:$0xff]  }
 0xaac   :  { %4485 = vmatpush1.bf16.msra.mxu0 %v13427_v44  ;;  %18735 = vst [vmem:[#allocation70_spill] sm:$0xff] %v16406_v60  ;;  %18736 = vst [vmem:[#allocation71_spill] sm:$0xff] %v16410_v12  ;;  %v16412_v44 = vld [vmem:[#allocation5 + $0x24] ss:$16 sps:$4 sm:$0xff]   ;;  %v16415_v42 = vld [vmem:[#allocation5 + $0x20] ss:$16 sps:$4 sm:$0xff]  }
 0xaad   :  { %4806 = vmatprep.subr.bf16.mxu0 %v13440_v19  ;;  %4526 = vmatpush1.bf16.msra.mxu1 %v13437_v10  ;;  %18737 = vst [vmem:[#allocation72_spill] sm:$0xff] %v16412_v44  ;;  %18738 = vst [vmem:[#allocation88_spill] sm:$0xff] %v16415_v42  ;;  %v16417_v0 = vld [vmem:[#allocation5 + $0x2c] ss:$16 sps:$4 sm:$0xff]   ;;  %v16419_v19 = vld [vmem:[#allocation5 + $0x28] ss:$16 sps:$4 sm:$0xff]  }
 0xaae   :  { %4847 = vmatprep.subr.bf16.mxu1 %v13446_v30  ;;  %18739 = vst [vmem:[#allocation100_spill] sm:$0xff] %v16417_v0  ;;  %18740 = vst [vmem:[#allocation90_spill] sm:$0xff] %v16419_v19  ;;  %v16424_v10 = vld [vmem:[#allocation5 + $0xc] ss:$16 sps:$4 sm:$0xff]   ;;  %v16431_v30 = vld [vmem:[#allocation5 + $0x8] ss:$16 sps:$4 sm:$0xff]  }
 0xaaf   :  { %4503 = vmatmul.mubr.bf16.vlgmr.msra.gmra.mxu0 %v16251_v45  ;;  %18742 = vst [vmem:[#allocation59_spill] sm:$0xff] %v16424_v10  ;;  %18744 = vst [vmem:[#allocation61_spill] sm:$0xff] %v16431_v30 }
 0xab0   :  { %4807 = vmatpush1.bf16.msra.mxu0 %v13438_v40  ;;  %4838 = vmatprep.mubr.bf16.mxu0 %v18403_v11  ;;  %v16421_v40 = vld [vmem:[#allocation5 + $0x4] ss:$16 sps:$4 sm:$0xff]  }
 0xab1   :  { %4808 = vmatprep.subr.bf16.mxu0 %v13443_v26  ;;  %4544 = vmatmul.mubr.bf16.vlgmr.msra.gmra.mxu1 %v16251_v45  ;;  %v16285_v45 = vld [vmem:[#allocation6 + $0x64] ss:$16 sps:$4 sm:$0xff]   ;;  %18741 = vst [vmem:[#allocation101_spill] sm:$0xff] %v16421_v40  ;;  %v16429_v26 = vld [vmem:[#allocation5] ss:$16 sps:$4 sm:$0xff]  }
 0xab2   :  { %4848 = vmatpush1.bf16.msra.mxu1 %v13444_v48  ;;  %4879 = vmatprep.mubr.bf16.mxu1 %v18403_v11  ;;  %18743 = vst [vmem:[#allocation60_spill] sm:$0xff] %v16429_v26  ;;  %v14235_v48 = vld [vmem:[#allocation4 + $0xec] ss:$16 sps:$4 sm:$0xff]  }
 0xab3   :  { %4849 = vmatprep.subr.bf16.mxu1 %v13452_v14 }
 0xab4   :  { %4809 = vmatpush1.bf16.msra.mxu0 %v13441_v55  ;;  %v14234_v55 = vld [vmem:[#allocation4 + $0xe4] ss:$16 sps:$4 sm:$0xff]  }
 0xab5   :  { %4810 = vmatprep.subr.bf16.mxu0 %v13449_v35  ;;  %v18745_v35 = vld [vmem:[#allocation95_spill] sm:$0xff] }
 0xab6   :  { %4850 = vmatpush1.bf16.msra.mxu1 %v13450_v38  ;;  %v4274_v14 = vunpack.c.l.bf16 %v18745_v35 }
 0xab7   :  { %4851 = vmatprep.subr.bf16.mxu1 %v16275_v28 }
 0xab8   :  { %4811 = vmatpush1.bf16.msra.mxu0 %v13447_v29  ;;  %v4275_v29 = vunpack.c.h.bf16 %v18745_v35 }
 0xab9   :  { %4812 = vmatprep.subr.bf16.mxu0 %v16273_v8 }
 0xaba   :  { %4852 = vmatpush1.bf16.msra.mxu1 %v16279_v17 }
 0xabb   :  { %4853 = vmatprep.subr.bf16.mxu1 %v16287_v15 }
 0xabc   :  { %4813 = vmatpush1.bf16.msra.mxu0 %v16277_v49 }
 0xabd   :  { %4814 = vmatprep.subr.bf16.mxu0 %v16285_v45 }
 0xabe   :  { %4854 = vmatpush1.bf16.msra.mxu1 %v16291_v27 }
 0xabf   :  { %4855 = vmatprep.subr.bf16.mxu1 %v16299_v18 }
 0xac0   :  { %4815 = vmatpush1.bf16.msra.mxu0 %v16289_v4 }
 0xac1   :  { %4816 = vmatprep.subr.bf16.mxu0 %v16297_v6 }
 0xac2   :  { %4856 = vmatpush1.bf16.msra.mxu1 %v16303_v1 }
 0xac3   :  { %4857 = vmatprep.subr.bf16.mxu1 %v16311_v16 }
 0xac4   :  { %4817 = vmatpush1.bf16.msra.mxu0 %v16301_v61 }
 0xac5   :  { %4818 = vmatprep.subr.bf16.mxu0 %v16309_v23 }
 0xac6   :  { %4858 = vmatpush1.bf16.msra.mxu1 %v16315_v43 }
 0xac7   :  { %4859 = vmatprep.subr.bf16.mxu1 %v16323_v37 }
 0xac8   :  { %4819 = vmatpush1.bf16.msra.mxu0 %v16313_v53 }
 0xac9   :  { %4820 = vmatprep.subr.bf16.mxu0 %v16321_v54 }
 0xaca   :  { %4860 = vmatpush1.bf16.msra.mxu1 %v16327_v5 }
 0xacb   :  { %4861 = vmatprep.subr.bf16.mxu1 %v16335_v46 }
 0xacc   :  { %4821 = vmatpush1.bf16.msra.mxu0 %v16325_v52 }
 0xacd   :  { %5048 = vmatprep.subr.bf16.mxu0 %v16342_v22 }
 0xace   :  { %4862 = vmatpush1.bf16.msra.mxu1 %v16337_v59 }
 0xacf   :  { %4839 = vmatmul.mubr.bf16.vlgmr.msra.gmra.mxu0 %v4613_v32  ;;  %5089 = vmatprep.subr.bf16.mxu1 %v16344_v34 }
 0xad0   :  { %5080 = vmatprep.mubr.bf16.mxu0 %v18403_v11  ;;  %5049 = vmatpush1.bf16.msra.mxu0 %v16346_v50 }
 0xad1   :  { %4880 = vmatmul.mubr.bf16.vlgmr.msra.gmra.mxu1 %v4613_v32  ;;  %5050 = vmatprep.subr.bf16.mxu0 %v16354_v31 }
 0xad2   :  { %5090 = vmatpush1.bf16.msra.mxu1 %v16348_v13  ;;  %5121 = vmatprep.mubr.bf16.mxu1 %v18403_v11 }
 0xad3   :  { %5091 = vmatprep.subr.bf16.mxu1 %v16356_v20 }
 0xad4   :  { %5051 = vmatpush1.bf16.msra.mxu0 %v16359_v2 }
 0xad5   :  { %5052 = vmatprep.subr.bf16.mxu0 %v16367_v7 }
 0xad6   :  { %5092 = vmatpush1.bf16.msra.mxu1 %v16361_v36 }
 0xad7   :  { %5093 = vmatprep.subr.bf16.mxu1 %v16369_v51 }
 0xad8   :  { %5053 = vmatpush1.bf16.msra.mxu0 %v16371_v56 }
 0xad9   :  { %5054 = vmatprep.subr.bf16.mxu0 %v16379_v33 }
 0xada   :  { %5094 = vmatpush1.bf16.msra.mxu1 %v16373_v41 }
 0xadb   :  { %5095 = vmatprep.subr.bf16.mxu1 %v16381_v57 }
 0xadc   :  { %5055 = vmatpush1.bf16.msra.mxu0 %v16383_v63 }
 0xadd   :  { %5056 = vmatprep.subr.bf16.mxu0 %v16391_v24 }
 0xade   :  { %5096 = vmatpush1.bf16.msra.mxu1 %v16385_v9 }
 0xadf   :  { %5097 = vmatprep.subr.bf16.mxu1 %v16393_v62 }
 0xae0   :  { %5057 = vmatpush1.bf16.msra.mxu0 %v16395_v39 }
 0xae1   :  { %5058 = vmatprep.subr.bf16.mxu0 %v16401_v47 }
 0xae2   :  { %5098 = vmatpush1.bf16.msra.mxu1 %v16397_v3 }
 0xae3   :  { %5099 = vmatprep.subr.bf16.mxu1 %v16403_v21 }
 0xae4   :  { %5059 = vmatpush1.bf16.msra.mxu0 %v16406_v60 }
 0xae5   :  { %5060 = vmatprep.subr.bf16.mxu0 %v16412_v44 }
 0xae6   :  { %5100 = vmatpush1.bf16.msra.mxu1 %v16410_v12  ;;  %v18746_v12 = vld [vmem:[#allocation110_spill] sm:$0xff] }
 0xae7   :  { %5101 = vmatprep.subr.bf16.mxu1 %v16417_v0 }
 0xae8   :  { %5061 = vmatpush1.bf16.msra.mxu0 %v16415_v42 }
 0xae9   :  { %5062 = vmatprep.subr.bf16.mxu0 %v16421_v40 }
 0xaea   :  { %5102 = vmatpush1.bf16.msra.mxu1 %v16419_v19 }
 0xaeb   :  { %5103 = vmatprep.subr.bf16.mxu1 %v16424_v10 }
 0xaec   :  { %5063 = vmatpush1.bf16.msra.mxu0 %v16429_v26 }
 0xaed   :  { %5379 = vmatprep.subr.bf16.mxu0 %v14234_v55  ;;  %v4277_v55 = vunpack.c.h.bf16 %v18746_v12 }
 0xaee   :  { %5104 = vmatpush1.bf16.msra.mxu1 %v16431_v30 }
 0xaef   :  { %5420 = vmatprep.subr.bf16.mxu1 %v14235_v48  ;;  %v4276_v48 = vunpack.c.l.bf16 %v18746_v12 }
 0xb6f   :  { %v4504_v38 = vpop.f32.mrf.mxu0 }
 0xb70   :  { %v4552_v32 = vadd.f32 %v4504_v38, %v4274_v14 }
 0xb71   :  { %v4506_v42 = vpop.f32.mrf.mxu0  ;;  %v4545_v44 = vpop.f32.mrf.mxu1 }
 0xb72   :  { %v11898_v19 = vmul.f32 -1.442695, %v4552_v32  ;;  %v4553_v0 = vadd.f32 %v4506_v42, %v4275_v29  ;;  %v4554_v35 = vadd.f32 %v4545_v44, %v4276_v48  ;;  %v14236_v32 = vld [vmem:[#allocation4 + $0xe0] ss:$16 sps:$4 sm:$0xff]   ;;  %v14239_v48 = vld [vmem:[#allocation4 + $0xcc] ss:$16 sps:$4 sm:$0xff]  }
 0xb73   :  { %v4508_v40 = vpop.f32.mrf.mxu0  ;;  %v4547_v30 = vpop.f32.mrf.mxu1 }
 0xb74   :  { %13978 = vpow2.f32 %v11898_v19  ;;  %v11899_v10 = vmul.f32 -1.442695, %v4553_v0  ;;  %v4555_v47 = vadd.f32 %v4547_v30, %v4277_v55  ;;  %v14237_v55 = vld [vmem:[#allocation4 + $0xe8] ss:$16 sps:$4 sm:$0xff]  }
 0xb75   :  { %v4509_v26 = vpop.f32.mrf.mxu0  ;;  %v4549_v60 = vpop.f32.mrf.mxu1 }
 0xb76   :  { %13980 = vpow2.f32 %v11899_v10  ;;  %v11900_v3 = vmul.f32 -1.442695, %v4555_v47 }
 0xb77   :  { %v4550_v21 = vpop.f32.mrf.mxu1  ;;  %13982 = vtanh.f32 %v4554_v35  ;;  %v14240_v35 = vld [vmem:[#allocation4 + $0xc0] ss:$16 sps:$4 sm:$0xff]  }
 0xb78   :  { %13984 = vpow2.f32 %v11900_v3 }
 0xb81   :  { %v13979_v14 = vpop.eup %13978 }
 0xb82   :  { %v4559_v38 = vadd.f32 1.0, %v13979_v14  ;;  %v14241_v14 = vld [vmem:[#allocation4 + $0xc8] ss:$16 sps:$4 sm:$0xff]  }
 0xb83   :  { %v13981_v42 = vpop.eup %13980 }
 0xb84   :  { %13986 = vrcp.f32 %v4559_v38  ;;  %v4565_v0 = vadd.f32 1.0, %v13981_v42  ;;  %v13983_v19 = vpop.eup %13982  ;;  %v14242_v38 = vld [vmem:[#allocation4 + $0xa4] ss:$16 sps:$4 sm:$0xff]   ;;  %v14243_v42 = vld [vmem:[#allocation4 + $0xac] ss:$16 sps:$4 sm:$0xff]  }
 0xb85   :  { %v13985_v40 = vpop.eup %13984 }
 0xb86   :  { %13988 = vrcp.f32 %v4565_v0  ;;  %v4572_v29 = vadd.f32 1.0, %v13985_v40  ;;  %v14244_v0 = vld [vmem:[#allocation4 + $0xa0] ss:$16 sps:$4 sm:$0xff]   ;;  %v14246_v40 = vld [vmem:[#allocation4 + $0x84] ss:$16 sps:$4 sm:$0xff]  }
 0xb88   :  { %13990 = vrcp.f32 %v4572_v29  ;;  %v14249_v29 = vld [vmem:[#allocation4 + $0x88] ss:$16 sps:$4 sm:$0xff]  }
 0xb91   :  { %v13987_v10 = vpop.eup %13986 }
 0xb92   :  { %v4576_v12 = vmul.f32 %v13987_v10, %v13983_v19  ;;  %v14245_v19 = vld [vmem:[#allocation4 + $0xa8] ss:$16 sps:$4 sm:$0xff]   ;;  %v14247_v10 = vld [vmem:[#allocation4 + $0x8c] ss:$16 sps:$4 sm:$0xff]  }
 0xb93   :  { %v13989_v26 = vpop.eup %13988 }
 0xb94   :  { %v4575_v60 = vmul.f32 %v13989_v26, %v16230_v58  ;;  %v14238_v58 = vld [vmem:[#allocation4 + $0xc4] ss:$16 sps:$4 sm:$0xff]   ;;  %v14248_v26 = vld [vmem:[#allocation4 + $0x80] ss:$16 sps:$4 sm:$0xff]  }
 0xb95   :  { %v13991_v47 = vpop.eup %13990 }
 0xb96   :  { %v16444_v21 = vadd.f32 %v4576_v12, %v4575_v60  ;;  %v14250_v60 = vld [vmem:[#allocation4 + $0x64] ss:$16 sps:$4 sm:$0xff]   ;;  %v14251_v12 = vld [vmem:[#allocation4 + $0x6c] ss:$16 sps:$4 sm:$0xff]  }
 0xb98   :  { %13992 = vtanh.f32 %v16444_v21 }
 0xba5   :  { %v13993_v44 = vpop.eup %13992 }
 0xba6   :  { %v4579_v30 = vmul.f32 %v13993_v44, %v13991_v47  ;;  %v14252_v47 = vld [vmem:[#allocation4 + $0x60] ss:$16 sps:$4 sm:$0xff]   ;;  %v14253_v44 = vld [vmem:[#allocation4 + $0x68] ss:$16 sps:$4 sm:$0xff]  }
 0xba8   :  { %v16447_v3 = vpack.c.bf16 %v4579_v30, %v4579_v30  ;;  %v14254_v30 = vld [vmem:[#allocation4 + $0x44] ss:$16 sps:$4 sm:$0xff]  }
 0xbaa   :  { %5081 = vmatmul.mubr.bf16.vlgmr.msra.gmra.mxu0 %v16447_v3  ;;  %5122 = vmatmul.mubr.bf16.vlgmr.msra.gmra.mxu1 %v16447_v3 }
 0xbab   :  { %5380 = vmatpush1.bf16.msra.mxu0 %v14236_v32  ;;  %5421 = vmatpush1.bf16.msra.mxu1 %v14237_v55  ;;  %v14255_v32 = vld [vmem:[#allocation4 + $0x4c] ss:$16 sps:$4 sm:$0xff]   ;;  %v14256_v55 = vld [vmem:[#allocation4 + $0x40] ss:$16 sps:$4 sm:$0xff]  }
 0xbac   :  { %5381 = vmatprep.subr.bf16.mxu0 %v14238_v58  ;;  %5422 = vmatprep.subr.bf16.mxu1 %v14239_v48  ;;  %v14257_v58 = vld [vmem:[#allocation4 + $0x48] ss:$16 sps:$4 sm:$0xff]   ;;  %v14258_v48 = vld [vmem:[#allocation4 + $0x24] ss:$16 sps:$4 sm:$0xff]  }
 0xbad   :  { %5411 = vmatprep.mubr.bf16.mxu0 %v18403_v11  ;;  %5452 = vmatprep.mubr.bf16.mxu1 %v18403_v11 }
 0xbaf   :  { %5382 = vmatpush1.bf16.msra.mxu0 %v14240_v35  ;;  %5423 = vmatpush1.bf16.msra.mxu1 %v14241_v14  ;;  %v14259_v35 = vld [vmem:[#allocation4 + $0x2c] ss:$16 sps:$4 sm:$0xff]   ;;  %v14260_v14 = vld [vmem:[#allocation4 + $0x20] ss:$16 sps:$4 sm:$0xff]  }
 0xbb0   :  { %5383 = vmatprep.subr.bf16.mxu0 %v14242_v38  ;;  %5424 = vmatprep.subr.bf16.mxu1 %v14243_v42  ;;  %v14261_v38 = vld [vmem:[#allocation4 + $0x28] ss:$16 sps:$4 sm:$0xff]   ;;  %v14262_v42 = vld [vmem:[#allocation4 + $0x4] ss:$16 sps:$4 sm:$0xff]  }
 0xbb3   :  { %5384 = vmatpush1.bf16.msra.mxu0 %v14244_v0  ;;  %5425 = vmatpush1.bf16.msra.mxu1 %v14245_v19  ;;  %v14263_v0 = vld [vmem:[#allocation4 + $0xc] ss:$16 sps:$4 sm:$0xff]   ;;  %v16453_v19 = vpop.f32.mrf.mxu0 }
 0xbb4   :  { %5385 = vmatprep.subr.bf16.mxu0 %v14246_v40  ;;  %5426 = vmatprep.subr.bf16.mxu1 %v14247_v10  ;;  %v14264_v40 = vld [vmem:[#allocation4] ss:$16 sps:$4 sm:$0xff]   ;;  %v14265_v10 = vld [vmem:[#allocation4 + $0x8] ss:$16 sps:$4 sm:$0xff]  }
 0xbb7   :  { %5386 = vmatpush1.bf16.msra.mxu0 %v14248_v26  ;;  %5427 = vmatpush1.bf16.msra.mxu1 %v14249_v29  ;;  %v16455_v26 = vpop.f32.mrf.mxu0  ;;  %v14266_v29 = vld [vmem:[#allocation6 + $0xe4] ss:$16 sps:$4 sm:$0xff]  }
 0xbb8   :  { %5387 = vmatprep.subr.bf16.mxu0 %v14250_v60  ;;  %5428 = vmatprep.subr.bf16.mxu1 %v14251_v12  ;;  %v14267_v60 = vld [vmem:[#allocation6 + $0xec] ss:$16 sps:$4 sm:$0xff]  }
 0xbb9   :  { %v4844_v12 = vpop.f32.mrf.mxu0 }
 0xbbb   :  { %5388 = vmatpush1.bf16.msra.mxu0 %v14252_v47  ;;  %5429 = vmatpush1.bf16.msra.mxu1 %v14253_v44  ;;  %v16459_v47 = vpop.f32.mrf.mxu1  ;;  %v4845_v44 = vpop.f32.mrf.mxu0 }
 0xbbc   :  { %5389 = vmatprep.subr.bf16.mxu0 %v14254_v30  ;;  %5430 = vmatprep.subr.bf16.mxu1 %v14255_v32  ;;  %v14268_v30 = vld [vmem:[#allocation6 + $0xe0] ss:$16 sps:$4 sm:$0xff]   ;;  %v14269_v32 = vld [vmem:[#allocation6 + $0xe8] ss:$16 sps:$4 sm:$0xff]  }
 0xbbf   :  { %5390 = vmatpush1.bf16.msra.mxu0 %v14256_v55  ;;  %5431 = vmatpush1.bf16.msra.mxu1 %v14257_v58  ;;  %v4883_v55 = vpop.f32.mrf.mxu1  ;;  %v14270_v58 = vld [vmem:[#allocation6 + $0xc4] ss:$16 sps:$4 sm:$0xff]  }
 0xbc0   :  { %5391 = vmatprep.subr.bf16.mxu0 %v14258_v48  ;;  %5432 = vmatprep.subr.bf16.mxu1 %v14259_v35  ;;  %v14271_v48 = vld [vmem:[#allocation6 + $0xcc] ss:$16 sps:$4 sm:$0xff]  }
 0xbc1   :  { %v4885_v35 = vpop.f32.mrf.mxu1 }
 0xbc3   :  { %5392 = vmatpush1.bf16.msra.mxu0 %v14260_v14  ;;  %5433 = vmatpush1.bf16.msra.mxu1 %v14261_v38  ;;  %v14272_v14 = vld [vmem:[#allocation6 + $0xc0] ss:$16 sps:$4 sm:$0xff]   ;;  %v4886_v38 = vpop.f32.mrf.mxu1 }
 0xbc4   :  { %5393 = vmatprep.subr.bf16.mxu0 %v14262_v42  ;;  %5434 = vmatprep.subr.bf16.mxu1 %v14263_v0  ;;  %v14274_v42 = vld [vmem:[#allocation6 + $0xa4] ss:$16 sps:$4 sm:$0xff]   ;;  %v14275_v0 = vld [vmem:[#allocation6 + $0xa0] ss:$16 sps:$4 sm:$0xff]  }
 0xbc7   :  { %5394 = vmatpush1.bf16.msra.mxu0 %v14264_v40  ;;  %5435 = vmatpush1.bf16.msra.mxu1 %v14265_v10 }
 0xbc8   :  { %5714 = vmatprep.subr.bf16.mxu0 %v14266_v29  ;;  %5755 = vmatprep.subr.bf16.mxu1 %v14267_v60 }
 0xbca   :  { %5412 = vmatmul.mubr.bf16.vlgmr.msra.gmra.mxu0 %v16447_v3  ;;  %5453 = vmatmul.mubr.bf16.vlgmr.msra.gmra.mxu1 %v16447_v3  ;;  %v14273_v3 = vld [vmem:[#allocation6 + $0xc8] ss:$16 sps:$4 sm:$0xff]  }
 0xbcb   :  { %5715 = vmatpush1.bf16.msra.mxu0 %v14268_v30  ;;  %5756 = vmatpush1.bf16.msra.mxu1 %v14269_v32  ;;  %v18752_v30 = vld [vmem:[#allocation79_spill] sm:$0xff] }
 0xbcc   :  { %5716 = vmatprep.subr.bf16.mxu0 %v14270_v58  ;;  %5757 = vmatprep.subr.bf16.mxu1 %v14271_v48  ;;  %v5183_v32 = vunpack.c.l.bf16 %v18752_v30 }
 0xbcd   :  { %5746 = vmatprep.mubr.bf16.mxu0 %v18403_v11  ;;  %5787 = vmatprep.mubr.bf16.mxu1 %v18403_v11 }
 0xbcf   :  { %5717 = vmatpush1.bf16.msra.mxu0 %v14272_v14  ;;  %5758 = vmatpush1.bf16.msra.mxu1 %v14273_v3 }
 0xbd0   :  { %5718 = vmatprep.subr.bf16.mxu0 %v14274_v42  ;;  %5759 = vmatprep.subr.bf16.mxu1 %v16275_v28  ;;  %v18748_v28 = vld [vmem:[#allocation32_spill] sm:$0xff] }
 0xbd3   :  { %5719 = vmatpush1.bf16.msra.mxu0 %v14275_v0  ;;  %5760 = vmatpush1.bf16.msra.mxu1 %v16279_v17 }
 0xbd4   :  { %5720 = vmatprep.subr.bf16.mxu0 %v16273_v8  ;;  %5761 = vmatprep.subr.bf16.mxu1 %v16287_v15  ;;  %v18747_v8 = vld [vmem:[#allocation68_spill] sm:$0xff] }
 0xbd7   :  { %5721 = vmatpush1.bf16.msra.mxu0 %v16277_v49  ;;  %5762 = vmatpush1.bf16.msra.mxu1 %v16291_v27  ;;  %v16489_v49 = vrot.slane %v18748_v28, %v18747_v8 }
 0xbd8   :  { %5722 = vmatprep.subr.bf16.mxu0 %v16285_v45  ;;  %5763 = vmatprep.subr.bf16.mxu1 %v16299_v18 }
 0xbdb   :  { %5723 = vmatpush1.bf16.msra.mxu0 %v16289_v4  ;;  %5764 = vmatpush1.bf16.msra.mxu1 %v16303_v1  ;;  %v18749_v4 = vld [vmem:[#allocation69_spill] sm:$0xff] }
 0xbdc   :  { %5724 = vmatprep.subr.bf16.mxu0 %v16297_v6  ;;  %5765 = vmatprep.subr.bf16.mxu1 %v16311_v16  ;;  %v16494_v27 = vrot.slane %v18748_v28, %v18749_v4 }
 0xbdf   :  { %5725 = vmatpush1.bf16.msra.mxu0 %v16301_v61  ;;  %5766 = vmatpush1.bf16.msra.mxu1 %v16315_v43 }
 0xbe0   :  { %5726 = vmatprep.subr.bf16.mxu0 %v16309_v23  ;;  %5767 = vmatprep.subr.bf16.mxu1 %v16323_v37 }
 0xbe3   :  { %5727 = vmatpush1.bf16.msra.mxu0 %v16313_v53  ;;  %5768 = vmatpush1.bf16.msra.mxu1 %v16327_v5 }
 0xbe4   :  { %5728 = vmatprep.subr.bf16.mxu0 %v16321_v54  ;;  %5769 = vmatprep.subr.bf16.mxu1 %v16335_v46  ;;  %v18750_v46 = vld [vmem:[#allocation94_spill] sm:$0xff] }
 0xbe7   :  { %5729 = vmatpush1.bf16.msra.mxu0 %v16325_v52  ;;  %5770 = vmatpush1.bf16.msra.mxu1 %v16337_v59  ;;  %v16501_v59 = vrot.slane %v18748_v28, %v18750_v46 }
 0xbe8   :  { %5956 = vmatprep.subr.bf16.mxu0 %v16342_v22  ;;  %5997 = vmatprep.subr.bf16.mxu1 %v16344_v34 }
 0xc6a   :  { %v5082_v17 = vpop.f32.mrf.mxu0  ;;  %v5123_v45 = vpop.f32.mrf.mxu1 }
 0xc6b   :  { %v5083_v15 = vadd.f32 %v5082_v17, %v16453_v19  ;;  %v5124_v34 = vadd.f32 %v5123_v45, %v16459_v47  ;;  %v18751_v19 = vld [vmem:[#allocation92_spill] sm:$0xff] }
 0xc6c   :  { %v5084_v6 = vpop.f32.mrf.mxu0  ;;  %v5125_v18 = vpop.f32.mrf.mxu1  ;;  %v16507_v40 = vrot.slane %v18748_v28, %v18751_v19 }
 0xc6d   :  { %v5151_v61 = vadd.f32 %v16489_v49, %v5083_v15  ;;  %v5085_v1 = vadd.f32 %v5084_v6, %v16455_v26  ;;  %v5126_v5 = vadd.f32 %v5125_v18, %v4883_v55  ;;  %v5184_v55 = vunpack.c.h.bf16 %v18752_v30  ;;  %v16552_v30 = vld [vmem:[#allocation4 + $0xe4] ss:$16 sps:$4 sm:$0xff]  }
 0xc6e   :  { %v5086_v23 = vpop.f32.mrf.mxu0  ;;  %v5127_v16 = vpop.f32.mrf.mxu1  ;;  %v5153_v29 = vadd.f32 %v16507_v40, %v5124_v34 }
 0xc6f   :  { %v11965_v53 = vmul.f32 -1.442695, %v5151_v61  ;;  %v5152_v43 = vadd.f32 %v16494_v27, %v5085_v1  ;;  %v5154_v22 = vadd.f32 %v16501_v59, %v5126_v5  ;;  %v18753_v23 = vld [vmem:[#allocation103_spill] sm:$0xff] }
 0xc70   :  { %v5087_v54 = vpop.f32.mrf.mxu0  ;;  %v5128_v37 = vpop.f32.mrf.mxu1  ;;  %v5186_v16 = vunpack.c.h.bf16 %v18753_v23 }
 0xc71   :  { %13994 = vpow2.f32 %v11965_v53  ;;  %v11966_v52 = vmul.f32 -1.442695, %v5152_v43  ;;  %v11967_v10 = vmul.f32 -1.442695, %v5154_v22  ;;  %v5185_v54 = vunpack.c.l.bf16 %v18753_v23  ;;  %v16614_v23 = vld [vmem:[#allocation4 + $0x68] ss:$16 sps:$4 sm:$0xff]  }
 0xc73   :  { %13996 = vpow2.f32 %v11966_v52 }
 0xc74   :  { %13998 = vpow2.f32 %v11967_v10 }
 0xc7e   :  { %v13995_v26 = vpop.eup %13994 }
 0xc7f   :  { %v5158_v60 = vadd.f32 1.0, %v13995_v26 }
 0xc80   :  { %v13997_v12 = vpop.eup %13996 }
 0xc81   :  { %14000 = vrcp.f32 %v5158_v60  ;;  %v5164_v44 = vadd.f32 1.0, %v13997_v12  ;;  %v13999_v3 = vpop.eup %13998 }
 0xc82   :  { %14002 = vtanh.f32 %v5153_v29  ;;  %v5171_v4 = vadd.f32 1.0, %v13999_v3  ;;  %v16568_v3 = vld [vmem:[#allocation4 + $0xcc] ss:$16 sps:$4 sm:$0xff]  }
 0xc83   :  { %14004 = vrcp.f32 %v5164_v44 }
 0xc8a   :  { %v5413_v47 = vpop.f32.mrf.mxu0  ;;  %v5454_v58 = vpop.f32.mrf.mxu1 }
 0xc8b   :  { %v5461_v48 = vadd.f32 %v5413_v47, %v5183_v32  ;;  %v5463_v5 = vadd.f32 %v5454_v58, %v5185_v54  ;;  %v16554_v32 = vld [vmem:[#allocation4 + $0xec] ss:$16 sps:$4 sm:$0xff]   ;;  %v16558_v58 = vld [vmem:[#allocation4 + $0xe0] ss:$16 sps:$4 sm:$0xff]  }
 0xc8c   :  { %v5415_v35 = vpop.f32.mrf.mxu0  ;;  %v5456_v14 = vpop.f32.mrf.mxu1  ;;  %v18766_v47 = vld [vmem:[#allocation61_spill] sm:$0xff]  ;;  %v16624_v54 = vld [vmem:[#allocation4 + $0x40] ss:$16 sps:$4 sm:$0xff]  }
 0xc8d   :  { %v12000_v38 = vmul.f32 -1.442695, %v5461_v48  ;;  %v5462_v42 = vadd.f32 %v5415_v35, %v5184_v55  ;;  %v5464_v43 = vadd.f32 %v5456_v14, %v5186_v16  ;;  %v18765_v55 = vld [vmem:[#allocation60_spill] sm:$0xff]  ;;  %v16560_v48 = vld [vmem:[#allocation4 + $0xe8] ss:$16 sps:$4 sm:$0xff]  }
 0xc8e   :  { %v14001_v0 = vpop.eup %14000  ;;  %v5417_v8 = vpop.f32.mrf.mxu0  ;;  %v16566_v14 = vld [vmem:[#allocation4 + $0xc4] ss:$16 sps:$4 sm:$0xff]  }
 0xc8f   :  { %v5458_v28 = vpop.f32.mrf.mxu1  ;;  %v14003_v17 = vpop.eup %14002  ;;  %14006 = vpow2.f32 %v12000_v38  ;;  %v12001_v45 = vmul.f32 -1.442695, %v5462_v42  ;;  %v12002_v37 = vmul.f32 -1.442695, %v5464_v43  ;;  %v16574_v38 = vld [vmem:[#allocation4 + $0xc0] ss:$16 sps:$4 sm:$0xff]  }
 0xc90   :  { %v14005_v15 = vpop.eup %14004  ;;  %v5418_v6 = vpop.f32.mrf.mxu0  ;;  %v5175_v1 = vmul.f32 %v14003_v17, %v14001_v0  ;;  %v16576_v42 = vld [vmem:[#allocation4 + $0xc8] ss:$16 sps:$4 sm:$0xff]   ;;  %v16580_v0 = vld [vmem:[#allocation4 + $0xa4] ss:$16 sps:$4 sm:$0xff]   ;;  %v16582_v8 = vld [vmem:[#allocation4 + $0xac] ss:$16 sps:$4 sm:$0xff]  }
 0xc91   :  { %v5459_v18 = vpop.f32.mrf.mxu1  ;;  %v5174_v61 = vmul.f32 %v14005_v15, %v16262_v25  ;;  %14008 = vpow2.f32 %v12001_v45  ;;  %v16588_v28 = vld [vmem:[#allocation4 + $0xa0] ss:$16 sps:$4 sm:$0xff]   ;;  %v16590_v17 = vld [vmem:[#allocation4 + $0xa8] ss:$16 sps:$4 sm:$0xff]   ;;  %v16594_v45 = vld [vmem:[#allocation4 + $0x84] ss:$16 sps:$4 sm:$0xff]  }
 0xc92   :  { %14010 = vrcp.f32 %v5171_v4  ;;  %v16596_v15 = vld [vmem:[#allocation4 + $0x8c] ss:$16 sps:$4 sm:$0xff]   ;;  %v16600_v4 = vld [vmem:[#allocation4 + $0x80] ss:$16 sps:$4 sm:$0xff]   ;;  %v16602_v6 = vld [vmem:[#allocation4 + $0x88] ss:$16 sps:$4 sm:$0xff]  }
 0xc93   :  { %v16514_v53 = vadd.f32 %v5175_v1, %v5174_v61  ;;  %v16606_v18 = vld [vmem:[#allocation4 + $0x64] ss:$16 sps:$4 sm:$0xff]   ;;  %v16608_v61 = vld [vmem:[#allocation4 + $0x6c] ss:$16 sps:$4 sm:$0xff]   ;;  %v16612_v1 = vld [vmem:[#allocation4 + $0x60] ss:$16 sps:$4 sm:$0xff]  }
 0xc94   :  { %v16618_v16 = vld [vmem:[#allocation4 + $0x44] ss:$16 sps:$4 sm:$0xff]   ;;  %v16620_v43 = vld [vmem:[#allocation4 + $0x4c] ss:$16 sps:$4 sm:$0xff]  }
 0xc95   :  { %14012 = vtanh.f32 %v16514_v53 }
 0xc96   :  { %14014 = vpow2.f32 %v12002_v37  ;;  %v16626_v37 = vld [vmem:[#allocation4 + $0x48] ss:$16 sps:$4 sm:$0xff]  }
 0xc9c   :  { %v14007_v52 = vpop.eup %14006 }
 0xc9d   :  { %v5468_v46 = vadd.f32 1.0, %v14007_v52  ;;  %v16630_v52 = vld [vmem:[#allocation4 + $0x24] ss:$16 sps:$4 sm:$0xff]  }
 0xc9e   :  { %v14009_v22 = vpop.eup %14008 }
 0xc9f   :  { %14016 = vrcp.f32 %v5468_v46  ;;  %v5474_v25 = vadd.f32 1.0, %v14009_v22  ;;  %v14011_v34 = vpop.eup %14010  ;;  %v16636_v46 = vld [vmem:[#allocation4 + $0x20] ss:$16 sps:$4 sm:$0xff]   ;;  %v16638_v22 = vld [vmem:[#allocation4 + $0x28] ss:$16 sps:$4 sm:$0xff]  }
 0xca0   :  { %14018 = vtanh.f32 %v5463_v5  ;;  %v16632_v5 = vld [vmem:[#allocation4 + $0x2c] ss:$16 sps:$4 sm:$0xff]  }
 0xca1   :  { %14020 = vrcp.f32 %v5474_v25  ;;  %v16642_v25 = vld [vmem:[#allocation4 + $0x4] ss:$16 sps:$4 sm:$0xff]  }
 0xca2   :  { %v14013_v19 = vpop.eup %14012 }
 0xca3   :  { %v5178_v10 = vmul.f32 %v14013_v19, %v14011_v34  ;;  %v14015_v29 = vpop.eup %14014  ;;  %v16644_v34 = vld [vmem:[#allocation4 + $0xc] ss:$16 sps:$4 sm:$0xff]   ;;  %v16648_v19 = vld [vmem:[#allocation4] ss:$16 sps:$4 sm:$0xff]  }
 0xca5   :  { %v5179_v26 = vpack.c.bf16 %v5178_v10, %v5178_v10  ;;  %v16650_v10 = vld [vmem:[#allocation4 + $0x8] ss:$16 sps:$4 sm:$0xff]  }
 0xca7   :  { %5180 = vst [vmem:[#allocation3] sm:$0xf] %v5179_v26  ;;  %5747 = vmatmul.mubr.bf16.vlgmr.msra.gmra.mxu0 %v5179_v26  ;;  %5788 = vmatmul.mubr.bf16.vlgmr.msra.gmra.mxu1 %v5179_v26  ;;  %v16660_v26 = vld [vmem:[#allocation6 + $0xe4] ss:$16 sps:$4 sm:$0xff]  }
 0xca8   :  { %5957 = vmatpush1.bf16.msra.mxu0 %v16346_v50  ;;  %5998 = vmatpush1.bf16.msra.mxu1 %v16348_v13  ;;  %v5481_v13 = vadd.f32 1.0, %v14015_v29  ;;  %v16662_v29 = vld [vmem:[#allocation6 + $0xec] ss:$16 sps:$4 sm:$0xff]  }
 0xca9   :  { %5958 = vmatprep.subr.bf16.mxu0 %v16354_v31  ;;  %5999 = vmatprep.subr.bf16.mxu1 %v16356_v20 }
 0xcaa   :  { %5988 = vmatprep.mubr.bf16.mxu0 %v18403_v11  ;;  %6029 = vmatprep.mubr.bf16.mxu1 %v18403_v11  ;;  %14022 = vrcp.f32 %v5481_v13  ;;  %v16674_v13 = vld [vmem:[#allocation6 + $0xcc] ss:$16 sps:$4 sm:$0xff]  }
 0xcab   :  { %18769 = vst [vmem:[#allocation64_spill] sm:$0xff] %v16674_v13 }
 0xcac   :  { %v14017_v60 = vpop.eup %14016  ;;  %5959 = vmatpush1.bf16.msra.mxu0 %v16359_v2  ;;  %6000 = vmatpush1.bf16.msra.mxu1 %v16361_v36  ;;  %v18754_v2 = vld [vmem:[#allocation65_spill] sm:$0xff]  ;;  %v18755_v36 = vld [vmem:[#allocation66_spill] sm:$0xff] }
 0xcad   :  { %v14019_v12 = vpop.eup %14018  ;;  %5960 = vmatprep.subr.bf16.mxu0 %v16367_v7  ;;  %6001 = vmatprep.subr.bf16.mxu1 %v16369_v51  ;;  %v18756_v7 = vld [vmem:[#allocation67_spill] sm:$0xff]  ;;  %v18757_v51 = vld [vmem:[#allocation70_spill] sm:$0xff] }
 0xcae   :  { %v14021_v50 = vpop.eup %14020  ;;  %v5485_v31 = vmul.f32 %v14019_v12, %v14017_v60  ;;  %v16664_v60 = vld [vmem:[#allocation6 + $0xe0] ss:$16 sps:$4 sm:$0xff]   ;;  %v16666_v12 = vld [vmem:[#allocation6 + $0xe8] ss:$16 sps:$4 sm:$0xff]  }
 0xcaf   :  { %v5484_v20 = vmul.f32 %v14021_v50, %v16444_v21  ;;  %18767 = vst [vmem:[#allocation62_spill] sm:$0xff] %v16666_v12  ;;  %v16672_v50 = vld [vmem:[#allocation6 + $0xc4] ss:$16 sps:$4 sm:$0xff]  }
 0xcb0   :  { %5961 = vmatpush1.bf16.msra.mxu0 %v16371_v56  ;;  %6002 = vmatpush1.bf16.msra.mxu1 %v16373_v41  ;;  %v18758_v56 = vld [vmem:[#allocation71_spill] sm:$0xff]  ;;  %v18759_v41 = vld [vmem:[#allocation72_spill] sm:$0xff]  ;;  %18768 = vst [vmem:[#allocation63_spill] sm:$0xff] %v16672_v50 }
 0xcb1   :  { %v16531_v44 = vadd.f32 %v5485_v31, %v5484_v20  ;;  %5962 = vmatprep.subr.bf16.mxu0 %v16379_v33  ;;  %6003 = vmatprep.subr.bf16.mxu1 %v16381_v57  ;;  %v18760_v33 = vld [vmem:[#allocation100_spill] sm:$0xff]  ;;  %v16678_v20 = vld [vmem:[#allocation6 + $0xc8] ss:$16 sps:$4 sm:$0xff]  }
 0xcb2   :  { %v16676_v31 = vld [vmem:[#allocation6 + $0xc0] ss:$16 sps:$4 sm:$0xff]   ;;  %18771 = vst [vmem:[#allocation99_spill] sm:$0xff] %v16678_v20 }
 0xcb3   :  { %14024 = vtanh.f32 %v16531_v44  ;;  %18770 = vst [vmem:[#allocation86_spill] sm:$0xff] %v16676_v31 }
 0xcb4   :  { %5963 = vmatpush1.bf16.msra.mxu0 %v16383_v63  ;;  %6004 = vmatpush1.bf16.msra.mxu1 %v16385_v9  ;;  %v18761_v9 = vld [vmem:[#allocation88_spill] sm:$0xff] }
 0xcb5   :  { %5964 = vmatprep.subr.bf16.mxu0 %v16391_v24  ;;  %6005 = vmatprep.subr.bf16.mxu1 %v16393_v62  ;;  %v18762_v24 = vld [vmem:[#allocation90_spill] sm:$0xff]  ;;  %v18763_v62 = vld [vmem:[#allocation101_spill] sm:$0xff] }
 0xcb7   :  { %v14023_v57 = vpop.eup %14022 }
 0xcb8   :  { %5965 = vmatpush1.bf16.msra.mxu0 %v16395_v39  ;;  %6006 = vmatpush1.bf16.msra.mxu1 %v18754_v2  ;;  %v18764_v39 = vld [vmem:[#allocation59_spill] sm:$0xff]  ;;  %v16684_v2 = vld [vmem:[#allocation6 + $0xa4] ss:$16 sps:$4 sm:$0xff]  }
 0xcb9   :  { %5966 = vmatprep.subr.bf16.mxu0 %v18755_v36  ;;  %6007 = vmatprep.subr.bf16.mxu1 %v18756_v7  ;;  %18772 = vst [vmem:[#allocation82_spill] sm:$0xff] %v16684_v2  ;;  %v16686_v36 = vld [vmem:[#allocation6 + $0xac] ss:$16 sps:$4 sm:$0xff]   ;;  %v16688_v7 = vld [vmem:[#allocation6 + $0xa0] ss:$16 sps:$4 sm:$0xff]  }
 0xcba   :  { %18773 = vst [vmem:[#allocation97_spill] sm:$0xff] %v16686_v36  ;;  %18774 = vst [vmem:[#allocation84_spill] sm:$0xff] %v16688_v7 }
 0xcbc   :  { %5967 = vmatpush1.bf16.msra.mxu0 %v18757_v51  ;;  %6008 = vmatpush1.bf16.msra.mxu1 %v18758_v56  ;;  %v16690_v51 = vld [vmem:[#allocation6 + $0xa8] ss:$16 sps:$4 sm:$0xff]   ;;  %v16696_v56 = vld [vmem:[#allocation6 + $0x84] ss:$16 sps:$4 sm:$0xff]  }
 0xcbd   :  { %5968 = vmatprep.subr.bf16.mxu0 %v18759_v41  ;;  %6009 = vmatprep.subr.bf16.mxu1 %v18760_v33  ;;  %18775 = vst [vmem:[#allocation98_spill] sm:$0xff] %v16690_v51  ;;  %18776 = vst [vmem:[#allocation73_spill] sm:$0xff] %v16696_v56  ;;  %v16698_v41 = vld [vmem:[#allocation6 + $0x8c] ss:$16 sps:$4 sm:$0xff]   ;;  %v16700_v33 = vld [vmem:[#allocation6 + $0x80] ss:$16 sps:$4 sm:$0xff]  }
 0xcbe   :  { %18777 = vst [vmem:[#allocation74_spill] sm:$0xff] %v16698_v41  ;;  %18778 = vst [vmem:[#allocation75_spill] sm:$0xff] %v16700_v33 }
 0xcc0   :  { %v14025_v63 = vpop.eup %14024  ;;  %5969 = vmatpush1.bf16.msra.mxu0 %v18761_v9  ;;  %6010 = vmatpush1.bf16.msra.mxu1 %v18762_v24  ;;  %v16710_v9 = vld [vmem:[#allocation6 + $0x6c] ss:$16 sps:$4 sm:$0xff]   ;;  %v16712_v24 = vld [vmem:[#allocation6 + $0x60] ss:$16 sps:$4 sm:$0xff]  }
 0xcc1   :  { %5970 = vmatprep.subr.bf16.mxu0 %v18763_v62  ;;  %6011 = vmatprep.subr.bf16.mxu1 %v18764_v39  ;;  %v5488_v21 = vmul.f32 %v14025_v63, %v14023_v57  ;;  %v16702_v57 = vld [vmem:[#allocation6 + $0x88] ss:$16 sps:$4 sm:$0xff]   ;;  %v16708_v63 = vld [vmem:[#allocation6 + $0x64] ss:$16 sps:$4 sm:$0xff]   ;;  %18781 = vst [vmem:[#allocation78_spill] sm:$0xff] %v16710_v9  ;;  %18782 = vst [vmem:[#allocation33_spill] sm:$0xff] %v16712_v24 }
 0xcc2   :  { %18779 = vst [vmem:[#allocation76_spill] sm:$0xff] %v16702_v57  ;;  %18780 = vst [vmem:[#allocation77_spill] sm:$0xff] %v16708_v63  ;;  %v16714_v62 = vld [vmem:[#allocation6 + $0x68] ss:$16 sps:$4 sm:$0xff]   ;;  %v16720_v39 = vld [vmem:[#allocation6 + $0x44] ss:$16 sps:$4 sm:$0xff]  }
 0xcc3   :  { %v16562_v35 = vpack.c.bf16 %v5488_v21, %v5488_v21  ;;  %18783 = vst [vmem:[#allocation35_spill] sm:$0xff] %v16714_v62  ;;  %18784 = vst [vmem:[#allocation34_spill] sm:$0xff] %v16720_v39  ;;  %v16722_v21 = vld [vmem:[#allocation6 + $0x4c] ss:$16 sps:$4 sm:$0xff]  }
 0xcc4   :  { %5971 = vmatpush1.bf16.msra.mxu0 %v18765_v55  ;;  %6012 = vmatpush1.bf16.msra.mxu1 %v18766_v47  ;;  %18785 = vst [vmem:[#allocation37_spill] sm:$0xff] %v16722_v21  ;;  %v16724_v55 = vld [vmem:[#allocation6 + $0x40] ss:$16 sps:$4 sm:$0xff]   ;;  %v16726_v47 = vld [vmem:[#allocation6 + $0x48] ss:$16 sps:$4 sm:$0xff]  }
 0xcc5   :  { %6267 = vmatprep.subr.bf16.mxu0 %v16552_v30  ;;  %6308 = vmatprep.subr.bf16.mxu1 %v16554_v32  ;;  %18786 = vst [vmem:[#allocation36_spill] sm:$0xff] %v16724_v55  ;;  %18787 = vst [vmem:[#allocation39_spill] sm:$0xff] %v16726_v47 }
 0xcc7   :  { %5989 = vmatmul.mubr.bf16.vlgmr.msra.gmra.mxu0 %v16562_v35  ;;  %6030 = vmatmul.mubr.bf16.vlgmr.msra.gmra.mxu1 %v16562_v35 }
 0xcc8   :  { %6268 = vmatpush1.bf16.msra.mxu0 %v16558_v58  ;;  %6309 = vmatpush1.bf16.msra.mxu1 %v16560_v48 }
 0xcc9   :  { %6269 = vmatprep.subr.bf16.mxu0 %v16566_v14  ;;  %6310 = vmatprep.subr.bf16.mxu1 %v16568_v3 }
 0xcca   :  { %6299 = vmatprep.mubr.bf16.mxu0 %v18403_v11  ;;  %6340 = vmatprep.mubr.bf16.mxu1 %v18403_v11 }
 0xccc   :  { %6270 = vmatpush1.bf16.msra.mxu0 %v16574_v38  ;;  %6311 = vmatpush1.bf16.msra.mxu1 %v16576_v42 }
 0xccd   :  { %6271 = vmatprep.subr.bf16.mxu0 %v16580_v0  ;;  %6312 = vmatprep.subr.bf16.mxu1 %v16582_v8 }
 0xcd0   :  { %6272 = vmatpush1.bf16.msra.mxu0 %v16588_v28  ;;  %6313 = vmatpush1.bf16.msra.mxu1 %v16590_v17 }
 0xcd1   :  { %6273 = vmatprep.subr.bf16.mxu0 %v16594_v45  ;;  %6314 = vmatprep.subr.bf16.mxu1 %v16596_v15 }
 0xcd4   :  { %6274 = vmatpush1.bf16.msra.mxu0 %v16600_v4  ;;  %6315 = vmatpush1.bf16.msra.mxu1 %v16602_v6 }
 0xcd5   :  { %6275 = vmatprep.subr.bf16.mxu0 %v16606_v18  ;;  %6316 = vmatprep.subr.bf16.mxu1 %v16608_v61 }
 0xcd8   :  { %6276 = vmatpush1.bf16.msra.mxu0 %v16612_v1  ;;  %6317 = vmatpush1.bf16.msra.mxu1 %v16614_v23 }
 0xcd9   :  { %6277 = vmatprep.subr.bf16.mxu0 %v16618_v16  ;;  %6318 = vmatprep.subr.bf16.mxu1 %v16620_v43 }
 0xcdc   :  { %6278 = vmatpush1.bf16.msra.mxu0 %v16624_v54  ;;  %6319 = vmatpush1.bf16.msra.mxu1 %v16626_v37 }
 0xcdd   :  { %6279 = vmatprep.subr.bf16.mxu0 %v16630_v52  ;;  %6320 = vmatprep.subr.bf16.mxu1 %v16632_v5 }
 0xce0   :  { %6280 = vmatpush1.bf16.msra.mxu0 %v16636_v46  ;;  %6321 = vmatpush1.bf16.msra.mxu1 %v16638_v22 }
 0xce1   :  { %6281 = vmatprep.subr.bf16.mxu0 %v16642_v25  ;;  %6322 = vmatprep.subr.bf16.mxu1 %v16644_v34 }
 0xce4   :  { %6282 = vmatpush1.bf16.msra.mxu0 %v16648_v19  ;;  %6323 = vmatpush1.bf16.msra.mxu1 %v16650_v10 }
 0xce5   :  { %6602 = vmatprep.subr.bf16.mxu0 %v16660_v26  ;;  %6643 = vmatprep.subr.bf16.mxu1 %v16662_v29 }
 0xce7   :  { %6300 = vmatmul.mubr.bf16.vlgmr.msra.gmra.mxu0 %v16562_v35  ;;  %6341 = vmatmul.mubr.bf16.vlgmr.msra.gmra.mxu1 %v16562_v35  ;;  %v16732_v35 = vld [vmem:[#allocation6 + $0x24] ss:$16 sps:$4 sm:$0xff]  }
 0xce8   :  { %6634 = vmatprep.mubr.bf16.mxu0 %v18403_v11  ;;  %6675 = vmatprep.mubr.bf16.mxu1 %v18403_v11  ;;  %18788 = vst [vmem:[#allocation38_spill] sm:$0xff] %v16732_v35 }
 0xce9   :  { %6603 = vmatpush1.bf16.msra.mxu0 %v16664_v60  ;;  %6644 = vmatpush1.bf16.msra.mxu1 %v16666_v12 }
 0xcea   :  { %6604 = vmatprep.subr.bf16.mxu0 %v16672_v50  ;;  %6645 = vmatprep.subr.bf16.mxu1 %v16674_v13 }
 0xced   :  { %6605 = vmatpush1.bf16.msra.mxu0 %v16676_v31  ;;  %6646 = vmatpush1.bf16.msra.mxu1 %v16678_v20 }
 0xcee   :  { %6606 = vmatprep.subr.bf16.mxu0 %v16684_v2  ;;  %6647 = vmatprep.subr.bf16.mxu1 %v16686_v36 }
 0xcf1   :  { %6607 = vmatpush1.bf16.msra.mxu0 %v16688_v7  ;;  %6648 = vmatpush1.bf16.msra.mxu1 %v16690_v51 }
 0xcf2   :  { %6608 = vmatprep.subr.bf16.mxu0 %v16696_v56  ;;  %6649 = vmatprep.subr.bf16.mxu1 %v16698_v41 }
 0xcf5   :  { %6609 = vmatpush1.bf16.msra.mxu0 %v16700_v33  ;;  %6650 = vmatpush1.bf16.msra.mxu1 %v16702_v57 }
 0xcf6   :  { %6610 = vmatprep.subr.bf16.mxu0 %v16708_v63  ;;  %6651 = vmatprep.subr.bf16.mxu1 %v16710_v9  ;;  %v16738_v9 = vld [vmem:[#allocation6 + $0x28] ss:$16 sps:$4 sm:$0xff]  }
 0xcf7   :  { %18791 = vst [vmem:[#allocation43_spill] sm:$0xff] %v16738_v9 }
 0xcf9   :  { %6611 = vmatpush1.bf16.msra.mxu0 %v16712_v24  ;;  %6652 = vmatpush1.bf16.msra.mxu1 %v16714_v62  ;;  %v16734_v24 = vld [vmem:[#allocation6 + $0x2c] ss:$16 sps:$4 sm:$0xff]   ;;  %v16736_v62 = vld [vmem:[#allocation6 + $0x20] ss:$16 sps:$4 sm:$0xff]  }
 0xcfa   :  { %6612 = vmatprep.subr.bf16.mxu0 %v16720_v39  ;;  %6653 = vmatprep.subr.bf16.mxu1 %v16722_v21  ;;  %18789 = vst [vmem:[#allocation41_spill] sm:$0xff] %v16734_v24  ;;  %18790 = vst [vmem:[#allocation40_spill] sm:$0xff] %v16736_v62  ;;  %v16744_v21 = vld [vmem:[#allocation6 + $0x4] ss:$16 sps:$4 sm:$0xff]   ;;  %v16750_v39 = vld [vmem:[#allocation6 + $0x8] ss:$16 sps:$4 sm:$0xff]  }
 0xcfb   :  { %18792 = vst [vmem:[#allocation42_spill] sm:$0xff] %v16744_v21  ;;  %18795 = vst [vmem:[#allocation46_spill] sm:$0xff] %v16750_v39 }
 0xcfd   :  { %6613 = vmatpush1.bf16.msra.mxu0 %v16724_v55  ;;  %6654 = vmatpush1.bf16.msra.mxu1 %v16726_v47  ;;  %v16746_v55 = vld [vmem:[#allocation6 + $0xc] ss:$16 sps:$4 sm:$0xff]   ;;  %v16748_v47 = vld [vmem:[#allocation6] ss:$16 sps:$4 sm:$0xff]  }
 0xcfe   :  { %6614 = vmatprep.subr.bf16.mxu0 %v16732_v35  ;;  %6655 = vmatprep.subr.bf16.mxu1 %v16734_v24  ;;  %18793 = vst [vmem:[#allocation44_spill] sm:$0xff] %v16746_v55  ;;  %18794 = vst [vmem:[#allocation45_spill] sm:$0xff] %v16748_v47  ;;  %v16756_v24 = vld [vmem:[#allocation5 + $0xe4] ss:$16 sps:$4 sm:$0xff]  }
 0xcff   :  { %18796 = vst [vmem:[#allocation80_spill] sm:$0xff] %v16756_v24 }
 0xd01   :  { %6615 = vmatpush1.bf16.msra.mxu0 %v16736_v62  ;;  %6656 = vmatpush1.bf16.msra.mxu1 %v16738_v9  ;;  %v16758_v62 = vld [vmem:[#allocation5 + $0xec] ss:$16 sps:$4 sm:$0xff]  }
 0xd02   :  { %6616 = vmatprep.subr.bf16.mxu0 %v16744_v21  ;;  %6657 = vmatprep.subr.bf16.mxu1 %v16746_v55  ;;  %18797 = vst [vmem:[#allocation96_spill] sm:$0xff] %v16758_v62 }
 0xd05   :  { %6617 = vmatpush1.bf16.msra.mxu0 %v16748_v47  ;;  %6658 = vmatpush1.bf16.msra.mxu1 %v16750_v39 }
 0xd06   :  { %6844 = vmatprep.subr.bf16.mxu0 %v16756_v24  ;;  %6885 = vmatprep.subr.bf16.mxu1 %v16758_v62 }
 0xd67   :  { %v5748_v9 = vpop.f32.mrf.mxu0  ;;  %v5789_v35 = vpop.f32.mrf.mxu1 }
 0xd69   :  { %v5750_v63 = vpop.f32.mrf.mxu0  ;;  %v5791_v57 = vpop.f32.mrf.mxu1 }
 0xd6b   :  { %v5752_v33 = vpop.f32.mrf.mxu0  ;;  %v5793_v21 = vpop.f32.mrf.mxu1 }
 0xd6d   :  { %v5753_v41 = vpop.f32.mrf.mxu0  ;;  %v5794_v55 = vpop.f32.mrf.mxu1 }
 0xd87   :  { %v5990_v56 = vpop.f32.mrf.mxu0  ;;  %v6031_v47 = vpop.f32.mrf.mxu1 }
 0xd88   :  { %v5991_v51 = vadd.f32 %v5990_v56, %v5748_v9  ;;  %v6032_v55 = vadd.f32 %v6031_v47, %v5789_v35 }
 0xd89   :  { %v5992_v39 = vpop.f32.mrf.mxu0  ;;  %v6033_v7 = vpop.f32.mrf.mxu1 }
 0xd8a   :  { %v6038_v36 = vadd.f32 %v5991_v51, %v16489_v49  ;;  %v5993_v2 = vadd.f32 %v5992_v39, %v5750_v63  ;;  %v6034_v41 = vadd.f32 %v6033_v7, %v5791_v57  ;;  %v6040_v12 = vadd.f32 %v6032_v55, %v16507_v40 }
 0xd8b   :  { %v5994_v20 = vpop.f32.mrf.mxu0  ;;  %v6035_v24 = vpop.f32.mrf.mxu1 }
 0xd8c   :  { %v12067_v31 = vmul.f32 -1.442695, %v6038_v36  ;;  %v6039_v62 = vadd.f32 %v5993_v2, %v16494_v27  ;;  %v6041_v21 = vadd.f32 %v6034_v41, %v16501_v59 }
 0xd8d   :  { %v5995_v13 = vpop.f32.mrf.mxu0  ;;  %v6036_v50 = vpop.f32.mrf.mxu1 }
 0xd8e   :  { %14026 = vpow2.f32 %v12067_v31  ;;  %v12068_v33 = vmul.f32 -1.442695, %v6039_v62  ;;  %v12069_v56 = vmul.f32 -1.442695, %v6041_v21  ;;  %v18798_v13 = vld [vmem:[#allocation81_spill] sm:$0xff] }
 0xd8f   :  { %v6071_v50 = vunpack.c.l.bf16 %v18798_v13  ;;  %v6072_v31 = vunpack.c.h.bf16 %v18798_v13  ;;  %v18799_v13 = vld [vmem:[#allocation104_spill] sm:$0xff] }
 0xd90   :  { %14028 = vpow2.f32 %v12068_v33 }
 0xd91   :  { %14030 = vpow2.f32 %v12069_v56 }
 0xd9b   :  { %v14027_v9 = vpop.eup %14026 }
 0xd9c   :  { %v6045_v51 = vadd.f32 1.0, %v14027_v9 }
 0xd9d   :  { %v14029_v63 = vpop.eup %14028 }
 0xd9e   :  { %14032 = vrcp.f32 %v6045_v51  ;;  %v6051_v20 = vadd.f32 1.0, %v14029_v63  ;;  %v14031_v62 = vpop.eup %14030 }
 0xd9f   :  { %14034 = vtanh.f32 %v6040_v12  ;;  %v6058_v56 = vadd.f32 1.0, %v14031_v62 }
 0xda0   :  { %14036 = vrcp.f32 %v6051_v20 }
 0xda7   :  { %v6301_v2 = vpop.f32.mrf.mxu0  ;;  %v6342_v36 = vpop.f32.mrf.mxu1 }
 0xda8   :  { %v6349_v7 = vadd.f32 %v6301_v2, %v6071_v50  ;;  %v6074_v50 = vunpack.c.h.bf16 %v18799_v13 }
 0xda9   :  { %v6303_v57 = vpop.f32.mrf.mxu0  ;;  %v6344_v24 = vpop.f32.mrf.mxu1 }
 0xdaa   :  { %v12102_v39 = vmul.f32 -1.442695, %v6349_v7  ;;  %v6350_v47 = vadd.f32 %v6303_v57, %v6072_v31  ;;  %v6352_v31 = vadd.f32 %v6344_v24, %v6074_v50  ;;  %v6073_v7 = vunpack.c.l.bf16 %v18799_v13 }
 0xdab   :  { %v14033_v35 = vpop.eup %14032  ;;  %v6305_v33 = vpop.f32.mrf.mxu0 }
 0xdac   :  { %v6346_v41 = vpop.f32.mrf.mxu1  ;;  %v14035_v21 = vpop.eup %14034  ;;  %14038 = vpow2.f32 %v12102_v39  ;;  %v12103_v55 = vmul.f32 -1.442695, %v6350_v47  ;;  %v12104_v57 = vmul.f32 -1.442695, %v6352_v31  ;;  %v6351_v47 = vadd.f32 %v6342_v36, %v6073_v7  ;;  %v16784_v36 = vld [vmem:[#allocation5 + $0xc0] ss:$16 sps:$4 sm:$0xff]  }
 0xdad   :  { %v14037_v12 = vpop.eup %14036  ;;  %v6306_v9 = vpop.f32.mrf.mxu0  ;;  %v6062_v63 = vmul.f32 %v14035_v21, %v14033_v35  ;;  %v16798_v31 = vld [vmem:[#allocation5 + $0xa0] ss:$16 sps:$4 sm:$0xff]   ;;  %v16800_v7 = vld [vmem:[#allocation5 + $0xa8] ss:$16 sps:$4 sm:$0xff]  }
 0xdae   :  { %v6347_v51 = vpop.f32.mrf.mxu1  ;;  %v6061_v20 = vmul.f32 %v14037_v12, %v16514_v53  ;;  %14040 = vpow2.f32 %v12103_v55  ;;  %v16774_v55 = vld [vmem:[#allocation5 + $0xe0] ss:$16 sps:$4 sm:$0xff]   ;;  %v16776_v12 = vld [vmem:[#allocation5 + $0xe8] ss:$16 sps:$4 sm:$0xff]   ;;  %v16780_v9 = vld [vmem:[#allocation5 + $0xcc] ss:$16 sps:$4 sm:$0xff]  }
 0xdaf   :  { %14042 = vrcp.f32 %v6058_v56  ;;  %v16778_v56 = vld [vmem:[#allocation5 + $0xc4] ss:$16 sps:$4 sm:$0xff]   ;;  %v16786_v51 = vld [vmem:[#allocation5 + $0xc8] ss:$16 sps:$4 sm:$0xff]  }
 0xdb0   :  { %v16770_v2 = vadd.f32 %v6062_v63, %v6061_v20  ;;  %v16790_v63 = vld [vmem:[#allocation5 + $0xa4] ss:$16 sps:$4 sm:$0xff]   ;;  %v16792_v20 = vld [vmem:[#allocation5 + $0xac] ss:$16 sps:$4 sm:$0xff]  }
 0xdb1   :  { %18800 = vst [vmem:[#allocation47_spill] sm:$0xff] %v16792_v20 }
 0xdb2   :  { %14044 = vtanh.f32 %v16770_v2 }
 0xdb3   :  { %14046 = vpow2.f32 %v12104_v57 }
 0xdb9   :  { %v14039_v39 = vpop.eup %14038 }
 0xdba   :  { %v6356_v62 = vadd.f32 1.0, %v14039_v39  ;;  %v16804_v39 = vld [vmem:[#allocation5 + $0x84] ss:$16 sps:$4 sm:$0xff]  }
 0xdbb   :  { %v14041_v33 = vpop.eup %14040 }
 0xdbc   :  { %14048 = vrcp.f32 %v6356_v62  ;;  %v6362_v35 = vadd.f32 1.0, %v14041_v33  ;;  %v14043_v53 = vpop.eup %14042 }
 0xdbd   :  { %14050 = vtanh.f32 %v6351_v47  ;;  %v16806_v47 = vld [vmem:[#allocation5 + $0x8c] ss:$16 sps:$4 sm:$0xff]  }
 0xdbe   :  { %14052 = vrcp.f32 %v6362_v35 }
 0xdbf   :  { %v14045_v41 = vpop.eup %14044 }
 0xdc0   :  { %v6065_v21 = vmul.f32 %v14045_v41, %v14043_v53  ;;  %v14047_v13 = vpop.eup %14046  ;;  %v16811_v41 = vld [vmem:[#allocation5 + $0x80] ss:$16 sps:$4 sm:$0xff]  }
 0xdc1   :  { %v6369_v33 = vadd.f32 1.0, %v14047_v13  ;;  %v16821_v13 = vld [vmem:[#allocation5 + $0x6c] ss:$16 sps:$4 sm:$0xff]  }
 0xdc2   :  { %v6066_v24 = vpack.c.bf16 %v6065_v21, %v6065_v21  ;;  %v16813_v21 = vld [vmem:[#allocation5 + $0x88] ss:$16 sps:$4 sm:$0xff]   ;;  %18803 = vst [vmem:[#allocation50_spill] sm:$0xff] %v16821_v13 }
 0xdc3   :  { %18801 = vst [vmem:[#allocation48_spill] sm:$0xff] %v16813_v21  ;;  %14054 = vrcp.f32 %v6369_v33  ;;  %v16838_v33 = vld [vmem:[#allocation5 + $0x40] ss:$16 sps:$4 sm:$0xff]  }
 0xdc4   :  { %6068 = vst [vmem:[#allocation3 + $0x4] sm:$0xf] %v6066_v24  ;;  %6635 = vmatmul.mubr.bf16.vlgmr.msra.gmra.mxu0 %v6066_v24  ;;  %6676 = vmatmul.mubr.bf16.vlgmr.msra.gmra.mxu1 %v6066_v24  ;;  %18808 = vst [vmem:[#allocation55_spill] sm:$0xff] %v16838_v33 }
 0xdc5   :  { %6845 = vmatpush1.bf16.msra.mxu0 %v16774_v55  ;;  %6886 = vmatpush1.bf16.msra.mxu1 %v16776_v12 }
 0xdc6   :  { %6846 = vmatprep.subr.bf16.mxu0 %v16778_v56  ;;  %6887 = vmatprep.subr.bf16.mxu1 %v16780_v9 }
 0xdc7   :  { %6876 = vmatprep.mubr.bf16.mxu0 %v18403_v11  ;;  %6917 = vmatprep.mubr.bf16.mxu1 %v18403_v11 }
 0xdc9   :  { %v14049_v50 = vpop.eup %14048  ;;  %6847 = vmatpush1.bf16.msra.mxu0 %v16784_v36  ;;  %6888 = vmatpush1.bf16.msra.mxu1 %v16786_v51 }
 0xdca   :  { %v14051_v57 = vpop.eup %14050  ;;  %6848 = vmatprep.subr.bf16.mxu0 %v16790_v63  ;;  %6889 = vmatprep.subr.bf16.mxu1 %v16792_v20  ;;  %v16819_v20 = vld [vmem:[#allocation5 + $0x64] ss:$16 sps:$4 sm:$0xff]  }
 0xdcb   :  { %v14053_v62 = vpop.eup %14052  ;;  %v6373_v35 = vmul.f32 %v14051_v57, %v14049_v50  ;;  %18802 = vst [vmem:[#allocation49_spill] sm:$0xff] %v16819_v20  ;;  %v16828_v50 = vld [vmem:[#allocation5 + $0x68] ss:$16 sps:$4 sm:$0xff]   ;;  %v16832_v57 = vld [vmem:[#allocation5 + $0x44] ss:$16 sps:$4 sm:$0xff]  }
 0xdcc   :  { %v6372_v53 = vmul.f32 %v14053_v62, %v16531_v44  ;;  %v16826_v44 = vld [vmem:[#allocation5 + $0x60] ss:$16 sps:$4 sm:$0xff]   ;;  %18805 = vst [vmem:[#allocation52_spill] sm:$0xff] %v16828_v50  ;;  %18806 = vst [vmem:[#allocation53_spill] sm:$0xff] %v16832_v57  ;;  %v16834_v62 = vld [vmem:[#allocation5 + $0x4c] ss:$16 sps:$4 sm:$0xff]  }
 0xdcd   :  { %6849 = vmatpush1.bf16.msra.mxu0 %v16798_v31  ;;  %6890 = vmatpush1.bf16.msra.mxu1 %v16800_v7  ;;  %18804 = vst [vmem:[#allocation51_spill] sm:$0xff] %v16826_v44  ;;  %18807 = vst [vmem:[#allocation54_spill] sm:$0xff] %v16834_v62 }
 0xdce   :  { %v16815_v24 = vadd.f32 %v6373_v35, %v6372_v53  ;;  %6850 = vmatprep.subr.bf16.mxu0 %v16804_v39  ;;  %6891 = vmatprep.subr.bf16.mxu1 %v16806_v47  ;;  %v16840_v35 = vld [vmem:[#allocation5 + $0x48] ss:$16 sps:$4 sm:$0xff]   ;;  %v16844_v53 = vld [vmem:[#allocation5 + $0x24] ss:$16 sps:$4 sm:$0xff]  }
 0xdcf   :  { %18809 = vst [vmem:[#allocation56_spill] sm:$0xff] %v16840_v35  ;;  %18810 = vst [vmem:[#allocation57_spill] sm:$0xff] %v16844_v53 }
 0xdd0   :  { %14056 = vtanh.f32 %v16815_v24 }
 0xdd1   :  { %6851 = vmatpush1.bf16.msra.mxu0 %v16811_v41  ;;  %6892 = vmatpush1.bf16.msra.mxu1 %v16813_v21 }
 0xdd2   :  { %6852 = vmatprep.subr.bf16.mxu0 %v16819_v20  ;;  %6893 = vmatprep.subr.bf16.mxu1 %v16821_v13  ;;  %v16846_v20 = vld [vmem:[#allocation5 + $0x2c] ss:$16 sps:$4 sm:$0xff]   ;;  %v16850_v13 = vld [vmem:[#allocation5 + $0x20] ss:$16 sps:$4 sm:$0xff]  }
 0xdd3   :  { %18811 = vst [vmem:[#allocation58_spill] sm:$0xff] %v16846_v20 }
 0xdd5   :  { %6853 = vmatpush1.bf16.msra.mxu0 %v16826_v44  ;;  %6894 = vmatpush1.bf16.msra.mxu1 %v16828_v50  ;;  %v16852_v44 = vld [vmem:[#allocation5 + $0x28] ss:$16 sps:$4 sm:$0xff]   ;;  %v16856_v50 = vld [vmem:[#allocation5 + $0x4] ss:$16 sps:$4 sm:$0xff]  }
 0xdd6   :  { %6854 = vmatprep.subr.bf16.mxu0 %v16832_v57  ;;  %6895 = vmatprep.subr.bf16.mxu1 %v16834_v62  ;;  %v16858_v57 = vld [vmem:[#allocation5 + $0xc] ss:$16 sps:$4 sm:$0xff]   ;;  %v14055_v62 = vpop.eup %14054 }
 0xdd9   :  { %6855 = vmatpush1.bf16.msra.mxu0 %v16838_v33  ;;  %6896 = vmatpush1.bf16.msra.mxu1 %v16840_v35  ;;  %v16862_v33 = vld [vmem:[#allocation5] ss:$16 sps:$4 sm:$0xff]   ;;  %v16864_v35 = vld [vmem:[#allocation5 + $0x8] ss:$16 sps:$4 sm:$0xff]  }
 0xdda   :  { %6856 = vmatprep.subr.bf16.mxu0 %v16844_v53  ;;  %6897 = vmatprep.subr.bf16.mxu1 %v16846_v20 }
 0xddd   :  { %v14057_v21 = vpop.eup %14056  ;;  %6857 = vmatpush1.bf16.msra.mxu0 %v16850_v13  ;;  %6898 = vmatpush1.bf16.msra.mxu1 %v16852_v44 }
 0xdde   :  { %6858 = vmatprep.subr.bf16.mxu0 %v16856_v50  ;;  %6899 = vmatprep.subr.bf16.mxu1 %v16858_v57  ;;  %v6376_v53 = vmul.f32 %v14057_v21, %v14055_v62 }
 0xde0   :  { %v6377_v20 = vpack.c.bf16 %v6376_v53, %v6376_v53 }
 0xde1   :  { %6859 = vmatpush1.bf16.msra.mxu0 %v16862_v33  ;;  %6900 = vmatpush1.bf16.msra.mxu1 %v16864_v35 }
 0xde2   :  { %7155 = vmatprep.subr.bf16.mxu0 %v16552_v30  ;;  %7196 = vmatprep.subr.bf16.mxu1 %v16554_v32  ;;  %v18812_v30 = vld [vmem:[#allocation62_spill] sm:$0xff]  ;;  %v18813_v32 = vld [vmem:[#allocation63_spill] sm:$0xff] }
 0xde4   :  { %6877 = vmatmul.mubr.bf16.vlgmr.msra.gmra.mxu0 %v6377_v20  ;;  %6918 = vmatmul.mubr.bf16.vlgmr.msra.gmra.mxu1 %v6377_v20 }
 0xde5   :  { %7156 = vmatpush1.bf16.msra.mxu0 %v16558_v58  ;;  %7197 = vmatpush1.bf16.msra.mxu1 %v16560_v48  ;;  %v18814_v58 = vld [vmem:[#allocation64_spill] sm:$0xff]  ;;  %v18815_v48 = vld [vmem:[#allocation86_spill] sm:$0xff] }
 0xde6   :  { %7157 = vmatprep.subr.bf16.mxu0 %v16566_v14  ;;  %7198 = vmatprep.subr.bf16.mxu1 %v16568_v3  ;;  %v18816_v14 = vld [vmem:[#allocation99_spill] sm:$0xff]  ;;  %v18817_v3 = vld [vmem:[#allocation82_spill] sm:$0xff] }
 0xde7   :  { %7187 = vmatprep.mubr.bf16.mxu0 %v18403_v11  ;;  %7228 = vmatprep.mubr.bf16.mxu1 %v18403_v11 }
 0xde9   :  { %7158 = vmatpush1.bf16.msra.mxu0 %v16574_v38  ;;  %7199 = vmatpush1.bf16.msra.mxu1 %v16576_v42  ;;  %v18818_v38 = vld [vmem:[#allocation97_spill] sm:$0xff]  ;;  %v18819_v42 = vld [vmem:[#allocation84_spill] sm:$0xff] }
 0xdea   :  { %7159 = vmatprep.subr.bf16.mxu0 %v16580_v0  ;;  %7200 = vmatprep.subr.bf16.mxu1 %v16582_v8  ;;  %v18820_v0 = vld [vmem:[#allocation98_spill] sm:$0xff]  ;;  %v18821_v8 = vld [vmem:[#allocation73_spill] sm:$0xff] }
 0xded   :  { %7160 = vmatpush1.bf16.msra.mxu0 %v16588_v28  ;;  %7201 = vmatpush1.bf16.msra.mxu1 %v16590_v17  ;;  %v18822_v28 = vld [vmem:[#allocation74_spill] sm:$0xff]  ;;  %v18823_v17 = vld [vmem:[#allocation75_spill] sm:$0xff] }
 0xdee   :  { %7161 = vmatprep.subr.bf16.mxu0 %v16594_v45  ;;  %7202 = vmatprep.subr.bf16.mxu1 %v16596_v15  ;;  %v18824_v45 = vld [vmem:[#allocation76_spill] sm:$0xff]  ;;  %v18825_v15 = vld [vmem:[#allocation77_spill] sm:$0xff] }
 0xdf1   :  { %7162 = vmatpush1.bf16.msra.mxu0 %v16600_v4  ;;  %7203 = vmatpush1.bf16.msra.mxu1 %v16602_v6  ;;  %v18826_v4 = vld [vmem:[#allocation78_spill] sm:$0xff]  ;;  %v18827_v6 = vld [vmem:[#allocation33_spill] sm:$0xff] }
 0xdf2   :  { %7163 = vmatprep.subr.bf16.mxu0 %v16606_v18  ;;  %7204 = vmatprep.subr.bf16.mxu1 %v16608_v61  ;;  %v18828_v18 = vld [vmem:[#allocation35_spill] sm:$0xff]  ;;  %v18829_v61 = vld [vmem:[#allocation34_spill] sm:$0xff] }
 0xdf5   :  { %7164 = vmatpush1.bf16.msra.mxu0 %v16612_v1  ;;  %7205 = vmatpush1.bf16.msra.mxu1 %v16614_v23  ;;  %v18830_v1 = vld [vmem:[#allocation37_spill] sm:$0xff]  ;;  %v18831_v23 = vld [vmem:[#allocation36_spill] sm:$0xff] }
 0xdf6   :  { %7165 = vmatprep.subr.bf16.mxu0 %v16618_v16  ;;  %7206 = vmatprep.subr.bf16.mxu1 %v16620_v43  ;;  %v18832_v16 = vld [vmem:[#allocation39_spill] sm:$0xff]  ;;  %v18833_v43 = vld [vmem:[#allocation38_spill] sm:$0xff] }
 0xdf9   :  { %7166 = vmatpush1.bf16.msra.mxu0 %v16624_v54  ;;  %7207 = vmatpush1.bf16.msra.mxu1 %v16626_v37  ;;  %v18834_v54 = vld [vmem:[#allocation41_spill] sm:$0xff]  ;;  %v18835_v37 = vld [vmem:[#allocation40_spill] sm:$0xff] }
 0xdfa   :  { %7167 = vmatprep.subr.bf16.mxu0 %v16630_v52  ;;  %7208 = vmatprep.subr.bf16.mxu1 %v16632_v5  ;;  %v18836_v52 = vld [vmem:[#allocation43_spill] sm:$0xff]  ;;  %v18837_v5 = vld [vmem:[#allocation42_spill] sm:$0xff] }
 0xdfd   :  { %7168 = vmatpush1.bf16.msra.mxu0 %v16636_v46  ;;  %7209 = vmatpush1.bf16.msra.mxu1 %v16638_v22  ;;  %v18838_v46 = vld [vmem:[#allocation44_spill] sm:$0xff]  ;;  %v18839_v22 = vld [vmem:[#allocation45_spill] sm:$0xff] }
 0xdfe   :  { %7169 = vmatprep.subr.bf16.mxu0 %v16642_v25  ;;  %7210 = vmatprep.subr.bf16.mxu1 %v16644_v34  ;;  %v18840_v25 = vld [vmem:[#allocation46_spill] sm:$0xff]  ;;  %v18841_v34 = vld [vmem:[#allocation80_spill] sm:$0xff] }
 0xe01   :  { %7170 = vmatpush1.bf16.msra.mxu0 %v16648_v19  ;;  %7211 = vmatpush1.bf16.msra.mxu1 %v16650_v10  ;;  %v18842_v19 = vld [vmem:[#allocation96_spill] sm:$0xff] }
 0xe02   :  { %7490 = vmatprep.subr.bf16.mxu0 %v16660_v26  ;;  %7531 = vmatprep.subr.bf16.mxu1 %v16662_v29 }
 0xe04   :  { %7188 = vmatmul.mubr.bf16.vlgmr.msra.gmra.mxu0 %v6377_v20  ;;  %7229 = vmatmul.mubr.bf16.vlgmr.msra.gmra.mxu1 %v6377_v20 }
 0xe05   :  { %7491 = vmatpush1.bf16.msra.mxu0 %v16664_v60  ;;  %7532 = vmatpush1.bf16.msra.mxu1 %v18812_v30 }
 0xe06   :  { %7492 = vmatprep.subr.bf16.mxu0 %v18813_v32  ;;  %7533 = vmatprep.subr.bf16.mxu1 %v18814_v58 }
 0xe07   :  { %7522 = vmatprep.mubr.bf16.mxu0 %v18403_v11  ;;  %7563 = vmatprep.mubr.bf16.mxu1 %v18403_v11 }
 0xe09   :  { %7493 = vmatpush1.bf16.msra.mxu0 %v18815_v48  ;;  %7534 = vmatpush1.bf16.msra.mxu1 %v18816_v14 }
 0xe0a   :  { %7494 = vmatprep.subr.bf16.mxu0 %v18817_v3  ;;  %7535 = vmatprep.subr.bf16.mxu1 %v18818_v38 }
 0xe0d   :  { %7495 = vmatpush1.bf16.msra.mxu0 %v18819_v42  ;;  %7536 = vmatpush1.bf16.msra.mxu1 %v18820_v0 }
 0xe0e   :  { %7496 = vmatprep.subr.bf16.mxu0 %v18821_v8  ;;  %7537 = vmatprep.subr.bf16.mxu1 %v18822_v28 }
 0xe11   :  { %7497 = vmatpush1.bf16.msra.mxu0 %v18823_v17  ;;  %7538 = vmatpush1.bf16.msra.mxu1 %v18824_v45 }
 0xe12   :  { %7498 = vmatprep.subr.bf16.mxu0 %v18825_v15  ;;  %7539 = vmatprep.subr.bf16.mxu1 %v18826_v4 }
 0xe15   :  { %7499 = vmatpush1.bf16.msra.mxu0 %v18827_v6  ;;  %7540 = vmatpush1.bf16.msra.mxu1 %v18828_v18 }
 0xe16   :  { %7500 = vmatprep.subr.bf16.mxu0 %v18829_v61  ;;  %7541 = vmatprep.subr.bf16.mxu1 %v18830_v1 }
 0xe19   :  { %7501 = vmatpush1.bf16.msra.mxu0 %v18831_v23  ;;  %7542 = vmatpush1.bf16.msra.mxu1 %v18832_v16 }
 0xe1a   :  { %7502 = vmatprep.subr.bf16.mxu0 %v18833_v43  ;;  %7543 = vmatprep.subr.bf16.mxu1 %v18834_v54 }
 0xe1d   :  { %7503 = vmatpush1.bf16.msra.mxu0 %v18835_v37  ;;  %7544 = vmatpush1.bf16.msra.mxu1 %v18836_v52  ;;  %v18843_v37 = vld [vmem:[#allocation83_spill] sm:$0xff] }
 0xe1e   :  { %7504 = vmatprep.subr.bf16.mxu0 %v18837_v5  ;;  %7545 = vmatprep.subr.bf16.mxu1 %v18838_v46  ;;  %v6959_v52 = vunpack.c.l.bf16 %v18843_v37  ;;  %v6960_v5 = vunpack.c.h.bf16 %v18843_v37 }
 0xe21   :  { %7505 = vmatpush1.bf16.msra.mxu0 %v18839_v22  ;;  %7546 = vmatpush1.bf16.msra.mxu1 %v18840_v25 }
 0xe22   :  { %7732 = vmatprep.subr.bf16.mxu0 %v18841_v34  ;;  %7773 = vmatprep.subr.bf16.mxu1 %v18842_v19 }
 0xe84   :  { %v6636_v10 = vpop.f32.mrf.mxu0  ;;  %v6677_v26 = vpop.f32.mrf.mxu1 }
 0xe86   :  { %v6638_v29 = vpop.f32.mrf.mxu0  ;;  %v6679_v60 = vpop.f32.mrf.mxu1 }
 0xe88   :  { %v6640_v20 = vpop.f32.mrf.mxu0  ;;  %v6681_v21 = vpop.f32.mrf.mxu1 }
 0xe8a   :  { %v6641_v62 = vpop.f32.mrf.mxu0  ;;  %v6682_v53 = vpop.f32.mrf.mxu1 }
 0xea4   :  { %v6878_v30 = vpop.f32.mrf.mxu0  ;;  %v6919_v32 = vpop.f32.mrf.mxu1 }
 0xea5   :  { %v6879_v58 = vadd.f32 %v6878_v30, %v6636_v10  ;;  %v6920_v18 = vadd.f32 %v6919_v32, %v6677_v26 }
 0xea6   :  { %v6880_v48 = vpop.f32.mrf.mxu0  ;;  %v6921_v14 = vpop.f32.mrf.mxu1 }
 0xea7   :  { %v6926_v3 = vadd.f32 %v6879_v58, %v16489_v49  ;;  %v6881_v38 = vadd.f32 %v6880_v48, %v6638_v29  ;;  %v6922_v4 = vadd.f32 %v6921_v14, %v6679_v60  ;;  %v6928_v23 = vadd.f32 %v6920_v18, %v16507_v40 }
 0xea8   :  { %v6882_v42 = vpop.f32.mrf.mxu0  ;;  %v6923_v0 = vpop.f32.mrf.mxu1 }
 0xea9   :  { %v12169_v8 = vmul.f32 -1.442695, %v6926_v3  ;;  %v6927_v28 = vadd.f32 %v6881_v38, %v16494_v27  ;;  %v6929_v6 = vadd.f32 %v6922_v4, %v16501_v59  ;;  %v18844_v38 = vld [vmem:[#allocation105_spill] sm:$0xff] }
 0xeaa   :  { %v6883_v17 = vpop.f32.mrf.mxu0  ;;  %v6924_v45 = vpop.f32.mrf.mxu1  ;;  %v6962_v42 = vunpack.c.h.bf16 %v18844_v38 }
 0xeab   :  { %14058 = vpow2.f32 %v12169_v8  ;;  %v12170_v15 = vmul.f32 -1.442695, %v6927_v28  ;;  %v12171_v61 = vmul.f32 -1.442695, %v6929_v6  ;;  %v6961_v28 = vunpack.c.l.bf16 %v18844_v38  ;;  %v17052_v38 = vld [vmem:[#allocation4 + $0x44] ss:$16 sps:$4 sm:$0xff]  }
 0xead   :  { %14060 = vpow2.f32 %v12170_v15 }
 0xeae   :  { %14062 = vpow2.f32 %v12171_v61 }
 0xeb8   :  { %v14059_v1 = vpop.eup %14058 }
 0xeb9   :  { %v6933_v16 = vadd.f32 1.0, %v14059_v1 }
 0xeba   :  { %v14061_v43 = vpop.eup %14060 }
 0xebb   :  { %14064 = vrcp.f32 %v6933_v16  ;;  %v6939_v54 = vadd.f32 1.0, %v14061_v43  ;;  %v14063_v10 = vpop.eup %14062 }
 0xebc   :  { %14066 = vtanh.f32 %v6928_v23  ;;  %v6946_v32 = vadd.f32 1.0, %v14063_v10  ;;  %v16988_v10 = vld [vmem:[#allocation4 + $0xec] ss:$16 sps:$4 sm:$0xff]  }
 0xebd   :  { %14068 = vrcp.f32 %v6939_v54 }
 0xec4   :  { %v7189_v46 = vpop.f32.mrf.mxu0  ;;  %v7230_v22 = vpop.f32.mrf.mxu1 }
 0xec5   :  { %v7237_v25 = vadd.f32 %v7189_v46, %v6959_v52  ;;  %v7239_v15 = vadd.f32 %v7230_v22, %v6961_v28  ;;  %v18855_v46 = vld [vmem:[#allocation57_spill] sm:$0xff] }
 0xec6   :  { %v7191_v34 = vpop.f32.mrf.mxu0  ;;  %v7232_v19 = vpop.f32.mrf.mxu1  ;;  %v17060_v28 = vld [vmem:[#allocation4 + $0x48] ss:$16 sps:$4 sm:$0xff]  }
 0xec7   :  { %v12204_v26 = vmul.f32 -1.442695, %v7237_v25  ;;  %v7238_v29 = vadd.f32 %v7191_v34, %v6960_v5  ;;  %v7240_v8 = vadd.f32 %v7232_v19, %v6962_v42  ;;  %v18854_v5 = vld [vmem:[#allocation56_spill] sm:$0xff]  ;;  %v17054_v42 = vld [vmem:[#allocation4 + $0x4c] ss:$16 sps:$4 sm:$0xff]  }
 0xec8   :  { %v14065_v60 = vpop.eup %14064  ;;  %v7193_v20 = vpop.f32.mrf.mxu0  ;;  %v16986_v19 = vld [vmem:[#allocation4 + $0xe4] ss:$16 sps:$4 sm:$0xff]  }
 0xec9   :  { %v7234_v21 = vpop.f32.mrf.mxu1  ;;  %v14067_v62 = vpop.eup %14066  ;;  %14070 = vpow2.f32 %v12204_v26  ;;  %v12205_v53 = vmul.f32 -1.442695, %v7238_v29  ;;  %v12206_v17 = vmul.f32 -1.442695, %v7240_v8  ;;  %v16994_v29 = vld [vmem:[#allocation4 + $0xe0] ss:$16 sps:$4 sm:$0xff]  }
 0xeca   :  { %v14069_v30 = vpop.eup %14068  ;;  %v7194_v58 = vpop.f32.mrf.mxu0  ;;  %v6950_v14 = vmul.f32 %v14067_v62, %v14065_v60  ;;  %v17016_v60 = vld [vmem:[#allocation4 + $0xac] ss:$16 sps:$4 sm:$0xff]   ;;  %v17022_v20 = vld [vmem:[#allocation4 + $0xa0] ss:$16 sps:$4 sm:$0xff]   ;;  %v17024_v21 = vld [vmem:[#allocation4 + $0xa8] ss:$16 sps:$4 sm:$0xff]  }
 0xecb   :  { %v7235_v48 = vpop.f32.mrf.mxu1  ;;  %v6949_v3 = vmul.f32 %v14069_v30, %v16770_v2  ;;  %14072 = vpow2.f32 %v12205_v53  ;;  %v17028_v62 = vld [vmem:[#allocation4 + $0x84] ss:$16 sps:$4 sm:$0xff]   ;;  %v17030_v53 = vld [vmem:[#allocation4 + $0x8c] ss:$16 sps:$4 sm:$0xff]   ;;  %v17034_v30 = vld [vmem:[#allocation4 + $0x80] ss:$16 sps:$4 sm:$0xff]  }
 0xecc   :  { %14074 = vrcp.f32 %v6946_v32  ;;  %v17036_v32 = vld [vmem:[#allocation4 + $0x88] ss:$16 sps:$4 sm:$0xff]   ;;  %v17040_v58 = vld [vmem:[#allocation4 + $0x64] ss:$16 sps:$4 sm:$0xff]   ;;  %v17042_v48 = vld [vmem:[#allocation4 + $0x6c] ss:$16 sps:$4 sm:$0xff]  }
 0xecd   :  { %v16948_v0 = vadd.f32 %v6950_v14, %v6949_v3  ;;  %v17046_v14 = vld [vmem:[#allocation4 + $0x60] ss:$16 sps:$4 sm:$0xff]   ;;  %v17048_v3 = vld [vmem:[#allocation4 + $0x68] ss:$16 sps:$4 sm:$0xff]  }
 0xece   :  { %v17058_v8 = vld [vmem:[#allocation4 + $0x40] ss:$16 sps:$4 sm:$0xff]  }
 0xecf   :  { %14076 = vtanh.f32 %v16948_v0 }
 0xed0   :  { %14078 = vpow2.f32 %v12206_v17  ;;  %v17064_v17 = vld [vmem:[#allocation4 + $0x24] ss:$16 sps:$4 sm:$0xff]  }
 0xed6   :  { %v14071_v45 = vpop.eup %14070 }
 0xed7   :  { %v7244_v4 = vadd.f32 1.0, %v14071_v45  ;;  %v17066_v45 = vld [vmem:[#allocation4 + $0x2c] ss:$16 sps:$4 sm:$0xff]  }
 0xed8   :  { %v14073_v6 = vpop.eup %14072 }
 0xed9   :  { %14080 = vrcp.f32 %v7244_v4  ;;  %v7250_v18 = vadd.f32 1.0, %v14073_v6  ;;  %v14075_v2 = vpop.eup %14074  ;;  %v17072_v4 = vld [vmem:[#allocation4 + $0x28] ss:$16 sps:$4 sm:$0xff]   ;;  %v17076_v6 = vld [vmem:[#allocation4 + $0x4] ss:$16 sps:$4 sm:$0xff]  }
 0xeda   :  { %14082 = vtanh.f32 %v7239_v15  ;;  %v17070_v15 = vld [vmem:[#allocation4 + $0x20] ss:$16 sps:$4 sm:$0xff]  }
 0xedb   :  { %14084 = vrcp.f32 %v7250_v18  ;;  %v17078_v18 = vld [vmem:[#allocation4 + $0xc] ss:$16 sps:$4 sm:$0xff]  }
 0xedc   :  { %v14077_v61 = vpop.eup %14076 }
 0xedd   :  { %v6953_v1 = vmul.f32 %v14077_v61, %v14075_v2  ;;  %v14079_v16 = vpop.eup %14078  ;;  %v17082_v2 = vld [vmem:[#allocation4] ss:$16 sps:$4 sm:$0xff]   ;;  %v17084_v61 = vld [vmem:[#allocation4 + $0x8] ss:$16 sps:$4 sm:$0xff]  }
 0xede   :  { %v7257_v37 = vadd.f32 1.0, %v14079_v16  ;;  %v17098_v16 = vld [vmem:[#allocation6 + $0xe0] ss:$16 sps:$4 sm:$0xff]  }
 0xedf   :  { %v6954_v23 = vpack.c.bf16 %v6953_v1, %v6953_v1  ;;  %v17094_v1 = vld [vmem:[#allocation6 + $0xe4] ss:$16 sps:$4 sm:$0xff]  }
 0xee0   :  { %14086 = vrcp.f32 %v7257_v37  ;;  %v17112_v37 = vld [vmem:[#allocation6 + $0xc8] ss:$16 sps:$4 sm:$0xff]  }
 0xee1   :  { %6956 = vst [vmem:[#allocation3 + $0x8] sm:$0xf] %v6954_v23  ;;  %7523 = vmatmul.mubr.bf16.vlgmr.msra.gmra.mxu0 %v6954_v23  ;;  %7564 = vmatmul.mubr.bf16.vlgmr.msra.gmra.mxu1 %v6954_v23  ;;  %v17096_v23 = vld [vmem:[#allocation6 + $0xec] ss:$16 sps:$4 sm:$0xff]   ;;  %18861 = vst [vmem:[#allocation68_spill] sm:$0xff] %v17112_v37 }
 0xee2   :  { %7733 = vmatpush1.bf16.msra.mxu0 %v16774_v55  ;;  %7774 = vmatpush1.bf16.msra.mxu1 %v16776_v12  ;;  %v18845_v55 = vld [vmem:[#allocation47_spill] sm:$0xff] }
 0xee3   :  { %7734 = vmatprep.subr.bf16.mxu0 %v16778_v56  ;;  %7775 = vmatprep.subr.bf16.mxu1 %v16780_v9 }
 0xee4   :  { %7764 = vmatprep.mubr.bf16.mxu0 %v18403_v11  ;;  %7805 = vmatprep.mubr.bf16.mxu1 %v18403_v11 }
 0xee6   :  { %v14081_v43 = vpop.eup %14080  ;;  %7735 = vmatpush1.bf16.msra.mxu0 %v16784_v36  ;;  %7776 = vmatpush1.bf16.msra.mxu1 %v16786_v51  ;;  %v18846_v36 = vld [vmem:[#allocation48_spill] sm:$0xff]  ;;  %v18847_v51 = vld [vmem:[#allocation49_spill] sm:$0xff] }
 0xee7   :  { %v14083_v54 = vpop.eup %14082  ;;  %7736 = vmatprep.subr.bf16.mxu0 %v16790_v63  ;;  %7777 = vmatprep.subr.bf16.mxu1 %v18845_v55  ;;  %v18848_v63 = vld [vmem:[#allocation50_spill] sm:$0xff]  ;;  %v17108_v55 = vld [vmem:[#allocation6 + $0xcc] ss:$16 sps:$4 sm:$0xff]  }
 0xee8   :  { %v14085_v12 = vpop.eup %14084  ;;  %v7261_v56 = vmul.f32 %v14083_v54, %v14081_v43  ;;  %v17100_v43 = vld [vmem:[#allocation6 + $0xe8] ss:$16 sps:$4 sm:$0xff]   ;;  %v17106_v54 = vld [vmem:[#allocation6 + $0xc4] ss:$16 sps:$4 sm:$0xff]   ;;  %18859 = vst [vmem:[#allocation95_spill] sm:$0xff] %v17108_v55 }
 0xee9   :  { %v7260_v9 = vmul.f32 %v14085_v12, %v16815_v24  ;;  %v18851_v24 = vld [vmem:[#allocation53_spill] sm:$0xff]  ;;  %18857 = vst [vmem:[#allocation93_spill] sm:$0xff] %v17100_v43  ;;  %18858 = vst [vmem:[#allocation102_spill] sm:$0xff] %v17106_v54  ;;  %v17110_v12 = vld [vmem:[#allocation6 + $0xc0] ss:$16 sps:$4 sm:$0xff]  }
 0xeea   :  { %7737 = vmatpush1.bf16.msra.mxu0 %v16798_v31  ;;  %7778 = vmatpush1.bf16.msra.mxu1 %v16800_v7  ;;  %v18849_v31 = vld [vmem:[#allocation51_spill] sm:$0xff]  ;;  %v18850_v7 = vld [vmem:[#allocation52_spill] sm:$0xff]  ;;  %18860 = vst [vmem:[#allocation110_spill] sm:$0xff] %v17110_v12 }
 0xeeb   :  { %v16965_v52 = vadd.f32 %v7261_v56, %v7260_v9  ;;  %7738 = vmatprep.subr.bf16.mxu0 %v16804_v39  ;;  %7779 = vmatprep.subr.bf16.mxu1 %v16806_v47  ;;  %v18852_v39 = vld [vmem:[#allocation54_spill] sm:$0xff]  ;;  %v18853_v47 = vld [vmem:[#allocation55_spill] sm:$0xff] }
 0xeec   :  { %v17118_v56 = vld [vmem:[#allocation6 + $0xa4] ss:$16 sps:$4 sm:$0xff]   ;;  %v17120_v9 = vld [vmem:[#allocation6 + $0xac] ss:$16 sps:$4 sm:$0xff]  }
 0xeed   :  { %14088 = vtanh.f32 %v16965_v52  ;;  %v14087_v22 = vpop.eup %14086  ;;  %18862 = vst [vmem:[#allocation32_spill] sm:$0xff] %v17118_v56  ;;  %18863 = vst [vmem:[#allocation69_spill] sm:$0xff] %v17120_v9 }
 0xeee   :  { %7739 = vmatpush1.bf16.msra.mxu0 %v16811_v41  ;;  %7780 = vmatpush1.bf16.msra.mxu1 %v18846_v36  ;;  %v18856_v41 = vld [vmem:[#allocation58_spill] sm:$0xff] }
 0xeef   :  { %7740 = vmatprep.subr.bf16.mxu0 %v18847_v51  ;;  %7781 = vmatprep.subr.bf16.mxu1 %v18848_v63  ;;  %v17122_v36 = vld [vmem:[#allocation6 + $0xa0] ss:$16 sps:$4 sm:$0xff]   ;;  %v17124_v51 = vld [vmem:[#allocation6 + $0xa8] ss:$16 sps:$4 sm:$0xff]   ;;  %v17130_v63 = vld [vmem:[#allocation6 + $0x84] ss:$16 sps:$4 sm:$0xff]  }
 0xef0   :  { %18864 = vst [vmem:[#allocation94_spill] sm:$0xff] %v17122_v36  ;;  %18865 = vst [vmem:[#allocation92_spill] sm:$0xff] %v17124_v51 }
 0xef1   :  { %18866 = vst [vmem:[#allocation79_spill] sm:$0xff] %v17130_v63 }
 0xef2   :  { %7741 = vmatpush1.bf16.msra.mxu0 %v18849_v31  ;;  %7782 = vmatpush1.bf16.msra.mxu1 %v18850_v7  ;;  %v17132_v31 = vld [vmem:[#allocation6 + $0x8c] ss:$16 sps:$4 sm:$0xff]   ;;  %v17134_v7 = vld [vmem:[#allocation6 + $0x80] ss:$16 sps:$4 sm:$0xff]  }
 0xef3   :  { %7742 = vmatprep.subr.bf16.mxu0 %v18851_v24  ;;  %7783 = vmatprep.subr.bf16.mxu1 %v18852_v39  ;;  %18867 = vst [vmem:[#allocation103_spill] sm:$0xff] %v17132_v31  ;;  %18868 = vst [vmem:[#allocation65_spill] sm:$0xff] %v17134_v7  ;;  %v17136_v24 = vld [vmem:[#allocation6 + $0x88] ss:$16 sps:$4 sm:$0xff]   ;;  %v17142_v39 = vld [vmem:[#allocation6 + $0x64] ss:$16 sps:$4 sm:$0xff]  }
 0xef4   :  { %18869 = vst [vmem:[#allocation66_spill] sm:$0xff] %v17136_v24  ;;  %18870 = vst [vmem:[#allocation67_spill] sm:$0xff] %v17142_v39 }
 0xef6   :  { %7743 = vmatpush1.bf16.msra.mxu0 %v18853_v47  ;;  %7784 = vmatpush1.bf16.msra.mxu1 %v18854_v5  ;;  %v17144_v47 = vld [vmem:[#allocation6 + $0x6c] ss:$16 sps:$4 sm:$0xff]   ;;  %v17146_v5 = vld [vmem:[#allocation6 + $0x60] ss:$16 sps:$4 sm:$0xff]  }
 0xef7   :  { %7744 = vmatprep.subr.bf16.mxu0 %v18855_v46  ;;  %7785 = vmatprep.subr.bf16.mxu1 %v18856_v41  ;;  %18871 = vst [vmem:[#allocation70_spill] sm:$0xff] %v17144_v47  ;;  %18872 = vst [vmem:[#allocation71_spill] sm:$0xff] %v17146_v5  ;;  %v17148_v46 = vld [vmem:[#allocation6 + $0x68] ss:$16 sps:$4 sm:$0xff]   ;;  %v17154_v41 = vld [vmem:[#allocation6 + $0x44] ss:$16 sps:$4 sm:$0xff]  }
 0xef8   :  { %18873 = vst [vmem:[#allocation72_spill] sm:$0xff] %v17148_v46  ;;  %18874 = vst [vmem:[#allocation100_spill] sm:$0xff] %v17154_v41 }
 0xefa   :  { %v14089_v25 = vpop.eup %14088  ;;  %7745 = vmatpush1.bf16.msra.mxu0 %v16850_v13  ;;  %7786 = vmatpush1.bf16.msra.mxu1 %v16852_v44  ;;  %v16996_v13 = vld [vmem:[#allocation4 + $0xe8] ss:$16 sps:$4 sm:$0xff]   ;;  %v17000_v44 = vld [vmem:[#allocation4 + $0xc4] ss:$16 sps:$4 sm:$0xff]  }
 0xefb   :  { %7746 = vmatprep.subr.bf16.mxu0 %v16856_v50  ;;  %7787 = vmatprep.subr.bf16.mxu1 %v16858_v57  ;;  %v7264_v34 = vmul.f32 %v14089_v25, %v14087_v22  ;;  %v17002_v50 = vld [vmem:[#allocation4 + $0xcc] ss:$16 sps:$4 sm:$0xff]   ;;  %v17008_v57 = vld [vmem:[#allocation4 + $0xc0] ss:$16 sps:$4 sm:$0xff]  }
 0xefc   :  { %v17156_v22 = vld [vmem:[#allocation6 + $0x4c] ss:$16 sps:$4 sm:$0xff]   ;;  %v17158_v25 = vld [vmem:[#allocation6 + $0x40] ss:$16 sps:$4 sm:$0xff]  }
 0xefd   :  { %v16990_v26 = vpack.c.bf16 %v7264_v34, %v7264_v34  ;;  %18875 = vst [vmem:[#allocation88_spill] sm:$0xff] %v17156_v22  ;;  %18876 = vst [vmem:[#allocation90_spill] sm:$0xff] %v17158_v25  ;;  %v17160_v34 = vld [vmem:[#allocation6 + $0x48] ss:$16 sps:$4 sm:$0xff]  }
 0xefe   :  { %7747 = vmatpush1.bf16.msra.mxu0 %v16862_v33  ;;  %7788 = vmatpush1.bf16.msra.mxu1 %v16864_v35  ;;  %v17010_v33 = vld [vmem:[#allocation4 + $0xc8] ss:$16 sps:$4 sm:$0xff]   ;;  %v17014_v35 = vld [vmem:[#allocation4 + $0xa4] ss:$16 sps:$4 sm:$0xff]   ;;  %18877 = vst [vmem:[#allocation101_spill] sm:$0xff] %v17160_v34 }
 0xeff   :  { %8043 = vmatprep.subr.bf16.mxu0 %v16986_v19  ;;  %8084 = vmatprep.subr.bf16.mxu1 %v16988_v10 }
 0xf01   :  { %7765 = vmatmul.mubr.bf16.vlgmr.msra.gmra.mxu0 %v16990_v26  ;;  %7806 = vmatmul.mubr.bf16.vlgmr.msra.gmra.mxu1 %v16990_v26 }
 0xf02   :  { %8044 = vmatpush1.bf16.msra.mxu0 %v16994_v29  ;;  %8085 = vmatpush1.bf16.msra.mxu1 %v16996_v13 }
 0xf03   :  { %8045 = vmatprep.subr.bf16.mxu0 %v17000_v44  ;;  %8086 = vmatprep.subr.bf16.mxu1 %v17002_v50 }
 0xf04   :  { %8075 = vmatprep.mubr.bf16.mxu0 %v18403_v11  ;;  %8116 = vmatprep.mubr.bf16.mxu1 %v18403_v11 }
 0xf06   :  { %8046 = vmatpush1.bf16.msra.mxu0 %v17008_v57  ;;  %8087 = vmatpush1.bf16.msra.mxu1 %v17010_v33 }
 0xf07   :  { %8047 = vmatprep.subr.bf16.mxu0 %v17014_v35  ;;  %8088 = vmatprep.subr.bf16.mxu1 %v17016_v60 }
 0xf0a   :  { %8048 = vmatpush1.bf16.msra.mxu0 %v17022_v20  ;;  %8089 = vmatpush1.bf16.msra.mxu1 %v17024_v21 }
 0xf0b   :  { %8049 = vmatprep.subr.bf16.mxu0 %v17028_v62  ;;  %8090 = vmatprep.subr.bf16.mxu1 %v17030_v53 }
 0xf0e   :  { %8050 = vmatpush1.bf16.msra.mxu0 %v17034_v30  ;;  %8091 = vmatpush1.bf16.msra.mxu1 %v17036_v32 }
 0xf0f   :  { %8051 = vmatprep.subr.bf16.mxu0 %v17040_v58  ;;  %8092 = vmatprep.subr.bf16.mxu1 %v17042_v48 }
 0xf12   :  { %8052 = vmatpush1.bf16.msra.mxu0 %v17046_v14  ;;  %8093 = vmatpush1.bf16.msra.mxu1 %v17048_v3 }
 0xf13   :  { %8053 = vmatprep.subr.bf16.mxu0 %v17052_v38  ;;  %8094 = vmatprep.subr.bf16.mxu1 %v17054_v42 }
 0xf16   :  { %8054 = vmatpush1.bf16.msra.mxu0 %v17058_v8  ;;  %8095 = vmatpush1.bf16.msra.mxu1 %v17060_v28 }
 0xf17   :  { %8055 = vmatprep.subr.bf16.mxu0 %v17064_v17  ;;  %8096 = vmatprep.subr.bf16.mxu1 %v17066_v45 }
 0xf1a   :  { %8056 = vmatpush1.bf16.msra.mxu0 %v17070_v15  ;;  %8097 = vmatpush1.bf16.msra.mxu1 %v17072_v4 }
 0xf1b   :  { %8057 = vmatprep.subr.bf16.mxu0 %v17076_v6  ;;  %8098 = vmatprep.subr.bf16.mxu1 %v17078_v18 }
 0xf1e   :  { %8058 = vmatpush1.bf16.msra.mxu0 %v17082_v2  ;;  %8099 = vmatpush1.bf16.msra.mxu1 %v17084_v61 }
 0xf1f   :  { %8378 = vmatprep.subr.bf16.mxu0 %v17094_v1  ;;  %8419 = vmatprep.subr.bf16.mxu1 %v17096_v23 }
 0xf21   :  { %8076 = vmatmul.mubr.bf16.vlgmr.msra.gmra.mxu0 %v16990_v26  ;;  %8117 = vmatmul.mubr.bf16.vlgmr.msra.gmra.mxu1 %v16990_v26  ;;  %v17166_v26 = vld [vmem:[#allocation6 + $0x24] ss:$16 sps:$4 sm:$0xff]  }
 0xf22   :  { %8410 = vmatprep.mubr.bf16.mxu0 %v18403_v11  ;;  %8451 = vmatprep.mubr.bf16.mxu1 %v18403_v11  ;;  %18878 = vst [vmem:[#allocation59_spill] sm:$0xff] %v17166_v26 }
 0xf23   :  { %8379 = vmatpush1.bf16.msra.mxu0 %v17098_v16  ;;  %8420 = vmatpush1.bf16.msra.mxu1 %v17100_v43 }
 0xf24   :  { %8380 = vmatprep.subr.bf16.mxu0 %v17106_v54  ;;  %8421 = vmatprep.subr.bf16.mxu1 %v17108_v55 }
 0xf27   :  { %8381 = vmatpush1.bf16.msra.mxu0 %v17110_v12  ;;  %8422 = vmatpush1.bf16.msra.mxu1 %v17112_v37 }
 0xf28   :  { %8382 = vmatprep.subr.bf16.mxu0 %v17118_v56  ;;  %8423 = vmatprep.subr.bf16.mxu1 %v17120_v9 }
 0xf2b   :  { %8383 = vmatpush1.bf16.msra.mxu0 %v17122_v36  ;;  %8424 = vmatpush1.bf16.msra.mxu1 %v17124_v51 }
 0xf2c   :  { %8384 = vmatprep.subr.bf16.mxu0 %v17130_v63  ;;  %8425 = vmatprep.subr.bf16.mxu1 %v17132_v31 }
 0xf2f   :  { %8385 = vmatpush1.bf16.msra.mxu0 %v17134_v7  ;;  %8426 = vmatpush1.bf16.msra.mxu1 %v17136_v24 }
 0xf30   :  { %8386 = vmatprep.subr.bf16.mxu0 %v17142_v39  ;;  %8427 = vmatprep.subr.bf16.mxu1 %v17144_v47  ;;  %v17172_v47 = vld [vmem:[#allocation6 + $0x28] ss:$16 sps:$4 sm:$0xff]  }
 0xf31   :  { %18881 = vst [vmem:[#allocation81_spill] sm:$0xff] %v17172_v47 }
 0xf33   :  { %8387 = vmatpush1.bf16.msra.mxu0 %v17146_v5  ;;  %8428 = vmatpush1.bf16.msra.mxu1 %v17148_v46  ;;  %v17168_v5 = vld [vmem:[#allocation6 + $0x2c] ss:$16 sps:$4 sm:$0xff]   ;;  %v17170_v46 = vld [vmem:[#allocation6 + $0x20] ss:$16 sps:$4 sm:$0xff]  }
 0xf34   :  { %8388 = vmatprep.subr.bf16.mxu0 %v17154_v41  ;;  %8429 = vmatprep.subr.bf16.mxu1 %v17156_v22  ;;  %18879 = vst [vmem:[#allocation60_spill] sm:$0xff] %v17168_v5  ;;  %18880 = vst [vmem:[#allocation61_spill] sm:$0xff] %v17170_v46  ;;  %v17178_v22 = vld [vmem:[#allocation6 + $0x4] ss:$16 sps:$4 sm:$0xff]   ;;  %v17184_v41 = vld [vmem:[#allocation6 + $0x8] ss:$16 sps:$4 sm:$0xff]  }
 0xf35   :  { %18882 = vst [vmem:[#allocation104_spill] sm:$0xff] %v17178_v22  ;;  %18885 = vst [vmem:[#allocation64_spill] sm:$0xff] %v17184_v41 }
 0xf37   :  { %8389 = vmatpush1.bf16.msra.mxu0 %v17158_v25  ;;  %8430 = vmatpush1.bf16.msra.mxu1 %v17160_v34  ;;  %v17180_v25 = vld [vmem:[#allocation6 + $0xc] ss:$16 sps:$4 sm:$0xff]   ;;  %v17182_v34 = vld [vmem:[#allocation6] ss:$16 sps:$4 sm:$0xff]  }
 0xf38   :  { %8390 = vmatprep.subr.bf16.mxu0 %v17166_v26  ;;  %8431 = vmatprep.subr.bf16.mxu1 %v17168_v5  ;;  %18883 = vst [vmem:[#allocation62_spill] sm:$0xff] %v17180_v25  ;;  %18884 = vst [vmem:[#allocation63_spill] sm:$0xff] %v17182_v34  ;;  %v17190_v5 = vld [vmem:[#allocation5 + $0xe4] ss:$16 sps:$4 sm:$0xff]  }
 0xf39   :  { %18886 = vst [vmem:[#allocation86_spill] sm:$0xff] %v17190_v5 }
 0xf3b   :  { %8391 = vmatpush1.bf16.msra.mxu0 %v17170_v46  ;;  %8432 = vmatpush1.bf16.msra.mxu1 %v17172_v47  ;;  %v17192_v46 = vld [vmem:[#allocation5 + $0xec] ss:$16 sps:$4 sm:$0xff]  }
 0xf3c   :  { %8392 = vmatprep.subr.bf16.mxu0 %v17178_v22  ;;  %8433 = vmatprep.subr.bf16.mxu1 %v17180_v25  ;;  %18887 = vst [vmem:[#allocation99_spill] sm:$0xff] %v17192_v46 }
 0xf3f   :  { %8393 = vmatpush1.bf16.msra.mxu0 %v17182_v34  ;;  %8434 = vmatpush1.bf16.msra.mxu1 %v17184_v41 }
 0xf40   :  { %8620 = vmatprep.subr.bf16.mxu0 %v17190_v5  ;;  %8661 = vmatprep.subr.bf16.mxu1 %v17192_v46 }
 0xfa1   :  { %v7524_v47 = vpop.f32.mrf.mxu0  ;;  %v7565_v26 = vpop.f32.mrf.mxu1 }
 0xfa3   :  { %v7526_v39 = vpop.f32.mrf.mxu0  ;;  %v7567_v24 = vpop.f32.mrf.mxu1 }
 0xfa5   :  { %v7528_v7 = vpop.f32.mrf.mxu0  ;;  %v7569_v22 = vpop.f32.mrf.mxu1 }
 0xfa7   :  { %v7529_v31 = vpop.f32.mrf.mxu0  ;;  %v7570_v25 = vpop.f32.mrf.mxu1 }
 0xfc1   :  { %v7766_v63 = vpop.f32.mrf.mxu0  ;;  %v7807_v34 = vpop.f32.mrf.mxu1 }
 0xfc2   :  { %v7767_v51 = vadd.f32 %v7766_v63, %v7524_v47  ;;  %v7808_v25 = vadd.f32 %v7807_v34, %v7565_v26 }
 0xfc3   :  { %v7768_v41 = vpop.f32.mrf.mxu0  ;;  %v7809_v36 = vpop.f32.mrf.mxu1 }
 0xfc4   :  { %v7814_v9 = vadd.f32 %v7767_v51, %v16489_v49  ;;  %v7769_v56 = vadd.f32 %v7768_v41, %v7526_v39  ;;  %v7810_v31 = vadd.f32 %v7809_v36, %v7567_v24  ;;  %v7816_v43 = vadd.f32 %v7808_v25, %v16507_v40 }
 0xfc5   :  { %v7770_v37 = vpop.f32.mrf.mxu0  ;;  %v7811_v5 = vpop.f32.mrf.mxu1 }
 0xfc6   :  { %v12271_v12 = vmul.f32 -1.442695, %v7814_v9  ;;  %v7815_v46 = vadd.f32 %v7769_v56, %v16494_v27  ;;  %v7817_v22 = vadd.f32 %v7810_v31, %v16501_v59 }
 0xfc7   :  { %v7771_v55 = vpop.f32.mrf.mxu0  ;;  %v7812_v54 = vpop.f32.mrf.mxu1 }
 0xfc8   :  { %14090 = vpow2.f32 %v12271_v12  ;;  %v12272_v7 = vmul.f32 -1.442695, %v7815_v46  ;;  %v12273_v63 = vmul.f32 -1.442695, %v7817_v22  ;;  %v18888_v55 = vld [vmem:[#allocation85_spill] sm:$0xff] }
 0xfc9   :  { %v7847_v54 = vunpack.c.l.bf16 %v18888_v55  ;;  %v7848_v12 = vunpack.c.h.bf16 %v18888_v55  ;;  %v18889_v55 = vld [vmem:[#allocation106_spill] sm:$0xff] }
 0xfca   :  { %14092 = vpow2.f32 %v12272_v7 }
 0xfcb   :  { %14094 = vpow2.f32 %v12273_v63 }
 0xfd5   :  { %v14091_v47 = vpop.eup %14090 }
 0xfd6   :  { %v7821_v51 = vadd.f32 1.0, %v14091_v47 }
 0xfd7   :  { %v14093_v39 = vpop.eup %14092 }
 0xfd8   :  { %14096 = vrcp.f32 %v7821_v51  ;;  %v7827_v37 = vadd.f32 1.0, %v14093_v39  ;;  %v14095_v46 = vpop.eup %14094 }
 0xfd9   :  { %14098 = vtanh.f32 %v7816_v43  ;;  %v7834_v63 = vadd.f32 1.0, %v14095_v46 }
 0xfda   :  { %14100 = vrcp.f32 %v7827_v37 }
 0xfe1   :  { %v8077_v56 = vpop.f32.mrf.mxu0  ;;  %v8118_v9 = vpop.f32.mrf.mxu1 }
 0xfe2   :  { %v8125_v36 = vadd.f32 %v8077_v56, %v7847_v54  ;;  %v7850_v54 = vunpack.c.h.bf16 %v18889_v55 }
 0xfe3   :  { %v8079_v24 = vpop.f32.mrf.mxu0  ;;  %v8120_v5 = vpop.f32.mrf.mxu1 }
 0xfe4   :  { %v12306_v41 = vmul.f32 -1.442695, %v8125_v36  ;;  %v8126_v34 = vadd.f32 %v8079_v24, %v7848_v12  ;;  %v8128_v12 = vadd.f32 %v8120_v5, %v7850_v54  ;;  %v7849_v36 = vunpack.c.l.bf16 %v18889_v55 }
 0xfe5   :  { %v14097_v26 = vpop.eup %14096  ;;  %v8081_v7 = vpop.f32.mrf.mxu0 }
 0xfe6   :  { %v8122_v31 = vpop.f32.mrf.mxu1  ;;  %v14099_v22 = vpop.eup %14098  ;;  %14102 = vpow2.f32 %v12306_v41  ;;  %v12307_v25 = vmul.f32 -1.442695, %v8126_v34  ;;  %v12308_v24 = vmul.f32 -1.442695, %v8128_v12  ;;  %v8127_v34 = vadd.f32 %v8118_v9, %v7849_v36  ;;  %v17218_v9 = vld [vmem:[#allocation5 + $0xc0] ss:$16 sps:$4 sm:$0xff]  }
 0xfe7   :  { %v14101_v43 = vpop.eup %14100  ;;  %v8082_v47 = vpop.f32.mrf.mxu0  ;;  %v7838_v39 = vmul.f32 %v14099_v22, %v14097_v26  ;;  %v17232_v12 = vld [vmem:[#allocation5 + $0xa0] ss:$16 sps:$4 sm:$0xff]   ;;  %v17234_v36 = vld [vmem:[#allocation5 + $0xa8] ss:$16 sps:$4 sm:$0xff]  }
 0xfe8   :  { %v8123_v51 = vpop.f32.mrf.mxu1  ;;  %v7837_v37 = vmul.f32 %v14101_v43, %v16948_v0  ;;  %14104 = vpow2.f32 %v12307_v25  ;;  %v17208_v25 = vld [vmem:[#allocation5 + $0xe0] ss:$16 sps:$4 sm:$0xff]   ;;  %v17210_v43 = vld [vmem:[#allocation5 + $0xe8] ss:$16 sps:$4 sm:$0xff]   ;;  %v17214_v47 = vld [vmem:[#allocation5 + $0xcc] ss:$16 sps:$4 sm:$0xff]  }
 0xfe9   :  { %14106 = vrcp.f32 %v7834_v63  ;;  %v17212_v63 = vld [vmem:[#allocation5 + $0xc4] ss:$16 sps:$4 sm:$0xff]   ;;  %v17220_v51 = vld [vmem:[#allocation5 + $0xc8] ss:$16 sps:$4 sm:$0xff]  }
 0xfea   :  { %v17204_v56 = vadd.f32 %v7838_v39, %v7837_v37  ;;  %v17224_v39 = vld [vmem:[#allocation5 + $0xa4] ss:$16 sps:$4 sm:$0xff]   ;;  %v17226_v37 = vld [vmem:[#allocation5 + $0xac] ss:$16 sps:$4 sm:$0xff]  }
 0xfeb   :  { %18890 = vst [vmem:[#allocation82_spill] sm:$0xff] %v17226_v37 }
 0xfec   :  { %14108 = vtanh.f32 %v17204_v56 }
 0xfed   :  { %14110 = vpow2.f32 %v12308_v24 }
 0xff3   :  { %v14103_v41 = vpop.eup %14102 }
 0xff4   :  { %v8132_v46 = vadd.f32 1.0, %v14103_v41  ;;  %v17238_v41 = vld [vmem:[#allocation5 + $0x84] ss:$16 sps:$4 sm:$0xff]  }
 0xff5   :  { %v14105_v7 = vpop.eup %14104 }
 0xff6   :  { %14112 = vrcp.f32 %v8132_v46  ;;  %v8138_v26 = vadd.f32 1.0, %v14105_v7  ;;  %v14107_v0 = vpop.eup %14106 }
 0xff7   :  { %14114 = vtanh.f32 %v8127_v34  ;;  %v17240_v34 = vld [vmem:[#allocation5 + $0x8c] ss:$16 sps:$4 sm:$0xff]  }
 0xff8   :  { %14116 = vrcp.f32 %v8138_v26 }
 0xff9   :  { %v14109_v31 = vpop.eup %14108 }
 0xffa   :  { %v7841_v22 = vmul.f32 %v14109_v31, %v14107_v0  ;;  %v14111_v55 = vpop.eup %14110  ;;  %v17245_v31 = vld [vmem:[#allocation5 + $0x80] ss:$16 sps:$4 sm:$0xff]  }
 0xffb   :  { %v8145_v7 = vadd.f32 1.0, %v14111_v55  ;;  %v17255_v55 = vld [vmem:[#allocation5 + $0x6c] ss:$16 sps:$4 sm:$0xff]  }
 0xffc   :  { %v7842_v5 = vpack.c.bf16 %v7841_v22, %v7841_v22  ;;  %v17247_v22 = vld [vmem:[#allocation5 + $0x88] ss:$16 sps:$4 sm:$0xff]   ;;  %18893 = vst [vmem:[#allocation98_spill] sm:$0xff] %v17255_v55 }
 0xffd   :  { %18891 = vst [vmem:[#allocation97_spill] sm:$0xff] %v17247_v22  ;;  %14118 = vrcp.f32 %v8145_v7  ;;  %v17272_v7 = vld [vmem:[#allocation5 + $0x40] ss:$16 sps:$4 sm:$0xff]  }
 0xffe   :  { %7844 = vst [vmem:[#allocation3 + $0xc] sm:$0xf] %v7842_v5  ;;  %8411 = vmatmul.mubr.bf16.vlgmr.msra.gmra.mxu0 %v7842_v5  ;;  %8452 = vmatmul.mubr.bf16.vlgmr.msra.gmra.mxu1 %v7842_v5  ;;  %18898 = vst [vmem:[#allocation77_spill] sm:$0xff] %v17272_v7 }
 0xfff   :  { %8621 = vmatpush1.bf16.msra.mxu0 %v17208_v25  ;;  %8662 = vmatpush1.bf16.msra.mxu1 %v17210_v43 }
0x1000   :  { %8622 = vmatprep.subr.bf16.mxu0 %v17212_v63  ;;  %8663 = vmatprep.subr.bf16.mxu1 %v17214_v47 }
0x1001   :  { %8652 = vmatprep.mubr.bf16.mxu0 %v18403_v11  ;;  %8693 = vmatprep.mubr.bf16.mxu1 %v18403_v11 }
0x1003   :  { %v14113_v54 = vpop.eup %14112  ;;  %8623 = vmatpush1.bf16.msra.mxu0 %v17218_v9  ;;  %8664 = vmatpush1.bf16.msra.mxu1 %v17220_v51 }
0x1004   :  { %v14115_v24 = vpop.eup %14114  ;;  %8624 = vmatprep.subr.bf16.mxu0 %v17224_v39  ;;  %8665 = vmatprep.subr.bf16.mxu1 %v17226_v37  ;;  %v17253_v37 = vld [vmem:[#allocation5 + $0x64] ss:$16 sps:$4 sm:$0xff]  }
0x1005   :  { %v14117_v46 = vpop.eup %14116  ;;  %v8149_v26 = vmul.f32 %v14115_v24, %v14113_v54  ;;  %18892 = vst [vmem:[#allocation84_spill] sm:$0xff] %v17253_v37  ;;  %v17262_v54 = vld [vmem:[#allocation5 + $0x68] ss:$16 sps:$4 sm:$0xff]   ;;  %v17266_v24 = vld [vmem:[#allocation5 + $0x44] ss:$16 sps:$4 sm:$0xff]  }
0x1006   :  { %v8148_v0 = vmul.f32 %v14117_v46, %v16965_v52  ;;  %v17260_v52 = vld [vmem:[#allocation5 + $0x60] ss:$16 sps:$4 sm:$0xff]   ;;  %18895 = vst [vmem:[#allocation74_spill] sm:$0xff] %v17262_v54  ;;  %18896 = vst [vmem:[#allocation75_spill] sm:$0xff] %v17266_v24  ;;  %v17268_v46 = vld [vmem:[#allocation5 + $0x4c] ss:$16 sps:$4 sm:$0xff]  }
0x1007   :  { %8625 = vmatpush1.bf16.msra.mxu0 %v17232_v12  ;;  %8666 = vmatpush1.bf16.msra.mxu1 %v17234_v36  ;;  %18894 = vst [vmem:[#allocation73_spill] sm:$0xff] %v17260_v52  ;;  %18897 = vst [vmem:[#allocation76_spill] sm:$0xff] %v17268_v46 }
0x1008   :  { %v17249_v5 = vadd.f32 %v8149_v26, %v8148_v0  ;;  %8626 = vmatprep.subr.bf16.mxu0 %v17238_v41  ;;  %8667 = vmatprep.subr.bf16.mxu1 %v17240_v34  ;;  %v17274_v26 = vld [vmem:[#allocation5 + $0x48] ss:$16 sps:$4 sm:$0xff]   ;;  %v17278_v0 = vld [vmem:[#allocation5 + $0x24] ss:$16 sps:$4 sm:$0xff]  }
0x1009   :  { %18899 = vst [vmem:[#allocation78_spill] sm:$0xff] %v17274_v26  ;;  %18900 = vst [vmem:[#allocation33_spill] sm:$0xff] %v17278_v0 }
0x100a   :  { %14120 = vtanh.f32 %v17249_v5 }
0x100b   :  { %8627 = vmatpush1.bf16.msra.mxu0 %v17245_v31  ;;  %8668 = vmatpush1.bf16.msra.mxu1 %v17247_v22 }
0x100c   :  { %8628 = vmatprep.subr.bf16.mxu0 %v17253_v37  ;;  %8669 = vmatprep.subr.bf16.mxu1 %v17255_v55  ;;  %v17280_v37 = vld [vmem:[#allocation5 + $0x2c] ss:$16 sps:$4 sm:$0xff]   ;;  %v17284_v55 = vld [vmem:[#allocation5 + $0x20] ss:$16 sps:$4 sm:$0xff]  }
0x100d   :  { %18901 = vst [vmem:[#allocation35_spill] sm:$0xff] %v17280_v37 }
0x100f   :  { %8629 = vmatpush1.bf16.msra.mxu0 %v17260_v52  ;;  %8670 = vmatpush1.bf16.msra.mxu1 %v17262_v54  ;;  %v17286_v52 = vld [vmem:[#allocation5 + $0x28] ss:$16 sps:$4 sm:$0xff]   ;;  %v17290_v54 = vld [vmem:[#allocation5 + $0x4] ss:$16 sps:$4 sm:$0xff]  }
0x1010   :  { %8630 = vmatprep.subr.bf16.mxu0 %v17266_v24  ;;  %8671 = vmatprep.subr.bf16.mxu1 %v17268_v46  ;;  %v17292_v24 = vld [vmem:[#allocation5 + $0xc] ss:$16 sps:$4 sm:$0xff]   ;;  %v14119_v46 = vpop.eup %14118 }
0x1013   :  { %8631 = vmatpush1.bf16.msra.mxu0 %v17272_v7  ;;  %8672 = vmatpush1.bf16.msra.mxu1 %v17274_v26  ;;  %v17296_v7 = vld [vmem:[#allocation5] ss:$16 sps:$4 sm:$0xff]   ;;  %v17298_v26 = vld [vmem:[#allocation5 + $0x8] ss:$16 sps:$4 sm:$0xff]  }
0x1014   :  { %8632 = vmatprep.subr.bf16.mxu0 %v17278_v0  ;;  %8673 = vmatprep.subr.bf16.mxu1 %v17280_v37 }
0x1017   :  { %v14121_v22 = vpop.eup %14120  ;;  %8633 = vmatpush1.bf16.msra.mxu0 %v17284_v55  ;;  %8674 = vmatpush1.bf16.msra.mxu1 %v17286_v52 }
0x1018   :  { %8634 = vmatprep.subr.bf16.mxu0 %v17290_v54  ;;  %8675 = vmatprep.subr.bf16.mxu1 %v17292_v24  ;;  %v8152_v0 = vmul.f32 %v14121_v22, %v14119_v46 }
0x101a   :  { %v8153_v37 = vpack.c.bf16 %v8152_v0, %v8152_v0 }
0x101b   :  { %8635 = vmatpush1.bf16.msra.mxu0 %v17296_v7  ;;  %8676 = vmatpush1.bf16.msra.mxu1 %v17298_v26 }
0x101c   :  { %8931 = vmatprep.subr.bf16.mxu0 %v16986_v19  ;;  %8972 = vmatprep.subr.bf16.mxu1 %v16988_v10  ;;  %v18902_v19 = vld [vmem:[#allocation93_spill] sm:$0xff]  ;;  %v18903_v10 = vld [vmem:[#allocation102_spill] sm:$0xff] }
0x101e   :  { %8653 = vmatmul.mubr.bf16.vlgmr.msra.gmra.mxu0 %v8153_v37  ;;  %8694 = vmatmul.mubr.bf16.vlgmr.msra.gmra.mxu1 %v8153_v37 }
0x101f   :  { %8932 = vmatpush1.bf16.msra.mxu0 %v16994_v29  ;;  %8973 = vmatpush1.bf16.msra.mxu1 %v16996_v13  ;;  %v18904_v29 = vld [vmem:[#allocation95_spill] sm:$0xff]  ;;  %v18905_v13 = vld [vmem:[#allocation110_spill] sm:$0xff] }
0x1020   :  { %8933 = vmatprep.subr.bf16.mxu0 %v17000_v44  ;;  %8974 = vmatprep.subr.bf16.mxu1 %v17002_v50  ;;  %v18906_v44 = vld [vmem:[#allocation68_spill] sm:$0xff] }
0x1021   :  { %8963 = vmatprep.mubr.bf16.mxu0 %v18403_v11  ;;  %9004 = vmatprep.mubr.bf16.mxu1 %v18403_v11  ;;  %v18907_v50 = vld [vmem:[#allocation32_spill] sm:$0xff] }
0x1023   :  { %8934 = vmatpush1.bf16.msra.mxu0 %v17008_v57  ;;  %8975 = vmatpush1.bf16.msra.mxu1 %v17010_v33  ;;  %v18908_v57 = vld [vmem:[#allocation69_spill] sm:$0xff]  ;;  %v18909_v33 = vld [vmem:[#allocation94_spill] sm:$0xff] }
0x1024   :  { %8935 = vmatprep.subr.bf16.mxu0 %v17014_v35  ;;  %8976 = vmatprep.subr.bf16.mxu1 %v17016_v60  ;;  %v18910_v35 = vld [vmem:[#allocation92_spill] sm:$0xff]  ;;  %v18911_v60 = vld [vmem:[#allocation79_spill] sm:$0xff] }
0x1027   :  { %8936 = vmatpush1.bf16.msra.mxu0 %v17022_v20  ;;  %8977 = vmatpush1.bf16.msra.mxu1 %v17024_v21  ;;  %v18912_v20 = vld [vmem:[#allocation103_spill] sm:$0xff]  ;;  %v18913_v21 = vld [vmem:[#allocation65_spill] sm:$0xff] }
0x1028   :  { %8937 = vmatprep.subr.bf16.mxu0 %v17028_v62  ;;  %8978 = vmatprep.subr.bf16.mxu1 %v17030_v53  ;;  %v18914_v62 = vld [vmem:[#allocation66_spill] sm:$0xff]  ;;  %v18915_v53 = vld [vmem:[#allocation67_spill] sm:$0xff] }
0x102b   :  { %8938 = vmatpush1.bf16.msra.mxu0 %v17034_v30  ;;  %8979 = vmatpush1.bf16.msra.mxu1 %v17036_v32  ;;  %v18916_v30 = vld [vmem:[#allocation70_spill] sm:$0xff]  ;;  %v18917_v32 = vld [vmem:[#allocation71_spill] sm:$0xff] }
0x102c   :  { %8939 = vmatprep.subr.bf16.mxu0 %v17040_v58  ;;  %8980 = vmatprep.subr.bf16.mxu1 %v17042_v48  ;;  %v18918_v58 = vld [vmem:[#allocation72_spill] sm:$0xff] }
0x102d   :  { %v18919_v48 = vld [vmem:[#allocation100_spill] sm:$0xff] }
0x102f   :  { %8940 = vmatpush1.bf16.msra.mxu0 %v17046_v14  ;;  %8981 = vmatpush1.bf16.msra.mxu1 %v17048_v3  ;;  %v18920_v14 = vld [vmem:[#allocation88_spill] sm:$0xff]  ;;  %v18921_v3 = vld [vmem:[#allocation90_spill] sm:$0xff] }
0x1030   :  { %8941 = vmatprep.subr.bf16.mxu0 %v17052_v38  ;;  %8982 = vmatprep.subr.bf16.mxu1 %v17054_v42  ;;  %v18922_v38 = vld [vmem:[#allocation101_spill] sm:$0xff]  ;;  %v18923_v42 = vld [vmem:[#allocation59_spill] sm:$0xff] }
0x1033   :  { %8942 = vmatpush1.bf16.msra.mxu0 %v17058_v8  ;;  %8983 = vmatpush1.bf16.msra.mxu1 %v17060_v28  ;;  %v18924_v8 = vld [vmem:[#allocation60_spill] sm:$0xff]  ;;  %v18925_v28 = vld [vmem:[#allocation61_spill] sm:$0xff] }
0x1034   :  { %8943 = vmatprep.subr.bf16.mxu0 %v17064_v17  ;;  %8984 = vmatprep.subr.bf16.mxu1 %v17066_v45  ;;  %v18926_v17 = vld [vmem:[#allocation81_spill] sm:$0xff]  ;;  %v18927_v45 = vld [vmem:[#allocation104_spill] sm:$0xff] }
0x1037   :  { %8944 = vmatpush1.bf16.msra.mxu0 %v17070_v15  ;;  %8985 = vmatpush1.bf16.msra.mxu1 %v17072_v4  ;;  %v18928_v15 = vld [vmem:[#allocation62_spill] sm:$0xff]  ;;  %v18929_v4 = vld [vmem:[#allocation63_spill] sm:$0xff] }
0x1038   :  { %8945 = vmatprep.subr.bf16.mxu0 %v17076_v6  ;;  %8986 = vmatprep.subr.bf16.mxu1 %v17078_v18  ;;  %v18930_v6 = vld [vmem:[#allocation64_spill] sm:$0xff]  ;;  %v18931_v18 = vld [vmem:[#allocation86_spill] sm:$0xff] }
0x103b   :  { %8946 = vmatpush1.bf16.msra.mxu0 %v17082_v2  ;;  %8987 = vmatpush1.bf16.msra.mxu1 %v17084_v61  ;;  %v18932_v2 = vld [vmem:[#allocation99_spill] sm:$0xff] }
0x103c   :  { %9266 = vmatprep.subr.bf16.mxu0 %v17094_v1  ;;  %9307 = vmatprep.subr.bf16.mxu1 %v17096_v23 }
0x103e   :  { %8964 = vmatmul.mubr.bf16.vlgmr.msra.gmra.mxu0 %v8153_v37  ;;  %9005 = vmatmul.mubr.bf16.vlgmr.msra.gmra.mxu1 %v8153_v37 }
0x103f   :  { %9267 = vmatpush1.bf16.msra.mxu0 %v17098_v16  ;;  %9308 = vmatpush1.bf16.msra.mxu1 %v18902_v19 }
0x1040   :  { %9268 = vmatprep.subr.bf16.mxu0 %v18903_v10  ;;  %9309 = vmatprep.subr.bf16.mxu1 %v18904_v29 }
0x1041   :  { %9298 = vmatprep.mubr.bf16.mxu0 %v18403_v11  ;;  %9339 = vmatprep.mubr.bf16.mxu1 %v18403_v11 }
0x1043   :  { %9269 = vmatpush1.bf16.msra.mxu0 %v18905_v13  ;;  %9310 = vmatpush1.bf16.msra.mxu1 %v18906_v44 }
0x1044   :  { %9270 = vmatprep.subr.bf16.mxu0 %v18907_v50  ;;  %9311 = vmatprep.subr.bf16.mxu1 %v18908_v57 }
0x1047   :  { %9271 = vmatpush1.bf16.msra.mxu0 %v18909_v33  ;;  %9312 = vmatpush1.bf16.msra.mxu1 %v18910_v35 }
0x1048   :  { %9272 = vmatprep.subr.bf16.mxu0 %v18911_v60  ;;  %9313 = vmatprep.subr.bf16.mxu1 %v18912_v20 }
0x104b   :  { %9273 = vmatpush1.bf16.msra.mxu0 %v18913_v21  ;;  %9314 = vmatpush1.bf16.msra.mxu1 %v18914_v62 }
0x104c   :  { %9274 = vmatprep.subr.bf16.mxu0 %v18915_v53  ;;  %9315 = vmatprep.subr.bf16.mxu1 %v18916_v30 }
0x104f   :  { %9275 = vmatpush1.bf16.msra.mxu0 %v18917_v32  ;;  %9316 = vmatpush1.bf16.msra.mxu1 %v18918_v58 }
0x1050   :  { %9276 = vmatprep.subr.bf16.mxu0 %v18919_v48  ;;  %9317 = vmatprep.subr.bf16.mxu1 %v18920_v14 }
0x1053   :  { %9277 = vmatpush1.bf16.msra.mxu0 %v18921_v3  ;;  %9318 = vmatpush1.bf16.msra.mxu1 %v18922_v38 }
0x1054   :  { %9278 = vmatprep.subr.bf16.mxu0 %v18923_v42  ;;  %9319 = vmatprep.subr.bf16.mxu1 %v18924_v8 }
0x1057   :  { %9279 = vmatpush1.bf16.msra.mxu0 %v18925_v28  ;;  %9320 = vmatpush1.bf16.msra.mxu1 %v18926_v17  ;;  %v18933_v28 = vld [vmem:[#allocation87_spill] sm:$0xff] }
0x1058   :  { %9280 = vmatprep.subr.bf16.mxu0 %v18927_v45  ;;  %9321 = vmatprep.subr.bf16.mxu1 %v18928_v15  ;;  %v8735_v17 = vunpack.c.l.bf16 %v18933_v28  ;;  %v8736_v45 = vunpack.c.h.bf16 %v18933_v28 }
0x105b   :  { %9281 = vmatpush1.bf16.msra.mxu0 %v18929_v4  ;;  %9322 = vmatpush1.bf16.msra.mxu1 %v18930_v6 }
0x105c   :  { %9508 = vmatprep.subr.bf16.mxu0 %v18931_v18  ;;  %9549 = vmatprep.subr.bf16.mxu1 %v18932_v2 }
0x10be   :  { %v8412_v61 = vpop.f32.mrf.mxu0  ;;  %v8453_v1 = vpop.f32.mrf.mxu1 }
0x10c0   :  { %v8414_v23 = vpop.f32.mrf.mxu0  ;;  %v8455_v16 = vpop.f32.mrf.mxu1 }
0x10c2   :  { %v8416_v37 = vpop.f32.mrf.mxu0  ;;  %v8457_v22 = vpop.f32.mrf.mxu1 }
0x10c4   :  { %v8417_v46 = vpop.f32.mrf.mxu0  ;;  %v8458_v0 = vpop.f32.mrf.mxu1 }
0x10de   :  { %v8654_v19 = vpop.f32.mrf.mxu0  ;;  %v8695_v10 = vpop.f32.mrf.mxu1 }
0x10df   :  { %v8655_v29 = vadd.f32 %v8654_v19, %v8412_v61  ;;  %v8696_v58 = vadd.f32 %v8695_v10, %v8453_v1 }
0x10e0   :  { %v8656_v13 = vpop.f32.mrf.mxu0  ;;  %v8697_v44 = vpop.f32.mrf.mxu1 }
0x10e1   :  { %v8702_v50 = vadd.f32 %v8655_v29, %v16489_v49  ;;  %v8657_v57 = vadd.f32 %v8656_v13, %v8414_v23  ;;  %v8698_v30 = vadd.f32 %v8697_v44, %v8455_v16  ;;  %v8704_v3 = vadd.f32 %v8696_v58, %v16507_v40 }
0x10e2   :  { %v8658_v33 = vpop.f32.mrf.mxu0  ;;  %v8699_v35 = vpop.f32.mrf.mxu1 }
0x10e3   :  { %v12373_v60 = vmul.f32 -1.442695, %v8702_v50  ;;  %v8703_v20 = vadd.f32 %v8657_v57, %v16494_v27  ;;  %v8705_v32 = vadd.f32 %v8698_v30, %v16501_v59  ;;  %v18934_v57 = vld [vmem:[#allocation107_spill] sm:$0xff] }
0x10e4   :  { %v8659_v21 = vpop.f32.mrf.mxu0  ;;  %v8700_v62 = vpop.f32.mrf.mxu1  ;;  %v8738_v33 = vunpack.c.h.bf16 %v18934_v57 }
0x10e5   :  { %14122 = vpow2.f32 %v12373_v60  ;;  %v12374_v53 = vmul.f32 -1.442695, %v8703_v20  ;;  %v12375_v48 = vmul.f32 -1.442695, %v8705_v32  ;;  %v8737_v20 = vunpack.c.l.bf16 %v18934_v57  ;;  %v17486_v57 = vld [vmem:[#allocation4 + $0x44] ss:$16 sps:$4 sm:$0xff]  }
0x10e7   :  { %14124 = vpow2.f32 %v12374_v53 }
0x10e8   :  { %14126 = vpow2.f32 %v12375_v48 }
0x10f2   :  { %v14123_v14 = vpop.eup %14122 }
0x10f3   :  { %v8709_v38 = vadd.f32 1.0, %v14123_v14 }
0x10f4   :  { %v14125_v42 = vpop.eup %14124 }
0x10f5   :  { %14128 = vrcp.f32 %v8709_v38  ;;  %v8715_v8 = vadd.f32 1.0, %v14125_v42  ;;  %v14127_v61 = vpop.eup %14126 }
0x10f6   :  { %14130 = vtanh.f32 %v8704_v3  ;;  %v8722_v10 = vadd.f32 1.0, %v14127_v61  ;;  %v17422_v61 = vld [vmem:[#allocation4 + $0xec] ss:$16 sps:$4 sm:$0xff]  }
0x10f7   :  { %14132 = vrcp.f32 %v8715_v8 }
0x10fe   :  { %v8965_v15 = vpop.f32.mrf.mxu0  ;;  %v9006_v4 = vpop.f32.mrf.mxu1 }
0x10ff   :  { %v9013_v6 = vadd.f32 %v8965_v15, %v8735_v17  ;;  %v9015_v53 = vadd.f32 %v9006_v4, %v8737_v20  ;;  %v18945_v15 = vld [vmem:[#allocation33_spill] sm:$0xff] }
0x1100   :  { %v8967_v18 = vpop.f32.mrf.mxu0  ;;  %v9008_v2 = vpop.f32.mrf.mxu1  ;;  %v17494_v20 = vld [vmem:[#allocation4 + $0x48] ss:$16 sps:$4 sm:$0xff]  }
0x1101   :  { %v12408_v1 = vmul.f32 -1.442695, %v9013_v6  ;;  %v9014_v23 = vadd.f32 %v8967_v18, %v8736_v45  ;;  %v9016_v60 = vadd.f32 %v9008_v2, %v8738_v33  ;;  %v18944_v45 = vld [vmem:[#allocation78_spill] sm:$0xff]  ;;  %v17488_v33 = vld [vmem:[#allocation4 + $0x4c] ss:$16 sps:$4 sm:$0xff]  }
0x1102   :  { %v14129_v16 = vpop.eup %14128  ;;  %v8969_v37 = vpop.f32.mrf.mxu0  ;;  %v17420_v2 = vld [vmem:[#allocation4 + $0xe4] ss:$16 sps:$4 sm:$0xff]  }
0x1103   :  { %v9010_v22 = vpop.f32.mrf.mxu1  ;;  %v14131_v46 = vpop.eup %14130  ;;  %14134 = vpow2.f32 %v12408_v1  ;;  %v12409_v0 = vmul.f32 -1.442695, %v9014_v23  ;;  %v12410_v21 = vmul.f32 -1.442695, %v9016_v60  ;;  %v17428_v23 = vld [vmem:[#allocation4 + $0xe0] ss:$16 sps:$4 sm:$0xff]  }
0x1104   :  { %v14133_v19 = vpop.eup %14132  ;;  %v8970_v29 = vpop.f32.mrf.mxu0  ;;  %v8726_v44 = vmul.f32 %v14131_v46, %v14129_v16  ;;  %v17450_v16 = vld [vmem:[#allocation4 + $0xac] ss:$16 sps:$4 sm:$0xff]   ;;  %v17456_v37 = vld [vmem:[#allocation4 + $0xa0] ss:$16 sps:$4 sm:$0xff]   ;;  %v17458_v22 = vld [vmem:[#allocation4 + $0xa8] ss:$16 sps:$4 sm:$0xff]  }
0x1105   :  { %v9011_v13 = vpop.f32.mrf.mxu1  ;;  %v8725_v50 = vmul.f32 %v14133_v19, %v17204_v56  ;;  %14136 = vpow2.f32 %v12409_v0  ;;  %v17462_v46 = vld [vmem:[#allocation4 + $0x84] ss:$16 sps:$4 sm:$0xff]   ;;  %v17464_v0 = vld [vmem:[#allocation4 + $0x8c] ss:$16 sps:$4 sm:$0xff]   ;;  %v17468_v19 = vld [vmem:[#allocation4 + $0x80] ss:$16 sps:$4 sm:$0xff]  }
0x1106   :  { %14138 = vrcp.f32 %v8722_v10  ;;  %v17470_v10 = vld [vmem:[#allocation4 + $0x88] ss:$16 sps:$4 sm:$0xff]   ;;  %v17474_v29 = vld [vmem:[#allocation4 + $0x64] ss:$16 sps:$4 sm:$0xff]   ;;  %v17476_v13 = vld [vmem:[#allocation4 + $0x6c] ss:$16 sps:$4 sm:$0xff]  }
0x1107   :  { %v17382_v35 = vadd.f32 %v8726_v44, %v8725_v50  ;;  %v17480_v44 = vld [vmem:[#allocation4 + $0x60] ss:$16 sps:$4 sm:$0xff]   ;;  %v17482_v50 = vld [vmem:[#allocation4 + $0x68] ss:$16 sps:$4 sm:$0xff]  }
0x1108   :  { %v17492_v60 = vld [vmem:[#allocation4 + $0x40] ss:$16 sps:$4 sm:$0xff]  }
0x1109   :  { %14140 = vtanh.f32 %v17382_v35 }
0x110a   :  { %14142 = vpow2.f32 %v12410_v21  ;;  %v17498_v21 = vld [vmem:[#allocation4 + $0x24] ss:$16 sps:$4 sm:$0xff]  }
0x1110   :  { %v14135_v62 = vpop.eup %14134 }
0x1111   :  { %v9020_v30 = vadd.f32 1.0, %v14135_v62  ;;  %v17500_v62 = vld [vmem:[#allocation4 + $0x2c] ss:$16 sps:$4 sm:$0xff]  }
0x1112   :  { %v14137_v32 = vpop.eup %14136 }
0x1113   :  { %14144 = vrcp.f32 %v9020_v30  ;;  %v9026_v58 = vadd.f32 1.0, %v14137_v32  ;;  %v14139_v56 = vpop.eup %14138  ;;  %v17506_v30 = vld [vmem:[#allocation4 + $0x28] ss:$16 sps:$4 sm:$0xff]   ;;  %v17510_v32 = vld [vmem:[#allocation4 + $0x4] ss:$16 sps:$4 sm:$0xff]  }
0x1114   :  { %14146 = vtanh.f32 %v9015_v53  ;;  %v17504_v53 = vld [vmem:[#allocation4 + $0x20] ss:$16 sps:$4 sm:$0xff]  }
0x1115   :  { %14148 = vrcp.f32 %v9026_v58  ;;  %v17512_v58 = vld [vmem:[#allocation4 + $0xc] ss:$16 sps:$4 sm:$0xff]  }
0x1116   :  { %v14141_v48 = vpop.eup %14140 }
0x1117   :  { %v8729_v14 = vmul.f32 %v14141_v48, %v14139_v56  ;;  %v14143_v38 = vpop.eup %14142  ;;  %v17516_v56 = vld [vmem:[#allocation4] ss:$16 sps:$4 sm:$0xff]   ;;  %v17518_v48 = vld [vmem:[#allocation4 + $0x8] ss:$16 sps:$4 sm:$0xff]  }
0x1118   :  { %v9033_v28 = vadd.f32 1.0, %v14143_v38  ;;  %v17532_v38 = vld [vmem:[#allocation6 + $0xe0] ss:$16 sps:$4 sm:$0xff]  }
0x1119   :  { %v8730_v3 = vpack.c.bf16 %v8729_v14, %v8729_v14  ;;  %v17528_v14 = vld [vmem:[#allocation6 + $0xe4] ss:$16 sps:$4 sm:$0xff]  }
0x111a   :  { %14150 = vrcp.f32 %v9033_v28  ;;  %v17546_v28 = vld [vmem:[#allocation6 + $0xc8] ss:$16 sps:$4 sm:$0xff]  }
0x111b   :  { %8732 = vst [vmem:[#allocation3 + $0x10] sm:$0xf] %v8730_v3  ;;  %9299 = vmatmul.mubr.bf16.vlgmr.msra.gmra.mxu0 %v8730_v3  ;;  %9340 = vmatmul.mubr.bf16.vlgmr.msra.gmra.mxu1 %v8730_v3  ;;  %v17530_v3 = vld [vmem:[#allocation6 + $0xec] ss:$16 sps:$4 sm:$0xff]   ;;  %18951 = vst [vmem:[#allocation38_spill] sm:$0xff] %v17546_v28 }
0x111c   :  { %9509 = vmatpush1.bf16.msra.mxu0 %v17208_v25  ;;  %9550 = vmatpush1.bf16.msra.mxu1 %v17210_v43  ;;  %v18935_v25 = vld [vmem:[#allocation82_spill] sm:$0xff] }
0x111d   :  { %9510 = vmatprep.subr.bf16.mxu0 %v17212_v63  ;;  %9551 = vmatprep.subr.bf16.mxu1 %v17214_v47 }
0x111e   :  { %9540 = vmatprep.mubr.bf16.mxu0 %v18403_v11  ;;  %9581 = vmatprep.mubr.bf16.mxu1 %v18403_v11 }
0x1120   :  { %v14145_v42 = vpop.eup %14144  ;;  %9511 = vmatpush1.bf16.msra.mxu0 %v17218_v9  ;;  %9552 = vmatpush1.bf16.msra.mxu1 %v17220_v51  ;;  %v18936_v9 = vld [vmem:[#allocation97_spill] sm:$0xff]  ;;  %v18937_v51 = vld [vmem:[#allocation84_spill] sm:$0xff] }
0x1121   :  { %v14147_v8 = vpop.eup %14146  ;;  %9512 = vmatprep.subr.bf16.mxu0 %v17224_v39  ;;  %9553 = vmatprep.subr.bf16.mxu1 %v18935_v25  ;;  %v18938_v39 = vld [vmem:[#allocation98_spill] sm:$0xff]  ;;  %v17542_v25 = vld [vmem:[#allocation6 + $0xcc] ss:$16 sps:$4 sm:$0xff]  }
0x1122   :  { %v14149_v43 = vpop.eup %14148  ;;  %v9037_v63 = vmul.f32 %v14147_v8, %v14145_v42  ;;  %v17534_v42 = vld [vmem:[#allocation6 + $0xe8] ss:$16 sps:$4 sm:$0xff]   ;;  %v17540_v8 = vld [vmem:[#allocation6 + $0xc4] ss:$16 sps:$4 sm:$0xff]   ;;  %18949 = vst [vmem:[#allocation36_spill] sm:$0xff] %v17542_v25 }
0x1123   :  { %v9036_v47 = vmul.f32 %v14149_v43, %v17249_v5  ;;  %v18941_v5 = vld [vmem:[#allocation75_spill] sm:$0xff]  ;;  %18947 = vst [vmem:[#allocation34_spill] sm:$0xff] %v17534_v42  ;;  %18948 = vst [vmem:[#allocation37_spill] sm:$0xff] %v17540_v8  ;;  %v17544_v43 = vld [vmem:[#allocation6 + $0xc0] ss:$16 sps:$4 sm:$0xff]  }
0x1124   :  { %9513 = vmatpush1.bf16.msra.mxu0 %v17232_v12  ;;  %9554 = vmatpush1.bf16.msra.mxu1 %v17234_v36  ;;  %v18939_v12 = vld [vmem:[#allocation73_spill] sm:$0xff]  ;;  %v18940_v36 = vld [vmem:[#allocation74_spill] sm:$0xff]  ;;  %18950 = vst [vmem:[#allocation39_spill] sm:$0xff] %v17544_v43 }
0x1125   :  { %v17399_v17 = vadd.f32 %v9037_v63, %v9036_v47  ;;  %9514 = vmatprep.subr.bf16.mxu0 %v17238_v41  ;;  %9555 = vmatprep.subr.bf16.mxu1 %v17240_v34  ;;  %v18942_v41 = vld [vmem:[#allocation76_spill] sm:$0xff]  ;;  %v18943_v34 = vld [vmem:[#allocation77_spill] sm:$0xff] }
0x1126   :  { %v17552_v63 = vld [vmem:[#allocation6 + $0xa4] ss:$16 sps:$4 sm:$0xff]   ;;  %v17554_v47 = vld [vmem:[#allocation6 + $0xac] ss:$16 sps:$4 sm:$0xff]  }
0x1127   :  { %14152 = vtanh.f32 %v17399_v17  ;;  %v14151_v4 = vpop.eup %14150  ;;  %18952 = vst [vmem:[#allocation41_spill] sm:$0xff] %v17552_v63  ;;  %18953 = vst [vmem:[#allocation40_spill] sm:$0xff] %v17554_v47 }
0x1128   :  { %9515 = vmatpush1.bf16.msra.mxu0 %v17245_v31  ;;  %9556 = vmatpush1.bf16.msra.mxu1 %v18936_v9  ;;  %v18946_v31 = vld [vmem:[#allocation35_spill] sm:$0xff]  ;;  %v17556_v9 = vld [vmem:[#allocation6 + $0xa0] ss:$16 sps:$4 sm:$0xff]  }
0x1129   :  { %9516 = vmatprep.subr.bf16.mxu0 %v18937_v51  ;;  %9557 = vmatprep.subr.bf16.mxu1 %v18938_v39  ;;  %18954 = vst [vmem:[#allocation43_spill] sm:$0xff] %v17556_v9  ;;  %v17558_v51 = vld [vmem:[#allocation6 + $0xa8] ss:$16 sps:$4 sm:$0xff]   ;;  %v17564_v39 = vld [vmem:[#allocation6 + $0x84] ss:$16 sps:$4 sm:$0xff]  }
0x112a   :  { %18955 = vst [vmem:[#allocation42_spill] sm:$0xff] %v17558_v51  ;;  %18956 = vst [vmem:[#allocation44_spill] sm:$0xff] %v17564_v39 }
0x112c   :  { %9517 = vmatpush1.bf16.msra.mxu0 %v18939_v12  ;;  %9558 = vmatpush1.bf16.msra.mxu1 %v18940_v36  ;;  %v17566_v12 = vld [vmem:[#allocation6 + $0x8c] ss:$16 sps:$4 sm:$0xff]   ;;  %v17568_v36 = vld [vmem:[#allocation6 + $0x80] ss:$16 sps:$4 sm:$0xff]  }
0x112d   :  { %9518 = vmatprep.subr.bf16.mxu0 %v18941_v5  ;;  %9559 = vmatprep.subr.bf16.mxu1 %v18942_v41  ;;  %18957 = vst [vmem:[#allocation45_spill] sm:$0xff] %v17566_v12  ;;  %18958 = vst [vmem:[#allocation46_spill] sm:$0xff] %v17568_v36  ;;  %v17570_v5 = vld [vmem:[#allocation6 + $0x88] ss:$16 sps:$4 sm:$0xff]   ;;  %v17576_v41 = vld [vmem:[#allocation6 + $0x64] ss:$16 sps:$4 sm:$0xff]  }
0x112e   :  { %18959 = vst [vmem:[#allocation80_spill] sm:$0xff] %v17570_v5  ;;  %18960 = vst [vmem:[#allocation96_spill] sm:$0xff] %v17576_v41 }
0x1130   :  { %9519 = vmatpush1.bf16.msra.mxu0 %v18943_v34  ;;  %9560 = vmatpush1.bf16.msra.mxu1 %v18944_v45  ;;  %v17578_v34 = vld [vmem:[#allocation6 + $0x6c] ss:$16 sps:$4 sm:$0xff]   ;;  %v17580_v45 = vld [vmem:[#allocation6 + $0x60] ss:$16 sps:$4 sm:$0xff]  }
0x1131   :  { %9520 = vmatprep.subr.bf16.mxu0 %v18945_v15  ;;  %9561 = vmatprep.subr.bf16.mxu1 %v18946_v31  ;;  %18961 = vst [vmem:[#allocation83_spill] sm:$0xff] %v17578_v34  ;;  %18962 = vst [vmem:[#allocation105_spill] sm:$0xff] %v17580_v45  ;;  %v17582_v15 = vld [vmem:[#allocation6 + $0x68] ss:$16 sps:$4 sm:$0xff]   ;;  %v17588_v31 = vld [vmem:[#allocation6 + $0x44] ss:$16 sps:$4 sm:$0xff]  }
0x1132   :  { %18963 = vst [vmem:[#allocation47_spill] sm:$0xff] %v17582_v15  ;;  %18964 = vst [vmem:[#allocation48_spill] sm:$0xff] %v17588_v31 }
0x1134   :  { %v14153_v6 = vpop.eup %14152  ;;  %9521 = vmatpush1.bf16.msra.mxu0 %v17284_v55  ;;  %9562 = vmatpush1.bf16.msra.mxu1 %v17286_v52  ;;  %v17430_v55 = vld [vmem:[#allocation4 + $0xe8] ss:$16 sps:$4 sm:$0xff]   ;;  %v17434_v52 = vld [vmem:[#allocation4 + $0xc4] ss:$16 sps:$4 sm:$0xff]  }
0x1135   :  { %9522 = vmatprep.subr.bf16.mxu0 %v17290_v54  ;;  %9563 = vmatprep.subr.bf16.mxu1 %v17292_v24  ;;  %v9040_v18 = vmul.f32 %v14153_v6, %v14151_v4  ;;  %v17436_v54 = vld [vmem:[#allocation4 + $0xcc] ss:$16 sps:$4 sm:$0xff]   ;;  %v17442_v24 = vld [vmem:[#allocation4 + $0xc0] ss:$16 sps:$4 sm:$0xff]  }
0x1136   :  { %v17590_v4 = vld [vmem:[#allocation6 + $0x4c] ss:$16 sps:$4 sm:$0xff]   ;;  %v17592_v6 = vld [vmem:[#allocation6 + $0x40] ss:$16 sps:$4 sm:$0xff]  }
0x1137   :  { %v17424_v1 = vpack.c.bf16 %v9040_v18, %v9040_v18  ;;  %18965 = vst [vmem:[#allocation49_spill] sm:$0xff] %v17590_v4  ;;  %18966 = vst [vmem:[#allocation50_spill] sm:$0xff] %v17592_v6  ;;  %v17594_v18 = vld [vmem:[#allocation6 + $0x48] ss:$16 sps:$4 sm:$0xff]  }
0x1138   :  { %9523 = vmatpush1.bf16.msra.mxu0 %v17296_v7  ;;  %9564 = vmatpush1.bf16.msra.mxu1 %v17298_v26  ;;  %v17444_v7 = vld [vmem:[#allocation4 + $0xc8] ss:$16 sps:$4 sm:$0xff]   ;;  %v17448_v26 = vld [vmem:[#allocation4 + $0xa4] ss:$16 sps:$4 sm:$0xff]   ;;  %18967 = vst [vmem:[#allocation51_spill] sm:$0xff] %v17594_v18 }
0x1139   :  { %9819 = vmatprep.subr.bf16.mxu0 %v17420_v2  ;;  %9860 = vmatprep.subr.bf16.mxu1 %v17422_v61 }
0x113b   :  { %9541 = vmatmul.mubr.bf16.vlgmr.msra.gmra.mxu0 %v17424_v1  ;;  %9582 = vmatmul.mubr.bf16.vlgmr.msra.gmra.mxu1 %v17424_v1 }
0x113c   :  { %9820 = vmatpush1.bf16.msra.mxu0 %v17428_v23  ;;  %9861 = vmatpush1.bf16.msra.mxu1 %v17430_v55 }
0x113d   :  { %9821 = vmatprep.subr.bf16.mxu0 %v17434_v52  ;;  %9862 = vmatprep.subr.bf16.mxu1 %v17436_v54 }
0x113e   :  { %9851 = vmatprep.mubr.bf16.mxu0 %v18403_v11  ;;  %9892 = vmatprep.mubr.bf16.mxu1 %v18403_v11 }
0x1140   :  { %9822 = vmatpush1.bf16.msra.mxu0 %v17442_v24  ;;  %9863 = vmatpush1.bf16.msra.mxu1 %v17444_v7 }
0x1141   :  { %9823 = vmatprep.subr.bf16.mxu0 %v17448_v26  ;;  %9864 = vmatprep.subr.bf16.mxu1 %v17450_v16 }
0x1144   :  { %9824 = vmatpush1.bf16.msra.mxu0 %v17456_v37  ;;  %9865 = vmatpush1.bf16.msra.mxu1 %v17458_v22 }
0x1145   :  { %9825 = vmatprep.subr.bf16.mxu0 %v17462_v46  ;;  %9866 = vmatprep.subr.bf16.mxu1 %v17464_v0 }
0x1148   :  { %9826 = vmatpush1.bf16.msra.mxu0 %v17468_v19  ;;  %9867 = vmatpush1.bf16.msra.mxu1 %v17470_v10 }
0x1149   :  { %9827 = vmatprep.subr.bf16.mxu0 %v17474_v29  ;;  %9868 = vmatprep.subr.bf16.mxu1 %v17476_v13 }
0x114c   :  { %9828 = vmatpush1.bf16.msra.mxu0 %v17480_v44  ;;  %9869 = vmatpush1.bf16.msra.mxu1 %v17482_v50 }
0x114d   :  { %9829 = vmatprep.subr.bf16.mxu0 %v17486_v57  ;;  %9870 = vmatprep.subr.bf16.mxu1 %v17488_v33 }
0x1150   :  { %9830 = vmatpush1.bf16.msra.mxu0 %v17492_v60  ;;  %9871 = vmatpush1.bf16.msra.mxu1 %v17494_v20 }
0x1151   :  { %9831 = vmatprep.subr.bf16.mxu0 %v17498_v21  ;;  %9872 = vmatprep.subr.bf16.mxu1 %v17500_v62 }
0x1154   :  { %9832 = vmatpush1.bf16.msra.mxu0 %v17504_v53  ;;  %9873 = vmatpush1.bf16.msra.mxu1 %v17506_v30 }
0x1155   :  { %9833 = vmatprep.subr.bf16.mxu0 %v17510_v32  ;;  %9874 = vmatprep.subr.bf16.mxu1 %v17512_v58 }
0x1158   :  { %9834 = vmatpush1.bf16.msra.mxu0 %v17516_v56  ;;  %9875 = vmatpush1.bf16.msra.mxu1 %v17518_v48 }
0x1159   :  { %10154 = vmatprep.subr.bf16.mxu0 %v17528_v14  ;;  %10195 = vmatprep.subr.bf16.mxu1 %v17530_v3 }
0x115b   :  { %9852 = vmatmul.mubr.bf16.vlgmr.msra.gmra.mxu0 %v17424_v1  ;;  %9893 = vmatmul.mubr.bf16.vlgmr.msra.gmra.mxu1 %v17424_v1  ;;  %v17600_v1 = vld [vmem:[#allocation6 + $0x24] ss:$16 sps:$4 sm:$0xff]  }
0x115c   :  { %10186 = vmatprep.mubr.bf16.mxu0 %v18403_v11  ;;  %10227 = vmatprep.mubr.bf16.mxu1 %v18403_v11  ;;  %18968 = vst [vmem:[#allocation52_spill] sm:$0xff] %v17600_v1 }
0x115d   :  { %10155 = vmatpush1.bf16.msra.mxu0 %v17532_v38  ;;  %10196 = vmatpush1.bf16.msra.mxu1 %v17534_v42 }
0x115e   :  { %10156 = vmatprep.subr.bf16.mxu0 %v17540_v8  ;;  %10197 = vmatprep.subr.bf16.mxu1 %v17542_v25 }
0x1161   :  { %10157 = vmatpush1.bf16.msra.mxu0 %v17544_v43  ;;  %10198 = vmatpush1.bf16.msra.mxu1 %v17546_v28 }
0x1162   :  { %10158 = vmatprep.subr.bf16.mxu0 %v17552_v63  ;;  %10199 = vmatprep.subr.bf16.mxu1 %v17554_v47 }
0x1165   :  { %10159 = vmatpush1.bf16.msra.mxu0 %v17556_v9  ;;  %10200 = vmatpush1.bf16.msra.mxu1 %v17558_v51 }
0x1166   :  { %10160 = vmatprep.subr.bf16.mxu0 %v17564_v39  ;;  %10201 = vmatprep.subr.bf16.mxu1 %v17566_v12 }
0x1169   :  { %10161 = vmatpush1.bf16.msra.mxu0 %v17568_v36  ;;  %10202 = vmatpush1.bf16.msra.mxu1 %v17570_v5 }
0x116a   :  { %10162 = vmatprep.subr.bf16.mxu0 %v17576_v41  ;;  %10203 = vmatprep.subr.bf16.mxu1 %v17578_v34  ;;  %v17606_v34 = vld [vmem:[#allocation6 + $0x28] ss:$16 sps:$4 sm:$0xff]  }
0x116b   :  { %18971 = vst [vmem:[#allocation55_spill] sm:$0xff] %v17606_v34 }
0x116d   :  { %10163 = vmatpush1.bf16.msra.mxu0 %v17580_v45  ;;  %10204 = vmatpush1.bf16.msra.mxu1 %v17582_v15  ;;  %v17602_v45 = vld [vmem:[#allocation6 + $0x2c] ss:$16 sps:$4 sm:$0xff]   ;;  %v17604_v15 = vld [vmem:[#allocation6 + $0x20] ss:$16 sps:$4 sm:$0xff]  }
0x116e   :  { %10164 = vmatprep.subr.bf16.mxu0 %v17588_v31  ;;  %10205 = vmatprep.subr.bf16.mxu1 %v17590_v4  ;;  %18969 = vst [vmem:[#allocation53_spill] sm:$0xff] %v17602_v45  ;;  %18970 = vst [vmem:[#allocation54_spill] sm:$0xff] %v17604_v15  ;;  %v17612_v4 = vld [vmem:[#allocation6 + $0x4] ss:$16 sps:$4 sm:$0xff]   ;;  %v17618_v31 = vld [vmem:[#allocation6 + $0x8] ss:$16 sps:$4 sm:$0xff]  }
0x116f   :  { %18972 = vst [vmem:[#allocation56_spill] sm:$0xff] %v17612_v4  ;;  %18975 = vst [vmem:[#allocation85_spill] sm:$0xff] %v17618_v31 }
0x1171   :  { %10165 = vmatpush1.bf16.msra.mxu0 %v17592_v6  ;;  %10206 = vmatpush1.bf16.msra.mxu1 %v17594_v18  ;;  %v17614_v6 = vld [vmem:[#allocation6 + $0xc] ss:$16 sps:$4 sm:$0xff]   ;;  %v17616_v18 = vld [vmem:[#allocation6] ss:$16 sps:$4 sm:$0xff]  }
0x1172   :  { %10166 = vmatprep.subr.bf16.mxu0 %v17600_v1  ;;  %10207 = vmatprep.subr.bf16.mxu1 %v17602_v45  ;;  %18973 = vst [vmem:[#allocation57_spill] sm:$0xff] %v17614_v6  ;;  %18974 = vst [vmem:[#allocation58_spill] sm:$0xff] %v17616_v18  ;;  %v17624_v45 = vld [vmem:[#allocation5 + $0xe4] ss:$16 sps:$4 sm:$0xff]  }
0x1173   :  { %18976 = vst [vmem:[#allocation106_spill] sm:$0xff] %v17624_v45 }
0x1175   :  { %10167 = vmatpush1.bf16.msra.mxu0 %v17604_v15  ;;  %10208 = vmatpush1.bf16.msra.mxu1 %v17606_v34  ;;  %v17626_v15 = vld [vmem:[#allocation5 + $0xec] ss:$16 sps:$4 sm:$0xff]  }
0x1176   :  { %10168 = vmatprep.subr.bf16.mxu0 %v17612_v4  ;;  %10209 = vmatprep.subr.bf16.mxu1 %v17614_v6  ;;  %18977 = vst [vmem:[#allocation93_spill] sm:$0xff] %v17626_v15 }
0x1179   :  { %10169 = vmatpush1.bf16.msra.mxu0 %v17616_v18  ;;  %10210 = vmatpush1.bf16.msra.mxu1 %v17618_v31 }
0x117a   :  { %10396 = vmatprep.subr.bf16.mxu0 %v17624_v45  ;;  %10437 = vmatprep.subr.bf16.mxu1 %v17626_v15 }
0x11db   :  { %v9300_v34 = vpop.f32.mrf.mxu0  ;;  %v9341_v1 = vpop.f32.mrf.mxu1 }
0x11dd   :  { %v9302_v41 = vpop.f32.mrf.mxu0  ;;  %v9343_v5 = vpop.f32.mrf.mxu1 }
0x11df   :  { %v9304_v36 = vpop.f32.mrf.mxu0  ;;  %v9345_v4 = vpop.f32.mrf.mxu1 }
0x11e1   :  { %v9305_v12 = vpop.f32.mrf.mxu0  ;;  %v9346_v6 = vpop.f32.mrf.mxu1 }
0x11fb   :  { %v9542_v39 = vpop.f32.mrf.mxu0  ;;  %v9583_v18 = vpop.f32.mrf.mxu1 }
0x11fc   :  { %v9543_v51 = vadd.f32 %v9542_v39, %v9300_v34  ;;  %v9584_v6 = vadd.f32 %v9583_v18, %v9341_v1 }
0x11fd   :  { %v9544_v31 = vpop.f32.mrf.mxu0  ;;  %v9585_v9 = vpop.f32.mrf.mxu1 }
0x11fe   :  { %v9590_v47 = vadd.f32 %v9543_v51, %v16489_v49  ;;  %v9545_v63 = vadd.f32 %v9544_v31, %v9302_v41  ;;  %v9586_v12 = vadd.f32 %v9585_v9, %v9343_v5  ;;  %v9592_v42 = vadd.f32 %v9584_v6, %v16507_v40 }
0x11ff   :  { %v9546_v28 = vpop.f32.mrf.mxu0  ;;  %v9587_v45 = vpop.f32.mrf.mxu1 }
0x1200   :  { %v12475_v43 = vmul.f32 -1.442695, %v9590_v47  ;;  %v9591_v15 = vadd.f32 %v9545_v63, %v16494_v27  ;;  %v9593_v4 = vadd.f32 %v9586_v12, %v16501_v59 }
0x1201   :  { %v9547_v25 = vpop.f32.mrf.mxu0  ;;  %v9588_v8 = vpop.f32.mrf.mxu1 }
0x1202   :  { %14154 = vpow2.f32 %v12475_v43  ;;  %v12476_v36 = vmul.f32 -1.442695, %v9591_v15  ;;  %v12477_v39 = vmul.f32 -1.442695, %v9593_v4  ;;  %v18978_v25 = vld [vmem:[#allocation89_spill] sm:$0xff] }
0x1203   :  { %v9623_v8 = vunpack.c.l.bf16 %v18978_v25  ;;  %v9624_v43 = vunpack.c.h.bf16 %v18978_v25  ;;  %v18979_v25 = vld [vmem:[#allocation108_spill] sm:$0xff] }
0x1204   :  { %14156 = vpow2.f32 %v12476_v36 }
0x1205   :  { %14158 = vpow2.f32 %v12477_v39 }
0x120f   :  { %v14155_v34 = vpop.eup %14154 }
0x1210   :  { %v9597_v51 = vadd.f32 1.0, %v14155_v34 }
0x1211   :  { %v14157_v41 = vpop.eup %14156 }
0x1212   :  { %14160 = vrcp.f32 %v9597_v51  ;;  %v9603_v28 = vadd.f32 1.0, %v14157_v41  ;;  %v14159_v15 = vpop.eup %14158 }
0x1213   :  { %14162 = vtanh.f32 %v9592_v42  ;;  %v9610_v39 = vadd.f32 1.0, %v14159_v15 }
0x1214   :  { %14164 = vrcp.f32 %v9603_v28 }
0x121b   :  { %v9853_v63 = vpop.f32.mrf.mxu0  ;;  %v9894_v47 = vpop.f32.mrf.mxu1 }
0x121c   :  { %v9901_v9 = vadd.f32 %v9853_v63, %v9623_v8  ;;  %v9626_v8 = vunpack.c.h.bf16 %v18979_v25 }
0x121d   :  { %v9855_v5 = vpop.f32.mrf.mxu0  ;;  %v9896_v45 = vpop.f32.mrf.mxu1 }
0x121e   :  { %v12510_v31 = vmul.f32 -1.442695, %v9901_v9  ;;  %v9902_v18 = vadd.f32 %v9855_v5, %v9624_v43  ;;  %v9904_v43 = vadd.f32 %v9896_v45, %v9626_v8  ;;  %v9625_v9 = vunpack.c.l.bf16 %v18979_v25 }
0x121f   :  { %v14161_v1 = vpop.eup %14160  ;;  %v9857_v36 = vpop.f32.mrf.mxu0 }
0x1220   :  { %v9898_v12 = vpop.f32.mrf.mxu1  ;;  %v14163_v4 = vpop.eup %14162  ;;  %14166 = vpow2.f32 %v12510_v31  ;;  %v12511_v6 = vmul.f32 -1.442695, %v9902_v18  ;;  %v12512_v5 = vmul.f32 -1.442695, %v9904_v43  ;;  %v9903_v18 = vadd.f32 %v9894_v47, %v9625_v9  ;;  %v17652_v47 = vld [vmem:[#allocation5 + $0xc0] ss:$16 sps:$4 sm:$0xff]  }
0x1221   :  { %v14165_v42 = vpop.eup %14164  ;;  %v9858_v34 = vpop.f32.mrf.mxu0  ;;  %v9614_v41 = vmul.f32 %v14163_v4, %v14161_v1  ;;  %v17666_v43 = vld [vmem:[#allocation5 + $0xa0] ss:$16 sps:$4 sm:$0xff]   ;;  %v17668_v9 = vld [vmem:[#allocation5 + $0xa8] ss:$16 sps:$4 sm:$0xff]  }
0x1222   :  { %v9899_v51 = vpop.f32.mrf.mxu1  ;;  %v9613_v28 = vmul.f32 %v14165_v42, %v17382_v35  ;;  %14168 = vpow2.f32 %v12511_v6  ;;  %v17642_v6 = vld [vmem:[#allocation5 + $0xe0] ss:$16 sps:$4 sm:$0xff]   ;;  %v17644_v42 = vld [vmem:[#allocation5 + $0xe8] ss:$16 sps:$4 sm:$0xff]   ;;  %v17648_v34 = vld [vmem:[#allocation5 + $0xcc] ss:$16 sps:$4 sm:$0xff]  }
0x1223   :  { %14170 = vrcp.f32 %v9610_v39  ;;  %v17646_v39 = vld [vmem:[#allocation5 + $0xc4] ss:$16 sps:$4 sm:$0xff]   ;;  %v17654_v51 = vld [vmem:[#allocation5 + $0xc8] ss:$16 sps:$4 sm:$0xff]  }
0x1224   :  { %v17638_v63 = vadd.f32 %v9614_v41, %v9613_v28  ;;  %v17658_v41 = vld [vmem:[#allocation5 + $0xa4] ss:$16 sps:$4 sm:$0xff]   ;;  %v17660_v28 = vld [vmem:[#allocation5 + $0xac] ss:$16 sps:$4 sm:$0xff]  }
0x1225   :  { %18980 = vst [vmem:[#allocation102_spill] sm:$0xff] %v17660_v28 }
0x1226   :  { %14172 = vtanh.f32 %v17638_v63 }
0x1227   :  { %14174 = vpow2.f32 %v12512_v5 }
0x122d   :  { %v14167_v31 = vpop.eup %14166 }
0x122e   :  { %v9908_v15 = vadd.f32 1.0, %v14167_v31  ;;  %v17672_v31 = vld [vmem:[#allocation5 + $0x84] ss:$16 sps:$4 sm:$0xff]  }
0x122f   :  { %v14169_v36 = vpop.eup %14168 }
0x1230   :  { %14176 = vrcp.f32 %v9908_v15  ;;  %v9914_v1 = vadd.f32 1.0, %v14169_v36  ;;  %v14171_v35 = vpop.eup %14170 }
0x1231   :  { %14178 = vtanh.f32 %v9903_v18  ;;  %v17674_v18 = vld [vmem:[#allocation5 + $0x8c] ss:$16 sps:$4 sm:$0xff]  }
0x1232   :  { %14180 = vrcp.f32 %v9914_v1 }
0x1233   :  { %v14173_v12 = vpop.eup %14172 }
0x1234   :  { %v9617_v4 = vmul.f32 %v14173_v12, %v14171_v35  ;;  %v14175_v25 = vpop.eup %14174  ;;  %v17679_v12 = vld [vmem:[#allocation5 + $0x80] ss:$16 sps:$4 sm:$0xff]  }
0x1235   :  { %v9921_v36 = vadd.f32 1.0, %v14175_v25  ;;  %v17689_v25 = vld [vmem:[#allocation5 + $0x6c] ss:$16 sps:$4 sm:$0xff]  }
0x1236   :  { %v9618_v45 = vpack.c.bf16 %v9617_v4, %v9617_v4  ;;  %v17681_v4 = vld [vmem:[#allocation5 + $0x88] ss:$16 sps:$4 sm:$0xff]   ;;  %18983 = vst [vmem:[#allocation68_spill] sm:$0xff] %v17689_v25 }
0x1237   :  { %18981 = vst [vmem:[#allocation95_spill] sm:$0xff] %v17681_v4  ;;  %14182 = vrcp.f32 %v9921_v36  ;;  %v17706_v36 = vld [vmem:[#allocation5 + $0x40] ss:$16 sps:$4 sm:$0xff]  }
0x1238   :  { %9620 = vst [vmem:[#allocation3 + $0x14] sm:$0xf] %v9618_v45  ;;  %10187 = vmatmul.mubr.bf16.vlgmr.msra.gmra.mxu0 %v9618_v45  ;;  %10228 = vmatmul.mubr.bf16.vlgmr.msra.gmra.mxu1 %v9618_v45  ;;  %18988 = vst [vmem:[#allocation79_spill] sm:$0xff] %v17706_v36 }
0x1239   :  { %10397 = vmatpush1.bf16.msra.mxu0 %v17642_v6  ;;  %10438 = vmatpush1.bf16.msra.mxu1 %v17644_v42 }
0x123a   :  { %10398 = vmatprep.subr.bf16.mxu0 %v17646_v39  ;;  %10439 = vmatprep.subr.bf16.mxu1 %v17648_v34 }
0x123b   :  { %10428 = vmatprep.mubr.bf16.mxu0 %v18403_v11  ;;  %10469 = vmatprep.mubr.bf16.mxu1 %v18403_v11 }
0x123d   :  { %v14177_v8 = vpop.eup %14176  ;;  %10399 = vmatpush1.bf16.msra.mxu0 %v17652_v47  ;;  %10440 = vmatpush1.bf16.msra.mxu1 %v17654_v51 }
0x123e   :  { %v14179_v5 = vpop.eup %14178  ;;  %10400 = vmatprep.subr.bf16.mxu0 %v17658_v41  ;;  %10441 = vmatprep.subr.bf16.mxu1 %v17660_v28  ;;  %v17687_v28 = vld [vmem:[#allocation5 + $0x64] ss:$16 sps:$4 sm:$0xff]  }
0x123f   :  { %v14181_v15 = vpop.eup %14180  ;;  %v9925_v1 = vmul.f32 %v14179_v5, %v14177_v8  ;;  %18982 = vst [vmem:[#allocation110_spill] sm:$0xff] %v17687_v28  ;;  %v17696_v8 = vld [vmem:[#allocation5 + $0x68] ss:$16 sps:$4 sm:$0xff]   ;;  %v17700_v5 = vld [vmem:[#allocation5 + $0x44] ss:$16 sps:$4 sm:$0xff]  }
0x1240   :  { %v9924_v35 = vmul.f32 %v14181_v15, %v17399_v17  ;;  %v17694_v17 = vld [vmem:[#allocation5 + $0x60] ss:$16 sps:$4 sm:$0xff]   ;;  %18985 = vst [vmem:[#allocation69_spill] sm:$0xff] %v17696_v8  ;;  %18986 = vst [vmem:[#allocation94_spill] sm:$0xff] %v17700_v5  ;;  %v17702_v15 = vld [vmem:[#allocation5 + $0x4c] ss:$16 sps:$4 sm:$0xff]  }
0x1241   :  { %10401 = vmatpush1.bf16.msra.mxu0 %v17666_v43  ;;  %10442 = vmatpush1.bf16.msra.mxu1 %v17668_v9  ;;  %18984 = vst [vmem:[#allocation32_spill] sm:$0xff] %v17694_v17  ;;  %18987 = vst [vmem:[#allocation92_spill] sm:$0xff] %v17702_v15 }
0x1242   :  { %v17683_v45 = vadd.f32 %v9925_v1, %v9924_v35  ;;  %10402 = vmatprep.subr.bf16.mxu0 %v17672_v31  ;;  %10443 = vmatprep.subr.bf16.mxu1 %v17674_v18  ;;  %v17708_v1 = vld [vmem:[#allocation5 + $0x48] ss:$16 sps:$4 sm:$0xff]   ;;  %v17712_v35 = vld [vmem:[#allocation5 + $0x24] ss:$16 sps:$4 sm:$0xff]  }
0x1243   :  { %18989 = vst [vmem:[#allocation103_spill] sm:$0xff] %v17708_v1  ;;  %18990 = vst [vmem:[#allocation65_spill] sm:$0xff] %v17712_v35 }
0x1244   :  { %14184 = vtanh.f32 %v17683_v45 }
0x1245   :  { %10403 = vmatpush1.bf16.msra.mxu0 %v17679_v12  ;;  %10444 = vmatpush1.bf16.msra.mxu1 %v17681_v4 }
0x1246   :  { %10404 = vmatprep.subr.bf16.mxu0 %v17687_v28  ;;  %10445 = vmatprep.subr.bf16.mxu1 %v17689_v25  ;;  %v17714_v28 = vld [vmem:[#allocation5 + $0x2c] ss:$16 sps:$4 sm:$0xff]   ;;  %v17718_v25 = vld [vmem:[#allocation5 + $0x20] ss:$16 sps:$4 sm:$0xff]  }
0x1247   :  { %18991 = vst [vmem:[#allocation66_spill] sm:$0xff] %v17714_v28 }
0x1249   :  { %10405 = vmatpush1.bf16.msra.mxu0 %v17694_v17  ;;  %10446 = vmatpush1.bf16.msra.mxu1 %v17696_v8  ;;  %v17720_v17 = vld [vmem:[#allocation5 + $0x28] ss:$16 sps:$4 sm:$0xff]   ;;  %v17724_v8 = vld [vmem:[#allocation5 + $0x4] ss:$16 sps:$4 sm:$0xff]  }
0x124a   :  { %10406 = vmatprep.subr.bf16.mxu0 %v17700_v5  ;;  %10447 = vmatprep.subr.bf16.mxu1 %v17702_v15  ;;  %v17726_v5 = vld [vmem:[#allocation5 + $0xc] ss:$16 sps:$4 sm:$0xff]   ;;  %v14183_v15 = vpop.eup %14182 }
0x124d   :  { %10407 = vmatpush1.bf16.msra.mxu0 %v17706_v36  ;;  %10448 = vmatpush1.bf16.msra.mxu1 %v17708_v1  ;;  %v17730_v36 = vld [vmem:[#allocation5] ss:$16 sps:$4 sm:$0xff]   ;;  %v17732_v1 = vld [vmem:[#allocation5 + $0x8] ss:$16 sps:$4 sm:$0xff]  }
0x124e   :  { %10408 = vmatprep.subr.bf16.mxu0 %v17712_v35  ;;  %10449 = vmatprep.subr.bf16.mxu1 %v17714_v28 }
0x1251   :  { %v14185_v4 = vpop.eup %14184  ;;  %10409 = vmatpush1.bf16.msra.mxu0 %v17718_v25  ;;  %10450 = vmatpush1.bf16.msra.mxu1 %v17720_v17 }
0x1252   :  { %10410 = vmatprep.subr.bf16.mxu0 %v17724_v8  ;;  %10451 = vmatprep.subr.bf16.mxu1 %v17726_v5  ;;  %v9928_v35 = vmul.f32 %v14185_v4, %v14183_v15 }
0x1254   :  { %v9929_v28 = vpack.c.bf16 %v9928_v35, %v9928_v35 }
0x1255   :  { %10411 = vmatpush1.bf16.msra.mxu0 %v17730_v36  ;;  %10452 = vmatpush1.bf16.msra.mxu1 %v17732_v1 }
0x1256   :  { %10707 = vmatprep.subr.bf16.mxu0 %v17420_v2  ;;  %10748 = vmatprep.subr.bf16.mxu1 %v17422_v61  ;;  %v18992_v2 = vld [vmem:[#allocation34_spill] sm:$0xff]  ;;  %v18993_v61 = vld [vmem:[#allocation37_spill] sm:$0xff] }
0x1258   :  { %10429 = vmatmul.mubr.bf16.vlgmr.msra.gmra.mxu0 %v9929_v28  ;;  %10470 = vmatmul.mubr.bf16.vlgmr.msra.gmra.mxu1 %v9929_v28 }
0x1259   :  { %10708 = vmatpush1.bf16.msra.mxu0 %v17428_v23  ;;  %10749 = vmatpush1.bf16.msra.mxu1 %v17430_v55  ;;  %v18994_v23 = vld [vmem:[#allocation36_spill] sm:$0xff]  ;;  %v18995_v55 = vld [vmem:[#allocation39_spill] sm:$0xff] }
0x125a   :  { %10709 = vmatprep.subr.bf16.mxu0 %v17434_v52  ;;  %10750 = vmatprep.subr.bf16.mxu1 %v17436_v54  ;;  %v18996_v52 = vld [vmem:[#allocation38_spill] sm:$0xff]  ;;  %v18997_v54 = vld [vmem:[#allocation41_spill] sm:$0xff] }
0x125b   :  { %10739 = vmatprep.mubr.bf16.mxu0 %v18403_v11  ;;  %10780 = vmatprep.mubr.bf16.mxu1 %v18403_v11 }
0x125d   :  { %10710 = vmatpush1.bf16.msra.mxu0 %v17442_v24  ;;  %10751 = vmatpush1.bf16.msra.mxu1 %v17444_v7  ;;  %v18998_v24 = vld [vmem:[#allocation40_spill] sm:$0xff]  ;;  %v18999_v7 = vld [vmem:[#allocation43_spill] sm:$0xff] }
0x125e   :  { %10711 = vmatprep.subr.bf16.mxu0 %v17448_v26  ;;  %10752 = vmatprep.subr.bf16.mxu1 %v17450_v16  ;;  %v19000_v26 = vld [vmem:[#allocation42_spill] sm:$0xff]  ;;  %v19001_v16 = vld [vmem:[#allocation44_spill] sm:$0xff] }
0x1261   :  { %10712 = vmatpush1.bf16.msra.mxu0 %v17456_v37  ;;  %10753 = vmatpush1.bf16.msra.mxu1 %v17458_v22  ;;  %v19002_v37 = vld [vmem:[#allocation45_spill] sm:$0xff]  ;;  %v19003_v22 = vld [vmem:[#allocation46_spill] sm:$0xff] }
0x1262   :  { %10713 = vmatprep.subr.bf16.mxu0 %v17462_v46  ;;  %10754 = vmatprep.subr.bf16.mxu1 %v17464_v0  ;;  %v19004_v46 = vld [vmem:[#allocation80_spill] sm:$0xff] }
0x1263   :  { %v19005_v0 = vld [vmem:[#allocation96_spill] sm:$0xff] }
0x1265   :  { %10714 = vmatpush1.bf16.msra.mxu0 %v17468_v19  ;;  %10755 = vmatpush1.bf16.msra.mxu1 %v17470_v10  ;;  %v19006_v19 = vld [vmem:[#allocation83_spill] sm:$0xff]  ;;  %v19007_v10 = vld [vmem:[#allocation105_spill] sm:$0xff] }
0x1266   :  { %10715 = vmatprep.subr.bf16.mxu0 %v17474_v29  ;;  %10756 = vmatprep.subr.bf16.mxu1 %v17476_v13  ;;  %v19008_v29 = vld [vmem:[#allocation47_spill] sm:$0xff]  ;;  %v19009_v13 = vld [vmem:[#allocation48_spill] sm:$0xff] }
0x1269   :  { %10716 = vmatpush1.bf16.msra.mxu0 %v17480_v44  ;;  %10757 = vmatpush1.bf16.msra.mxu1 %v17482_v50  ;;  %v19010_v44 = vld [vmem:[#allocation49_spill] sm:$0xff]  ;;  %v19011_v50 = vld [vmem:[#allocation50_spill] sm:$0xff] }
0x126a   :  { %10717 = vmatprep.subr.bf16.mxu0 %v17486_v57  ;;  %10758 = vmatprep.subr.bf16.mxu1 %v17488_v33  ;;  %v19012_v57 = vld [vmem:[#allocation51_spill] sm:$0xff]  ;;  %v19013_v33 = vld [vmem:[#allocation52_spill] sm:$0xff] }
0x126d   :  { %10718 = vmatpush1.bf16.msra.mxu0 %v17492_v60  ;;  %10759 = vmatpush1.bf16.msra.mxu1 %v17494_v20  ;;  %v19014_v60 = vld [vmem:[#allocation53_spill] sm:$0xff]  ;;  %v19015_v20 = vld [vmem:[#allocation54_spill] sm:$0xff] }
0x126e   :  { %10719 = vmatprep.subr.bf16.mxu0 %v17498_v21  ;;  %10760 = vmatprep.subr.bf16.mxu1 %v17500_v62  ;;  %v19016_v21 = vld [vmem:[#allocation55_spill] sm:$0xff]  ;;  %v19017_v62 = vld [vmem:[#allocation56_spill] sm:$0xff] }
0x1271   :  { %10720 = vmatpush1.bf16.msra.mxu0 %v17504_v53  ;;  %10761 = vmatpush1.bf16.msra.mxu1 %v17506_v30  ;;  %v19018_v53 = vld [vmem:[#allocation57_spill] sm:$0xff]  ;;  %v19019_v30 = vld [vmem:[#allocation58_spill] sm:$0xff] }
0x1272   :  { %10721 = vmatprep.subr.bf16.mxu0 %v17510_v32  ;;  %10762 = vmatprep.subr.bf16.mxu1 %v17512_v58  ;;  %v19020_v32 = vld [vmem:[#allocation85_spill] sm:$0xff]  ;;  %v19021_v58 = vld [vmem:[#allocation106_spill] sm:$0xff] }
0x1275   :  { %10722 = vmatpush1.bf16.msra.mxu0 %v17516_v56  ;;  %10763 = vmatpush1.bf16.msra.mxu1 %v17518_v48  ;;  %v19022_v56 = vld [vmem:[#allocation93_spill] sm:$0xff] }
0x1276   :  { %11042 = vmatprep.subr.bf16.mxu0 %v17528_v14  ;;  %11083 = vmatprep.subr.bf16.mxu1 %v17530_v3 }
0x1278   :  { %10740 = vmatmul.mubr.bf16.vlgmr.msra.gmra.mxu0 %v9929_v28  ;;  %10781 = vmatmul.mubr.bf16.vlgmr.msra.gmra.mxu1 %v9929_v28 }
0x1279   :  { %11043 = vmatpush1.bf16.msra.mxu0 %v17532_v38  ;;  %11084 = vmatpush1.bf16.msra.mxu1 %v18992_v2 }
0x127a   :  { %11044 = vmatprep.subr.bf16.mxu0 %v18993_v61  ;;  %11085 = vmatprep.subr.bf16.mxu1 %v18994_v23 }
0x127b   :  { %11074 = vmatprep.mubr.bf16.mxu0 %v18403_v11  ;;  %11115 = vmatprep.mubr.bf16.mxu1 %v18403_v11 }
0x127d   :  { %11045 = vmatpush1.bf16.msra.mxu0 %v18995_v55  ;;  %11086 = vmatpush1.bf16.msra.mxu1 %v18996_v52 }
0x127e   :  { %11046 = vmatprep.subr.bf16.mxu0 %v18997_v54  ;;  %11087 = vmatprep.subr.bf16.mxu1 %v18998_v24 }
0x1281   :  { %11047 = vmatpush1.bf16.msra.mxu0 %v18999_v7  ;;  %11088 = vmatpush1.bf16.msra.mxu1 %v19000_v26 }
0x1282   :  { %11048 = vmatprep.subr.bf16.mxu0 %v19001_v16  ;;  %11089 = vmatprep.subr.bf16.mxu1 %v19002_v37 }
0x1285   :  { %11049 = vmatpush1.bf16.msra.mxu0 %v19003_v22  ;;  %11090 = vmatpush1.bf16.msra.mxu1 %v19004_v46 }
0x1286   :  { %11050 = vmatprep.subr.bf16.mxu0 %v19005_v0  ;;  %11091 = vmatprep.subr.bf16.mxu1 %v19006_v19 }
0x1289   :  { %11051 = vmatpush1.bf16.msra.mxu0 %v19007_v10  ;;  %11092 = vmatpush1.bf16.msra.mxu1 %v19008_v29 }
0x128a   :  { %11052 = vmatprep.subr.bf16.mxu0 %v19009_v13  ;;  %11093 = vmatprep.subr.bf16.mxu1 %v19010_v44 }
0x128d   :  { %11053 = vmatpush1.bf16.msra.mxu0 %v19011_v50  ;;  %11094 = vmatpush1.bf16.msra.mxu1 %v19012_v57 }
0x128e   :  { %11054 = vmatprep.subr.bf16.mxu0 %v19013_v33  ;;  %11095 = vmatprep.subr.bf16.mxu1 %v19014_v60 }
0x1291   :  { %11055 = vmatpush1.bf16.msra.mxu0 %v19015_v20  ;;  %11096 = vmatpush1.bf16.msra.mxu1 %v19016_v21  ;;  %v19023_v20 = vld [vmem:[#allocation91_spill] sm:$0xff] }
0x1292   :  { %11056 = vmatprep.subr.bf16.mxu0 %v19017_v62  ;;  %11097 = vmatprep.subr.bf16.mxu1 %v19018_v53  ;;  %v10511_v21 = vunpack.c.l.bf16 %v19023_v20  ;;  %v10512_v62 = vunpack.c.h.bf16 %v19023_v20 }
0x1295   :  { %11057 = vmatpush1.bf16.msra.mxu0 %v19019_v30  ;;  %11098 = vmatpush1.bf16.msra.mxu1 %v19020_v32 }
0x1296   :  { %11284 = vmatprep.subr.bf16.mxu0 %v19021_v58  ;;  %11325 = vmatprep.subr.bf16.mxu1 %v19022_v56 }
0x12f8   :  { %v10188_v48 = vpop.f32.mrf.mxu0  ;;  %v10229_v14 = vpop.f32.mrf.mxu1 }
0x12fa   :  { %v10190_v3 = vpop.f32.mrf.mxu0  ;;  %v10231_v38 = vpop.f32.mrf.mxu1 }
0x12fc   :  { %v10192_v28 = vpop.f32.mrf.mxu0  ;;  %v10233_v4 = vpop.f32.mrf.mxu1 }
0x12fe   :  { %v10193_v15 = vpop.f32.mrf.mxu0  ;;  %v10234_v35 = vpop.f32.mrf.mxu1 }
0x1318   :  { %v10430_v2 = vpop.f32.mrf.mxu0  ;;  %v10471_v61 = vpop.f32.mrf.mxu1 }
0x1319   :  { %v10431_v23 = vadd.f32 %v10430_v2, %v10188_v48  ;;  %v10472_v29 = vadd.f32 %v10471_v61, %v10229_v14 }
0x131a   :  { %v10432_v55 = vpop.f32.mrf.mxu0  ;;  %v10473_v52 = vpop.f32.mrf.mxu1 }
0x131b   :  { %v10478_v54 = vadd.f32 %v10431_v23, %v16489_v49  ;;  %v10433_v24 = vadd.f32 %v10432_v55, %v10190_v3  ;;  %v10474_v19 = vadd.f32 %v10473_v52, %v10231_v38  ;;  %v10480_v50 = vadd.f32 %v10472_v29, %v16507_v40 }
0x131c   :  { %v10434_v7 = vpop.f32.mrf.mxu0  ;;  %v10475_v26 = vpop.f32.mrf.mxu1 }
0x131d   :  { %v12577_v16 = vmul.f32 -1.442695, %v10478_v54  ;;  %v10479_v37 = vadd.f32 %v10433_v24, %v16494_v27  ;;  %v10481_v10 = vadd.f32 %v10474_v19, %v16501_v59  ;;  %v19024_v24 = vld [vmem:[#allocation109_spill] sm:$0xff] }
0x131e   :  { %v10435_v22 = vpop.f32.mrf.mxu0  ;;  %v10476_v46 = vpop.f32.mrf.mxu1  ;;  %v10514_v7 = vunpack.c.h.bf16 %v19024_v24 }
0x131f   :  { %14186 = vpow2.f32 %v12577_v16  ;;  %v12578_v0 = vmul.f32 -1.442695, %v10479_v37  ;;  %v12579_v13 = vmul.f32 -1.442695, %v10481_v10  ;;  %v10513_v37 = vunpack.c.l.bf16 %v19024_v24 }
0x1321   :  { %14188 = vpow2.f32 %v12578_v0 }
0x1322   :  { %14190 = vpow2.f32 %v12579_v13 }
0x132c   :  { %v14187_v44 = vpop.eup %14186 }
0x132d   :  { %v10485_v57 = vadd.f32 1.0, %v14187_v44 }
0x132e   :  { %v14189_v33 = vpop.eup %14188 }
0x132f   :  { %14192 = vrcp.f32 %v10485_v57  ;;  %v10491_v60 = vadd.f32 1.0, %v14189_v33  ;;  %v14191_v48 = vpop.eup %14190 }
0x1330   :  { %14194 = vtanh.f32 %v10480_v50  ;;  %v10498_v61 = vadd.f32 1.0, %v14191_v48  ;;  %v13968_v48 = vld [vmem:[#allocation7 + $0x30] sm:$0xff]  }
0x1331   :  { %14196 = vrcp.f32 %v10491_v60 }
0x1338   :  { %v10741_v53 = vpop.f32.mrf.mxu0  ;;  %v10782_v30 = vpop.f32.mrf.mxu1 }
0x1339   :  { %v10789_v32 = vadd.f32 %v10741_v53, %v10511_v21  ;;  %v10791_v0 = vadd.f32 %v10782_v30, %v10513_v37  ;;  %v19032_v21 = vld [vmem:[#allocation92_spill] sm:$0xff] }
0x133a   :  { %v10743_v58 = vpop.f32.mrf.mxu0  ;;  %v10784_v56 = vpop.f32.mrf.mxu1 }
0x133b   :  { %v12612_v14 = vmul.f32 -1.442695, %v10789_v32  ;;  %v10790_v3 = vadd.f32 %v10743_v58, %v10512_v62  ;;  %v10792_v16 = vadd.f32 %v10784_v56, %v10514_v7  ;;  %v19035_v62 = vld [vmem:[#allocation65_spill] sm:$0xff]  ;;  %v13966_v58 = vld [vmem:[#allocation7 + $0x38] sm:$0xff]  }
0x133c   :  { %v14193_v38 = vpop.eup %14192  ;;  %v10745_v28 = vpop.f32.mrf.mxu0 }
0x133d   :  { %v10786_v4 = vpop.f32.mrf.mxu1  ;;  %v14195_v15 = vpop.eup %14194  ;;  %14198 = vpow2.f32 %v12612_v14  ;;  %v12613_v35 = vmul.f32 -1.442695, %v10790_v3  ;;  %v12614_v22 = vmul.f32 -1.442695, %v10792_v16  ;;  %v13967_v14 = vld [vmem:[#allocation3] sm:$0xff]   ;;  %v13975_v3 = vld [vmem:[#allocation3 + $0x8] sm:$0xff]  }
0x133e   :  { %v14197_v2 = vpop.eup %14196  ;;  %v10746_v23 = vpop.f32.mrf.mxu0  ;;  %v10502_v52 = vmul.f32 %v14195_v15, %v14193_v38  ;;  %v13976_v38 = vld [vmem:[#allocation3 + $0x10] sm:$0xff]  }
0x133f   :  { %v10787_v55 = vpop.f32.mrf.mxu1  ;;  %v10501_v54 = vmul.f32 %v14197_v2, %v17638_v63  ;;  %14200 = vpow2.f32 %v12613_v35 }
0x1340   :  { %14202 = vrcp.f32 %v10498_v61 }
0x1341   :  { %v17816_v26 = vadd.f32 %v10502_v52, %v10501_v54 }
0x1343   :  { %14204 = vtanh.f32 %v17816_v26 }
0x1344   :  { %14206 = vpow2.f32 %v12614_v22 }
0x134a   :  { %v14199_v46 = vpop.eup %14198 }
0x134b   :  { %v10796_v19 = vadd.f32 1.0, %v14199_v46 }
0x134c   :  { %v14201_v10 = vpop.eup %14200 }
0x134d   :  { %14208 = vrcp.f32 %v10796_v19  ;;  %v10802_v29 = vadd.f32 1.0, %v14201_v10  ;;  %v14203_v63 = vpop.eup %14202 }
0x134e   :  { %14210 = vtanh.f32 %v10791_v0 }
0x134f   :  { %14212 = vrcp.f32 %v10802_v29 }
0x1350   :  { %v14205_v13 = vpop.eup %14204 }
0x1351   :  { %v10505_v44 = vmul.f32 %v14205_v13, %v14203_v63  ;;  %v14207_v57 = vpop.eup %14206 }
0x1352   :  { %v10809_v20 = vadd.f32 1.0, %v14207_v57 }
0x1353   :  { %v10506_v50 = vpack.c.bf16 %v10505_v44, %v10505_v44 }
0x1354   :  { %14214 = vrcp.f32 %v10809_v20 }
0x1355   :  { %10508 = vst [vmem:[#allocation3 + $0x18] sm:$0xf] %v10506_v50  ;;  %11075 = vmatmul.mubr.bf16.vlgmr.msra.gmra.mxu0 %v10506_v50  ;;  %11116 = vmatmul.mubr.bf16.vlgmr.msra.gmra.mxu1 %v10506_v50 }
0x1356   :  { %11285 = vmatpush1.bf16.msra.mxu0 %v17642_v6  ;;  %11326 = vmatpush1.bf16.msra.mxu1 %v17644_v42  ;;  %v19025_v6 = vld [vmem:[#allocation102_spill] sm:$0xff] }
0x1357   :  { %11286 = vmatprep.subr.bf16.mxu0 %v17646_v39  ;;  %11327 = vmatprep.subr.bf16.mxu1 %v17648_v34 }
0x1358   :  { %11316 = vmatprep.mubr.bf16.mxu0 %v18403_v11  ;;  %11357 = vmatprep.mubr.bf16.mxu1 %v18403_v11 }
0x135a   :  { %v14209_v33 = vpop.eup %14208  ;;  %11287 = vmatpush1.bf16.msra.mxu0 %v17652_v47  ;;  %11328 = vmatpush1.bf16.msra.mxu1 %v17654_v51  ;;  %v19026_v47 = vld [vmem:[#allocation95_spill] sm:$0xff]  ;;  %v19027_v51 = vld [vmem:[#allocation110_spill] sm:$0xff] }
0x135b   :  { %v14211_v60 = vpop.eup %14210  ;;  %11288 = vmatprep.subr.bf16.mxu0 %v17658_v41  ;;  %11329 = vmatprep.subr.bf16.mxu1 %v19025_v6  ;;  %v19028_v41 = vld [vmem:[#allocation68_spill] sm:$0xff] }
0x135c   :  { %v14213_v42 = vpop.eup %14212  ;;  %v10813_v39 = vmul.f32 %v14211_v60, %v14209_v33 }
0x135d   :  { %v10812_v34 = vmul.f32 %v14213_v42, %v17683_v45  ;;  %v19029_v45 = vld [vmem:[#allocation32_spill] sm:$0xff] }
0x135e   :  { %11289 = vmatpush1.bf16.msra.mxu0 %v17666_v43  ;;  %11330 = vmatpush1.bf16.msra.mxu1 %v17668_v9  ;;  %v19030_v43 = vld [vmem:[#allocation69_spill] sm:$0xff]  ;;  %v19031_v9 = vld [vmem:[#allocation94_spill] sm:$0xff] }
0x135f   :  { %v10814_v11 = vadd.f32 %v10813_v39, %v10812_v34  ;;  %11290 = vmatprep.subr.bf16.mxu0 %v17672_v31  ;;  %11331 = vmatprep.subr.bf16.mxu1 %v17674_v18  ;;  %v19033_v31 = vld [vmem:[#allocation79_spill] sm:$0xff] }
0x1360   :  { %v19034_v18 = vld [vmem:[#allocation103_spill] sm:$0xff] }
0x1361   :  { %14216 = vtanh.f32 %v10814_v11  ;;  %v14215_v53 = vpop.eup %14214 }
0x1362   :  { %11291 = vmatpush1.bf16.msra.mxu0 %v17679_v12  ;;  %11332 = vmatpush1.bf16.msra.mxu1 %v19026_v47  ;;  %v19036_v12 = vld [vmem:[#allocation66_spill] sm:$0xff] }
0x1363   :  { %11292 = vmatprep.subr.bf16.mxu0 %v19027_v51  ;;  %11333 = vmatprep.subr.bf16.mxu1 %v19028_v41 }
0x1366   :  { %11293 = vmatpush1.bf16.msra.mxu0 %v19029_v45  ;;  %11334 = vmatpush1.bf16.msra.mxu1 %v19030_v43 }
0x1367   :  { %11294 = vmatprep.subr.bf16.mxu0 %v19031_v9  ;;  %11335 = vmatprep.subr.bf16.mxu1 %v19032_v21 }
0x136a   :  { %11295 = vmatpush1.bf16.msra.mxu0 %v19033_v31  ;;  %11336 = vmatpush1.bf16.msra.mxu1 %v19034_v18 }
0x136b   :  { %11296 = vmatprep.subr.bf16.mxu0 %v19035_v62  ;;  %11337 = vmatprep.subr.bf16.mxu1 %v19036_v12 }
0x136e   :  { %v14217_v30 = vpop.eup %14216  ;;  %11297 = vmatpush1.bf16.msra.mxu0 %v17718_v25  ;;  %11338 = vmatpush1.bf16.msra.mxu1 %v17720_v17  ;;  %v13969_v25 = vld [vmem:[#allocation7 + $0x28] sm:$0xff]   ;;  %v13970_v17 = vld [vmem:[#allocation7 + $0x20] sm:$0xff]  }
0x136f   :  { %11298 = vmatprep.subr.bf16.mxu0 %v17724_v8  ;;  %11339 = vmatprep.subr.bf16.mxu1 %v17726_v5  ;;  %v10816_v32 = vmul.f32 %v14217_v30, %v14215_v53  ;;  %v13971_v8 = vld [vmem:[#allocation7 + $0x18] sm:$0xff]   ;;  %v13972_v5 = vld [vmem:[#allocation7 + $0x10] sm:$0xff]  }
0x1371   :  { %v10817_v56 = vpack.c.bf16 %v10816_v32, %v10816_v32 }
0x1372   :  { %11299 = vmatpush1.bf16.msra.mxu0 %v17730_v36  ;;  %11340 = vmatpush1.bf16.msra.mxu1 %v17732_v1  ;;  %v13973_v36 = vld [vmem:[#allocation7 + $0x8] sm:$0xff]   ;;  %v13974_v1 = vld [vmem:[#allocation7] sm:$0xff]  }
0x1373   :  { %12743 = vmatprep.subr.bf16.mxu0 %v13966_v58 }
0x1375   :  { %11317 = vmatmul.mubr.bf16.vlgmr.msra.gmra.mxu0 %v10817_v56  ;;  %11358 = vmatmul.mubr.bf16.vlgmr.msra.gmra.mxu1 %v10817_v56 }
0x1376   :  { %12744 = vmatpush3.bf16.msra.mxu0 %v13966_v58  ;;  %12759 = vmatprep.mubr.bf16.mxu0 %v13967_v14 }
0x1377   :  { %12745 = vmatprep.subr.bf16.mxu0 %v13968_v48 }
0x137a   :  { %12746 = vmatpush3.bf16.msra.mxu0 %v13968_v48 }
0x137b   :  { %12747 = vmatprep.subr.bf16.mxu0 %v13969_v25 }
0x137e   :  { %12748 = vmatpush3.bf16.msra.mxu0 %v13969_v25 }
0x137f   :  { %12749 = vmatprep.subr.bf16.mxu0 %v13970_v17 }
0x1382   :  { %12750 = vmatpush3.bf16.msra.mxu0 %v13970_v17 }
0x1383   :  { %12751 = vmatprep.subr.bf16.mxu0 %v13971_v8 }
0x1386   :  { %12752 = vmatpush3.bf16.msra.mxu0 %v13971_v8 }
0x1387   :  { %12753 = vmatprep.subr.bf16.mxu0 %v13972_v5 }
0x138a   :  { %12754 = vmatpush3.bf16.msra.mxu0 %v13972_v5 }
0x138b   :  { %12755 = vmatprep.subr.bf16.mxu0 %v13973_v36 }
0x138e   :  { %12756 = vmatpush3.bf16.msra.mxu0 %v13973_v36 }
0x138f   :  { %12757 = vmatprep.subr.bf16.mxu0 %v13974_v1 }
0x1392   :  { %12758 = vmatpush3.bf16.msra.mxu0 %v13974_v1 }
0x1395   :  { %12760 = vmatmul.mubr.bf16.vlgmr.msra.gmra.mxu0 %v13975_v3 }
0x1396   :  { %12763 = vmatprep.mubr.bf16.mxu0 %v13976_v38 }
0x1415   :  { %v11076_v28 = vpop.f32.mrf.mxu0  ;;  %v11117_v4 = vpop.f32.mrf.mxu1 }
0x1417   :  { %v11078_v15 = vpop.f32.mrf.mxu0  ;;  %v11119_v35 = vpop.f32.mrf.mxu1 }
0x1419   :  { %v11080_v2 = vpop.f32.mrf.mxu0  ;;  %v11121_v61 = vpop.f32.mrf.mxu1 }
0x141b   :  { %v11081_v23 = vpop.f32.mrf.mxu0  ;;  %v11122_v55 = vpop.f32.mrf.mxu1 }
0x1435   :  { %v11318_v52 = vpop.f32.mrf.mxu0  ;;  %v11359_v54 = vpop.f32.mrf.mxu1 }
0x1436   :  { %v11319_v24 = vadd.f32 %v11318_v52, %v11076_v28  ;;  %v11360_v57 = vadd.f32 %v11359_v54, %v11117_v4 }
0x1437   :  { %v11320_v7 = vpop.f32.mrf.mxu0  ;;  %v11361_v16 = vpop.f32.mrf.mxu1 }
0x1438   :  { %v11366_v37 = vadd.f32 %v11319_v24, %v16489_v49  ;;  %v11321_v22 = vadd.f32 %v11320_v7, %v11078_v15  ;;  %v11362_v44 = vadd.f32 %v11361_v16, %v11119_v35  ;;  %v11368_v6 = vadd.f32 %v11360_v57, %v16507_v40 }
0x1439   :  { %v11322_v46 = vpop.f32.mrf.mxu0  ;;  %v11363_v0 = vpop.f32.mrf.mxu1 }
0x143a   :  { %v12679_v19 = vmul.f32 -1.442695, %v11366_v37  ;;  %v11367_v10 = vadd.f32 %v11321_v22, %v16494_v27  ;;  %v11369_v50 = vadd.f32 %v11362_v44, %v16501_v59  ;;  %v12682_v27 = vld [vmem:[%s17897_s12] ss:$0 sm:$0xff] }
0x143b   :  { %v11323_v29 = vpop.f32.mrf.mxu0  ;;  %v11364_v63 = vpop.f32.mrf.mxu1 }
0x143c   :  { %14218 = vpow2.f32 %v12679_v19  ;;  %v12680_v13 = vmul.f32 -1.442695, %v11367_v10  ;;  %v12681_v33 = vmul.f32 -1.442695, %v11369_v50 }
0x143e   :  { %14220 = vpow2.f32 %v12680_v13 }
0x143f   :  { %14222 = vpow2.f32 %v12681_v33 }
0x1449   :  { %v14219_v60 = vpop.eup %14218 }
0x144a   :  { %v11373_v49 = vadd.f32 1.0, %v14219_v60 }
0x144b   :  { %v14221_v42 = vpop.eup %14220 }
0x144c   :  { %14224 = vrcp.f32 %v11373_v49  ;;  %v11379_v20 = vadd.f32 1.0, %v14221_v42  ;;  %v14223_v59 = vpop.eup %14222 }
0x144d   :  { %14226 = vtanh.f32 %v11368_v6  ;;  %v11386_v9 = vadd.f32 1.0, %v14223_v59 }
0x144e   :  { %14228 = vrcp.f32 %v11379_v20 }
0x144f   :  { %14230 = vrcp.f32 %v11386_v9 }
0x1455   :  { %v12761_v39 = vpop.f32.mrf.mxu0 }
0x1456   :  { %v11543_v34 = vadd.f32 %v12761_v39, %v12682_v27 }
0x1457   :  { %v11534_v11 = vpop.f32.mrf.mxu0 }
0x1458   :  { %11567 = vst [vmem:[%s17898_s13 + $0x10] sm:$0xff] %v11543_v34  ;;  %v11535_v40 = vadd.f32 %v12682_v27, %v11534_v11 }
0x1459   :  { %v14225_v47 = vpop.eup %14224  ;;  %v12762_v51 = vpop.f32.mrf.mxu0 }
0x145a   :  { %v14227_v41 = vpop.eup %14226  ;;  %11565 = vst [vmem:[%s17898_s13] sm:$0xff] %v11535_v40  ;;  %v11546_v45 = vadd.f32 %v12762_v51, %v12682_v27 }
0x145b   :  { %v14229_v43 = vpop.eup %14228  ;;  %v11537_v21 = vpop.f32.mrf.mxu0  ;;  %v11390_v31 = vmul.f32 %v14227_v41, %v14225_v47 }
0x145c   :  { %v11389_v18 = vmul.f32 %v14229_v43, %v17816_v26  ;;  %11568 = vst [vmem:[%s17898_s13 + $0x18] sm:$0xff] %v11546_v45  ;;  %v11538_v62 = vadd.f32 %v12682_v27, %v11537_v21  ;;  %v14231_v53 = vpop.eup %14230 }
0x145e   :  { %v11391_v12 = vadd.f32 %v11390_v31, %v11389_v18  ;;  %11566 = vst [vmem:[%s17898_s13 + $0x8] sm:$0xff] %v11538_v62 }
0x1460   :  { %14232 = vtanh.f32 %v11391_v12 }
0x146d   :  { %v14233_v30 = vpop.eup %14232 }
0x146e   :  { %v11393_v32 = vmul.f32 %v14233_v30, %v14231_v53 }
0x1470   :  { %v11394_v58 = vpack.c.bf16 %v11393_v32, %v11393_v32 }
0x1472   :  { %11396 = vst [vmem:[#allocation3 + $0x1c] sm:$0xf] %v11394_v58 }
0x1479   :  { %v13977_v56 = vld [vmem:[#allocation3 + $0x18] sm:$0xff]  }
0x147a   :  { %12764 = vmatmul.mubr.bf16.gmra.mxu0 %v13977_v56 }
0x153a   :  { %v12765_v26 = vpop.f32.mrf.mxu0 }
0x153b   :  { %v11559_v48 = vadd.f32 %v12765_v26, %v12682_v27 }
0x153c   :  { %v11550_v14 = vpop.f32.mrf.mxu0 }
0x153d   :  { %11571 = vst [vmem:[%s17898_s13 + $0x30] sm:$0xff] %v11559_v48  ;;  %v11551_v25 = vadd.f32 %v12682_v27, %v11550_v14 }
0x153e   :  { %v12766_v17 = vpop.f32.mrf.mxu0 }
0x153f   :  { %11569 = vst [vmem:[%s17898_s13 + $0x20] sm:$0xff] %v11551_v25  ;;  %v11562_v8 = vadd.f32 %v12766_v17, %v12682_v27 }
0x1540   :  { %v11553_v5 = vpop.f32.mrf.mxu0 }
0x1541   :  { %11572 = vst [vmem:[%s17898_s13 + $0x38] sm:$0xff] %v11562_v8  ;;  %v11554_v36 = vadd.f32 %v12682_v27, %v11553_v5 }
0x1543   :  { %11570 = vst [vmem:[%s17898_s13 + $0x28] sm:$0xff] %v11554_v36 }
0x1544   :  { %11577 = vsyncpa [#allocation10], 1 }
0x1545   :  { %11578 = vsyncpa [#allocation12], 1 }
0x1546   :  { %11579 = vsyncpa [#allocation15], 1 }
0x1547   :  { %11580 = vsyncmov [#allocation8] }
0x154a   :  { %s11581_s10 = vpop.sfrf %11580 }
0x154b   :  { %p12695_p7 = scmp.ne.s32.totalorder %s11581_s10, 0 }
0x154d   :  { %11585 = shalt.err (%p12695_p7)  }
0x154e   :  { %11587 = vsyncmov [#allocation8 + $0x1] }
0x1551   :  { %s11588_s19 = vpop.sfrf %11587 }
0x1552   :  { %p12696_p8 = scmp.ne.s32.totalorder %s11588_s19, 0 }
0x1554   :  { %11592 = shalt.err (%p12696_p8)  }
0x1555   :  { %11594 = vsyncmov [#allocation8 + $0x2] }
0x1558   :  { %s11595_s20 = vpop.sfrf %11594 }
0x1559   :  { %p12697_p9 = scmp.ne.s32.totalorder %s11595_s20, 0 }
0x155b   :  { %11599 = shalt.err (%p12697_p9)  }
0x155c   :  { %11601 = vsyncmov [#allocation8 + $0x3] }
0x155f   :  { %s11602_s21 = vpop.sfrf %11601 }
0x1560   :  { %p12698_p10 = scmp.ne.s32.totalorder %s11602_s21, 0 }
0x1562   :  { %11606 = shalt.err (%p12698_p10)  }

</bundles_post_ra>
